<compile_context>
chip_gen: v7x
topology: tpu7x:2x2x1
jax: 0.10.0
libtpu: 0.0.40
codegen_flags: <defaults>
</compile_context>

<pallas_src>
import functools

import jax
import jax.numpy as jnp
from jax import lax
from jax.experimental import pallas as pl
from jax.experimental.pallas import tpu as pltpu

F32 = jnp.float32
BF16 = jnp.bfloat16
EPS = 1e-5  # nn.LayerNorm default eps


def _layer_norm(x, g, b):
    # var = E[x^2] - mu^2: the two reductions are independent (shorter XLU
    # critical path than mean -> centered-second-moment).  Stats in f32.
    mu = x.mean(-1, keepdims=True)
    ms = (x * x).mean(-1, keepdims=True)
    var = ms - mu * mu
    return (x - mu) * lax.rsqrt(var + EPS) * g + b


# ----------------------------- fused C-Tran kernel -----------------------------

def _ctran_fused_kernel(pix_ref, bw_ref, bb_ref, lbl_ref,
                        ln_g_ref, ln_b_ref,
                        wq_ref, wk_ref, wv_ref, wo_ref,
                        bq_ref, bk_ref, bv_ref, bo_ref,
                        g1_ref, be1_ref,
                        w1_ref, bf1_ref, w2_ref, bf2_ref,
                        g2_ref, be2_ref,
                        ow_ref, ob_ref,
                        out_ref, feat_ref, attn_ref,
                        emb_ref,
                        *, batch, heads, num_labels, hw):
    """Grid step l runs encoder layer l on the WHOLE batch (M = batch*S rows).

    Activations live in the VMEM scratch `emb_ref` across the layer loop.
    l == 0 additionally does the backbone projection, embedding concat and the
    initial LayerNorm; the last step additionally runs the diagonal output head.
    """
    l = pl.program_id(0)
    M, D = emb_ref.shape
    S = M // batch
    L = num_labels

    # ---- l == 0: backbone projection + embedding build + initial LayerNorm
    @pl.when(l == 0)
    def _():
        feats = jnp.dot(pix_ref[...], bw_ref[...],
                        preferred_element_type=F32) + bb_ref[...]      # (batch*hw, D)
        for b in range(batch):                                          # static unroll
            fb = feats[b * hw:(b + 1) * hw, :]
            feat_ref[b] = fb                                            # save_features
            emb_ref[b * S:b * S + hw, :] = fb                           # image tokens
            emb_ref[b * S + hw:(b + 1) * S, :] = lbl_ref[b]             # label tokens
        emb_ref[...] = _layer_norm(emb_ref[...], ln_g_ref[...], ln_b_ref[...])

    x = emb_ref[...]                                                    # (M, D) f32
    x_bf = x.astype(BF16)

    # ---- multi-head self-attention (per-head weight refs; scale folded in wq/bq)
    attn_out = None                       # (M, D) == concat_h(ctx_h) @ Wo
    attn_w = [None] * batch               # per-batch head-summed attention probs
    for h in range(heads):                                              # static unroll
        qh = jnp.dot(x_bf, wq_ref[h], preferred_element_type=F32) + bq_ref[h]
        kh = jnp.dot(x_bf, wk_ref[h], preferred_element_type=F32) + bk_ref[h]
        vh = jnp.dot(x_bf, wv_ref[h], preferred_element_type=F32) + bv_ref[h]
        ctx_parts = []
        for b in range(batch):            # static unroll; 8-aligned sublane slices
            rows = slice(b * S, (b + 1) * S)
            s = lax.dot_general(qh[rows], kh[rows], (((1,), (1,)), ((), ())),
                                preferred_element_type=F32)             # (S, S)
            s = s - s.max(-1, keepdims=True)
            e = jnp.exp(s)
            p = e * pl.reciprocal(e.sum(-1, keepdims=True), approx=True)
            attn_w[b] = p if attn_w[b] is None else attn_w[b] + p
            ctx_parts.append(jnp.dot(p, vh[rows], preferred_element_type=F32))
        ctx = jnp.concatenate(ctx_parts, axis=0)                        # (M, dh)
        part = jnp.dot(ctx.astype(BF16), wo_ref[h], preferred_element_type=F32)
        attn_out = part if attn_out is None else attn_out + part

    inv_heads = 1.0 / heads
    for b in range(batch):
        attn_ref[b] = attn_w[b] * inv_heads       # head-averaged attention maps

    # ---- post-norm residual block 1 (dropout == identity in eval)
    src = _layer_norm(x + attn_out + bo_ref[...], g1_ref[...], be1_ref[...])

    # ---- feed-forward + post-norm residual block 2
    h1 = jnp.maximum(
        jnp.dot(src.astype(BF16), w1_ref[...], preferred_element_type=F32)
        + bf1_ref[...], 0.0)
    h2 = jnp.dot(h1.astype(BF16), w2_ref[...],
                 preferred_element_type=F32) + bf2_ref[...]
    new = _layer_norm(src + h2, g2_ref[...], be2_ref[...])
    emb_ref[...] = new

    # ---- diagonal output head at the last layer:
    #      out[b, j] = sum_d label_emb[b, j, d] * W[j, d] + bias[j]
    @pl.when(l == pl.num_programs(0) - 1)
    def _():
        ow = ow_ref[...]
        ob = ob_ref[...]
        for b in range(batch):
            lab = new[b * S + hw:b * S + hw + L, :]                     # (L, D)
            out_ref[b] = (lab * ow).sum(-1, keepdims=True) + ob


def ctran_stack(pix, init_label, params, *, batch, hw, heads, num_labels):
    """pix: (batch*hw, C); init_label: (batch, L, D).  Returns
    ((batch, L) logits, (batch, hw, D) features, (layers, batch, S, S) attns)."""
    D = params["ln_g"].shape[-1]
    lp = params["layers"]
    Lyr, nheads, _, dh = lp["wq"].shape
    Dff = lp["w1"].shape[2]
    L = num_labels
    S = hw + L
    M = batch * S
    C = pix.shape[-1]

    def _w(*tail):       # per-layer param: stream block `l` each grid step
        nz = (0,) * len(tail)
        return pl.BlockSpec((None,) + tail, lambda l: (l,) + nz)

    def _shared(*shape):  # layer-shared param: constant block index -> DMA'd once
        nz = (0,) * len(shape)
        return pl.BlockSpec(shape, lambda l: nz)

    kernel = functools.partial(_ctran_fused_kernel, batch=batch, heads=heads,
                               num_labels=L, hw=hw)

    out, feats, attns = pl.pallas_call(
        kernel,
        grid=(Lyr,),
        out_shape=(jax.ShapeDtypeStruct((batch, L, 1), F32),
                   jax.ShapeDtypeStruct((batch, hw, D), F32),
                   jax.ShapeDtypeStruct((Lyr, batch, S, S), F32)),
        in_specs=[_shared(batch * hw, C),                     # flattened pixels
                  _shared(C, D), _shared(1, D),               # backbone proj w, b
                  _shared(batch, L, D),                       # init label embeddings
                  _shared(1, D), _shared(1, D),               # initial LayerNorm g, b
                  _w(nheads, D, dh), _w(nheads, D, dh),       # wq wk
                  _w(nheads, D, dh), _w(nheads, dh, D),       # wv wo
                  _w(nheads, 1, dh), _w(nheads, 1, dh),       # bq bk
                  _w(nheads, 1, dh), _w(1, D),                # bv bo
                  _w(1, D), _w(1, D),                         # g1 be1
                  _w(D, Dff), _w(1, Dff), _w(Dff, D), _w(1, D),  # w1 bf1 w2 bf2
                  _w(1, D), _w(1, D),                         # g2 be2
                  _shared(L, D), _shared(L, 1)],              # out_w out_b
        out_specs=(pl.BlockSpec((batch, L, 1), lambda l: (0, 0, 0)),
                   pl.BlockSpec((batch, hw, D), lambda l: (0, 0, 0)),
                   pl.BlockSpec((None, batch, S, S), lambda l: (l, 0, 0, 0))),
        scratch_shapes=[pltpu.VMEM((M, D), F32)],
        compiler_params=pltpu.CompilerParams(
            dimension_semantics=("arbitrary",)),
    )(pix,
      params["backbone_w"], params["backbone_b"],
      init_label,
      params["ln_g"], params["ln_b"],
      lp["wq"], lp["wk"], lp["wv"], lp["wo"],
      lp["bq"], lp["bk"], lp["bv"], lp["bo"],
      lp["g1"], lp["be1"],
      lp["w1"], lp["bf1"], lp["w2"], lp["bf2"],
      lp["g2"], lp["be2"],
      params["out_w"], params["out_b"])
    return out[..., 0], feats, attns


# ----------------------------- parameters / glue -----------------------------

def init_params(key, num_labels, hidden, layers, in_channels, ffn_dim, heads):
    ks = jax.random.split(key, 7)
    lk = jax.random.split(ks[6], 12)
    dh = hidden // heads
    qscale = float(dh) ** -0.5
    Lyr = layers

    def nrm(k, shape, scale=0.02):
        return scale * jax.random.normal(k, shape, F32)

    # Per-head layouts (kernel slices the refs per head — static, free).
    # To load a PyTorch nn.MultiheadAttention checkpoint: wq = in_proj_weight[:D].T
    # then reshape (D, heads, dh) -> transpose -> (heads, D, dh), etc.
    def per_head_in(w):    # (Lyr, D, D) columns-per-head -> (Lyr, heads, D, dh)
        return w.reshape(Lyr, hidden, heads, dh).transpose(0, 2, 1, 3)

    def per_head_bias(b):  # (Lyr, 1, D) -> (Lyr, heads, 1, dh)
        return b.reshape(Lyr, 1, heads, dh).transpose(0, 2, 1, 3)

    wq = nrm(lk[0], (Lyr, hidden, hidden)) * qscale      # q-scale folded in
    bq = nrm(lk[1], (Lyr, 1, hidden)) * qscale
    wk = nrm(lk[2], (Lyr, hidden, hidden))
    bk = nrm(lk[3], (Lyr, 1, hidden))
    wv = nrm(lk[4], (Lyr, hidden, hidden))
    bv = nrm(lk[5], (Lyr, 1, hidden))
    wo = nrm(lk[6], (Lyr, hidden, hidden))

    layer_p = {
        "wq": per_head_in(wq).astype(BF16),
        "wk": per_head_in(wk).astype(BF16),
        "wv": per_head_in(wv).astype(BF16),
        "wo": wo.reshape(Lyr, heads, dh, hidden).astype(BF16),  # rows-per-head
        "bq": per_head_bias(bq), "bk": per_head_bias(bk), "bv": per_head_bias(bv),
        "bo": nrm(lk[7], (Lyr, 1, hidden)),
        "g1": jnp.ones((Lyr, 1, hidden), F32), "be1": jnp.zeros((Lyr, 1, hidden), F32),
        "w1": nrm(lk[8], (Lyr, hidden, ffn_dim)).astype(BF16),
        "bf1": nrm(lk[9], (Lyr, 1, ffn_dim)),
        "w2": nrm(lk[10], (Lyr, ffn_dim, hidden)).astype(BF16),
        "bf2": nrm(lk[11], (Lyr, 1, hidden)),
        "g2": jnp.ones((Lyr, 1, hidden), F32), "be2": jnp.zeros((Lyr, 1, hidden), F32),
    }
    return {
        "backbone_w": nrm(ks[0], (in_channels, hidden)),
        "backbone_b": nrm(ks[1], (1, hidden)),
        "label_lt": nrm(ks[2], (num_labels, hidden)),
        "known_label_lt": nrm(ks[3], (3, hidden)).at[0].set(0.0),  # padding_idx=0
        "ln_g": jnp.ones((1, hidden), F32),
        "ln_b": jnp.zeros((1, hidden), F32),
        # PyTorch nn.Linear orientation: weight (num_labels, hidden), bias (num_labels,)
        "out_w": nrm(ks[4], (num_labels, hidden)),
        "out_b": nrm(ks[5], (num_labels, 1)),
        "layers": layer_p,
    }


def ctran_forward(params, images, mask, *, num_labels, hidden, heads):
    B, C, Himg, Wimg = images.shape
    HW = Himg * Wimg

    # TODO(synk): the original `Backbone()` (ResNet101 trunk -> (B, 2048, H', W')) is
    # not defined in the provided module; substituted by a 1x1-conv projection
    # C -> hidden, fused into the l==0 step of the stack kernel.
    pix = images.transpose(0, 2, 3, 1).reshape(B * HW, C)   # NCHW -> (B*HW, C)

    # custom_replace(mask, 0, 1, 2): {-1, 0, 1} -> {0, 1, 2}; row 0 of known_label_lt
    # is the zero "padding_idx=0" state.  Tiny (3, D) gather done in plain XLA.
    label_idx = (mask + 1.0).astype(jnp.int32)
    init_label = params["label_lt"][None] + params["known_label_lt"][label_idx]

    logits, feats, attns = ctran_stack(
        pix, init_label, params, batch=B, hw=HW, heads=heads, num_labels=num_labels)

    save_features = feats.reshape(B, Himg, Wimg, hidden).transpose(0, 3, 1, 2)  # NCHW
    return logits, save_features, attns


if __name__ == "__main__":
    # Small shapes consistent with the forward pass.
    B, C, Himg, Wimg = 2, 3, 8, 8
    num_labels, hidden, heads, layers = 8, 64, 4, 3
    ffn_dim = hidden          # C-Tran SelfAttnLayer: dim_feedforward = d_model * 1
    seq = Himg * Wimg + num_labels

    key = jax.random.PRNGKey(0)
    kp, ki, km = jax.random.split(key, 3)
    params = init_params(kp, num_labels, hidden, layers, C, ffn_dim, heads)
    images = jax.random.normal(ki, (B, C, Himg, Wimg), F32)
    mask = jax.random.randint(km, (B, num_labels), -1, 2).astype(F32)  # {-1, 0, 1}

    fwd = jax.jit(functools.partial(
        ctran_forward, num_labels=num_labels, hidden=hidden, heads=heads))
    output, save_features, attns = fwd(params, images, mask)
    jax.block_until_ready((output, save_features, attns))

    assert output.shape == (B, num_labels)
    assert save_features.shape == (B, hidden, Himg, Wimg)
    assert attns.shape == (layers, B, seq, seq)
    print("KERNEL_OK")
</pallas_src>

<mosaic_0001>
module attributes {stable_mosaic.version = 11 : i64} {
  func.func @_ctran_fused_kernel(%arg0: i32, %arg1: memref<128x3xf32, #tpu.memory_space<vmem>>, %arg2: memref<3x64xf32, #tpu.memory_space<vmem>>, %arg3: memref<1x64xf32, #tpu.memory_space<vmem>>, %arg4: memref<2x8x64xf32, #tpu.memory_space<vmem>>, %arg5: memref<1x64xf32, #tpu.memory_space<vmem>>, %arg6: memref<1x64xf32, #tpu.memory_space<vmem>>, %arg7: memref<1x4x64x16xbf16, #tpu.memory_space<vmem>>, %arg8: memref<1x4x64x16xbf16, #tpu.memory_space<vmem>>, %arg9: memref<1x4x64x16xbf16, #tpu.memory_space<vmem>>, %arg10: memref<1x4x16x64xbf16, #tpu.memory_space<vmem>>, %arg11: memref<1x4x1x16xf32, #tpu.memory_space<vmem>>, %arg12: memref<1x4x1x16xf32, #tpu.memory_space<vmem>>, %arg13: memref<1x4x1x16xf32, #tpu.memory_space<vmem>>, %arg14: memref<1x1x64xf32, #tpu.memory_space<vmem>>, %arg15: memref<1x1x64xf32, #tpu.memory_space<vmem>>, %arg16: memref<1x1x64xf32, #tpu.memory_space<vmem>>, %arg17: memref<1x64x64xbf16, #tpu.memory_space<vmem>>, %arg18: memref<1x1x64xf32, #tpu.memory_space<vmem>>, %arg19: memref<1x64x64xbf16, #tpu.memory_space<vmem>>, %arg20: memref<1x1x64xf32, #tpu.memory_space<vmem>>, %arg21: memref<1x1x64xf32, #tpu.memory_space<vmem>>, %arg22: memref<1x1x64xf32, #tpu.memory_space<vmem>>, %arg23: memref<8x64xf32, #tpu.memory_space<vmem>>, %arg24: memref<8x1xf32, #tpu.memory_space<vmem>>, %arg25: memref<2x8x1xf32, #tpu.memory_space<vmem>>, %arg26: memref<2x64x64xf32, #tpu.memory_space<vmem>>, %arg27: memref<1x2x72x72xf32, #tpu.memory_space<vmem>>, %arg28: memref<144x64xf32, #tpu.memory_space<vmem>>) attributes {dimension_semantics = [#tpu.dimension_semantics<arbitrary>], iteration_bounds = array<i64: 3>, scalar_prefetch = 0 : i64, scratch_operands = 1 : i64, tpu.core_type = #tpu.core_type<tc>, window_params = [{pipeline_mode = #tpu.pipeline_mode<synchronous>, transform_indices = @transform_0, window_bounds = array<i64: 128, 3>}, {pipeline_mode = #tpu.pipeline_mode<synchronous>, transform_indices = @transform_1, window_bounds = array<i64: 3, 64>}, {pipeline_mode = #tpu.pipeline_mode<synchronous>, transform_indices = @transform_2, window_bounds = array<i64: 1, 64>}, {pipeline_mode = #tpu.pipeline_mode<synchronous>, transform_indices = @transform_3, window_bounds = array<i64: 2, 8, 64>}, {pipeline_mode = #tpu.pipeline_mode<synchronous>, transform_indices = @transform_4, window_bounds = array<i64: 1, 64>}, {pipeline_mode = #tpu.pipeline_mode<synchronous>, transform_indices = @transform_5, window_bounds = array<i64: 1, 64>}, {transform_indices = @transform_6, window_bounds = array<i64: 1, 4, 64, 16>}, {transform_indices = @transform_7, window_bounds = array<i64: 1, 4, 64, 16>}, {transform_indices = @transform_8, window_bounds = array<i64: 1, 4, 64, 16>}, {transform_indices = @transform_9, window_bounds = array<i64: 1, 4, 16, 64>}, {transform_indices = @transform_10, window_bounds = array<i64: 1, 4, 1, 16>}, {transform_indices = @transform_11, window_bounds = array<i64: 1, 4, 1, 16>}, {transform_indices = @transform_12, window_bounds = array<i64: 1, 4, 1, 16>}, {transform_indices = @transform_13, window_bounds = array<i64: 1, 1, 64>}, {transform_indices = @transform_14, window_bounds = array<i64: 1, 1, 64>}, {transform_indices = @transform_15, window_bounds = array<i64: 1, 1, 64>}, {transform_indices = @transform_16, window_bounds = array<i64: 1, 64, 64>}, {transform_indices = @transform_17, window_bounds = array<i64: 1, 1, 64>}, {transform_indices = @transform_18, window_bounds = array<i64: 1, 64, 64>}, {transform_indices = @transform_19, window_bounds = array<i64: 1, 1, 64>}, {transform_indices = @transform_20, window_bounds = array<i64: 1, 1, 64>}, {transform_indices = @transform_21, window_bounds = array<i64: 1, 1, 64>}, {pipeline_mode = #tpu.pipeline_mode<synchronous>, transform_indices = @transform_22, window_bounds = array<i64: 8, 64>}, {pipeline_mode = #tpu.pipeline_mode<synchronous>, transform_indices = @transform_23, window_bounds = array<i64: 8, 1>}, {pipeline_mode = #tpu.pipeline_mode<synchronous>, transform_indices = @transform_24, window_bounds = array<i64: 2, 8, 1>}, {pipeline_mode = #tpu.pipeline_mode<synchronous>, transform_indices = @transform_25, window_bounds = array<i64: 2, 64, 64>}, {transform_indices = @transform_26, window_bounds = array<i64: 1, 2, 72, 72>}]} {
    %c0_i32 = arith.constant 0 : i32
    %0 = arith.cmpi eq, %arg0, %c0_i32 : i32
    %1 = arith.extui %0 : i1 to i32
    %c0_i32_0 = arith.constant 0 : i32
    %2 = arith.cmpi ne, %1, %c0_i32_0 : i32
    scf.if %2 {
      %c0_211 = arith.constant 0 : index
      %c0_212 = arith.constant 0 : index
      %328 = vector.load %arg1[%c0_211, %c0_212] : memref<128x3xf32, #tpu.memory_space<vmem>>, vector<128x3xf32>
      %c0_213 = arith.constant 0 : index
      %c0_214 = arith.constant 0 : index
      %329 = vector.load %arg2[%c0_213, %c0_214] : memref<3x64xf32, #tpu.memory_space<vmem>>, vector<3x64xf32>
      %cst_215 = arith.constant dense<0.000000e+00> : vector<128x64xf32>
      %330 = tpu.matmul %328, %329, %cst_215 {dimension_numbers = #tpu.dot_dimension_numbers<[1], [0], [0], [1], [0, 0, 1, 1], [], []>} : vector<128x3xf32>, vector<3x64xf32>, vector<128x64xf32> -> vector<128x64xf32>
      %c0_216 = arith.constant 0 : index
      %c0_217 = arith.constant 0 : index
      %331 = vector.load %arg3[%c0_216, %c0_217] : memref<1x64xf32, #tpu.memory_space<vmem>>, vector<1x64xf32>
      %332 = vector.broadcast %331 : vector<1x64xf32> to vector<128x64xf32>
      %333 = arith.addf %330, %332 : vector<128x64xf32>
      %334 = vector.extract_strided_slice %333 {offsets = [0, 0], sizes = [64, 64], strides = [1, 1]} : vector<128x64xf32> to vector<64x64xf32>
      %c0_218 = arith.constant 0 : index
      %c0_219 = arith.constant 0 : index
      %c0_220 = arith.constant 0 : index
      %335 = vector.load %arg26[%c0_218, %c0_219, %c0_220] : memref<2x64x64xf32, #tpu.memory_space<vmem>>, vector<1x64x64xf32>
      %336 = vector.shape_cast %335 : vector<1x64x64xf32> to vector<64x64xf32>
      %337 = vector.shape_cast %334 : vector<64x64xf32> to vector<1x64x64xf32>
      tpu.vector_store %arg26[%c0_218, %c0_219, %c0_220], %337 {strides = array<i32>} : memref<2x64x64xf32, #tpu.memory_space<vmem>>, vector<1x64x64xf32>,
      %c0_221 = arith.constant 0 : index
      %c0_222 = arith.constant 0 : index
      %338 = vector.load %arg28[%c0_221, %c0_222] : memref<144x64xf32, #tpu.memory_space<vmem>>, vector<64x64xf32>
      tpu.vector_store %arg28[%c0_221, %c0_222], %334 {strides = array<i32>} : memref<144x64xf32, #tpu.memory_space<vmem>>, vector<64x64xf32>,
      %c0_223 = arith.constant 0 : index
      %c0_224 = arith.constant 0 : index
      %c0_225 = arith.constant 0 : index
      %339 = vector.load %arg4[%c0_223, %c0_224, %c0_225] : memref<2x8x64xf32, #tpu.memory_space<vmem>>, vector<1x8x64xf32>
      %340 = vector.shape_cast %339 : vector<1x8x64xf32> to vector<8x64xf32>
      %c64 = arith.constant 64 : index
      %c0_226 = arith.constant 0 : index
      %341 = vector.load %arg28[%c64, %c0_226] : memref<144x64xf32, #tpu.memory_space<vmem>>, vector<8x64xf32>
      tpu.vector_store %arg28[%c64, %c0_226], %340 {strides = array<i32>} : memref<144x64xf32, #tpu.memory_space<vmem>>, vector<8x64xf32>,
      %342 = vector.extract_strided_slice %333 {offsets = [64, 0], sizes = [64, 64], strides = [1, 1]} : vector<128x64xf32> to vector<64x64xf32>
      %c1_227 = arith.constant 1 : index
      %c0_228 = arith.constant 0 : index
      %c0_229 = arith.constant 0 : index
      %343 = vector.load %arg26[%c1_227, %c0_228, %c0_229] : memref<2x64x64xf32, #tpu.memory_space<vmem>>, vector<1x64x64xf32>
      %344 = vector.shape_cast %343 : vector<1x64x64xf32> to vector<64x64xf32>
      %345 = vector.shape_cast %342 : vector<64x64xf32> to vector<1x64x64xf32>
      tpu.vector_store %arg26[%c1_227, %c0_228, %c0_229], %345 {strides = array<i32>} : memref<2x64x64xf32, #tpu.memory_space<vmem>>, vector<1x64x64xf32>,
      %c72 = arith.constant 72 : index
      %c0_230 = arith.constant 0 : index
      %346 = vector.load %arg28[%c72, %c0_230] : memref<144x64xf32, #tpu.memory_space<vmem>>, vector<64x64xf32>
      tpu.vector_store %arg28[%c72, %c0_230], %342 {strides = array<i32>} : memref<144x64xf32, #tpu.memory_space<vmem>>, vector<64x64xf32>,
      %c1_231 = arith.constant 1 : index
      %c0_232 = arith.constant 0 : index
      %c0_233 = arith.constant 0 : index
      %347 = vector.load %arg4[%c1_231, %c0_232, %c0_233] : memref<2x8x64xf32, #tpu.memory_space<vmem>>, vector<1x8x64xf32>
      %348 = vector.shape_cast %347 : vector<1x8x64xf32> to vector<8x64xf32>
      %c136 = arith.constant 136 : index
      %c0_234 = arith.constant 0 : index
      %349 = vector.load %arg28[%c136, %c0_234] : memref<144x64xf32, #tpu.memory_space<vmem>>, vector<8x64xf32>
      tpu.vector_store %arg28[%c136, %c0_234], %348 {strides = array<i32>} : memref<144x64xf32, #tpu.memory_space<vmem>>, vector<8x64xf32>,
      %c0_235 = arith.constant 0 : index
      %c0_236 = arith.constant 0 : index
      %350 = vector.load %arg28[%c0_235, %c0_236] : memref<144x64xf32, #tpu.memory_space<vmem>>, vector<144x64xf32>
      %c0_237 = arith.constant 0 : index
      %c0_238 = arith.constant 0 : index
      %351 = vector.load %arg5[%c0_237, %c0_238] : memref<1x64xf32, #tpu.memory_space<vmem>>, vector<1x64xf32>
      %c0_239 = arith.constant 0 : index
      %c0_240 = arith.constant 0 : index
      %352 = vector.load %arg6[%c0_239, %c0_240] : memref<1x64xf32, #tpu.memory_space<vmem>>, vector<1x64xf32>
      %cst_241 = arith.constant dense<0.000000e+00> : vector<144xf32>
      %353 = vector.multi_reduction <add>, %350, %cst_241 [1] : vector<144x64xf32> to vector<144xf32>
      %354 = vector.shape_cast %353 : vector<144xf32> to vector<144x1xf32>
      %cst_242 = arith.constant 6.400000e+01 : f32
      %355 = vector.broadcast %cst_242 : f32 to vector<144x1xf32>
      %356 = arith.divf %354, %355 : vector<144x1xf32>
      %357 = arith.mulf %350, %350 : vector<144x64xf32>
      %cst_243 = arith.constant dense<0.000000e+00> : vector<144xf32>
      %358 = vector.multi_reduction <add>, %357, %cst_243 [1] : vector<144x64xf32> to vector<144xf32>
      %359 = vector.shape_cast %358 : vector<144xf32> to vector<144x1xf32>
      %cst_244 = arith.constant 6.400000e+01 : f32
      %360 = vector.broadcast %cst_244 : f32 to vector<144x1xf32>
      %361 = arith.divf %359, %360 : vector<144x1xf32>
      %362 = arith.mulf %356, %356 : vector<144x1xf32>
      %363 = arith.subf %361, %362 : vector<144x1xf32>
      %364 = vector.broadcast %356 : vector<144x1xf32> to vector<144x64xf32>
      %365 = arith.subf %350, %364 : vector<144x64xf32>
      %cst_245 = arith.constant 9.99999974E-6 : f32
      %366 = vector.broadcast %cst_245 : f32 to vector<144x1xf32>
      %367 = arith.addf %363, %366 : vector<144x1xf32>
      %368 = math.rsqrt %367 : vector<144x1xf32>
      %369 = vector.broadcast %368 : vector<144x1xf32> to vector<144x64xf32>
      %370 = arith.mulf %365, %369 : vector<144x64xf32>
      %371 = vector.broadcast %351 : vector<1x64xf32> to vector<144x64xf32>
      %372 = arith.mulf %370, %371 : vector<144x64xf32>
      %373 = vector.broadcast %352 : vector<1x64xf32> to vector<144x64xf32>
      %374 = arith.addf %372, %373 : vector<144x64xf32>
      %c0_246 = arith.constant 0 : index
      %c0_247 = arith.constant 0 : index
      %375 = vector.load %arg28[%c0_246, %c0_247] : memref<144x64xf32, #tpu.memory_space<vmem>>, vector<144x64xf32>
      tpu.vector_store %arg28[%c0_246, %c0_247], %374 {strides = array<i32>} : memref<144x64xf32, #tpu.memory_space<vmem>>, vector<144x64xf32>,
    } else {
    }
    %c0 = arith.constant 0 : index
    %c0_1 = arith.constant 0 : index
    %3 = vector.load %arg28[%c0, %c0_1] : memref<144x64xf32, #tpu.memory_space<vmem>>, vector<144x64xf32>
    %4 = arith.truncf %3 : vector<144x64xf32> to vector<144x64xbf16>
    %c0_2 = arith.constant 0 : index
    %c0_3 = arith.constant 0 : index
    %c0_4 = arith.constant 0 : index
    %c0_5 = arith.constant 0 : index
    %5 = vector.load %arg7[%c0_2, %c0_3, %c0_4, %c0_5] : memref<1x4x64x16xbf16, #tpu.memory_space<vmem>>, vector<1x1x64x16xbf16>
    %6 = vector.shape_cast %5 : vector<1x1x64x16xbf16> to vector<64x16xbf16>
    %cst = arith.constant dense<0.000000e+00> : vector<144x16xf32>
    %7 = tpu.matmul %4, %6, %cst {dimension_numbers = #tpu.dot_dimension_numbers<[1], [0], [0], [1], [0, 0, 1, 1], [], []>} : vector<144x64xbf16>, vector<64x16xbf16>, vector<144x16xf32> -> vector<144x16xf32>
    %c0_6 = arith.constant 0 : index
    %c0_7 = arith.constant 0 : index
    %c0_8 = arith.constant 0 : index
    %c0_9 = arith.constant 0 : index
    %8 = vector.load %arg11[%c0_6, %c0_7, %c0_8, %c0_9] : memref<1x4x1x16xf32, #tpu.memory_space<vmem>>, vector<1x1x1x16xf32>
    %9 = vector.shape_cast %8 : vector<1x1x1x16xf32> to vector<1x16xf32>
    %10 = vector.broadcast %9 : vector<1x16xf32> to vector<144x16xf32>
    %11 = arith.addf %7, %10 : vector<144x16xf32>
    %c0_10 = arith.constant 0 : index
    %c0_11 = arith.constant 0 : index
    %c0_12 = arith.constant 0 : index
    %c0_13 = arith.constant 0 : index
    %12 = vector.load %arg8[%c0_10, %c0_11, %c0_12, %c0_13] : memref<1x4x64x16xbf16, #tpu.memory_space<vmem>>, vector<1x1x64x16xbf16>
    %13 = vector.shape_cast %12 : vector<1x1x64x16xbf16> to vector<64x16xbf16>
    %cst_14 = arith.constant dense<0.000000e+00> : vector<144x16xf32>
    %14 = tpu.matmul %4, %13, %cst_14 {dimension_numbers = #tpu.dot_dimension_numbers<[1], [0], [0], [1], [0, 0, 1, 1], [], []>} : vector<144x64xbf16>, vector<64x16xbf16>, vector<144x16xf32> -> vector<144x16xf32>
    %c0_15 = arith.constant 0 : index
    %c0_16 = arith.constant 0 : index
    %c0_17 = arith.constant 0 : index
    %c0_18 = arith.constant 0 : index
    %15 = vector.load %arg12[%c0_15, %c0_16, %c0_17, %c0_18] : memref<1x4x1x16xf32, #tpu.memory_space<vmem>>, vector<1x1x1x16xf32>
    %16 = vector.shape_cast %15 : vector<1x1x1x16xf32> to vector<1x16xf32>
    %17 = vector.broadcast %16 : vector<1x16xf32> to vector<144x16xf32>
    %18 = arith.addf %14, %17 : vector<144x16xf32>
    %c0_19 = arith.constant 0 : index
    %c0_20 = arith.constant 0 : index
    %c0_21 = arith.constant 0 : index
    %c0_22 = arith.constant 0 : index
    %19 = vector.load %arg9[%c0_19, %c0_20, %c0_21, %c0_22] : memref<1x4x64x16xbf16, #tpu.memory_space<vmem>>, vector<1x1x64x16xbf16>
    %20 = vector.shape_cast %19 : vector<1x1x64x16xbf16> to vector<64x16xbf16>
    %cst_23 = arith.constant dense<0.000000e+00> : vector<144x16xf32>
    %21 = tpu.matmul %4, %20, %cst_23 {dimension_numbers = #tpu.dot_dimension_numbers<[1], [0], [0], [1], [0, 0, 1, 1], [], []>} : vector<144x64xbf16>, vector<64x16xbf16>, vector<144x16xf32> -> vector<144x16xf32>
    %c0_24 = arith.constant 0 : index
    %c0_25 = arith.constant 0 : index
    %c0_26 = arith.constant 0 : index
    %c0_27 = arith.constant 0 : index
    %22 = vector.load %arg13[%c0_24, %c0_25, %c0_26, %c0_27] : memref<1x4x1x16xf32, #tpu.memory_space<vmem>>, vector<1x1x1x16xf32>
    %23 = vector.shape_cast %22 : vector<1x1x1x16xf32> to vector<1x16xf32>
    %24 = vector.broadcast %23 : vector<1x16xf32> to vector<144x16xf32>
    %25 = arith.addf %21, %24 : vector<144x16xf32>
    %26 = vector.extract_strided_slice %11 {offsets = [0, 0], sizes = [72, 16], strides = [1, 1]} : vector<144x16xf32> to vector<72x16xf32>
    %27 = vector.extract_strided_slice %18 {offsets = [0, 0], sizes = [72, 16], strides = [1, 1]} : vector<144x16xf32> to vector<72x16xf32>
    %cst_28 = arith.constant dense<0.000000e+00> : vector<72x72xf32>
    %28 = tpu.matmul %26, %27, %cst_28 {dimension_numbers = #tpu.dot_dimension_numbers<[1], [1], [0], [0], [0, 0, 1, 0], [], []>} : vector<72x16xf32>, vector<72x16xf32>, vector<72x72xf32> -> vector<72x72xf32>
    %cst_29 = arith.constant dense<0xFF800000> : vector<72xf32>
    %29 = vector.multi_reduction <maximumf>, %28, %cst_29 [1] : vector<72x72xf32> to vector<72xf32>
    %30 = vector.shape_cast %29 : vector<72xf32> to vector<72x1xf32>
    %31 = vector.broadcast %30 : vector<72x1xf32> to vector<72x72xf32>
    %32 = arith.subf %28, %31 : vector<72x72xf32>
    %33 = math.exp %32 : vector<72x72xf32>
    %cst_30 = arith.constant dense<0.000000e+00> : vector<72xf32>
    %34 = vector.multi_reduction <add>, %33, %cst_30 [1] : vector<72x72xf32> to vector<72xf32>
    %35 = vector.shape_cast %34 : vector<72xf32> to vector<72x1xf32>
    %36 = tpu.reciprocal %35 {approx = true} : vector<72x1xf32> -> vector<72x1xf32>
    %37 = vector.broadcast %36 : vector<72x1xf32> to vector<72x72xf32>
    %38 = arith.mulf %33, %37 : vector<72x72xf32>
    %39 = vector.extract_strided_slice %25 {offsets = [0, 0], sizes = [72, 16], strides = [1, 1]} : vector<144x16xf32> to vector<72x16xf32>
    %cst_31 = arith.constant dense<0.000000e+00> : vector<72x16xf32>
    %40 = tpu.matmul %38, %39, %cst_31 {dimension_numbers = #tpu.dot_dimension_numbers<[1], [0], [0], [1], [0, 0, 1, 1], [], []>} : vector<72x72xf32>, vector<72x16xf32>, vector<72x16xf32> -> vector<72x16xf32>
    %41 = vector.extract_strided_slice %11 {offsets = [72, 0], sizes = [72, 16], strides = [1, 1]} : vector<144x16xf32> to vector<72x16xf32>
    %42 = vector.extract_strided_slice %18 {offsets = [72, 0], sizes = [72, 16], strides = [1, 1]} : vector<144x16xf32> to vector<72x16xf32>
    %cst_32 = arith.constant dense<0.000000e+00> : vector<72x72xf32>
    %43 = tpu.matmul %41, %42, %cst_32 {dimension_numbers = #tpu.dot_dimension_numbers<[1], [1], [0], [0], [0, 0, 1, 0], [], []>} : vector<72x16xf32>, vector<72x16xf32>, vector<72x72xf32> -> vector<72x72xf32>
    %cst_33 = arith.constant dense<0xFF800000> : vector<72xf32>
    %44 = vector.multi_reduction <maximumf>, %43, %cst_33 [1] : vector<72x72xf32> to vector<72xf32>
    %45 = vector.shape_cast %44 : vector<72xf32> to vector<72x1xf32>
    %46 = vector.broadcast %45 : vector<72x1xf32> to vector<72x72xf32>
    %47 = arith.subf %43, %46 : vector<72x72xf32>
    %48 = math.exp %47 : vector<72x72xf32>
    %cst_34 = arith.constant dense<0.000000e+00> : vector<72xf32>
    %49 = vector.multi_reduction <add>, %48, %cst_34 [1] : vector<72x72xf32> to vector<72xf32>
    %50 = vector.shape_cast %49 : vector<72xf32> to vector<72x1xf32>
    %51 = tpu.reciprocal %50 {approx = true} : vector<72x1xf32> -> vector<72x1xf32>
    %52 = vector.broadcast %51 : vector<72x1xf32> to vector<72x72xf32>
    %53 = arith.mulf %48, %52 : vector<72x72xf32>
    %54 = vector.extract_strided_slice %25 {offsets = [72, 0], sizes = [72, 16], strides = [1, 1]} : vector<144x16xf32> to vector<72x16xf32>
    %cst_35 = arith.constant dense<0.000000e+00> : vector<72x16xf32>
    %55 = tpu.matmul %53, %54, %cst_35 {dimension_numbers = #tpu.dot_dimension_numbers<[1], [0], [0], [1], [0, 0, 1, 1], [], []>} : vector<72x72xf32>, vector<72x16xf32>, vector<72x16xf32> -> vector<72x16xf32>
    %56 = tpu.concatenate %40, %55 in 0 : vector<72x16xf32>, vector<72x16xf32> -> vector<144x16xf32>
    %57 = arith.truncf %56 : vector<144x16xf32> to vector<144x16xbf16>
    %c0_36 = arith.constant 0 : index
    %c0_37 = arith.constant 0 : index
    %c0_38 = arith.constant 0 : index
    %c0_39 = arith.constant 0 : index
    %58 = vector.load %arg10[%c0_36, %c0_37, %c0_38, %c0_39] : memref<1x4x16x64xbf16, #tpu.memory_space<vmem>>, vector<1x1x16x64xbf16>
    %59 = vector.shape_cast %58 : vector<1x1x16x64xbf16> to vector<16x64xbf16>
    %cst_40 = arith.constant dense<0.000000e+00> : vector<144x64xf32>
    %60 = tpu.matmul %57, %59, %cst_40 {dimension_numbers = #tpu.dot_dimension_numbers<[1], [0], [0], [1], [0, 0, 1, 1], [], []>} : vector<144x16xbf16>, vector<16x64xbf16>, vector<144x64xf32> -> vector<144x64xf32>
    %c0_41 = arith.constant 0 : index
    %c1 = arith.constant 1 : index
    %c0_42 = arith.constant 0 : index
    %c0_43 = arith.constant 0 : index
    %61 = vector.load %arg7[%c0_41, %c1, %c0_42, %c0_43] : memref<1x4x64x16xbf16, #tpu.memory_space<vmem>>, vector<1x1x64x16xbf16>
    %62 = vector.shape_cast %61 : vector<1x1x64x16xbf16> to vector<64x16xbf16>
    %cst_44 = arith.constant dense<0.000000e+00> : vector<144x16xf32>
    %63 = tpu.matmul %4, %62, %cst_44 {dimension_numbers = #tpu.dot_dimension_numbers<[1], [0], [0], [1], [0, 0, 1, 1], [], []>} : vector<144x64xbf16>, vector<64x16xbf16>, vector<144x16xf32> -> vector<144x16xf32>
    %c0_45 = arith.constant 0 : index
    %c1_46 = arith.constant 1 : index
    %c0_47 = arith.constant 0 : index
    %c0_48 = arith.constant 0 : index
    %64 = vector.load %arg11[%c0_45, %c1_46, %c0_47, %c0_48] : memref<1x4x1x16xf32, #tpu.memory_space<vmem>>, vector<1x1x1x16xf32>
    %65 = vector.shape_cast %64 : vector<1x1x1x16xf32> to vector<1x16xf32>
    %66 = vector.broadcast %65 : vector<1x16xf32> to vector<144x16xf32>
    %67 = arith.addf %63, %66 : vector<144x16xf32>
    %c0_49 = arith.constant 0 : index
    %c1_50 = arith.constant 1 : index
    %c0_51 = arith.constant 0 : index
    %c0_52 = arith.constant 0 : index
    %68 = vector.load %arg8[%c0_49, %c1_50, %c0_51, %c0_52] : memref<1x4x64x16xbf16, #tpu.memory_space<vmem>>, vector<1x1x64x16xbf16>
    %69 = vector.shape_cast %68 : vector<1x1x64x16xbf16> to vector<64x16xbf16>
    %cst_53 = arith.constant dense<0.000000e+00> : vector<144x16xf32>
    %70 = tpu.matmul %4, %69, %cst_53 {dimension_numbers = #tpu.dot_dimension_numbers<[1], [0], [0], [1], [0, 0, 1, 1], [], []>} : vector<144x64xbf16>, vector<64x16xbf16>, vector<144x16xf32> -> vector<144x16xf32>
    %c0_54 = arith.constant 0 : index
    %c1_55 = arith.constant 1 : index
    %c0_56 = arith.constant 0 : index
    %c0_57 = arith.constant 0 : index
    %71 = vector.load %arg12[%c0_54, %c1_55, %c0_56, %c0_57] : memref<1x4x1x16xf32, #tpu.memory_space<vmem>>, vector<1x1x1x16xf32>
    %72 = vector.shape_cast %71 : vector<1x1x1x16xf32> to vector<1x16xf32>
    %73 = vector.broadcast %72 : vector<1x16xf32> to vector<144x16xf32>
    %74 = arith.addf %70, %73 : vector<144x16xf32>
    %c0_58 = arith.constant 0 : index
    %c1_59 = arith.constant 1 : index
    %c0_60 = arith.constant 0 : index
    %c0_61 = arith.constant 0 : index
    %75 = vector.load %arg9[%c0_58, %c1_59, %c0_60, %c0_61] : memref<1x4x64x16xbf16, #tpu.memory_space<vmem>>, vector<1x1x64x16xbf16>
    %76 = vector.shape_cast %75 : vector<1x1x64x16xbf16> to vector<64x16xbf16>
    %cst_62 = arith.constant dense<0.000000e+00> : vector<144x16xf32>
    %77 = tpu.matmul %4, %76, %cst_62 {dimension_numbers = #tpu.dot_dimension_numbers<[1], [0], [0], [1], [0, 0, 1, 1], [], []>} : vector<144x64xbf16>, vector<64x16xbf16>, vector<144x16xf32> -> vector<144x16xf32>
    %c0_63 = arith.constant 0 : index
    %c1_64 = arith.constant 1 : index
    %c0_65 = arith.constant 0 : index
    %c0_66 = arith.constant 0 : index
    %78 = vector.load %arg13[%c0_63, %c1_64, %c0_65, %c0_66] : memref<1x4x1x16xf32, #tpu.memory_space<vmem>>, vector<1x1x1x16xf32>
    %79 = vector.shape_cast %78 : vector<1x1x1x16xf32> to vector<1x16xf32>
    %80 = vector.broadcast %79 : vector<1x16xf32> to vector<144x16xf32>
    %81 = arith.addf %77, %80 : vector<144x16xf32>
    %82 = vector.extract_strided_slice %67 {offsets = [0, 0], sizes = [72, 16], strides = [1, 1]} : vector<144x16xf32> to vector<72x16xf32>
    %83 = vector.extract_strided_slice %74 {offsets = [0, 0], sizes = [72, 16], strides = [1, 1]} : vector<144x16xf32> to vector<72x16xf32>
    %cst_67 = arith.constant dense<0.000000e+00> : vector<72x72xf32>
    %84 = tpu.matmul %82, %83, %cst_67 {dimension_numbers = #tpu.dot_dimension_numbers<[1], [1], [0], [0], [0, 0, 1, 0], [], []>} : vector<72x16xf32>, vector<72x16xf32>, vector<72x72xf32> -> vector<72x72xf32>
    %cst_68 = arith.constant dense<0xFF800000> : vector<72xf32>
    %85 = vector.multi_reduction <maximumf>, %84, %cst_68 [1] : vector<72x72xf32> to vector<72xf32>
    %86 = vector.shape_cast %85 : vector<72xf32> to vector<72x1xf32>
    %87 = vector.broadcast %86 : vector<72x1xf32> to vector<72x72xf32>
    %88 = arith.subf %84, %87 : vector<72x72xf32>
    %89 = math.exp %88 : vector<72x72xf32>
    %cst_69 = arith.constant dense<0.000000e+00> : vector<72xf32>
    %90 = vector.multi_reduction <add>, %89, %cst_69 [1] : vector<72x72xf32> to vector<72xf32>
    %91 = vector.shape_cast %90 : vector<72xf32> to vector<72x1xf32>
    %92 = tpu.reciprocal %91 {approx = true} : vector<72x1xf32> -> vector<72x1xf32>
    %93 = vector.broadcast %92 : vector<72x1xf32> to vector<72x72xf32>
    %94 = arith.mulf %89, %93 : vector<72x72xf32>
    %95 = arith.addf %38, %94 : vector<72x72xf32>
    %96 = vector.extract_strided_slice %81 {offsets = [0, 0], sizes = [72, 16], strides = [1, 1]} : vector<144x16xf32> to vector<72x16xf32>
    %cst_70 = arith.constant dense<0.000000e+00> : vector<72x16xf32>
    %97 = tpu.matmul %94, %96, %cst_70 {dimension_numbers = #tpu.dot_dimension_numbers<[1], [0], [0], [1], [0, 0, 1, 1], [], []>} : vector<72x72xf32>, vector<72x16xf32>, vector<72x16xf32> -> vector<72x16xf32>
    %98 = vector.extract_strided_slice %67 {offsets = [72, 0], sizes = [72, 16], strides = [1, 1]} : vector<144x16xf32> to vector<72x16xf32>
    %99 = vector.extract_strided_slice %74 {offsets = [72, 0], sizes = [72, 16], strides = [1, 1]} : vector<144x16xf32> to vector<72x16xf32>
    %cst_71 = arith.constant dense<0.000000e+00> : vector<72x72xf32>
    %100 = tpu.matmul %98, %99, %cst_71 {dimension_numbers = #tpu.dot_dimension_numbers<[1], [1], [0], [0], [0, 0, 1, 0], [], []>} : vector<72x16xf32>, vector<72x16xf32>, vector<72x72xf32> -> vector<72x72xf32>
    %cst_72 = arith.constant dense<0xFF800000> : vector<72xf32>
    %101 = vector.multi_reduction <maximumf>, %100, %cst_72 [1] : vector<72x72xf32> to vector<72xf32>
    %102 = vector.shape_cast %101 : vector<72xf32> to vector<72x1xf32>
    %103 = vector.broadcast %102 : vector<72x1xf32> to vector<72x72xf32>
    %104 = arith.subf %100, %103 : vector<72x72xf32>
    %105 = math.exp %104 : vector<72x72xf32>
    %cst_73 = arith.constant dense<0.000000e+00> : vector<72xf32>
    %106 = vector.multi_reduction <add>, %105, %cst_73 [1] : vector<72x72xf32> to vector<72xf32>
    %107 = vector.shape_cast %106 : vector<72xf32> to vector<72x1xf32>
    %108 = tpu.reciprocal %107 {approx = true} : vector<72x1xf32> -> vector<72x1xf32>
    %109 = vector.broadcast %108 : vector<72x1xf32> to vector<72x72xf32>
    %110 = arith.mulf %105, %109 : vector<72x72xf32>
    %111 = arith.addf %53, %110 : vector<72x72xf32>
    %112 = vector.extract_strided_slice %81 {offsets = [72, 0], sizes = [72, 16], strides = [1, 1]} : vector<144x16xf32> to vector<72x16xf32>
    %cst_74 = arith.constant dense<0.000000e+00> : vector<72x16xf32>
    %113 = tpu.matmul %110, %112, %cst_74 {dimension_numbers = #tpu.dot_dimension_numbers<[1], [0], [0], [1], [0, 0, 1, 1], [], []>} : vector<72x72xf32>, vector<72x16xf32>, vector<72x16xf32> -> vector<72x16xf32>
    %114 = tpu.concatenate %97, %113 in 0 : vector<72x16xf32>, vector<72x16xf32> -> vector<144x16xf32>
    %115 = arith.truncf %114 : vector<144x16xf32> to vector<144x16xbf16>
    %c0_75 = arith.constant 0 : index
    %c1_76 = arith.constant 1 : index
    %c0_77 = arith.constant 0 : index
    %c0_78 = arith.constant 0 : index
    %116 = vector.load %arg10[%c0_75, %c1_76, %c0_77, %c0_78] : memref<1x4x16x64xbf16, #tpu.memory_space<vmem>>, vector<1x1x16x64xbf16>
    %117 = vector.shape_cast %116 : vector<1x1x16x64xbf16> to vector<16x64xbf16>
    %cst_79 = arith.constant dense<0.000000e+00> : vector<144x64xf32>
    %118 = tpu.matmul %115, %117, %cst_79 {dimension_numbers = #tpu.dot_dimension_numbers<[1], [0], [0], [1], [0, 0, 1, 1], [], []>} : vector<144x16xbf16>, vector<16x64xbf16>, vector<144x64xf32> -> vector<144x64xf32>
    %119 = arith.addf %60, %118 : vector<144x64xf32>
    %c0_80 = arith.constant 0 : index
    %c2 = arith.constant 2 : index
    %c0_81 = arith.constant 0 : index
    %c0_82 = arith.constant 0 : index
    %120 = vector.load %arg7[%c0_80, %c2, %c0_81, %c0_82] : memref<1x4x64x16xbf16, #tpu.memory_space<vmem>>, vector<1x1x64x16xbf16>
    %121 = vector.shape_cast %120 : vector<1x1x64x16xbf16> to vector<64x16xbf16>
    %cst_83 = arith.constant dense<0.000000e+00> : vector<144x16xf32>
    %122 = tpu.matmul %4, %121, %cst_83 {dimension_numbers = #tpu.dot_dimension_numbers<[1], [0], [0], [1], [0, 0, 1, 1], [], []>} : vector<144x64xbf16>, vector<64x16xbf16>, vector<144x16xf32> -> vector<144x16xf32>
    %c0_84 = arith.constant 0 : index
    %c2_85 = arith.constant 2 : index
    %c0_86 = arith.constant 0 : index
    %c0_87 = arith.constant 0 : index
    %123 = vector.load %arg11[%c0_84, %c2_85, %c0_86, %c0_87] : memref<1x4x1x16xf32, #tpu.memory_space<vmem>>, vector<1x1x1x16xf32>
    %124 = vector.shape_cast %123 : vector<1x1x1x16xf32> to vector<1x16xf32>
    %125 = vector.broadcast %124 : vector<1x16xf32> to vector<144x16xf32>
    %126 = arith.addf %122, %125 : vector<144x16xf32>
    %c0_88 = arith.constant 0 : index
    %c2_89 = arith.constant 2 : index
    %c0_90 = arith.constant 0 : index
    %c0_91 = arith.constant 0 : index
    %127 = vector.load %arg8[%c0_88, %c2_89, %c0_90, %c0_91] : memref<1x4x64x16xbf16, #tpu.memory_space<vmem>>, vector<1x1x64x16xbf16>
    %128 = vector.shape_cast %127 : vector<1x1x64x16xbf16> to vector<64x16xbf16>
    %cst_92 = arith.constant dense<0.000000e+00> : vector<144x16xf32>
    %129 = tpu.matmul %4, %128, %cst_92 {dimension_numbers = #tpu.dot_dimension_numbers<[1], [0], [0], [1], [0, 0, 1, 1], [], []>} : vector<144x64xbf16>, vector<64x16xbf16>, vector<144x16xf32> -> vector<144x16xf32>
    %c0_93 = arith.constant 0 : index
    %c2_94 = arith.constant 2 : index
    %c0_95 = arith.constant 0 : index
    %c0_96 = arith.constant 0 : index
    %130 = vector.load %arg12[%c0_93, %c2_94, %c0_95, %c0_96] : memref<1x4x1x16xf32, #tpu.memory_space<vmem>>, vector<1x1x1x16xf32>
    %131 = vector.shape_cast %130 : vector<1x1x1x16xf32> to vector<1x16xf32>
    %132 = vector.broadcast %131 : vector<1x16xf32> to vector<144x16xf32>
    %133 = arith.addf %129, %132 : vector<144x16xf32>
    %c0_97 = arith.constant 0 : index
    %c2_98 = arith.constant 2 : index
    %c0_99 = arith.constant 0 : index
    %c0_100 = arith.constant 0 : index
    %134 = vector.load %arg9[%c0_97, %c2_98, %c0_99, %c0_100] : memref<1x4x64x16xbf16, #tpu.memory_space<vmem>>, vector<1x1x64x16xbf16>
    %135 = vector.shape_cast %134 : vector<1x1x64x16xbf16> to vector<64x16xbf16>
    %cst_101 = arith.constant dense<0.000000e+00> : vector<144x16xf32>
    %136 = tpu.matmul %4, %135, %cst_101 {dimension_numbers = #tpu.dot_dimension_numbers<[1], [0], [0], [1], [0, 0, 1, 1], [], []>} : vector<144x64xbf16>, vector<64x16xbf16>, vector<144x16xf32> -> vector<144x16xf32>
    %c0_102 = arith.constant 0 : index
    %c2_103 = arith.constant 2 : index
    %c0_104 = arith.constant 0 : index
    %c0_105 = arith.constant 0 : index
    %137 = vector.load %arg13[%c0_102, %c2_103, %c0_104, %c0_105] : memref<1x4x1x16xf32, #tpu.memory_space<vmem>>, vector<1x1x1x16xf32>
    %138 = vector.shape_cast %137 : vector<1x1x1x16xf32> to vector<1x16xf32>
    %139 = vector.broadcast %138 : vector<1x16xf32> to vector<144x16xf32>
    %140 = arith.addf %136, %139 : vector<144x16xf32>
    %141 = vector.extract_strided_slice %126 {offsets = [0, 0], sizes = [72, 16], strides = [1, 1]} : vector<144x16xf32> to vector<72x16xf32>
    %142 = vector.extract_strided_slice %133 {offsets = [0, 0], sizes = [72, 16], strides = [1, 1]} : vector<144x16xf32> to vector<72x16xf32>
    %cst_106 = arith.constant dense<0.000000e+00> : vector<72x72xf32>
    %143 = tpu.matmul %141, %142, %cst_106 {dimension_numbers = #tpu.dot_dimension_numbers<[1], [1], [0], [0], [0, 0, 1, 0], [], []>} : vector<72x16xf32>, vector<72x16xf32>, vector<72x72xf32> -> vector<72x72xf32>
    %cst_107 = arith.constant dense<0xFF800000> : vector<72xf32>
    %144 = vector.multi_reduction <maximumf>, %143, %cst_107 [1] : vector<72x72xf32> to vector<72xf32>
    %145 = vector.shape_cast %144 : vector<72xf32> to vector<72x1xf32>
    %146 = vector.broadcast %145 : vector<72x1xf32> to vector<72x72xf32>
    %147 = arith.subf %143, %146 : vector<72x72xf32>
    %148 = math.exp %147 : vector<72x72xf32>
    %cst_108 = arith.constant dense<0.000000e+00> : vector<72xf32>
    %149 = vector.multi_reduction <add>, %148, %cst_108 [1] : vector<72x72xf32> to vector<72xf32>
    %150 = vector.shape_cast %149 : vector<72xf32> to vector<72x1xf32>
    %151 = tpu.reciprocal %150 {approx = true} : vector<72x1xf32> -> vector<72x1xf32>
    %152 = vector.broadcast %151 : vector<72x1xf32> to vector<72x72xf32>
    %153 = arith.mulf %148, %152 : vector<72x72xf32>
    %154 = arith.addf %95, %153 : vector<72x72xf32>
    %155 = vector.extract_strided_slice %140 {offsets = [0, 0], sizes = [72, 16], strides = [1, 1]} : vector<144x16xf32> to vector<72x16xf32>
    %cst_109 = arith.constant dense<0.000000e+00> : vector<72x16xf32>
    %156 = tpu.matmul %153, %155, %cst_109 {dimension_numbers = #tpu.dot_dimension_numbers<[1], [0], [0], [1], [0, 0, 1, 1], [], []>} : vector<72x72xf32>, vector<72x16xf32>, vector<72x16xf32> -> vector<72x16xf32>
    %157 = vector.extract_strided_slice %126 {offsets = [72, 0], sizes = [72, 16], strides = [1, 1]} : vector<144x16xf32> to vector<72x16xf32>
    %158 = vector.extract_strided_slice %133 {offsets = [72, 0], sizes = [72, 16], strides = [1, 1]} : vector<144x16xf32> to vector<72x16xf32>
    %cst_110 = arith.constant dense<0.000000e+00> : vector<72x72xf32>
    %159 = tpu.matmul %157, %158, %cst_110 {dimension_numbers = #tpu.dot_dimension_numbers<[1], [1], [0], [0], [0, 0, 1, 0], [], []>} : vector<72x16xf32>, vector<72x16xf32>, vector<72x72xf32> -> vector<72x72xf32>
    %cst_111 = arith.constant dense<0xFF800000> : vector<72xf32>
    %160 = vector.multi_reduction <maximumf>, %159, %cst_111 [1] : vector<72x72xf32> to vector<72xf32>
    %161 = vector.shape_cast %160 : vector<72xf32> to vector<72x1xf32>
    %162 = vector.broadcast %161 : vector<72x1xf32> to vector<72x72xf32>
    %163 = arith.subf %159, %162 : vector<72x72xf32>
    %164 = math.exp %163 : vector<72x72xf32>
    %cst_112 = arith.constant dense<0.000000e+00> : vector<72xf32>
    %165 = vector.multi_reduction <add>, %164, %cst_112 [1] : vector<72x72xf32> to vector<72xf32>
    %166 = vector.shape_cast %165 : vector<72xf32> to vector<72x1xf32>
    %167 = tpu.reciprocal %166 {approx = true} : vector<72x1xf32> -> vector<72x1xf32>
    %168 = vector.broadcast %167 : vector<72x1xf32> to vector<72x72xf32>
    %169 = arith.mulf %164, %168 : vector<72x72xf32>
    %170 = arith.addf %111, %169 : vector<72x72xf32>
    %171 = vector.extract_strided_slice %140 {offsets = [72, 0], sizes = [72, 16], strides = [1, 1]} : vector<144x16xf32> to vector<72x16xf32>
    %cst_113 = arith.constant dense<0.000000e+00> : vector<72x16xf32>
    %172 = tpu.matmul %169, %171, %cst_113 {dimension_numbers = #tpu.dot_dimension_numbers<[1], [0], [0], [1], [0, 0, 1, 1], [], []>} : vector<72x72xf32>, vector<72x16xf32>, vector<72x16xf32> -> vector<72x16xf32>
    %173 = tpu.concatenate %156, %172 in 0 : vector<72x16xf32>, vector<72x16xf32> -> vector<144x16xf32>
    %174 = arith.truncf %173 : vector<144x16xf32> to vector<144x16xbf16>
    %c0_114 = arith.constant 0 : index
    %c2_115 = arith.constant 2 : index
    %c0_116 = arith.constant 0 : index
    %c0_117 = arith.constant 0 : index
    %175 = vector.load %arg10[%c0_114, %c2_115, %c0_116, %c0_117] : memref<1x4x16x64xbf16, #tpu.memory_space<vmem>>, vector<1x1x16x64xbf16>
    %176 = vector.shape_cast %175 : vector<1x1x16x64xbf16> to vector<16x64xbf16>
    %cst_118 = arith.constant dense<0.000000e+00> : vector<144x64xf32>
    %177 = tpu.matmul %174, %176, %cst_118 {dimension_numbers = #tpu.dot_dimension_numbers<[1], [0], [0], [1], [0, 0, 1, 1], [], []>} : vector<144x16xbf16>, vector<16x64xbf16>, vector<144x64xf32> -> vector<144x64xf32>
    %178 = arith.addf %119, %177 : vector<144x64xf32>
    %c0_119 = arith.constant 0 : index
    %c3 = arith.constant 3 : index
    %c0_120 = arith.constant 0 : index
    %c0_121 = arith.constant 0 : index
    %179 = vector.load %arg7[%c0_119, %c3, %c0_120, %c0_121] : memref<1x4x64x16xbf16, #tpu.memory_space<vmem>>, vector<1x1x64x16xbf16>
    %180 = vector.shape_cast %179 : vector<1x1x64x16xbf16> to vector<64x16xbf16>
    %cst_122 = arith.constant dense<0.000000e+00> : vector<144x16xf32>
    %181 = tpu.matmul %4, %180, %cst_122 {dimension_numbers = #tpu.dot_dimension_numbers<[1], [0], [0], [1], [0, 0, 1, 1], [], []>} : vector<144x64xbf16>, vector<64x16xbf16>, vector<144x16xf32> -> vector<144x16xf32>
    %c0_123 = arith.constant 0 : index
    %c3_124 = arith.constant 3 : index
    %c0_125 = arith.constant 0 : index
    %c0_126 = arith.constant 0 : index
    %182 = vector.load %arg11[%c0_123, %c3_124, %c0_125, %c0_126] : memref<1x4x1x16xf32, #tpu.memory_space<vmem>>, vector<1x1x1x16xf32>
    %183 = vector.shape_cast %182 : vector<1x1x1x16xf32> to vector<1x16xf32>
    %184 = vector.broadcast %183 : vector<1x16xf32> to vector<144x16xf32>
    %185 = arith.addf %181, %184 : vector<144x16xf32>
    %c0_127 = arith.constant 0 : index
    %c3_128 = arith.constant 3 : index
    %c0_129 = arith.constant 0 : index
    %c0_130 = arith.constant 0 : index
    %186 = vector.load %arg8[%c0_127, %c3_128, %c0_129, %c0_130] : memref<1x4x64x16xbf16, #tpu.memory_space<vmem>>, vector<1x1x64x16xbf16>
    %187 = vector.shape_cast %186 : vector<1x1x64x16xbf16> to vector<64x16xbf16>
    %cst_131 = arith.constant dense<0.000000e+00> : vector<144x16xf32>
    %188 = tpu.matmul %4, %187, %cst_131 {dimension_numbers = #tpu.dot_dimension_numbers<[1], [0], [0], [1], [0, 0, 1, 1], [], []>} : vector<144x64xbf16>, vector<64x16xbf16>, vector<144x16xf32> -> vector<144x16xf32>
    %c0_132 = arith.constant 0 : index
    %c3_133 = arith.constant 3 : index
    %c0_134 = arith.constant 0 : index
    %c0_135 = arith.constant 0 : index
    %189 = vector.load %arg12[%c0_132, %c3_133, %c0_134, %c0_135] : memref<1x4x1x16xf32, #tpu.memory_space<vmem>>, vector<1x1x1x16xf32>
    %190 = vector.shape_cast %189 : vector<1x1x1x16xf32> to vector<1x16xf32>
    %191 = vector.broadcast %190 : vector<1x16xf32> to vector<144x16xf32>
    %192 = arith.addf %188, %191 : vector<144x16xf32>
    %c0_136 = arith.constant 0 : index
    %c3_137 = arith.constant 3 : index
    %c0_138 = arith.constant 0 : index
    %c0_139 = arith.constant 0 : index
    %193 = vector.load %arg9[%c0_136, %c3_137, %c0_138, %c0_139] : memref<1x4x64x16xbf16, #tpu.memory_space<vmem>>, vector<1x1x64x16xbf16>
    %194 = vector.shape_cast %193 : vector<1x1x64x16xbf16> to vector<64x16xbf16>
    %cst_140 = arith.constant dense<0.000000e+00> : vector<144x16xf32>
    %195 = tpu.matmul %4, %194, %cst_140 {dimension_numbers = #tpu.dot_dimension_numbers<[1], [0], [0], [1], [0, 0, 1, 1], [], []>} : vector<144x64xbf16>, vector<64x16xbf16>, vector<144x16xf32> -> vector<144x16xf32>
    %c0_141 = arith.constant 0 : index
    %c3_142 = arith.constant 3 : index
    %c0_143 = arith.constant 0 : index
    %c0_144 = arith.constant 0 : index
    %196 = vector.load %arg13[%c0_141, %c3_142, %c0_143, %c0_144] : memref<1x4x1x16xf32, #tpu.memory_space<vmem>>, vector<1x1x1x16xf32>
    %197 = vector.shape_cast %196 : vector<1x1x1x16xf32> to vector<1x16xf32>
    %198 = vector.broadcast %197 : vector<1x16xf32> to vector<144x16xf32>
    %199 = arith.addf %195, %198 : vector<144x16xf32>
    %200 = vector.extract_strided_slice %185 {offsets = [0, 0], sizes = [72, 16], strides = [1, 1]} : vector<144x16xf32> to vector<72x16xf32>
    %201 = vector.extract_strided_slice %192 {offsets = [0, 0], sizes = [72, 16], strides = [1, 1]} : vector<144x16xf32> to vector<72x16xf32>
    %cst_145 = arith.constant dense<0.000000e+00> : vector<72x72xf32>
    %202 = tpu.matmul %200, %201, %cst_145 {dimension_numbers = #tpu.dot_dimension_numbers<[1], [1], [0], [0], [0, 0, 1, 0], [], []>} : vector<72x16xf32>, vector<72x16xf32>, vector<72x72xf32> -> vector<72x72xf32>
    %cst_146 = arith.constant dense<0xFF800000> : vector<72xf32>
    %203 = vector.multi_reduction <maximumf>, %202, %cst_146 [1] : vector<72x72xf32> to vector<72xf32>
    %204 = vector.shape_cast %203 : vector<72xf32> to vector<72x1xf32>
    %205 = vector.broadcast %204 : vector<72x1xf32> to vector<72x72xf32>
    %206 = arith.subf %202, %205 : vector<72x72xf32>
    %207 = math.exp %206 : vector<72x72xf32>
    %cst_147 = arith.constant dense<0.000000e+00> : vector<72xf32>
    %208 = vector.multi_reduction <add>, %207, %cst_147 [1] : vector<72x72xf32> to vector<72xf32>
    %209 = vector.shape_cast %208 : vector<72xf32> to vector<72x1xf32>
    %210 = tpu.reciprocal %209 {approx = true} : vector<72x1xf32> -> vector<72x1xf32>
    %211 = vector.broadcast %210 : vector<72x1xf32> to vector<72x72xf32>
    %212 = arith.mulf %207, %211 : vector<72x72xf32>
    %213 = arith.addf %154, %212 : vector<72x72xf32>
    %214 = vector.extract_strided_slice %199 {offsets = [0, 0], sizes = [72, 16], strides = [1, 1]} : vector<144x16xf32> to vector<72x16xf32>
    %cst_148 = arith.constant dense<0.000000e+00> : vector<72x16xf32>
    %215 = tpu.matmul %212, %214, %cst_148 {dimension_numbers = #tpu.dot_dimension_numbers<[1], [0], [0], [1], [0, 0, 1, 1], [], []>} : vector<72x72xf32>, vector<72x16xf32>, vector<72x16xf32> -> vector<72x16xf32>
    %216 = vector.extract_strided_slice %185 {offsets = [72, 0], sizes = [72, 16], strides = [1, 1]} : vector<144x16xf32> to vector<72x16xf32>
    %217 = vector.extract_strided_slice %192 {offsets = [72, 0], sizes = [72, 16], strides = [1, 1]} : vector<144x16xf32> to vector<72x16xf32>
    %cst_149 = arith.constant dense<0.000000e+00> : vector<72x72xf32>
    %218 = tpu.matmul %216, %217, %cst_149 {dimension_numbers = #tpu.dot_dimension_numbers<[1], [1], [0], [0], [0, 0, 1, 0], [], []>} : vector<72x16xf32>, vector<72x16xf32>, vector<72x72xf32> -> vector<72x72xf32>
    %cst_150 = arith.constant dense<0xFF800000> : vector<72xf32>
    %219 = vector.multi_reduction <maximumf>, %218, %cst_150 [1] : vector<72x72xf32> to vector<72xf32>
    %220 = vector.shape_cast %219 : vector<72xf32> to vector<72x1xf32>
    %221 = vector.broadcast %220 : vector<72x1xf32> to vector<72x72xf32>
    %222 = arith.subf %218, %221 : vector<72x72xf32>
    %223 = math.exp %222 : vector<72x72xf32>
    %cst_151 = arith.constant dense<0.000000e+00> : vector<72xf32>
    %224 = vector.multi_reduction <add>, %223, %cst_151 [1] : vector<72x72xf32> to vector<72xf32>
    %225 = vector.shape_cast %224 : vector<72xf32> to vector<72x1xf32>
    %226 = tpu.reciprocal %225 {approx = true} : vector<72x1xf32> -> vector<72x1xf32>
    %227 = vector.broadcast %226 : vector<72x1xf32> to vector<72x72xf32>
    %228 = arith.mulf %223, %227 : vector<72x72xf32>
    %229 = arith.addf %170, %228 : vector<72x72xf32>
    %230 = vector.extract_strided_slice %199 {offsets = [72, 0], sizes = [72, 16], strides = [1, 1]} : vector<144x16xf32> to vector<72x16xf32>
    %cst_152 = arith.constant dense<0.000000e+00> : vector<72x16xf32>
    %231 = tpu.matmul %228, %230, %cst_152 {dimension_numbers = #tpu.dot_dimension_numbers<[1], [0], [0], [1], [0, 0, 1, 1], [], []>} : vector<72x72xf32>, vector<72x16xf32>, vector<72x16xf32> -> vector<72x16xf32>
    %232 = tpu.concatenate %215, %231 in 0 : vector<72x16xf32>, vector<72x16xf32> -> vector<144x16xf32>
    %233 = arith.truncf %232 : vector<144x16xf32> to vector<144x16xbf16>
    %c0_153 = arith.constant 0 : index
    %c3_154 = arith.constant 3 : index
    %c0_155 = arith.constant 0 : index
    %c0_156 = arith.constant 0 : index
    %234 = vector.load %arg10[%c0_153, %c3_154, %c0_155, %c0_156] : memref<1x4x16x64xbf16, #tpu.memory_space<vmem>>, vector<1x1x16x64xbf16>
    %235 = vector.shape_cast %234 : vector<1x1x16x64xbf16> to vector<16x64xbf16>
    %cst_157 = arith.constant dense<0.000000e+00> : vector<144x64xf32>
    %236 = tpu.matmul %233, %235, %cst_157 {dimension_numbers = #tpu.dot_dimension_numbers<[1], [0], [0], [1], [0, 0, 1, 1], [], []>} : vector<144x16xbf16>, vector<16x64xbf16>, vector<144x64xf32> -> vector<144x64xf32>
    %237 = arith.addf %178, %236 : vector<144x64xf32>
    %cst_158 = arith.constant 2.500000e-01 : f32
    %238 = vector.broadcast %cst_158 : f32 to vector<72x72xf32>
    %239 = arith.mulf %213, %238 : vector<72x72xf32>
    %c0_159 = arith.constant 0 : index
    %c0_160 = arith.constant 0 : index
    %c0_161 = arith.constant 0 : index
    %c0_162 = arith.constant 0 : index
    %240 = vector.load %arg27[%c0_159, %c0_160, %c0_161, %c0_162] : memref<1x2x72x72xf32, #tpu.memory_space<vmem>>, vector<1x1x72x72xf32>
    %241 = vector.shape_cast %240 : vector<1x1x72x72xf32> to vector<72x72xf32>
    %242 = vector.shape_cast %239 : vector<72x72xf32> to vector<1x1x72x72xf32>
    tpu.vector_store %arg27[%c0_159, %c0_160, %c0_161, %c0_162], %242 {strides = array<i32>} : memref<1x2x72x72xf32, #tpu.memory_space<vmem>>, vector<1x1x72x72xf32>,
    %cst_163 = arith.constant 2.500000e-01 : f32
    %243 = vector.broadcast %cst_163 : f32 to vector<72x72xf32>
    %244 = arith.mulf %229, %243 : vector<72x72xf32>
    %c0_164 = arith.constant 0 : index
    %c1_165 = arith.constant 1 : index
    %c0_166 = arith.constant 0 : index
    %c0_167 = arith.constant 0 : index
    %245 = vector.load %arg27[%c0_164, %c1_165, %c0_166, %c0_167] : memref<1x2x72x72xf32, #tpu.memory_space<vmem>>, vector<1x1x72x72xf32>
    %246 = vector.shape_cast %245 : vector<1x1x72x72xf32> to vector<72x72xf32>
    %247 = vector.shape_cast %244 : vector<72x72xf32> to vector<1x1x72x72xf32>
    tpu.vector_store %arg27[%c0_164, %c1_165, %c0_166, %c0_167], %247 {strides = array<i32>} : memref<1x2x72x72xf32, #tpu.memory_space<vmem>>, vector<1x1x72x72xf32>,
    %248 = arith.addf %3, %237 : vector<144x64xf32>
    %c0_168 = arith.constant 0 : index
    %c0_169 = arith.constant 0 : index
    %c0_170 = arith.constant 0 : index
    %249 = vector.load %arg14[%c0_168, %c0_169, %c0_170] : memref<1x1x64xf32, #tpu.memory_space<vmem>>, vector<1x1x64xf32>
    %250 = vector.shape_cast %249 : vector<1x1x64xf32> to vector<1x64xf32>
    %251 = vector.broadcast %250 : vector<1x64xf32> to vector<144x64xf32>
    %252 = arith.addf %248, %251 : vector<144x64xf32>
    %c0_171 = arith.constant 0 : index
    %c0_172 = arith.constant 0 : index
    %c0_173 = arith.constant 0 : index
    %253 = vector.load %arg15[%c0_171, %c0_172, %c0_173] : memref<1x1x64xf32, #tpu.memory_space<vmem>>, vector<1x1x64xf32>
    %254 = vector.shape_cast %253 : vector<1x1x64xf32> to vector<1x64xf32>
    %c0_174 = arith.constant 0 : index
    %c0_175 = arith.constant 0 : index
    %c0_176 = arith.constant 0 : index
    %255 = vector.load %arg16[%c0_174, %c0_175, %c0_176] : memref<1x1x64xf32, #tpu.memory_space<vmem>>, vector<1x1x64xf32>
    %256 = vector.shape_cast %255 : vector<1x1x64xf32> to vector<1x64xf32>
    %cst_177 = arith.constant dense<0.000000e+00> : vector<144xf32>
    %257 = vector.multi_reduction <add>, %252, %cst_177 [1] : vector<144x64xf32> to vector<144xf32>
    %258 = vector.shape_cast %257 : vector<144xf32> to vector<144x1xf32>
    %cst_178 = arith.constant 6.400000e+01 : f32
    %259 = vector.broadcast %cst_178 : f32 to vector<144x1xf32>
    %260 = arith.divf %258, %259 : vector<144x1xf32>
    %261 = arith.mulf %252, %252 : vector<144x64xf32>
    %cst_179 = arith.constant dense<0.000000e+00> : vector<144xf32>
    %262 = vector.multi_reduction <add>, %261, %cst_179 [1] : vector<144x64xf32> to vector<144xf32>
    %263 = vector.shape_cast %262 : vector<144xf32> to vector<144x1xf32>
    %cst_180 = arith.constant 6.400000e+01 : f32
    %264 = vector.broadcast %cst_180 : f32 to vector<144x1xf32>
    %265 = arith.divf %263, %264 : vector<144x1xf32>
    %266 = arith.mulf %260, %260 : vector<144x1xf32>
    %267 = arith.subf %265, %266 : vector<144x1xf32>
    %268 = vector.broadcast %260 : vector<144x1xf32> to vector<144x64xf32>
    %269 = arith.subf %252, %268 : vector<144x64xf32>
    %cst_181 = arith.constant 9.99999974E-6 : f32
    %270 = vector.broadcast %cst_181 : f32 to vector<144x1xf32>
    %271 = arith.addf %267, %270 : vector<144x1xf32>
    %272 = math.rsqrt %271 : vector<144x1xf32>
    %273 = vector.broadcast %272 : vector<144x1xf32> to vector<144x64xf32>
    %274 = arith.mulf %269, %273 : vector<144x64xf32>
    %275 = vector.broadcast %254 : vector<1x64xf32> to vector<144x64xf32>
    %276 = arith.mulf %274, %275 : vector<144x64xf32>
    %277 = vector.broadcast %256 : vector<1x64xf32> to vector<144x64xf32>
    %278 = arith.addf %276, %277 : vector<144x64xf32>
    %279 = arith.truncf %278 : vector<144x64xf32> to vector<144x64xbf16>
    %c0_182 = arith.constant 0 : index
    %c0_183 = arith.constant 0 : index
    %c0_184 = arith.constant 0 : index
    %280 = vector.load %arg17[%c0_182, %c0_183, %c0_184] : memref<1x64x64xbf16, #tpu.memory_space<vmem>>, vector<1x64x64xbf16>
    %281 = vector.shape_cast %280 : vector<1x64x64xbf16> to vector<64x64xbf16>
    %cst_185 = arith.constant dense<0.000000e+00> : vector<144x64xf32>
    %282 = tpu.matmul %279, %281, %cst_185 {dimension_numbers = #tpu.dot_dimension_numbers<[1], [0], [0], [1], [0, 0, 1, 1], [], []>} : vector<144x64xbf16>, vector<64x64xbf16>, vector<144x64xf32> -> vector<144x64xf32>
    %c0_186 = arith.constant 0 : index
    %c0_187 = arith.constant 0 : index
    %c0_188 = arith.constant 0 : index
    %283 = vector.load %arg18[%c0_186, %c0_187, %c0_188] : memref<1x1x64xf32, #tpu.memory_space<vmem>>, vector<1x1x64xf32>
    %284 = vector.shape_cast %283 : vector<1x1x64xf32> to vector<1x64xf32>
    %285 = vector.broadcast %284 : vector<1x64xf32> to vector<144x64xf32>
    %286 = arith.addf %282, %285 : vector<144x64xf32>
    %cst_189 = arith.constant 0.000000e+00 : f32
    %287 = vector.broadcast %cst_189 : f32 to vector<144x64xf32>
    %288 = arith.maximumf %286, %287 : vector<144x64xf32>
    %289 = arith.truncf %288 : vector<144x64xf32> to vector<144x64xbf16>
    %c0_190 = arith.constant 0 : index
    %c0_191 = arith.constant 0 : index
    %c0_192 = arith.constant 0 : index
    %290 = vector.load %arg19[%c0_190, %c0_191, %c0_192] : memref<1x64x64xbf16, #tpu.memory_space<vmem>>, vector<1x64x64xbf16>
    %291 = vector.shape_cast %290 : vector<1x64x64xbf16> to vector<64x64xbf16>
    %cst_193 = arith.constant dense<0.000000e+00> : vector<144x64xf32>
    %292 = tpu.matmul %289, %291, %cst_193 {dimension_numbers = #tpu.dot_dimension_numbers<[1], [0], [0], [1], [0, 0, 1, 1], [], []>} : vector<144x64xbf16>, vector<64x64xbf16>, vector<144x64xf32> -> vector<144x64xf32>
    %c0_194 = arith.constant 0 : index
    %c0_195 = arith.constant 0 : index
    %c0_196 = arith.constant 0 : index
    %293 = vector.load %arg20[%c0_194, %c0_195, %c0_196] : memref<1x1x64xf32, #tpu.memory_space<vmem>>, vector<1x1x64xf32>
    %294 = vector.shape_cast %293 : vector<1x1x64xf32> to vector<1x64xf32>
    %295 = vector.broadcast %294 : vector<1x64xf32> to vector<144x64xf32>
    %296 = arith.addf %292, %295 : vector<144x64xf32>
    %297 = arith.addf %278, %296 : vector<144x64xf32>
    %c0_197 = arith.constant 0 : index
    %c0_198 = arith.constant 0 : index
    %c0_199 = arith.constant 0 : index
    %298 = vector.load %arg21[%c0_197, %c0_198, %c0_199] : memref<1x1x64xf32, #tpu.memory_space<vmem>>, vector<1x1x64xf32>
    %299 = vector.shape_cast %298 : vector<1x1x64xf32> to vector<1x64xf32>
    %c0_200 = arith.constant 0 : index
    %c0_201 = arith.constant 0 : index
    %c0_202 = arith.constant 0 : index
    %300 = vector.load %arg22[%c0_200, %c0_201, %c0_202] : memref<1x1x64xf32, #tpu.memory_space<vmem>>, vector<1x1x64xf32>
    %301 = vector.shape_cast %300 : vector<1x1x64xf32> to vector<1x64xf32>
    %cst_203 = arith.constant dense<0.000000e+00> : vector<144xf32>
    %302 = vector.multi_reduction <add>, %297, %cst_203 [1] : vector<144x64xf32> to vector<144xf32>
    %303 = vector.shape_cast %302 : vector<144xf32> to vector<144x1xf32>
    %cst_204 = arith.constant 6.400000e+01 : f32
    %304 = vector.broadcast %cst_204 : f32 to vector<144x1xf32>
    %305 = arith.divf %303, %304 : vector<144x1xf32>
    %306 = arith.mulf %297, %297 : vector<144x64xf32>
    %cst_205 = arith.constant dense<0.000000e+00> : vector<144xf32>
    %307 = vector.multi_reduction <add>, %306, %cst_205 [1] : vector<144x64xf32> to vector<144xf32>
    %308 = vector.shape_cast %307 : vector<144xf32> to vector<144x1xf32>
    %cst_206 = arith.constant 6.400000e+01 : f32
    %309 = vector.broadcast %cst_206 : f32 to vector<144x1xf32>
    %310 = arith.divf %308, %309 : vector<144x1xf32>
    %311 = arith.mulf %305, %305 : vector<144x1xf32>
    %312 = arith.subf %310, %311 : vector<144x1xf32>
    %313 = vector.broadcast %305 : vector<144x1xf32> to vector<144x64xf32>
    %314 = arith.subf %297, %313 : vector<144x64xf32>
    %cst_207 = arith.constant 9.99999974E-6 : f32
    %315 = vector.broadcast %cst_207 : f32 to vector<144x1xf32>
    %316 = arith.addf %312, %315 : vector<144x1xf32>
    %317 = math.rsqrt %316 : vector<144x1xf32>
    %318 = vector.broadcast %317 : vector<144x1xf32> to vector<144x64xf32>
    %319 = arith.mulf %314, %318 : vector<144x64xf32>
    %320 = vector.broadcast %299 : vector<1x64xf32> to vector<144x64xf32>
    %321 = arith.mulf %319, %320 : vector<144x64xf32>
    %322 = vector.broadcast %301 : vector<1x64xf32> to vector<144x64xf32>
    %323 = arith.addf %321, %322 : vector<144x64xf32>
    %c0_208 = arith.constant 0 : index
    %c0_209 = arith.constant 0 : index
    %324 = vector.load %arg28[%c0_208, %c0_209] : memref<144x64xf32, #tpu.memory_space<vmem>>, vector<144x64xf32>
    tpu.vector_store %arg28[%c0_208, %c0_209], %323 {strides = array<i32>} : memref<144x64xf32, #tpu.memory_space<vmem>>, vector<144x64xf32>,
    %c2_i32 = arith.constant 2 : i32
    %325 = arith.cmpi eq, %arg0, %c2_i32 : i32
    %326 = arith.extui %325 : i1 to i32
    %c0_i32_210 = arith.constant 0 : i32
    %327 = arith.cmpi ne, %326, %c0_i32_210 : i32
    scf.if %327 {
      %c0_211 = arith.constant 0 : index
      %c0_212 = arith.constant 0 : index
      %328 = vector.load %arg23[%c0_211, %c0_212] : memref<8x64xf32, #tpu.memory_space<vmem>>, vector<8x64xf32>
      %c0_213 = arith.constant 0 : index
      %c0_214 = arith.constant 0 : index
      %329 = vector.load %arg24[%c0_213, %c0_214] : memref<8x1xf32, #tpu.memory_space<vmem>>, vector<8x1xf32>
      %330 = vector.extract_strided_slice %323 {offsets = [64, 0], sizes = [8, 64], strides = [1, 1]} : vector<144x64xf32> to vector<8x64xf32>
      %331 = arith.mulf %330, %328 : vector<8x64xf32>
      %cst_215 = arith.constant dense<0.000000e+00> : vector<8xf32>
      %332 = vector.multi_reduction <add>, %331, %cst_215 [1] : vector<8x64xf32> to vector<8xf32>
      %333 = vector.shape_cast %332 : vector<8xf32> to vector<8x1xf32>
      %334 = arith.addf %333, %329 : vector<8x1xf32>
      %c0_216 = arith.constant 0 : index
      %c0_217 = arith.constant 0 : index
      %c0_218 = arith.constant 0 : index
      %335 = vector.load %arg25[%c0_216, %c0_217, %c0_218] : memref<2x8x1xf32, #tpu.memory_space<vmem>>, vector<1x8x1xf32>
      %336 = vector.shape_cast %335 : vector<1x8x1xf32> to vector<8x1xf32>
      %337 = vector.shape_cast %334 : vector<8x1xf32> to vector<1x8x1xf32>
      tpu.vector_store %arg25[%c0_216, %c0_217, %c0_218], %337 {strides = array<i32>} : memref<2x8x1xf32, #tpu.memory_space<vmem>>, vector<1x8x1xf32>,
      %338 = vector.extract_strided_slice %323 {offsets = [136, 0], sizes = [8, 64], strides = [1, 1]} : vector<144x64xf32> to vector<8x64xf32>
      %339 = arith.mulf %338, %328 : vector<8x64xf32>
      %cst_219 = arith.constant dense<0.000000e+00> : vector<8xf32>
      %340 = vector.multi_reduction <add>, %339, %cst_219 [1] : vector<8x64xf32> to vector<8xf32>
      %341 = vector.shape_cast %340 : vector<8xf32> to vector<8x1xf32>
      %342 = arith.addf %341, %329 : vector<8x1xf32>
      %c1_220 = arith.constant 1 : index
      %c0_221 = arith.constant 0 : index
      %c0_222 = arith.constant 0 : index
      %343 = vector.load %arg25[%c1_220, %c0_221, %c0_222] : memref<2x8x1xf32, #tpu.memory_space<vmem>>, vector<1x8x1xf32>
      %344 = vector.shape_cast %343 : vector<1x8x1xf32> to vector<8x1xf32>
      %345 = vector.shape_cast %342 : vector<8x1xf32> to vector<1x8x1xf32>
      tpu.vector_store %arg25[%c1_220, %c0_221, %c0_222], %345 {strides = array<i32>} : memref<2x8x1xf32, #tpu.memory_space<vmem>>, vector<1x8x1xf32>,
    } else {
    }
    return
  }
  func.func @transform_0(%arg0: i32) -> (i32, i32) {
    %c0_i32 = arith.constant 0 : i32
    %c0_i32_0 = arith.constant 0 : i32
    %c0_i32_1 = arith.constant 0 : i32
    return %c0_i32, %c0_i32_0 : i32, i32
  }
  func.func @transform_1(%arg0: i32) -> (i32, i32) {
    %c0_i32 = arith.constant 0 : i32
    %c0_i32_0 = arith.constant 0 : i32
    %c0_i32_1 = arith.constant 0 : i32
    return %c0_i32, %c0_i32_0 : i32, i32
  }
  func.func @transform_2(%arg0: i32) -> (i32, i32) {
    %c0_i32 = arith.constant 0 : i32
    %c0_i32_0 = arith.constant 0 : i32
    %c0_i32_1 = arith.constant 0 : i32
    return %c0_i32, %c0_i32_0 : i32, i32
  }
  func.func @transform_3(%arg0: i32) -> (i32, i32, i32) {
    %c0_i32 = arith.constant 0 : i32
    %c0_i32_0 = arith.constant 0 : i32
    %c0_i32_1 = arith.constant 0 : i32
    %c0_i32_2 = arith.constant 0 : i32
    return %c0_i32, %c0_i32_0, %c0_i32_1 : i32, i32, i32
  }
  func.func @transform_4(%arg0: i32) -> (i32, i32) {
    %c0_i32 = arith.constant 0 : i32
    %c0_i32_0 = arith.constant 0 : i32
    %c0_i32_1 = arith.constant 0 : i32
    return %c0_i32, %c0_i32_0 : i32, i32
  }
  func.func @transform_5(%arg0: i32) -> (i32, i32) {
    %c0_i32 = arith.constant 0 : i32
    %c0_i32_0 = arith.constant 0 : i32
    %c0_i32_1 = arith.constant 0 : i32
    return %c0_i32, %c0_i32_0 : i32, i32
  }
  func.func @transform_6(%arg0: i32) -> (i32, i32, i32, i32) {
    %c0_i32 = arith.constant 0 : i32
    %c0_i32_0 = arith.constant 0 : i32
    %c0_i32_1 = arith.constant 0 : i32
    %c0_i32_2 = arith.constant 0 : i32
    return %arg0, %c0_i32, %c0_i32_0, %c0_i32_1 : i32, i32, i32, i32
  }
  func.func @transform_7(%arg0: i32) -> (i32, i32, i32, i32) {
    %c0_i32 = arith.constant 0 : i32
    %c0_i32_0 = arith.constant 0 : i32
    %c0_i32_1 = arith.constant 0 : i32
    %c0_i32_2 = arith.constant 0 : i32
    return %arg0, %c0_i32, %c0_i32_0, %c0_i32_1 : i32, i32, i32, i32
  }
  func.func @transform_8(%arg0: i32) -> (i32, i32, i32, i32) {
    %c0_i32 = arith.constant 0 : i32
    %c0_i32_0 = arith.constant 0 : i32
    %c0_i32_1 = arith.constant 0 : i32
    %c0_i32_2 = arith.constant 0 : i32
    return %arg0, %c0_i32, %c0_i32_0, %c0_i32_1 : i32, i32, i32, i32
  }
  func.func @transform_9(%arg0: i32) -> (i32, i32, i32, i32) {
    %c0_i32 = arith.constant 0 : i32
    %c0_i32_0 = arith.constant 0 : i32
    %c0_i32_1 = arith.constant 0 : i32
    %c0_i32_2 = arith.constant 0 : i32
    return %arg0, %c0_i32, %c0_i32_0, %c0_i32_1 : i32, i32, i32, i32
  }
  func.func @transform_10(%arg0: i32) -> (i32, i32, i32, i32) {
    %c0_i32 = arith.constant 0 : i32
    %c0_i32_0 = arith.constant 0 : i32
    %c0_i32_1 = arith.constant 0 : i32
    %c0_i32_2 = arith.constant 0 : i32
    return %arg0, %c0_i32, %c0_i32_0, %c0_i32_1 : i32, i32, i32, i32
  }
  func.func @transform_11(%arg0: i32) -> (i32, i32, i32, i32) {
    %c0_i32 = arith.constant 0 : i32
    %c0_i32_0 = arith.constant 0 : i32
    %c0_i32_1 = arith.constant 0 : i32
    %c0_i32_2 = arith.constant 0 : i32
    return %arg0, %c0_i32, %c0_i32_0, %c0_i32_1 : i32, i32, i32, i32
  }
  func.func @transform_12(%arg0: i32) -> (i32, i32, i32, i32) {
    %c0_i32 = arith.constant 0 : i32
    %c0_i32_0 = arith.constant 0 : i32
    %c0_i32_1 = arith.constant 0 : i32
    %c0_i32_2 = arith.constant 0 : i32
    return %arg0, %c0_i32, %c0_i32_0, %c0_i32_1 : i32, i32, i32, i32
  }
  func.func @transform_13(%arg0: i32) -> (i32, i32, i32) {
    %c0_i32 = arith.constant 0 : i32
    %c0_i32_0 = arith.constant 0 : i32
    %c0_i32_1 = arith.constant 0 : i32
    return %arg0, %c0_i32, %c0_i32_0 : i32, i32, i32
  }
  func.func @transform_14(%arg0: i32) -> (i32, i32, i32) {
    %c0_i32 = arith.constant 0 : i32
    %c0_i32_0 = arith.constant 0 : i32
    %c0_i32_1 = arith.constant 0 : i32
    return %arg0, %c0_i32, %c0_i32_0 : i32, i32, i32
  }
  func.func @transform_15(%arg0: i32) -> (i32, i32, i32) {
    %c0_i32 = arith.constant 0 : i32
    %c0_i32_0 = arith.constant 0 : i32
    %c0_i32_1 = arith.constant 0 : i32
    return %arg0, %c0_i32, %c0_i32_0 : i32, i32, i32
  }
  func.func @transform_16(%arg0: i32) -> (i32, i32, i32) {
    %c0_i32 = arith.constant 0 : i32
    %c0_i32_0 = arith.constant 0 : i32
    %c0_i32_1 = arith.constant 0 : i32
    return %arg0, %c0_i32, %c0_i32_0 : i32, i32, i32
  }
  func.func @transform_17(%arg0: i32) -> (i32, i32, i32) {
    %c0_i32 = arith.constant 0 : i32
    %c0_i32_0 = arith.constant 0 : i32
    %c0_i32_1 = arith.constant 0 : i32
    return %arg0, %c0_i32, %c0_i32_0 : i32, i32, i32
  }
  func.func @transform_18(%arg0: i32) -> (i32, i32, i32) {
    %c0_i32 = arith.constant 0 : i32
    %c0_i32_0 = arith.constant 0 : i32
    %c0_i32_1 = arith.constant 0 : i32
    return %arg0, %c0_i32, %c0_i32_0 : i32, i32, i32
  }
  func.func @transform_19(%arg0: i32) -> (i32, i32, i32) {
    %c0_i32 = arith.constant 0 : i32
    %c0_i32_0 = arith.constant 0 : i32
    %c0_i32_1 = arith.constant 0 : i32
    return %arg0, %c0_i32, %c0_i32_0 : i32, i32, i32
  }
  func.func @transform_20(%arg0: i32) -> (i32, i32, i32) {
    %c0_i32 = arith.constant 0 : i32
    %c0_i32_0 = arith.constant 0 : i32
    %c0_i32_1 = arith.constant 0 : i32
    return %arg0, %c0_i32, %c0_i32_0 : i32, i32, i32
  }
  func.func @transform_21(%arg0: i32) -> (i32, i32, i32) {
    %c0_i32 = arith.constant 0 : i32
    %c0_i32_0 = arith.constant 0 : i32
    %c0_i32_1 = arith.constant 0 : i32
    return %arg0, %c0_i32, %c0_i32_0 : i32, i32, i32
  }
  func.func @transform_22(%arg0: i32) -> (i32, i32) {
    %c0_i32 = arith.constant 0 : i32
    %c0_i32_0 = arith.constant 0 : i32
    %c0_i32_1 = arith.constant 0 : i32
    return %c0_i32, %c0_i32_0 : i32, i32
  }
  func.func @transform_23(%arg0: i32) -> (i32, i32) {
    %c0_i32 = arith.constant 0 : i32
    %c0_i32_0 = arith.constant 0 : i32
    %c0_i32_1 = arith.constant 0 : i32
    return %c0_i32, %c0_i32_0 : i32, i32
  }
  func.func @transform_24(%arg0: i32) -> (i32, i32, i32) {
    %c0_i32 = arith.constant 0 : i32
    %c0_i32_0 = arith.constant 0 : i32
    %c0_i32_1 = arith.constant 0 : i32
    %c0_i32_2 = arith.constant 0 : i32
    return %c0_i32, %c0_i32_0, %c0_i32_1 : i32, i32, i32
  }
  func.func @transform_25(%arg0: i32) -> (i32, i32, i32) {
    %c0_i32 = arith.constant 0 : i32
    %c0_i32_0 = arith.constant 0 : i32
    %c0_i32_1 = arith.constant 0 : i32
    %c0_i32_2 = arith.constant 0 : i32
    return %c0_i32, %c0_i32_0, %c0_i32_1 : i32, i32, i32
  }
  func.func @transform_26(%arg0: i32) -> (i32, i32, i32, i32) {
    %c0_i32 = arith.constant 0 : i32
    %c0_i32_0 = arith.constant 0 : i32
    %c0_i32_1 = arith.constant 0 : i32
    %c0_i32_2 = arith.constant 0 : i32
    return %arg0, %c0_i32, %c0_i32_0, %c0_i32_1 : i32, i32, i32, i32
  }
}

</mosaic_0001>

<bundles_post_ra>
// kernel: ctran_forward.1
= control target key start
LH: loop header
LB: loop body
LE: loop exit
PB: predicated region body
PF: predicated region fallthrough
CT: control target
= control target key end

     0   :  { %s16769_s0 = inlined_call_operand.vmem [shape: f32[128,3], index: 0, kind: input, shape index: {}]   ;;  %s16770_s1 = inlined_call_operand.vmem [shape: f32[3,64], index: 1, kind: input, shape index: {}]   ;;  %s16771_s2 = inlined_call_operand.vmem [shape: f32[1,64], index: 2, kind: input, shape index: {}]   ;;  %s16772_s3 = inlined_call_operand.vmem [shape: f32[2,8,64], index: 3, kind: input, shape index: {}]   ;;  %s16773_s4 = inlined_call_operand.vmem [shape: f32[1,64], index: 4, kind: input, shape index: {}]   ;;  %s16774_s5 = inlined_call_operand.vmem [shape: f32[1,64], index: 5, kind: input, shape index: {}]   ;;  %s16775_s6 = inlined_call_operand.vmem [shape: bf16[3,4,64,16], index: 6, kind: input, shape index: {}]   ;;  %s16776_s7 = inlined_call_operand.vmem [shape: bf16[3,4,64,16], index: 7, kind: input, shape index: {}]   ;;  %s16777_s8 = inlined_call_operand.vmem [shape: bf16[3,4,64,16], index: 8, kind: input, shape index: {}]   ;;  %s16778_s9 = inlined_call_operand.vmem [shape: bf16[3,4,16,64], index: 9, kind: input, shape index: {}]   ;;  %s16779_s10 = inlined_call_operand.vmem [shape: f32[3,4,1,16], index: 10, kind: input, shape index: {}]   ;;  %s16780_s11 = inlined_call_operand.vmem [shape: f32[3,4,1,16], index: 11, kind: input, shape index: {}]   ;;  %s16781_s12 = inlined_call_operand.vmem [shape: f32[3,4,1,16], index: 12, kind: input, shape index: {}]   ;;  %s16782_s13 = inlined_call_operand.vmem [shape: f32[3,1,64], index: 13, kind: input, shape index: {}]   ;;  %s16783_s14 = inlined_call_operand.vmem [shape: f32[3,1,64], index: 14, kind: input, shape index: {}]   ;;  %s16784_s15 = inlined_call_operand.vmem [shape: f32[3,1,64], index: 15, kind: input, shape index: {}]   ;;  %s16785_s16 = inlined_call_operand.vmem [shape: bf16[3,64,64], index: 16, kind: input, shape index: {}]   ;;  %s16786_s17 = inlined_call_operand.vmem [shape: f32[3,1,64], index: 17, kind: input, shape index: {}]   ;;  %s16787_s18 = inlined_call_operand.vmem [shape: bf16[3,64,64], index: 18, kind: input, shape index: {}]   ;;  %s16788_s19 = inlined_call_operand.vmem [shape: f32[3,1,64], index: 19, kind: input, shape index: {}]   ;;  %s16789_s20 = inlined_call_operand.vmem [shape: f32[3,1,64], index: 20, kind: input, shape index: {}]   ;;  %s16790_s21 = inlined_call_operand.vmem [shape: f32[3,1,64], index: 21, kind: input, shape index: {}]   ;;  %s16791_s22 = inlined_call_operand.vmem [shape: f32[8,64], index: 22, kind: input, shape index: {}]   ;;  %s16792_s23 = inlined_call_operand.vmem [shape: f32[8,1], index: 23, kind: input, shape index: {}]   ;;  %s16793_s24 = inlined_call_operand.vmem [shape: f32[2,8,1], index: 24, kind: output, shape index: {0}]   ;;  %s16794_s25 = inlined_call_operand.hbm [shape: f32[2,64,64], index: 25, kind: output, shape index: {1}]   ;;  %s16795_s26 = inlined_call_operand.hbm [shape: f32[3,2,72,72], index: 26, kind: output, shape index: {2}]  }
   0x1   :  { %16861 = sst [smem:[#allocation64_spill]] %s16769_s0 }
   0x2   :  { %16862 = sst [smem:[#allocation65_spill]] %s16770_s1 }
   0x3   :  { %16863 = sst [smem:[#allocation66_spill]] %s16771_s2 }
   0x4   :  { %16864 = sst [smem:[#allocation67_spill]] %s16772_s3 }
   0x5   :  { %16865 = sst [smem:[#allocation68_spill]] %s16773_s4 }
   0x6   :  { %16866 = sst [smem:[#allocation69_spill]] %s16774_s5 }
   0x7   :  { %16867 = sst [smem:[#allocation70_spill]] %s16775_s6 }
   0x8   :  { %16868 = sst [smem:[#allocation71_spill]] %s16776_s7 }
   0x9   :  { %16869 = sst [smem:[#allocation72_spill]] %s16777_s8 }
   0xa   :  { %16870 = sst [smem:[#allocation73_spill]] %s16778_s9 }
   0xb   :  { %16871 = sst [smem:[#allocation74_spill]] %s16779_s10 }
   0xc   :  { %16872 = sst [smem:[#allocation75_spill]] %s16780_s11 }
   0xd   :  { %16873 = sst [smem:[#allocation76_spill]] %s16781_s12 }
   0xe   :  { %16874 = sst [smem:[#allocation77_spill]] %s16783_s14 }
   0xf   :  { %16875 = sst [smem:[#allocation78_spill]] %s16784_s15 }
  0x10   :  { %16876 = sst [smem:[#allocation79_spill]] %s16785_s16 }
  0x11   :  { %16877 = sst [smem:[#allocation80_spill]] %s16789_s20 }
  0x12   :  { %16878 = sst [smem:[#allocation81_spill]] %s16790_s21 }
  0x13   :  { %16879 = sst [smem:[#allocation82_spill]] %s16791_s22 }
  0x14   :  { %16880 = sst [smem:[#allocation83_spill]] %s16792_s23 }
  0x15   :  { %16881 = sst [smem:[#allocation84_spill]] %s16793_s24 }
  0x16   :  { %16882 = sst [smem:[#allocation85_spill]] %s16794_s25 }
  0x17   :  { %16883 = sst [smem:[#allocation86_spill]] %s16795_s26 }
  0x18   :  { %32 = vsyncpa [#allocation4], 0 }
  0x19   :  { %33 = vsyncpa [#allocation6], 0 }
  0x1a   :  { %35 = vsyncpa [#allocation6 + $0x1], 0  ;;  %s12409_s27 = smov 0   ;;  %s12411_s3 = smov 0  }
  0x1b   :  { %s12413_s7 = smov 0   ;;  %s12415_s28 = smov 0  }
  0x1c LB: > { %16884 = sst [smem:[#allocation9_spill]] %s12253_s27  ;;  %s12430_s8 = sadd.s32 4294967295, %s12265_s28   ;;  %s12265_s28 = sphi %s12415_s28, %s17087_s28   ;;  %s12261_s7 = sphi %s12413_s7, %s17090_s7   ;;  %s12257_s3 = sphi %s12411_s3, %s17089_s3   ;;  %s12253_s27 = sphi %s12409_s27, %s17088_s27  }
  0x1d   : > { %16885 = sst [smem:[#allocation10_spill]] %s12257_s3  ;;  %s8772_s4 = sadd.s32 4294967294, %s12265_s28  }
  0x1e   : > { %16886 = sst [smem:[#allocation11_spill]] %s12261_s7  ;;  %s12434_s29 = sadd.s32 1, %s12265_s28  }
  0x1f   : > { %16887 = sst [smem:[#allocation12_spill]] %s12265_s28  ;;  %s674_s0 = sadd.s32 1, %s12261_s7 }
  0x20   : > { %16888 = sst [smem:[#allocation13_spill]] %s12430_s8  ;;  %s671_s9 = ssub.s32 %s12265_s28, %s12434_s29 }
  0x21   : > { %16889 = sst [smem:[#allocation14_spill]] %s12434_s29  ;;  %p684_p0 = scmp.ne.s32.totalorder %s12261_s7, %s12257_s3 }
  0x22   : > { %p672_p1 = scmp.eq.s32.totalorder %s671_s9, 0  ;;  %p685_p2 = scmp.eq.s32.totalorder %s12430_s8, 2 }
  0x23   : > { %p690_p3 = scmp.ne.s32.totalorder %s12257_s3, %s12253_s27  ;;  %p691_p4 = scmp.eq.s32.totalorder %s8772_s4, 2 }
  0x24   : > { %s12445_s30 = scalar_select %p672_p1, %s12261_s7, %s674_s0  }
  0x25   : > { %p12449_p5 = por %p685_p2, %p684_p0  ;;  %p12453_p6 = por %p691_p4, %p690_p3 }
  0x26   : > { %16890 = sst [smem:[#allocation15_spill]] %s12445_s30  ;;  %p8775_p7 = scmp.ge.s32.totalorder %s12265_s28, 1 }
  0x27   : > { %s16891_s2 = scalar_select %p12449_p5, 1, 0 }
  0x28   : > { %s16893_s5 = scalar_select %p12453_p6, 1, 0 }
  0x29   : > { %16892 = sst [smem:[#allocation16_spill]] %s16891_s2  ;;  %p844_p8 = scmp.lt.s32.totalorder %s12265_s28, 4 }
  0x2a   : > { %16894 = sst [smem:[#allocation17_spill]] %s16893_s5 }
  0x2b   : > { %p845_p9 = pnand %p8775_p7, %p844_p8 }
  0x2d   : > { %848 = sbr.rel (%p845_p9) target bundleno = 6308 (0x18a4), region = 116 }
  0x34   : > { %s16802_s10 = sand.u32 1, %s12257_s3   ;;  %p972_p10 = scmp.lt.s32.totalorder %s12430_s8, 2 }
  0x35   : > { %s11646_s6 = smul.u32 144, %s16802_s10  ;;  %s16895_s7 = sld [smem:[#allocation70_spill]] }
  0x36   : > { %s12464_s1 = scalar_select %p972_p10, %s12430_s8, 2 }
  0x37   : > { %s16897_s27 = sld [smem:[#allocation71_spill]]  ;;  %s16899_s3 = sld [smem:[#allocation72_spill]] }
  0x38   : > { %s9373_s4 = sshll.u32 %s12464_s1, 7  ;;  %s9376_s0 = sshll.u32 %s12464_s1, 5 }
  0x39   : > { %s16900_s22 = sld [smem:[#allocation73_spill]]  ;;  %s8784_s30 = sshll.u32 %s12464_s1, 2 }
  0x3a   : > { %s16901_s10 = sld [smem:[#allocation74_spill]]  ;;  %s16902_s11 = sld [smem:[#allocation75_spill]] }
  0x3b   : > { %s12471_s29 = scalar_lea.vmem %s16895_s7, %s9373_s4  ;;  %s16903_s12 = sld [smem:[#allocation76_spill]] }
  0x3c   : > { %16896 = sst [smem:[#allocation18_spill]] %s12471_s29  ;;  %s16906_s16 = sld [smem:[#allocation79_spill]] }
  0x3d   : > { %s12476_s28 = scalar_lea.vmem %s16897_s27, %s9373_s4  ;;  %s12481_s25 = scalar_lea.vmem %s16899_s3, %s9373_s4 }
  0x3e   : > { %16898 = sst [smem:[#allocation19_spill]] %s12476_s28  ;;  %s12528_s2 = scalar_lea.vmem %s16787_s18, %s9376_s0 }
  0x3f   : > { %s12486_s8 = scalar_lea.vmem %s16900_s22, %s9376_s0  ;;  %s1028_s4 = scalar_lea.vmem %s16788_s19, %s12464_s1 }
  0x40   : > { %s12496_s27 = scalar_lea.vmem %s16901_s10, %s8784_s30  ;;  %s12501_s26 = scalar_lea.vmem %s16902_s11, %s8784_s30 }
  0x41   : > { %s12506_s22 = scalar_lea.vmem %s16903_s12, %s8784_s30  ;;  %s1020_s11 = scalar_lea.vmem %s16786_s17, %s12464_s1 }
  0x42   : > { %s12519_s29 = scalar_lea.vmem %s16906_s16, %s9376_s0  ;;  %s16907_s21 = sld [smem:[#allocation80_spill]] }
  0x43   : > { %s16908_s16 = sld [smem:[#allocation81_spill]]  ;;  %s12542_s14 = scalar_lea.vmem [#allocation5], %s11646_s6 }
  0x44   : > { %s16909_s20 = sld [smem:[#allocation13_spill]] }
  0x48   : > { %s1031_s12 = scalar_lea.vmem %s16907_s21, %s12464_s1 }
  0x49   : > { %s1034_s15 = scalar_lea.vmem %s16908_s16, %s12464_s1 }
  0x4a   : > { %p8791_p11 = scmp.ne.s32.totalorder %s16909_s20, 0 }
  0x4b   : > { %s16910_s3 = sld [smem:[#allocation65_spill]] (!%p8791_p11)  ;;  %vm1113_vm0 = vcmask (!%p8791_p11), 1042432   ;;  %s16911_s24 = sld [smem:[#allocation64_spill]] (!%p8791_p11)  ;;  %vm1064_vm1 = vcmask (!%p8791_p11), 23552   ;;  %vm1262_vm2 = vcmask (!%p8791_p11), 523264  }
  0x4c   : > { %1039 = sbr.rel (%p8791_p11) target bundleno = 540 (0x21c), region = 120  ;;  %s16912_s6 = sld [smem:[#allocation67_spill]] (!%p8791_p11) }
  0x4d   : > { %s16913_s23 = sld [smem:[#allocation68_spill]] (!%p8791_p11)  ;;  %s16914_s16 = sld [smem:[#allocation69_spill]] (!%p8791_p11) }
  0x4e   : > { %s16915_s10 = sld [smem:[#allocation66_spill]] (!%p8791_p11) }
  0x51   : > { %v1056_v0 = vld [vmem:[%s16910_s3] sm:$0x7] (!%p8791_p11)  ;;  %v1041_v3 = vld [vmem:[%s16911_s24 + $0x8] sm:$0xff] (!%p8791_p11)  ;;  %v1042_v5 = vld [vmem:[%s16911_s24 + $0x10] sm:$0xff] (!%p8791_p11) }
  0x52   : > { %v1040_v1 = vld [vmem:[%s16911_s24] sm:$0xff] (!%p8791_p11)  ;;  %9906 = vmatprep.subr.msk.mxu0 (!%p8791_p11), %vm1113_vm0, %v1056_v0  ;;  %11644 = vmatprep.subr.msk.mxu1 (!%p8791_p11), %vm1113_vm0, %v1056_v0  ;;  %v1049_v4 = vld [vmem:[%s16911_s24 + $0x48] sm:$0xff] (!%p8791_p11)  ;;  %v1050_v6 = vld [vmem:[%s16911_s24 + $0x50] sm:$0xff] (!%p8791_p11) }
  0x53   : > { %v1048_v2 = vld [vmem:[%s16911_s24 + $0x40] sm:$0xff]  ;;  %9907 = vmatpush3.msk.msra.mxu0 %vm1113_vm0, %v1056_v0  ;;  %11645 = vmatpush3.msk.msra.mxu1 %vm1113_vm0, %v1056_v0  ;;  %v1043_v7 = vld [vmem:[%s16911_s24 + $0x18] sm:$0xff]  ;;  %v1045_v12 = vld [vmem:[%s16911_s24 + $0x28] sm:$0xff] }
  0x54   : > { %9908 = vmatprep.mubr.msk.f32.mxu0 %vm1064_vm1, %v1040_v1  ;;  %9920 = vmatprep.mubr.msk.f32.mxu1 %vm1064_vm1, %v1048_v2  ;;  %v1051_v8 = vld [vmem:[%s16911_s24 + $0x58] sm:$0xff]  ;;  %v1279_v9 = vld [vmem:[%s16912_s6] sm:$0xff]  ;;  %v1053_v13 = vld [vmem:[%s16911_s24 + $0x68] sm:$0xff] }
  0x55   : > { %9909 = vmatmul.mubr.msk.f32.vlgmr.msra.gmra.mrb[0].mxu0 %vm1064_vm1, %v1041_v3  ;;  %9921 = vmatmul.mubr.msk.f32.vlgmr.msra.gmra.mrb[0].mxu1 %vm1064_vm1, %v1049_v4  ;;  %v1044_v10 = vld [vmem:[%s16911_s24 + $0x20] sm:$0xff]  ;;  %1280 = vst.msk [vmem:[#allocation2 + $0x40] sm:$0xff] %vm1262_vm2, %v1279_v9  ;;  %v1046_v14 = vld [vmem:[%s16911_s24 + $0x30] sm:$0xff]  ;;  %v1047_v16 = vld [vmem:[%s16911_s24 + $0x38] sm:$0xff] }
  0x56   : > { %9911 = vmatprep.mubr.msk.f32.mxu0 %vm1064_vm1, %v1042_v5  ;;  %9923 = vmatprep.mubr.msk.f32.mxu1 %vm1064_vm1, %v1050_v6  ;;  %v1052_v11 = vld [vmem:[%s16911_s24 + $0x60] sm:$0xff]  ;;  %v1054_v15 = vld [vmem:[%s16911_s24 + $0x70] sm:$0xff]  ;;  %v1055_v17 = vld [vmem:[%s16911_s24 + $0x78] sm:$0xff] }
  0x57   : > { %v8810_v22 = vld [vmem:[%s16912_s6 + $0x8] sm:$0xff]  ;;  %v12629_v34 = vld [vmem:[%s16913_s23] ss:$0 sm:$0xff] }
  0x58   : > { %1300 = vst.msk [vmem:[#allocation2 + $0x88] sm:$0xff] %vm1262_vm2, %v8810_v22  ;;  %v12634_v36 = vld [vmem:[%s16914_s16] ss:$0 sm:$0xff] }
  0x59   : > { %9912 = vmatmul.mubr.msk.f32.gmra.mrb[2].mxu0 %vm1064_vm1, %v1043_v7  ;;  %9924 = vmatmul.mubr.msk.f32.gmra.mrb[2].mxu1 %vm1064_vm1, %v1051_v8  ;;  %v12642_v39 = vld [vmem:[%s16915_s10] ss:$0 sm:$0xff] }
  0x5a   : > { %9914 = vmatprep.mubr.msk.f32.mxu0 %vm1064_vm1, %v1044_v10  ;;  %9926 = vmatprep.mubr.msk.f32.mxu1 %vm1064_vm1, %v1052_v11 }
  0x5c   : > { %v1309_v18 = vld [vmem:[#allocation2 + $0x40] sm:$0xff] }
  0x5d   : > { %9915 = vmatmul.mubr.msk.f32.gmra.mrb[4].mxu0 %vm1064_vm1, %v1045_v12  ;;  %9927 = vmatmul.mubr.msk.f32.gmra.mrb[4].mxu1 %vm1064_vm1, %v1053_v13  ;;  %v1345_v19 = vsel %vm1262_vm2, %v1309_v18, 0.0  ;;  %v1402_v20 = vmul.f32 %v1309_v18, %v1309_v18 }
  0x5e   : > { %9917 = vmatprep.mubr.msk.f32.mxu0 %vm1064_vm1, %v1046_v14  ;;  %9929 = vmatprep.mubr.msk.f32.mxu1 %vm1064_vm1, %v1054_v15 }
  0x5f   : > { %1346 = vadd.xlane.f32.xlu0 %v1345_v19  ;;  %v1436_v21 = vsel %vm1262_vm2, %v1402_v20, 0.0  ;;  %v12622_v23 = vld [vmem:[#allocation2 + $0x88] sm:$0xff] }
  0x60   : > { %v1372_v24 = vsel %vm1262_vm2, %v12622_v23, 0.0 }
  0x61   : > { %9918 = vmatmul.mubr.msk.f32.gmra.mrb[6].mxu0 %vm1064_vm1, %v1047_v16  ;;  %9930 = vmatmul.mubr.msk.f32.gmra.mrb[6].mxu1 %vm1064_vm1, %v1055_v17 }
  0x62   : > { %1373 = vadd.xlane.f32.xlu1 %v1372_v24 }
  0x63   : > { %1437 = vadd.xlane.f32.xlu0 %v1436_v21 }
  0xec   : > { %v1347_v25 = vpop.xlane.xlu0 %1346 }
  0xed   : > { %v1384_v26 = vmul.f32 0.015625, %v1347_v25 }
  0xef   : > { %v1492_v27 = vmul.f32 %v1384_v26, %v1384_v26  ;;  %v1528_v32 = vsub.f32 %v1309_v18, %v1384_v26 }
  0xf0   : > { %v1438_v28 = vpop.xlane.xlu0 %1437 }
  0xf1   : > { %v1474_v29 = vmul.f32 0.015625, %v1438_v28 }
  0xf3   : > { %v1510_v30 = vsub.f32 %v1474_v29, %v1492_v27 }
  0xf5   : > { %v1546_v31 = vadd.f32 1e-05, %v1510_v30 }
  0xf7   : > { %11699 = vrsqrt.f32 %v1546_v31 }
 0x101   : > { %v11700_v33 = vpop.eup %11699 }
 0x102   : > { %v1582_v35 = vmul.f32 %v11700_v33, %v1528_v32 }
 0x104   : > { %v1606_v37 = vmul.f32 %v12629_v34, %v1582_v35 }
 0x106   : > { %v1630_v38 = vadd.f32 %v12634_v36, %v1606_v37 }
 0x108   : > { %1648 = vst.msk [vmem:[#allocation2 + $0x40] sm:$0xff] %vm1262_vm2, %v1630_v38 }
 0x128   : > { %v9910_v40 = vpop.f32.mrb[0].mxu0  ;;  %v9922_v41 = vpop.f32.mrb[0].mxu1 }
 0x129   : > { %v1189_v42 = vadd.f32 %v9910_v40, %v12642_v39  ;;  %v1229_v43 = vadd.f32 %v9922_v41, %v12642_v39  ;;  %v1223_v44 = vpop.f32.mrb[1].mxu1  ;;  %v1183_v45 = vpop.f32.mrb[1].mxu0 }
 0x12a   : > { %v1224_v46 = vadd.f32 %v12642_v39, %v1223_v44  ;;  %v1184_v47 = vadd.f32 %v12642_v39, %v1183_v45 }
 0x12b   : > { %1264 = vst.msk [vmem:[#allocation3 + $0x8] sm:$0xff] %vm1262_vm2, %v1189_v42  ;;  %1272 = vst.msk [vmem:[#allocation2 + $0x8] sm:$0xff] %vm1262_vm2, %v1189_v42 }
 0x12c   : > { %1283 = vst.msk [vmem:[#allocation3 + $0x48] sm:$0xff] %vm1262_vm2, %v1229_v43  ;;  %1291 = vst.msk [vmem:[#allocation2 + $0x50] sm:$0xff] %vm1262_vm2, %v1229_v43  ;;  %v9913_v48 = vpop.f32.mrb[2].mxu0  ;;  %v9925_v49 = vpop.f32.mrb[2].mxu1 }
 0x12d   : > { %1282 = vst.msk [vmem:[#allocation3 + $0x40] sm:$0xff] %vm1262_vm2, %v1224_v46  ;;  %1290 = vst.msk [vmem:[#allocation2 + $0x48] sm:$0xff] %vm1262_vm2, %v1224_v46  ;;  %v1199_v50 = vadd.f32 %v9913_v48, %v12642_v39  ;;  %v1193_v51 = vpop.f32.mrb[3].mxu0  ;;  %v1239_v52 = vadd.f32 %v9925_v49, %v12642_v39  ;;  %v1233_v53 = vpop.f32.mrb[3].mxu1 }
 0x12e   : > { %1263 = vst.msk [vmem:[#allocation3] sm:$0xff] %vm1262_vm2, %v1184_v47  ;;  %1271 = vst.msk [vmem:[#allocation2] sm:$0xff] %vm1262_vm2, %v1184_v47  ;;  %v1194_v54 = vadd.f32 %v12642_v39, %v1193_v51  ;;  %v1234_v55 = vadd.f32 %v12642_v39, %v1233_v53 }
 0x12f   : > { %1266 = vst.msk [vmem:[#allocation3 + $0x18] sm:$0xff] %vm1262_vm2, %v1199_v50  ;;  %1274 = vst.msk [vmem:[#allocation2 + $0x18] sm:$0xff] %vm1262_vm2, %v1199_v50 }
 0x130   : > { %1285 = vst.msk [vmem:[#allocation3 + $0x58] sm:$0xff] %vm1262_vm2, %v1239_v52  ;;  %1293 = vst.msk [vmem:[#allocation2 + $0x60] sm:$0xff] %vm1262_vm2, %v1239_v52  ;;  %v9916_v56 = vpop.f32.mrb[4].mxu0  ;;  %v9928_v57 = vpop.f32.mrb[4].mxu1 }
 0x131   : > { %1265 = vst.msk [vmem:[#allocation3 + $0x10] sm:$0xff] %vm1262_vm2, %v1194_v54  ;;  %1273 = vst.msk [vmem:[#allocation2 + $0x10] sm:$0xff] %vm1262_vm2, %v1194_v54  ;;  %v1209_v58 = vadd.f32 %v9916_v56, %v12642_v39  ;;  %v1249_v59 = vadd.f32 %v9928_v57, %v12642_v39  ;;  %v1203_v60 = vpop.f32.mrb[5].mxu0  ;;  %v1243_v61 = vpop.f32.mrb[5].mxu1 }
 0x132   : > { %1284 = vst.msk [vmem:[#allocation3 + $0x50] sm:$0xff] %vm1262_vm2, %v1234_v55  ;;  %1292 = vst.msk [vmem:[#allocation2 + $0x58] sm:$0xff] %vm1262_vm2, %v1234_v55  ;;  %v12670_v62 = vld [vmem:[#allocation2 + $0x8] sm:$0xff]  ;;  %v1204_v63 = vadd.f32 %v12642_v39, %v1203_v60  ;;  %v1244_v0 = vadd.f32 %v12642_v39, %v1243_v61 }
 0x133   : > { %v1324_v1 = vsel %vm1262_vm2, %v12670_v62, 0.0  ;;  %v1395_v3 = vmul.f32 %v12670_v62, %v12670_v62  ;;  %1268 = vst.msk [vmem:[#allocation3 + $0x28] sm:$0xff] %vm1262_vm2, %v1209_v58  ;;  %1276 = vst.msk [vmem:[#allocation2 + $0x28] sm:$0xff] %vm1262_vm2, %v1209_v58  ;;  %v12686_v5 = vld [vmem:[#allocation2 + $0x50] sm:$0xff] }
 0x134   : > { %v12676_v2 = vld [vmem:[#allocation2 + $0x48] sm:$0xff]  ;;  %1287 = vst.msk [vmem:[#allocation3 + $0x68] sm:$0xff] %vm1262_vm2, %v1249_v59  ;;  %1295 = vst.msk [vmem:[#allocation2 + $0x70] sm:$0xff] %vm1262_vm2, %v1249_v59  ;;  %1325 = vadd.xlane.f32.xlu0 %v1324_v1  ;;  %v9919_v6 = vpop.f32.mrb[6].mxu0  ;;  %v9931_v7 = vpop.f32.mrb[6].mxu1  ;;  %v1351_v15 = vsel %vm1262_vm2, %v12686_v5, 0.0  ;;  %v1404_v19 = vmul.f32 %v12686_v5, %v12686_v5 }
 0x135   : > { %v1348_v4 = vsel %vm1262_vm2, %v12676_v2, 0.0  ;;  %1267 = vst.msk [vmem:[#allocation3 + $0x20] sm:$0xff] %vm1262_vm2, %v1204_v63  ;;  %1275 = vst.msk [vmem:[#allocation2 + $0x20] sm:$0xff] %vm1262_vm2, %v1204_v63  ;;  %v1219_v8 = vadd.f32 %v9919_v6, %v12642_v39  ;;  %v1259_v9 = vadd.f32 %v9931_v7, %v12642_v39  ;;  %v1213_v10 = vpop.f32.mrb[7].mxu0  ;;  %v1253_v11 = vpop.f32.mrb[7].mxu1  ;;  %v1415_v12 = vsel %vm1262_vm2, %v1395_v3, 0.0 }
 0x136   : > { %1286 = vst.msk [vmem:[#allocation3 + $0x60] sm:$0xff] %vm1262_vm2, %v1244_v0  ;;  %1294 = vst.msk [vmem:[#allocation2 + $0x68] sm:$0xff] %vm1262_vm2, %v1244_v0  ;;  %1349 = vadd.xlane.f32.xlu1 %v1348_v4  ;;  %v1214_v13 = vadd.f32 %v12642_v39, %v1213_v10  ;;  %v1254_v14 = vadd.f32 %v12642_v39, %v1253_v11  ;;  %v12703_v16 = vld [vmem:[#allocation2] sm:$0xff]  ;;  %v1403_v17 = vmul.f32 %v12676_v2, %v12676_v2  ;;  %v12715_v20 = vld [vmem:[#allocation2 + $0x18] sm:$0xff] }
 0x137   : > { %1270 = vst.msk [vmem:[#allocation3 + $0x38] sm:$0xff] %vm1262_vm2, %v1219_v8  ;;  %1278 = vst.msk [vmem:[#allocation2 + $0x38] sm:$0xff] %vm1262_vm2, %v1219_v8  ;;  %v1321_v18 = vsel %vm1262_vm2, %v12703_v16, 0.0  ;;  %v1330_v22 = vsel %vm1262_vm2, %v12715_v20, 0.0  ;;  %v1442_v24 = vsel %vm1262_vm2, %v1404_v19, 0.0  ;;  %v1394_v25 = vmul.f32 %v12703_v16, %v12703_v16  ;;  %v12725_v27 = vld [vmem:[#allocation2 + $0x60] sm:$0xff] }
 0x138   : > { %1289 = vst.msk [vmem:[#allocation3 + $0x78] sm:$0xff] %vm1262_vm2, %v1259_v9  ;;  %1297 = vst.msk [vmem:[#allocation2 + $0x80] sm:$0xff] %vm1262_vm2, %v1259_v9  ;;  %1352 = vadd.xlane.f32.xlu0 %v1351_v15  ;;  %v1439_v21 = vsel %vm1262_vm2, %v1403_v17, 0.0  ;;  %v12723_v26 = vld [vmem:[#allocation2 + $0x10] sm:$0xff]  ;;  %v1357_v31 = vsel %vm1262_vm2, %v12725_v27, 0.0  ;;  %v1406_v33 = vmul.f32 %v12725_v27, %v12725_v27  ;;  %v1397_v35 = vmul.f32 %v12715_v20, %v12715_v20  ;;  %v12807_v17 = vpop.xlane.xlu1 %1373 }
 0x139   : > { %1269 = vst.msk [vmem:[#allocation3 + $0x30] sm:$0xff] %vm1262_vm2, %v1214_v13  ;;  %1277 = vst.msk [vmem:[#allocation2 + $0x30] sm:$0xff] %vm1262_vm2, %v1214_v13  ;;  %v1412_v28 = vsel %vm1262_vm2, %v1394_v25, 0.0  ;;  %v12728_v29 = vld [vmem:[#allocation2 + $0x58] sm:$0xff]  ;;  %v1327_v30 = vsel %vm1262_vm2, %v12723_v26, 0.0  ;;  %v1396_v38 = vmul.f32 %v12723_v26, %v12723_v26 }
 0x13a   : > { %1288 = vst.msk [vmem:[#allocation3 + $0x70] sm:$0xff] %vm1262_vm2, %v1254_v14  ;;  %1296 = vst.msk [vmem:[#allocation2 + $0x78] sm:$0xff] %vm1262_vm2, %v1254_v14  ;;  %1416 = vadd.xlane.f32.xlu1 %v1415_v12  ;;  %v1354_v32 = vsel %vm1262_vm2, %v12728_v29, 0.0  ;;  %v1448_v37 = vsel %vm1262_vm2, %v1406_v33, 0.0  ;;  %v1421_v39 = vsel %vm1262_vm2, %v1397_v35, 0.0  ;;  %v1405_v40 = vmul.f32 %v12728_v29, %v12728_v29  ;;  %v12749_v43 = vld [vmem:[#allocation2 + $0x28] sm:$0xff] }
 0x13b   : > { %v12746_v41 = vld [vmem:[#allocation2 + $0x70] sm:$0xff]  ;;  %v1418_v42 = vsel %vm1262_vm2, %v1396_v38, 0.0  ;;  %v1336_v46 = vsel %vm1262_vm2, %v12749_v43, 0.0  ;;  %v1399_v52 = vmul.f32 %v12749_v43, %v12749_v43  ;;  %v1411_v12 = vmul.f32 %v12622_v23, %v12622_v23 }
 0x13c   : > { %1322 = vadd.xlane.f32.xlu0 %v1321_v18  ;;  %v1445_v44 = vsel %vm1262_vm2, %v1405_v40, 0.0  ;;  %v1363_v45 = vsel %vm1262_vm2, %v12746_v41, 0.0  ;;  %v12758_v48 = vld [vmem:[#allocation2 + $0x20] sm:$0xff]  ;;  %v1408_v51 = vmul.f32 %v12746_v41, %v12746_v41 }
 0x13d   : > { %v12756_v47 = vld [vmem:[#allocation2 + $0x68] sm:$0xff]  ;;  %v1333_v50 = vsel %vm1262_vm2, %v12758_v48, 0.0  ;;  %v1398_v54 = vmul.f32 %v12758_v48, %v12758_v48  ;;  %v1427_v55 = vsel %vm1262_vm2, %v1399_v52, 0.0  ;;  %v1463_v15 = vsel %vm1262_vm2, %v1411_v12, 0.0 }
 0x13e   : > { %1440 = vadd.xlane.f32.xlu1 %v1439_v21  ;;  %v1360_v49 = vsel %vm1262_vm2, %v12756_v47, 0.0  ;;  %v1454_v53 = vsel %vm1262_vm2, %v1408_v51, 0.0  ;;  %v1407_v56 = vmul.f32 %v12756_v47, %v12756_v47  ;;  %v12777_v59 = vld [vmem:[#allocation2 + $0x38] sm:$0xff] }
 0x13f   : > { %v12774_v57 = vld [vmem:[#allocation2 + $0x80] sm:$0xff]  ;;  %v1424_v58 = vsel %vm1262_vm2, %v1398_v54, 0.0  ;;  %v1342_v63 = vsel %vm1262_vm2, %v12777_v59, 0.0  ;;  %v1401_v7 = vmul.f32 %v12777_v59, %v12777_v59 }
 0x140   : > { %1443 = vadd.xlane.f32.xlu0 %v1442_v24  ;;  %v1451_v60 = vsel %vm1262_vm2, %v1407_v56, 0.0  ;;  %v1369_v61 = vsel %vm1262_vm2, %v12774_v57, 0.0  ;;  %v12786_v1 = vld [vmem:[#allocation2 + $0x30] sm:$0xff]  ;;  %v1410_v9 = vmul.f32 %v12774_v57, %v12774_v57 }
 0x141   : > { %v12784_v0 = vld [vmem:[#allocation2 + $0x78] sm:$0xff]  ;;  %v1339_v4 = vsel %vm1262_vm2, %v12786_v1, 0.0  ;;  %v1400_v6 = vmul.f32 %v12786_v1, %v12786_v1  ;;  %v1433_v10 = vsel %vm1262_vm2, %v1401_v7, 0.0 }
 0x142   : > { %1331 = vadd.xlane.f32.xlu1 %v1330_v22  ;;  %v1366_v3 = vsel %vm1262_vm2, %v12784_v0, 0.0  ;;  %v1409_v11 = vmul.f32 %v12784_v0, %v12784_v0  ;;  %v1460_v13 = vsel %vm1262_vm2, %v1410_v9, 0.0 }
 0x143   : > { %v1430_v8 = vsel %vm1262_vm2, %v1400_v6, 0.0 }
 0x144   : > { %1413 = vadd.xlane.f32.xlu0 %v1412_v28  ;;  %v1457_v14 = vsel %vm1262_vm2, %v1409_v11, 0.0 }
 0x146   : > { %1328 = vadd.xlane.f32.xlu1 %v1327_v30 }
 0x148   : > { %1358 = vadd.xlane.f32.xlu0 %v1357_v31 }
 0x14a   : > { %1355 = vadd.xlane.f32.xlu1 %v1354_v32 }
 0x14c   : > { %1449 = vadd.xlane.f32.xlu0 %v1448_v37 }
 0x14e   : > { %1422 = vadd.xlane.f32.xlu1 %v1421_v39 }
 0x150   : > { %1419 = vadd.xlane.f32.xlu0 %v1418_v42 }
 0x152   : > { %1446 = vadd.xlane.f32.xlu1 %v1445_v44 }
 0x154   : > { %1364 = vadd.xlane.f32.xlu0 %v1363_v45 }
 0x156   : > { %1337 = vadd.xlane.f32.xlu1 %v1336_v46 }
 0x158   : > { %1334 = vadd.xlane.f32.xlu0 %v1333_v50 }
 0x15a   : > { %1361 = vadd.xlane.f32.xlu1 %v1360_v49 }
 0x15c   : > { %1455 = vadd.xlane.f32.xlu0 %v1454_v53 }
 0x15e   : > { %1428 = vadd.xlane.f32.xlu1 %v1427_v55 }
 0x160   : > { %1425 = vadd.xlane.f32.xlu0 %v1424_v58 }
 0x162   : > { %1452 = vadd.xlane.f32.xlu1 %v1451_v60 }
 0x164   : > { %1370 = vadd.xlane.f32.xlu0 %v1369_v61 }
 0x166   : > { %1343 = vadd.xlane.f32.xlu1 %v1342_v63 }
 0x168   : > { %1340 = vadd.xlane.f32.xlu0 %v1339_v4 }
 0x16a   : > { %1367 = vadd.xlane.f32.xlu1 %v1366_v3 }
 0x16c   : > { %1431 = vadd.xlane.f32.xlu0 %v1430_v8 }
 0x16e   : > { %1434 = vadd.xlane.f32.xlu1 %v1433_v10 }
 0x170   : > { %1461 = vadd.xlane.f32.xlu0 %v1460_v13 }
 0x172   : > { %1458 = vadd.xlane.f32.xlu1 %v1457_v14 }
 0x176   : > { %1464 = vadd.xlane.f32.xlu1 %v1463_v15 }
 0x1c1   : > { %v1326_v18 = vpop.xlane.xlu0 %1325 }
 0x1c2   : > { %v1377_v21 = vmul.f32 0.015625, %v1326_v18 }
 0x1c3   : > { %v1350_v19 = vpop.xlane.xlu1 %1349 }
 0x1c4   : > { %v1485_v22 = vmul.f32 %v1377_v21, %v1377_v21  ;;  %v1385_v28 = vmul.f32 0.015625, %v1350_v19  ;;  %v1521_v61 = vsub.f32 %v12670_v62, %v1377_v21 }
 0x1c5   : > { %v1353_v24 = vpop.xlane.xlu0 %1352 }
 0x1c6   : > { %v1386_v33 = vmul.f32 0.015625, %v1353_v24  ;;  %v1493_v37 = vmul.f32 %v1385_v28, %v1385_v28  ;;  %v1529_v9 = vsub.f32 %v12676_v2, %v1385_v28 }
 0x1c7   : > { %v1417_v25 = vpop.xlane.xlu1 %1416 }
 0x1c8   : > { %v1467_v30 = vmul.f32 0.015625, %v1417_v25  ;;  %v1494_v44 = vmul.f32 %v1386_v33, %v1386_v33  ;;  %v1530_v25 = vsub.f32 %v12686_v5, %v1386_v33 }
 0x1c9   : > { %v1323_v32 = vpop.xlane.xlu0 %1322 }
 0x1ca   : > { %v1503_v31 = vsub.f32 %v1467_v30, %v1485_v22  ;;  %v12809_v45 = vmul.f32 0.015625, %v1323_v32 }
 0x1cb   : > { %v1441_v35 = vpop.xlane.xlu1 %1440 }
 0x1cc   : > { %v1539_v38 = vadd.f32 1e-05, %v1503_v31  ;;  %v1475_v39 = vmul.f32 0.015625, %v1441_v35  ;;  %v1484_v53 = vmul.f32 %v12809_v45, %v12809_v45 }
 0x1cd   : > { %v1444_v42 = vpop.xlane.xlu0 %1443 }
 0x1ce   : > { %11701 = vrsqrt.f32 %v1539_v38  ;;  %v1511_v40 = vsub.f32 %v1475_v39, %v1493_v37  ;;  %v1476_v46 = vmul.f32 0.015625, %v1444_v42 }
 0x1cf   : > { %v1332_v49 = vpop.xlane.xlu1 %1331 }
 0x1d0   : > { %v1547_v50 = vadd.f32 1e-05, %v1511_v40  ;;  %v1512_v51 = vsub.f32 %v1476_v46, %v1494_v44  ;;  %v12816_v7 = vmul.f32 0.015625, %v1332_v49  ;;  %v1520_v49 = vsub.f32 %v12703_v16, %v12809_v45 }
 0x1d1   : > { %v1414_v52 = vpop.xlane.xlu0 %1413 }
 0x1d2   : > { %11703 = vrsqrt.f32 %v1547_v50  ;;  %v1548_v54 = vadd.f32 1e-05, %v1512_v51  ;;  %v1466_v55 = vmul.f32 0.015625, %v1414_v52  ;;  %v1487_v18 = vmul.f32 %v12816_v7, %v12816_v7 }
 0x1d3   : > { %v1329_v56 = vpop.xlane.xlu1 %1328 }
 0x1d4   : > { %11705 = vrsqrt.f32 %v1548_v54  ;;  %v1502_v58 = vsub.f32 %v1466_v55, %v1484_v53  ;;  %v12820_v12 = vmul.f32 0.015625, %v1329_v56 }
 0x1d5   : > { %v1359_v60 = vpop.xlane.xlu0 %1358 }
 0x1d6   : > { %v1538_v63 = vadd.f32 1e-05, %v1502_v58  ;;  %v12814_v3 = vmul.f32 0.015625, %v1359_v60  ;;  %v1486_v35 = vmul.f32 %v12820_v12, %v12820_v12 }
 0x1d7   : > { %v1356_v4 = vpop.xlane.xlu1 %1355 }
 0x1d8   : > { %v11702_v6 = vpop.eup %11701  ;;  %11707 = vrsqrt.f32 %v1538_v63  ;;  %v1496_v13 = vmul.f32 %v12814_v3, %v12814_v3  ;;  %v12826_v19 = vmul.f32 0.015625, %v1356_v4 }
 0x1d9   : > { %v1575_v8 = vmul.f32 %v11702_v6, %v1521_v61  ;;  %v1450_v10 = vpop.xlane.xlu0 %1449 }
 0x1da   : > { %v1478_v62 = vmul.f32 0.015625, %v1450_v10  ;;  %v1495_v42 = vmul.f32 %v12826_v19, %v12826_v19 }
 0x1db   : > { %v1599_v11 = vmul.f32 %v12629_v34, %v1575_v8  ;;  %v1423_v14 = vpop.xlane.xlu1 %1422  ;;  %v1532_v8 = vsub.f32 %v12725_v27, %v12814_v3  ;;  %v1522_v3 = vsub.f32 %v12723_v26, %v12820_v12 }
 0x1dc   : > { %v11704_v15 = vpop.eup %11703  ;;  %v1469_v21 = vmul.f32 0.015625, %v1423_v14  ;;  %v1514_v24 = vsub.f32 %v1478_v62, %v1496_v13  ;;  %v1523_v13 = vsub.f32 %v12715_v20, %v12816_v7  ;;  %v1531_v20 = vsub.f32 %v12728_v29, %v12826_v19 }
 0x1dd   : > { %v1623_v22 = vadd.f32 %v12634_v36, %v1599_v11  ;;  %v1583_v2 = vmul.f32 %v11704_v15, %v1529_v9  ;;  %v1420_v30 = vpop.xlane.xlu0 %1419 }
 0x1de   : > { %v1505_v28 = vsub.f32 %v1469_v21, %v1487_v18  ;;  %v11706_v31 = vpop.eup %11705  ;;  %v1550_v37 = vadd.f32 1e-05, %v1514_v24  ;;  %v1468_v38 = vmul.f32 0.015625, %v1420_v30 }
 0x1df   : > { %1641 = vst.msk [vmem:[#allocation2 + $0x8] sm:$0xff] %vm1262_vm2, %v1623_v22  ;;  %v1607_v32 = vmul.f32 %v12629_v34, %v1583_v2  ;;  %v1447_v39 = vpop.xlane.xlu1 %1446  ;;  %v1584_v40 = vmul.f32 %v11706_v31, %v1530_v25 }
 0x1e0   : > { %v1541_v44 = vadd.f32 1e-05, %v1505_v28  ;;  %v1477_v46 = vmul.f32 0.015625, %v1447_v39  ;;  %11709 = vrsqrt.f32 %v1550_v37  ;;  %v1504_v33 = vsub.f32 %v1468_v38, %v1486_v35 }
 0x1e1   : > { %v1631_v5 = vadd.f32 %v12634_v36, %v1607_v32  ;;  %v1608_v50 = vmul.f32 %v12629_v34, %v1584_v40  ;;  %v1365_v52 = vpop.xlane.xlu0 %1364 }
 0x1e2   : > { %11711 = vrsqrt.f32 %v1541_v44  ;;  %v1513_v51 = vsub.f32 %v1477_v46, %v1495_v42  ;;  %v11708_v53 = vpop.eup %11707  ;;  %v1540_v54 = vadd.f32 1e-05, %v1504_v33  ;;  %v12847_v6 = vmul.f32 0.015625, %v1365_v52 }
 0x1e3   : > { %1649 = vst.msk [vmem:[#allocation2 + $0x48] sm:$0xff] %vm1262_vm2, %v1631_v5  ;;  %v1338_v55 = vpop.xlane.xlu1 %1337  ;;  %v1632_v56 = vadd.f32 %v12634_v36, %v1608_v50  ;;  %v1574_v58 = vmul.f32 %v11708_v53, %v1520_v49 }
 0x1e4   : > { %v1549_v60 = vadd.f32 1e-05, %v1513_v51  ;;  %11713 = vrsqrt.f32 %v1540_v54  ;;  %v12845_v4 = vmul.f32 0.015625, %v1338_v55  ;;  %v1498_v62 = vmul.f32 %v12847_v6, %v12847_v6 }
 0x1e5   : > { %1650 = vst.msk [vmem:[#allocation2 + $0x50] sm:$0xff] %vm1262_vm2, %v1632_v56  ;;  %v1598_v61 = vmul.f32 %v12629_v34, %v1574_v58  ;;  %v1335_v16 = vpop.xlane.xlu0 %1334 }
 0x1e6   : > { %11715 = vrsqrt.f32 %v1549_v60  ;;  %v12852_v9 = vmul.f32 0.015625, %v1335_v16  ;;  %v1489_v2 = vmul.f32 %v12845_v4, %v12845_v4 }
 0x1e7   : > { %v1362_v45 = vpop.xlane.xlu1 %1361  ;;  %v1622_v63 = vadd.f32 %v12634_v36, %v1598_v61 }
 0x1e8   : > { %v12858_v14 = vmul.f32 0.015625, %v1362_v45  ;;  %v1488_v28 = vmul.f32 %v12852_v9, %v12852_v9  ;;  %v1534_v45 = vsub.f32 %v12746_v41, %v12847_v6  ;;  %v12897_v41 = vmul.f32 0.015625, %v12807_v17 }
 0x1e9   : > { %1640 = vst.msk [vmem:[#allocation2] sm:$0xff] %vm1262_vm2, %v1622_v63  ;;  %v1456_v10 = vpop.xlane.xlu0 %1455 }
 0x1ea   : > { %v11710_v11 = vpop.eup %11709  ;;  %v1480_v15 = vmul.f32 0.015625, %v1456_v10  ;;  %v1497_v37 = vmul.f32 %v12858_v14, %v12858_v14  ;;  %v1525_v10 = vsub.f32 %v12749_v43, %v12845_v4  ;;  %v1524_v43 = vsub.f32 %v12758_v48, %v12852_v9 }
 0x1eb   : > { %v1429_v18 = vpop.xlane.xlu1 %1428  ;;  %v1586_v22 = vmul.f32 %v11710_v11, %v1532_v8 }
 0x1ec   : > { %v11712_v21 = vpop.eup %11711  ;;  %v1471_v27 = vmul.f32 0.015625, %v1429_v18  ;;  %v1516_v25 = vsub.f32 %v1480_v15, %v1498_v62 }
 0x1ed   : > { %v1577_v24 = vmul.f32 %v11712_v21, %v1523_v13  ;;  %v1610_v7 = vmul.f32 %v12629_v34, %v1586_v22  ;;  %v1426_v31 = vpop.xlane.xlu0 %1425 }
 0x1ee   : > { %v1507_v30 = vsub.f32 %v1471_v27, %v1489_v2  ;;  %v11714_v32 = vpop.eup %11713  ;;  %v1552_v38 = vadd.f32 1e-05, %v1516_v25  ;;  %v1470_v26 = vmul.f32 0.015625, %v1426_v31 }
 0x1ef   : > { %v1601_v35 = vmul.f32 %v12629_v34, %v1577_v24  ;;  %v1453_v12 = vpop.xlane.xlu1 %1452  ;;  %v1634_v40 = vadd.f32 %v12634_v36, %v1610_v7  ;;  %v1576_v29 = vmul.f32 %v11714_v32, %v1522_v3  ;;  %v1533_v3 = vsub.f32 %v12756_v47, %v12858_v14 }
 0x1f0   : > { %v11716_v39 = vpop.eup %11715  ;;  %v1543_v19 = vadd.f32 1e-05, %v1507_v30  ;;  %v1479_v42 = vmul.f32 0.015625, %v1453_v12  ;;  %11717 = vrsqrt.f32 %v1552_v38  ;;  %v1506_v5 = vsub.f32 %v1470_v26, %v1488_v28 }
 0x1f1   : > { %v1625_v44 = vadd.f32 %v12634_v36, %v1601_v35  ;;  %v1585_v46 = vmul.f32 %v11716_v39, %v1531_v20  ;;  %1652 = vst.msk [vmem:[#allocation2 + $0x60] sm:$0xff] %vm1262_vm2, %v1634_v40  ;;  %v1600_v33 = vmul.f32 %v12629_v34, %v1576_v29  ;;  %v1371_v50 = vpop.xlane.xlu0 %1370 }
 0x1f2   : > { %11719 = vrsqrt.f32 %v1543_v19  ;;  %v1515_v49 = vsub.f32 %v1479_v42, %v1497_v37  ;;  %v1542_v52 = vadd.f32 1e-05, %v1506_v5  ;;  %v1392_v22 = vmul.f32 0.015625, %v1371_v50 }
 0x1f3   : > { %1643 = vst.msk [vmem:[#allocation2 + $0x18] sm:$0xff] %vm1262_vm2, %v1625_v44  ;;  %v1609_v51 = vmul.f32 %v12629_v34, %v1585_v46  ;;  %v1344_v53 = vpop.xlane.xlu1 %1343  ;;  %v1624_v54 = vadd.f32 %v12634_v36, %v1600_v33  ;;  %v1501_v44 = vmul.f32 %v12897_v41, %v12897_v41 }
 0x1f4   : > { %v1551_v55 = vadd.f32 1e-05, %v1515_v49  ;;  %11721 = vrsqrt.f32 %v1542_v52  ;;  %v12884_v16 = vmul.f32 0.015625, %v1344_v53  ;;  %v1500_v25 = vmul.f32 %v1392_v22, %v1392_v22 }
 0x1f5   : > { %v1633_v56 = vadd.f32 %v12634_v36, %v1609_v51  ;;  %1642 = vst.msk [vmem:[#allocation2 + $0x10] sm:$0xff] %vm1262_vm2, %v1624_v54  ;;  %v1341_v58 = vpop.xlane.xlu0 %1340 }
 0x1f6   : > { %11723 = vrsqrt.f32 %v1551_v55  ;;  %v12882_v60 = vmul.f32 0.015625, %v1341_v58  ;;  %v1491_v2 = vmul.f32 %v12884_v16, %v12884_v16  ;;  %v1527_v54 = vsub.f32 %v12777_v59, %v12884_v16 }
 0x1f7   : > { %1651 = vst.msk [vmem:[#allocation2 + $0x58] sm:$0xff] %vm1262_vm2, %v1633_v56  ;;  %v1368_v61 = vpop.xlane.xlu1 %1367 }
 0x1f8   : > { %v1490_v11 = vmul.f32 %v12882_v60, %v12882_v60  ;;  %v12892_v13 = vmul.f32 0.015625, %v1368_v61  ;;  %v1526_v52 = vsub.f32 %v12786_v1, %v12882_v60  ;;  %v1536_v61 = vsub.f32 %v12774_v57, %v1392_v22 }
 0x1f9   : > { %v1432_v63 = vpop.xlane.xlu0 %1431  ;;  %v1537_v57 = vsub.f32 %v12622_v23, %v12897_v41 }
 0x1fa   : > { %v11718_v8 = vpop.eup %11717  ;;  %v1472_v62 = vmul.f32 0.015625, %v1432_v63  ;;  %v1499_v17 = vmul.f32 %v12892_v13, %v12892_v13 }
 0x1fb   : > { %v1435_v15 = vpop.xlane.xlu1 %1434  ;;  %v1588_v21 = vmul.f32 %v11718_v8, %v1534_v45  ;;  %v1535_v8 = vsub.f32 %v12784_v0, %v12892_v13 }
 0x1fc   : > { %v11720_v18 = vpop.eup %11719  ;;  %v1473_v27 = vmul.f32 0.015625, %v1435_v15  ;;  %v1508_v6 = vsub.f32 %v1472_v62, %v1490_v11 }
 0x1fd   : > { %v1579_v4 = vmul.f32 %v11720_v18, %v1525_v10  ;;  %v1612_v24 = vmul.f32 %v12629_v34, %v1588_v21  ;;  %v1462_v7 = vpop.xlane.xlu0 %1461 }
 0x1fe   : > { %v1509_v20 = vsub.f32 %v1473_v27, %v1491_v2  ;;  %v11722_v28 = vpop.eup %11721  ;;  %v1544_v31 = vadd.f32 1e-05, %v1508_v6  ;;  %v1482_v32 = vmul.f32 0.015625, %v1462_v7 }
 0x1ff   : > { %v1603_v30 = vmul.f32 %v12629_v34, %v1579_v4  ;;  %v1459_v35 = vpop.xlane.xlu1 %1458  ;;  %v1636_v9 = vadd.f32 %v12634_v36, %v1612_v24  ;;  %v1578_v37 = vmul.f32 %v11722_v28, %v1524_v43 }
 0x200   : > { %v11724_v48 = vpop.eup %11723  ;;  %v1545_v38 = vadd.f32 1e-05, %v1509_v20  ;;  %v1481_v47 = vmul.f32 0.015625, %v1459_v35  ;;  %11725 = vrsqrt.f32 %v1544_v31  ;;  %v1518_v12 = vsub.f32 %v1482_v32, %v1500_v25 }
 0x201   : > { %v1627_v14 = vadd.f32 %v12634_v36, %v1603_v30  ;;  %v1587_v26 = vmul.f32 %v11724_v48, %v1533_v3  ;;  %1654 = vst.msk [vmem:[#allocation2 + $0x70] sm:$0xff] %vm1262_vm2, %v1636_v9  ;;  %v1602_v39 = vmul.f32 %v12629_v34, %v1578_v37 }
 0x202   : > { %11727 = vrsqrt.f32 %v1545_v38  ;;  %v1517_v40 = vsub.f32 %v1481_v47, %v1499_v17  ;;  %v1554_v19 = vadd.f32 1e-05, %v1518_v12 }
 0x203   : > { %1645 = vst.msk [vmem:[#allocation2 + $0x28] sm:$0xff] %vm1262_vm2, %v1627_v14  ;;  %v1611_v29 = vmul.f32 %v12629_v34, %v1587_v26  ;;  %v1465_v42 = vpop.xlane.xlu1 %1464  ;;  %v1626_v46 = vadd.f32 %v12634_v36, %v1602_v39 }
 0x204   : > { %v1553_v5 = vadd.f32 1e-05, %v1517_v40  ;;  %v1483_v33 = vmul.f32 0.015625, %v1465_v42  ;;  %11729 = vrsqrt.f32 %v1554_v19 }
 0x205   : > { %v1635_v49 = vadd.f32 %v12634_v36, %v1611_v29  ;;  %1644 = vst.msk [vmem:[#allocation2 + $0x20] sm:$0xff] %vm1262_vm2, %v1626_v46 }
 0x206   : > { %11731 = vrsqrt.f32 %v1553_v5  ;;  %v1519_v50 = vsub.f32 %v1483_v33, %v1501_v44 }
 0x207   : > { %1653 = vst.msk [vmem:[#allocation2 + $0x68] sm:$0xff] %vm1262_vm2, %v1635_v49 }
 0x208   : > { %v1555_v51 = vadd.f32 1e-05, %v1519_v50 }
 0x20a   : > { %11733 = vrsqrt.f32 %v1555_v51  ;;  %v11726_v53 = vpop.eup %11725 }
 0x20b   : > { %v1580_v56 = vmul.f32 %v11726_v53, %v1526_v52 }
 0x20c   : > { %v11728_v55 = vpop.eup %11727 }
 0x20d   : > { %v1581_v58 = vmul.f32 %v11728_v55, %v1527_v54  ;;  %v1604_v45 = vmul.f32 %v12629_v34, %v1580_v56 }
 0x20e   : > { %v11730_v63 = vpop.eup %11729 }
 0x20f   : > { %v1605_v10 = vmul.f32 %v12629_v34, %v1581_v58  ;;  %v1628_v1 = vadd.f32 %v12634_v36, %v1604_v45  ;;  %v1590_v60 = vmul.f32 %v11730_v63, %v1536_v61 }
 0x210   : > { %v11732_v11 = vpop.eup %11731 }
 0x211   : > { %v1629_v62 = vadd.f32 %v12634_v36, %v1605_v10  ;;  %v1589_v59 = vmul.f32 %v11732_v11, %v1535_v8  ;;  %1646 = vst.msk [vmem:[#allocation2 + $0x30] sm:$0xff] %vm1262_vm2, %v1628_v1  ;;  %v1614_v16 = vmul.f32 %v12629_v34, %v1590_v60 }
 0x213   : > { %1647 = vst.msk [vmem:[#allocation2 + $0x38] sm:$0xff] %vm1262_vm2, %v1629_v62  ;;  %v1613_v0 = vmul.f32 %v12629_v34, %v1589_v59  ;;  %v1638_v15 = vadd.f32 %v12634_v36, %v1614_v16 }
 0x214   : > { %v11734_v13 = vpop.eup %11733 }
 0x215   : > { %v1637_v18 = vadd.f32 %v12634_v36, %v1613_v0  ;;  %v1591_v21 = vmul.f32 %v11734_v13, %v1537_v57  ;;  %1656 = vst.msk [vmem:[#allocation2 + $0x80] sm:$0xff] %vm1262_vm2, %v1638_v15 }
 0x217   : > { %1655 = vst.msk [vmem:[#allocation2 + $0x78] sm:$0xff] %vm1262_vm2, %v1637_v18  ;;  %v1615_v22 = vmul.f32 %v12629_v34, %v1591_v21 }
 0x219   : > { %v1639_v2 = vadd.f32 %v12634_v36, %v1615_v22 }
 0x21b   : > { %1657 = vst.msk [vmem:[#allocation2 + $0x88] sm:$0xff] %vm1262_vm2, %v1639_v2 }
 0x21c PF: > { %s16916_s20 = sld [smem:[#allocation19_spill]]  ;;  %s16917_s28 = sld [smem:[#allocation18_spill]]  ;;  %v16815_v27 = vmov 0.0   ;;  %vm12268_vm3 = vmmov 0   ;;  %v1658_v6 = vld [vmem:[#allocation2] sm:$0xff]  ;;  %v1659_v3 = vld [vmem:[#allocation2 + $0x8] sm:$0xff] }
 0x21d   : > { %9976 = vmatprep.subr.bf16.mxu1 %v16815_v27  ;;  %9932 = vmatprep.subr.bf16.mxu0 %v16815_v27  ;;  %vm1724_vm4 = vcmask 523264   ;;  %v12960_v25 = vpack.c.bf16 %v1659_v3, %v1658_v6  ;;  %v1660_v7 = vld [vmem:[#allocation2 + $0x10] sm:$0xff]  ;;  %v1661_v28 = vld [vmem:[#allocation2 + $0x18] sm:$0xff]  ;;  %v1662_v17 = vld [vmem:[#allocation2 + $0x20] sm:$0xff]  ;;  %v16817_v39 = vmov 0.0|0.0   ;;  %vm2145_vm5 = vcmask 130048  }
 0x21e   : > { %9984 = vmatprep.mubr.msk.bf16.mxu1 %vm12268_vm3, %v16815_v27  ;;  %9940 = vmatprep.mubr.msk.bf16.mxu0 %vm12268_vm3, %v16815_v27  ;;  %v12969_v30 = vpack.c.bf16 %v1661_v28, %v1660_v7  ;;  %v1663_v31 = vld [vmem:[#allocation2 + $0x28] sm:$0xff]  ;;  %v1664_v35 = vld [vmem:[#allocation2 + $0x30] sm:$0xff]  ;;  %v1665_v48 = vld [vmem:[#allocation2 + $0x38] sm:$0xff]  ;;  %v16925_v58 = vmov 0  ;;  %vm2310_vm7 = vcmask 588800   ;;  %s17070_s23 = sld [smem:[#allocation78_spill]] }
 0x21f   : > { %v12980_v32 = vpack.c.bf16 %v1663_v31, %v1662_v17  ;;  %v12990_v9 = vpack.c.bf16 %v1665_v48, %v1664_v35  ;;  %v1666_v37 = vld [vmem:[#allocation2 + $0x40] sm:$0xff]  ;;  %v1667_v38 = vld [vmem:[#allocation2 + $0x48] sm:$0xff]  ;;  %v1668_v14 = vld [vmem:[#allocation2 + $0x50] sm:$0xff] }
 0x220   : > { %v13000_v47 = vpack.c.bf16 %v1667_v38, %v1666_v37  ;;  %v1669_v26 = vld [vmem:[#allocation2 + $0x58] sm:$0xff]  ;;  %v1670_v40 = vld [vmem:[#allocation2 + $0x60] sm:$0xff]  ;;  %v1671_v29 = vld [vmem:[#allocation2 + $0x68] sm:$0xff] }
 0x221   : > { %16918 = vst [vmem:[#allocation20_spill] sm:$0xff] %v12980_v32  ;;  %16919 = vst [vmem:[#allocation21_spill] sm:$0xff] %v12990_v9  ;;  %v13010_v12 = vpack.c.bf16 %v1669_v26, %v1668_v14  ;;  %v13025_v19 = vpack.c.bf16 %v1671_v29, %v1670_v40  ;;  %v1672_v42 = vld [vmem:[#allocation2 + $0x70] sm:$0xff]  ;;  %v1673_v44 = vld [vmem:[#allocation2 + $0x78] sm:$0xff] }
 0x222   : > { %v11735_v23 = vld [vmem:[%s16916_s20] sm:$0xff]   ;;  %v11736_v41 = vld [vmem:[%s16916_s20 + $0x8] sm:$0xff]   ;;  %v11737_v34 = vld [vmem:[%s16916_s20 + $0x10] sm:$0xff]   ;;  %16920 = vst [vmem:[#allocation22_spill] sm:$0xff] %v13000_v47  ;;  %v13035_v46 = vpack.c.bf16 %v1673_v44, %v1672_v42 }
 0x223   : > { %9977 = vmatpush3.bf16.msra.mxu1 %v11735_v23  ;;  %v11739_v36 = vld [vmem:[%s16917_s28] sm:$0xff]   ;;  %v11740_v43 = vld [vmem:[%s16917_s28 + $0x8] sm:$0xff]   ;;  %v11738_v4 = vld [vmem:[%s16916_s20 + $0x18] sm:$0xff]   ;;  %16921 = vst [vmem:[#allocation23_spill] sm:$0xff] %v13010_v12 }
 0x224   : > { %9978 = vmatprep.subr.bf16.mxu1 %v16815_v27  ;;  %9933 = vmatpush3.bf16.msra.mxu0 %v11739_v36  ;;  %v11741_v24 = vld [vmem:[%s16917_s28 + $0x10] sm:$0xff]   ;;  %v11742_v20 = vld [vmem:[%s16917_s28 + $0x18] sm:$0xff]   ;;  %16922 = vst [vmem:[#allocation24_spill] sm:$0xff] %v13025_v19  ;;  %16923 = vst [vmem:[#allocation25_spill] sm:$0xff] %v13035_v46  ;;  %s17071_s21 = scalar_lea.vmem %s17070_s23, %s12464_s1 }
 0x225   : > { %9934 = vmatprep.subr.bf16.mxu0 %v16815_v27  ;;  %v1674_v5 = vld [vmem:[#allocation2 + $0x80] sm:$0xff]  ;;  %v1675_v33 = vld [vmem:[#allocation2 + $0x88] sm:$0xff]  ;;  %vm13062_vm6 = vmpackc.low %vm2145_vm5, %vm2145_vm5 }
 0x226   : > { %v13045_v49 = vpack.c.bf16 %v1675_v33, %v1674_v5  ;;  %v13056_v50 = vld [vmem:[%s12501_s26] ss:$0 sm:$0xff]  ;;  %v16926_v58 = vsel %vm13062_vm6, 4294967295, %v16925_v58 }
 0x227   : > { %9979 = vmatpush3.bf16.msra.mxu1 %v11736_v41  ;;  %16927 = vst [vmem:[#allocation27_spill] sm:$0xff] %v16926_v58  ;;  %v13086_v44 = vld [vmem:[%s12496_s27] ss:$0 sm:$0xff] }
 0x228   : > { %9980 = vmatprep.subr.bf16.mxu1 %v16815_v27  ;;  %9935 = vmatpush3.bf16.msra.mxu0 %v11740_v43  ;;  %16924 = vst [vmem:[#allocation26_spill] sm:$0xff] %v13045_v49 }
 0x229   : > { %9936 = vmatprep.subr.bf16.mxu0 %v16815_v27 }
 0x22b   : > { %9981 = vmatpush3.bf16.msra.mxu1 %v11737_v34 }
 0x22c   : > { %9982 = vmatprep.subr.bf16.mxu1 %v16815_v27  ;;  %9937 = vmatpush3.bf16.msra.mxu0 %v11741_v24 }
 0x22d   : > { %9938 = vmatprep.subr.bf16.mxu0 %v16815_v27 }
 0x22f   : > { %9983 = vmatpush3.bf16.msra.mxu1 %v11738_v4 }
 0x230   : > { %9939 = vmatpush3.bf16.msra.mxu0 %v11742_v20  ;;  %11420 = vmatprep.subr.bf16.mxu1 %v16817_v39 }
 0x231   : > { %10020 = vmatprep.subr.bf16.mxu0 %v16815_v27 }
 0x232   : > { %9985 = vmatmul.mubr.msk.bf16.vlgmr.msra.gmra.mrb[0].mxu1 %vm1724_vm4, %v12960_v25 }
 0x233   : > { %9988 = vmatprep.mubr.msk.bf16.mxu1 %vm12268_vm3, %v16815_v27  ;;  %9941 = vmatmul.mubr.msk.bf16.vlgmr.msra.gmra.mrb[0].mxu0 %vm1724_vm4, %v12960_v25 }
 0x234   : > { %9944 = vmatprep.mubr.msk.bf16.mxu0 %vm12268_vm3, %v16815_v27 }
 0x23a   : > { %9989 = vmatmul.mubr.msk.bf16.gmra.mrb[4].mxu1 %vm1724_vm4, %v12969_v30 }
 0x23b   : > { %9992 = vmatprep.mubr.msk.bf16.mxu1 %vm12268_vm3, %v16815_v27  ;;  %9945 = vmatmul.mubr.msk.bf16.gmra.mrb[4].mxu0 %vm1724_vm4, %v12969_v30 }
 0x23c   : > { %9948 = vmatprep.mubr.msk.bf16.mxu0 %vm12268_vm3, %v16815_v27 }
 0x242   : > { %9993 = vmatmul.mubr.msk.bf16.gmra.mrb[8].mxu1 %vm1724_vm4, %v12980_v32 }
 0x243   : > { %9996 = vmatprep.mubr.msk.bf16.mxu1 %vm12268_vm3, %v16815_v27  ;;  %9949 = vmatmul.mubr.msk.bf16.gmra.mrb[8].mxu0 %vm1724_vm4, %v12980_v32 }
 0x244   : > { %9952 = vmatprep.mubr.msk.bf16.mxu0 %vm12268_vm3, %v16815_v27 }
 0x24a   : > { %9997 = vmatmul.mubr.msk.bf16.gmra.mrb[12].mxu1 %vm1724_vm4, %v12990_v9 }
 0x24b   : > { %10000 = vmatprep.mubr.msk.bf16.mxu1 %vm12268_vm3, %v16815_v27  ;;  %9953 = vmatmul.mubr.msk.bf16.gmra.mrb[12].mxu0 %vm1724_vm4, %v12990_v9 }
 0x24c   : > { %9956 = vmatprep.mubr.msk.bf16.mxu0 %vm12268_vm3, %v16815_v27 }
 0x252   : > { %10001 = vmatmul.mubr.msk.bf16.gmra.mrb[16].mxu1 %vm1724_vm4, %v13000_v47 }
 0x253   : > { %10004 = vmatprep.mubr.msk.bf16.mxu1 %vm12268_vm3, %v16815_v27  ;;  %9957 = vmatmul.mubr.msk.bf16.gmra.mrb[16].mxu0 %vm1724_vm4, %v13000_v47 }
 0x254   : > { %9960 = vmatprep.mubr.msk.bf16.mxu0 %vm12268_vm3, %v16815_v27 }
 0x25a   : > { %10005 = vmatmul.mubr.msk.bf16.gmra.mrb[20].mxu1 %vm1724_vm4, %v13010_v12 }
 0x25b   : > { %10008 = vmatprep.mubr.msk.bf16.mxu1 %vm12268_vm3, %v16815_v27  ;;  %9961 = vmatmul.mubr.msk.bf16.gmra.mrb[20].mxu0 %vm1724_vm4, %v13010_v12 }
 0x25c   : > { %9964 = vmatprep.mubr.msk.bf16.mxu0 %vm12268_vm3, %v16815_v27 }
 0x262   : > { %10009 = vmatmul.mubr.msk.bf16.gmra.mrb[24].mxu1 %vm1724_vm4, %v13025_v19 }
 0x263   : > { %9965 = vmatmul.mubr.msk.bf16.gmra.mrb[24].mxu0 %vm1724_vm4, %v13025_v19  ;;  %10012 = vmatprep.mubr.msk.bf16.mxu1 %vm12268_vm3, %v16815_v27 }
 0x264   : > { %9968 = vmatprep.mubr.msk.bf16.mxu0 %vm12268_vm3, %v16815_v27 }
 0x26a   : > { %10013 = vmatmul.mubr.msk.bf16.gmra.mrb[28].mxu1 %vm1724_vm4, %v13035_v46 }
 0x26b   : > { %9969 = vmatmul.mubr.msk.bf16.gmra.mrb[28].mxu0 %vm1724_vm4, %v13035_v46  ;;  %10016 = vmatprep.mubr.msk.bf16.mxu1 %vm12268_vm3, %v16815_v27 }
 0x26c   : > { %9972 = vmatprep.mubr.msk.bf16.mxu0 %vm12268_vm3, %v16815_v27 }
 0x272   : > { %10017 = vmatmul.mubr.msk.bf16.gmra.mrb[32].mxu1 %vm1724_vm4, %v13045_v49 }
 0x273   : > { %9973 = vmatmul.mubr.msk.bf16.gmra.mrb[32].mxu0 %vm1724_vm4, %v13045_v49  ;;  %10082 = vmatprep.mubr.msk.f32.mxu1 %vm12268_vm3, %v16815_v27 }
 0x274   : > { %10028 = vmatprep.mubr.msk.bf16.mxu0 %vm12268_vm3, %v16815_v27 }
 0x305   : > { %v1930_v51 = vpop.f32.mrb[0].mxu1 }
 0x306   : > { %v9986_v52 = vpop.f32.mrb[1].mxu1  ;;  %v1931_v54 = vadd.f32 %v13056_v50, %v1930_v51  ;;  %v1786_v45 = vpop.f32.mrb[0].mxu0 }
 0x307   : > { %v1933_v53 = vpop.f32.mrb[2].mxu1  ;;  %v9942_v63 = vpop.f32.mrb[1].mxu0  ;;  %v1787_v33 = vadd.f32 %v13086_v44, %v1786_v45 }
 0x308   : > { %v1934_v55 = vadd.f32 %v13056_v50, %v1933_v53  ;;  %v9987_v56 = vpop.f32.mrb[3].mxu1  ;;  %v1789_v10 = vpop.f32.mrb[2].mxu0 }
 0x309   : > { %v9943_v1 = vpop.f32.mrb[3].mxu0 }
 0x30a   : > { %v11421_v61 = vpack.c.bf16 %v1934_v55, %v1931_v54  ;;  %v1790_v1 = vadd.f32 %v13086_v44, %v1789_v10 }
 0x30c   : > { %11423 = vmatpush3.bf16.xpose.msk.msra.mxu1 %vm13062_vm6, %v11421_v61 }
 0x30d   : > { %v1938_v8 = vpop.f32.mrb[4].mxu1  ;;  %11424 = vmatprep.subr.bf16.mxu1 %v16817_v39 }
 0x30e   : > { %v9990_v11 = vpop.f32.mrb[5].mxu1  ;;  %v1939_v62 = vadd.f32 %v13056_v50, %v1938_v8  ;;  %v1794_v0 = vpop.f32.mrb[4].mxu0 }
 0x30f   : > { %v1941_v60 = vpop.f32.mrb[6].mxu1  ;;  %v9946_v13 = vpop.f32.mrb[5].mxu0 }
 0x310   : > { %v1942_v59 = vadd.f32 %v13056_v50, %v1941_v60  ;;  %v9991_v16 = vpop.f32.mrb[7].mxu1  ;;  %v1797_v18 = vpop.f32.mrb[6].mxu0  ;;  %v1795_v60 = vadd.f32 %v13086_v44, %v1794_v0 }
 0x311   : > { %v9947_v22 = vpop.f32.mrb[7].mxu0 }
 0x312   : > { %v11425_v57 = vpack.c.bf16 %v1942_v59, %v1939_v62  ;;  %v1798_v62 = vadd.f32 %v13086_v44, %v1797_v18 }
 0x314   : > { %11427 = vmatpush3.bf16.xpose.msk.msra.mxu1 %vm13062_vm6, %v11425_v57 }
 0x315   : > { %v1946_v15 = vpop.f32.mrb[8].mxu1  ;;  %11428 = vmatprep.subr.bf16.mxu1 %v16817_v39 }
 0x316   : > { %v9994_v21 = vpop.f32.mrb[9].mxu1  ;;  %v1947_v23 = vadd.f32 %v13056_v50, %v1946_v15  ;;  %v1802_v43 = vpop.f32.mrb[8].mxu0 }
 0x317   : > { %v1949_v2 = vpop.f32.mrb[10].mxu1  ;;  %v9950_v4 = vpop.f32.mrb[9].mxu0  ;;  %v1803_v59 = vadd.f32 %v13086_v44, %v1802_v43 }
 0x318   : > { %v1950_v41 = vadd.f32 %v13056_v50, %v1949_v2  ;;  %v9995_v34 = vpop.f32.mrb[11].mxu1  ;;  %v1805_v3 = vpop.f32.mrb[10].mxu0 }
 0x319   : > { %v9951_v20 = vpop.f32.mrb[11].mxu0  ;;  %v1806_v10 = vadd.f32 %v13086_v44, %v1805_v3 }
 0x31a   : > { %v11429_v36 = vpack.c.bf16 %v1950_v41, %v1947_v23 }
 0x31c   : > { %11431 = vmatpush3.bf16.xpose.msk.msra.mxu1 %vm13062_vm6, %v11429_v36 }
 0x31d   : > { %v1954_v6 = vpop.f32.mrb[12].mxu1  ;;  %11432 = vmatprep.subr.bf16.mxu1 %v16817_v39 }
 0x31e   : > { %v9998_v24 = vpop.f32.mrb[13].mxu1  ;;  %v1955_v28 = vadd.f32 %v13056_v50, %v1954_v6  ;;  %v1810_v48 = vpop.f32.mrb[12].mxu0 }
 0x31f   : > { %v1957_v7 = vpop.f32.mrb[14].mxu1  ;;  %v9954_v37 = vpop.f32.mrb[13].mxu0  ;;  %v1811_v16 = vadd.f32 %v13086_v44, %v1810_v48  ;;  %v11743_v48 = vld [vmem:[%s12481_s25] sm:$0xff]  }
 0x320   : > { %v1958_v17 = vadd.f32 %v13056_v50, %v1957_v7  ;;  %v9999_v31 = vpop.f32.mrb[15].mxu1  ;;  %v1813_v14 = vpop.f32.mrb[14].mxu0  ;;  %10021 = vmatpush3.bf16.msra.mxu0 %v11743_v48  ;;  %v11744_v37 = vld [vmem:[%s12481_s25 + $0x8] sm:$0xff]  }
 0x321   : > { %v9955_v40 = vpop.f32.mrb[15].mxu0  ;;  %v1814_v57 = vadd.f32 %v13086_v44, %v1813_v14  ;;  %10022 = vmatprep.subr.bf16.mxu0 %v16815_v27  ;;  %v11746_v14 = vld [vmem:[%s12481_s25 + $0x18] sm:$0xff]  }
 0x322   : > { %v11433_v35 = vpack.c.bf16 %v1958_v17, %v1955_v28 }
 0x324   : > { %11435 = vmatpush3.bf16.xpose.msk.msra.mxu1 %vm13062_vm6, %v11433_v35  ;;  %10023 = vmatpush3.bf16.msra.mxu0 %v11744_v37 }
 0x325   : > { %v1962_v38 = vpop.f32.mrb[16].mxu1  ;;  %10080 = vmatprep.subr.mxu1 %v16815_v27  ;;  %10024 = vmatprep.subr.bf16.mxu0 %v16815_v27 }
 0x326   : > { %v10002_v26 = vpop.f32.mrb[17].mxu1  ;;  %v1963_v42 = vadd.f32 %v13056_v50, %v1962_v38  ;;  %v1818_v51 = vpop.f32.mrb[16].mxu0  ;;  %v11745_v38 = vld [vmem:[%s12481_s25 + $0x10] sm:$0xff]  }
 0x327   : > { %v1965_v29 = vpop.f32.mrb[18].mxu1  ;;  %v9958_v52 = vpop.f32.mrb[17].mxu0  ;;  %v1819_v0 = vadd.f32 %v13086_v44, %v1818_v51 }
 0x328   : > { %v10003_v5 = vpop.f32.mrb[19].mxu1  ;;  %v13090_v54 = vpop.f32.mrb[18].mxu0  ;;  %v13094_v55 = vadd.f32 %v13056_v50, %v1965_v29  ;;  %10025 = vmatpush3.bf16.msra.mxu0 %v11745_v38 }
 0x329   : > { %v9959_v61 = vpop.f32.mrb[19].mxu0  ;;  %10026 = vmatprep.subr.bf16.mxu0 %v16815_v27 }
 0x32c   : > { %10081 = vmatpush3.xpose.msk.msra.mxu1 %vm2145_vm5, %v1963_v42  ;;  %10027 = vmatpush3.bf16.msra.mxu0 %v11746_v14 }
 0x32d   : > { %v1970_v53 = vpop.f32.mrb[20].mxu1  ;;  %11436 = vmatprep.subr.bf16.mxu1 %v16817_v39  ;;  %10244 = vmatprep.subr.bf16.mxu0 %v16815_v27 }
 0x32e   : > { %v13097_v56 = vadd.f32 %v13056_v50, %v1970_v53  ;;  %v10006_v63 = vpop.f32.mrb[21].mxu1 }
 0x32f   : > { %10083 = vmatmul.mubr.msk.f32.vlgmr.msra.gmra.mrb[36].mxu1 %vm2145_vm5, %v1787_v33  ;;  %v1973_v45 = vpop.f32.mrb[22].mxu1  ;;  %10029 = vmatmul.mubr.msk.bf16.vlgmr.msra.gmra.mrb[36].mxu0 %vm1724_vm4, %v12960_v25 }
 0x330   : > { %v11449_v8 = vpack.c.bf16 %v13097_v56, %v13094_v55  ;;  %10085 = vmatprep.mubr.msk.f32.mxu1 %vm12268_vm3, %v16815_v27  ;;  %v10007_v11 = vpop.f32.mrb[23].mxu1  ;;  %v13137_v13 = vadd.f32 %v13056_v50, %v1973_v45  ;;  %10032 = vmatprep.mubr.msk.bf16.mxu0 %vm12268_vm3, %v16815_v27 }
 0x333   : > { %10086 = vmatmul.mubr.msk.f32.gmra.mrb[38].mxu1 %vm2145_vm5, %v1790_v1 }
 0x334   : > { %10088 = vmatprep.mubr.msk.f32.mxu1 %vm12268_vm3, %v16815_v27 }
 0x335   : > { %v1978_v15 = vpop.f32.mrb[24].mxu1 }
 0x336   : > { %v13140_v18 = vadd.f32 %v13056_v50, %v1978_v15  ;;  %v10010_v21 = vpop.f32.mrb[25].mxu1 }
 0x337   : > { %10089 = vmatmul.mubr.msk.f32.gmra.mrb[40].mxu1 %vm2145_vm5, %v1795_v60  ;;  %v1981_v22 = vpop.f32.mrb[26].mxu1  ;;  %10033 = vmatmul.mubr.msk.bf16.gmra.mrb[40].mxu0 %vm1724_vm4, %v12969_v30 }
 0x338   : > { %10091 = vmatprep.mubr.msk.f32.mxu1 %vm12268_vm3, %v16815_v27  ;;  %v11453_v2 = vpack.c.bf16 %v13140_v18, %v13137_v13  ;;  %v10011_v23 = vpop.f32.mrb[27].mxu1  ;;  %v13145_v41 = vadd.f32 %v13056_v50, %v1981_v22  ;;  %10036 = vmatprep.mubr.msk.bf16.mxu0 %vm12268_vm3, %v16815_v27 }
 0x33b   : > { %10092 = vmatmul.mubr.msk.f32.gmra.mrb[42].mxu1 %vm2145_vm5, %v1798_v62 }
 0x33c   : > { %10094 = vmatprep.mubr.msk.f32.mxu1 %vm12268_vm3, %v16815_v27 }
 0x33d   : > { %v1986_v34 = vpop.f32.mrb[28].mxu1 }
 0x33e   : > { %v13148_v36 = vadd.f32 %v13056_v50, %v1986_v34  ;;  %v10014_v43 = vpop.f32.mrb[29].mxu1 }
 0x33f   : > { %10095 = vmatmul.mubr.msk.f32.gmra.mrb[44].mxu1 %vm2145_vm5, %v1803_v59  ;;  %v1989_v4 = vpop.f32.mrb[30].mxu1  ;;  %10037 = vmatmul.mubr.msk.bf16.gmra.mrb[44].mxu0 %vm1724_vm4, %v12980_v32 }
 0x340   : > { %10097 = vmatprep.mubr.msk.f32.mxu1 %vm12268_vm3, %v16815_v27  ;;  %v11457_v6 = vpack.c.bf16 %v13148_v36, %v13145_v41  ;;  %v10015_v3 = vpop.f32.mrb[31].mxu1  ;;  %v13153_v24 = vadd.f32 %v13056_v50, %v1989_v4  ;;  %10040 = vmatprep.mubr.msk.bf16.mxu0 %vm12268_vm3, %v16815_v27  ;;  %v13242_v4 = vpop.f32.mrb[20].mxu0 }
 0x341   : > { %v9962_v3 = vpop.f32.mrb[21].mxu0 }
 0x343   : > { %10098 = vmatmul.mubr.msk.f32.gmra.mrb[46].mxu1 %vm2145_vm5, %v1806_v10 }
 0x344   : > { %10100 = vmatprep.mubr.msk.f32.mxu1 %vm12268_vm3, %v16815_v27 }
 0x345   : > { %v1994_v20 = vpop.f32.mrb[32].mxu1 }
 0x346   : > { %v13156_v7 = vadd.f32 %v13056_v50, %v1994_v20  ;;  %v10018_v28 = vpop.f32.mrb[33].mxu1  ;;  %v13244_v20 = vpop.f32.mrb[22].mxu0 }
 0x347   : > { %10101 = vmatmul.mubr.msk.f32.gmra.mrb[48].mxu1 %vm2145_vm5, %v1811_v16  ;;  %v13158_v17 = vpop.f32.mrb[34].mxu1  ;;  %10041 = vmatmul.mubr.msk.bf16.gmra.mrb[48].mxu0 %vm1724_vm4, %v12990_v9  ;;  %v9963_v28 = vpop.f32.mrb[23].mxu0 }
 0x348   : > { %10103 = vmatprep.mubr.msk.f32.mxu1 %vm12268_vm3, %v16815_v27  ;;  %v11461_v31 = vpack.c.bf16 %v13156_v7, %v13153_v24  ;;  %v10019_v35 = vpop.f32.mrb[35].mxu1  ;;  %10044 = vmatprep.mubr.msk.bf16.mxu0 %vm12268_vm3, %v16815_v27  ;;  %v1998_v24 = vadd.f32 %v13056_v50, %v13158_v17  ;;  %v1822_v7 = vadd.f32 %v13086_v44, %v13090_v54 }
 0x349   : > { %v13246_v35 = vpop.f32.mrb[24].mxu0  ;;  %v1827_v50 = vadd.f32 %v13086_v44, %v13242_v4  ;;  %v1830_v54 = vadd.f32 %v13086_v44, %v13244_v20 }
 0x34a   : > { %v9966_v48 = vpop.f32.mrb[25].mxu0  ;;  %v1835_v17 = vadd.f32 %v13086_v44, %v13246_v35 }
 0x34b   : > { %10104 = vmatmul.mubr.msk.f32.gmra.mrb[50].mxu1 %vm2145_vm5, %v1814_v57  ;;  %v13248_v37 = vpop.f32.mrb[26].mxu0 }
 0x34c   : > { %10106 = vmatprep.mubr.msk.f32.mxu1 %vm12268_vm3, %v16815_v27  ;;  %v9967_v38 = vpop.f32.mrb[27].mxu0 }
 0x34d   : > { %v13250_v14 = vpop.f32.mrb[28].mxu0 }
 0x34e   : > { %v1843_v4 = vadd.f32 %v13086_v44, %v13250_v14 }
 0x34f   : > { %10107 = vmatmul.mubr.msk.f32.gmra.mrb[52].mxu1 %vm2145_vm5, %v1819_v0  ;;  %10045 = vmatmul.mubr.msk.bf16.gmra.mrb[52].mxu0 %vm1724_vm4, %v13000_v47 }
 0x350   : > { %10127 = vmatprep.mubr.msk.f32.mxu1 %vm12268_vm3, %v16815_v27  ;;  %10048 = vmatprep.mubr.msk.bf16.mxu0 %vm12268_vm3, %v16815_v27 }
 0x357   : > { %10049 = vmatmul.mubr.msk.bf16.gmra.mrb[56].mxu0 %vm1724_vm4, %v13010_v12 }
 0x358   : > { %10052 = vmatprep.mubr.msk.bf16.mxu0 %vm12268_vm3, %v16815_v27 }
 0x35f   : > { %10053 = vmatmul.mubr.msk.bf16.gmra.mrb[60].mxu0 %vm1724_vm4, %v13025_v19 }
 0x360   : > { %10056 = vmatprep.mubr.msk.bf16.mxu0 %vm12268_vm3, %v16815_v27 }
 0x367   : > { %10057 = vmatmul.mubr.msk.bf16.gmra.mrb[64].mxu0 %vm1724_vm4, %v13035_v46 }
 0x368   : > { %10060 = vmatprep.mubr.msk.bf16.mxu0 %vm12268_vm3, %v16815_v27 }
 0x36f   : > { %10061 = vmatmul.mubr.msk.bf16.gmra.mrb[68].mxu0 %vm1724_vm4, %v13045_v49 }
 0x370   : > { %10252 = vmatprep.mubr.msk.bf16.mxu0 %vm12268_vm3, %v16815_v27 }
 0x402   : > { %v13206_v26 = vpop.f32.mrb[36].mxu1 }
 0x403   : > { %v10084_v40 = vpop.f32.mrb[37].mxu1  ;;  %v2311_v29 = vsel %vm2310_vm7, %v13206_v26, -inf }
 0x404   : > { %2312 = vmax.xlane.f32.xlu0 %v2311_v29  ;;  %v9970_v40 = vpop.f32.mrb[29].mxu0 }
 0x405   : > { %v13252_v29 = vpop.f32.mrb[30].mxu0 }
 0x406   : > { %v13210_v42 = vpop.f32.mrb[38].mxu1  ;;  %v1846_v20 = vadd.f32 %v13086_v44, %v13252_v29 }
 0x407   : > { %v10087_v5 = vpop.f32.mrb[39].mxu1  ;;  %v2314_v33 = vsel %vm2310_vm7, %v13210_v42, -inf }
 0x408   : > { %2315 = vmax.xlane.f32.xlu0 %v2314_v33  ;;  %v9971_v5 = vpop.f32.mrb[31].mxu0 }
 0x409   : > { %v13254_v33 = vpop.f32.mrb[32].mxu0 }
 0x40a   : > { %v13214_v51 = vpop.f32.mrb[40].mxu1  ;;  %v1851_v35 = vadd.f32 %v13086_v44, %v13254_v33 }
 0x40b   : > { %v10090_v52 = vpop.f32.mrb[41].mxu1  ;;  %v2317_v53 = vsel %vm2310_vm7, %v13214_v51, -inf }
 0x40c   : > { %2318 = vmax.xlane.f32.xlu1 %v2317_v53  ;;  %v9974_v52 = vpop.f32.mrb[33].mxu0 }
 0x40d   : > { %v13256_v53 = vpop.f32.mrb[34].mxu0 }
 0x40e   : > { %v13218_v61 = vpop.f32.mrb[42].mxu1 }
 0x40f   : > { %v10093_v63 = vpop.f32.mrb[43].mxu1  ;;  %v2320_v45 = vsel %vm2310_vm7, %v13218_v61, -inf }
 0x410   : > { %2321 = vmax.xlane.f32.xlu1 %v2320_v45  ;;  %v9975_v63 = vpop.f32.mrb[35].mxu0  ;;  %v13259_v45 = vld [vmem:[%s12506_s22] ss:$0 sm:$0xff] }
 0x412   : > { %v13222_v11 = vpop.f32.mrb[44].mxu1 }
 0x413   : > { %v10096_v1 = vpop.f32.mrb[45].mxu1  ;;  %v2323_v60 = vsel %vm2310_vm7, %v13222_v11, -inf }
 0x414   : > { %2324 = vmax.xlane.f32.xlu0 %v2323_v60  ;;  %v2074_v1 = vpop.f32.mrb[36].mxu0 }
 0x415   : > { %v2075_v60 = vadd.f32 %v13259_v45, %v2074_v1 }
 0x416   : > { %v13226_v62 = vpop.f32.mrb[46].mxu1 }
 0x417   : > { %v10099_v59 = vpop.f32.mrb[47].mxu1  ;;  %v2326_v10 = vsel %vm2310_vm7, %v13226_v62, -inf }
 0x418   : > { %2327 = vmax.xlane.f32.xlu1 %v2326_v10  ;;  %v10030_v59 = vpop.f32.mrb[37].mxu0 }
 0x419   : > { %v2077_v10 = vpop.f32.mrb[38].mxu0 }
 0x41a   : > { %v13230_v16 = vpop.f32.mrb[48].mxu1 }
 0x41b   : > { %v10102_v57 = vpop.f32.mrb[49].mxu1  ;;  %v2329_v0 = vsel %vm2310_vm7, %v13230_v16, -inf }
 0x41c   : > { %2330 = vmax.xlane.f32.xlu0 %v2329_v0  ;;  %v2078_v57 = vadd.f32 %v13259_v45, %v2077_v10  ;;  %v10031_v0 = vpop.f32.mrb[39].mxu0 }
 0x41e   : > { %v13234_v15 = vpop.f32.mrb[50].mxu1 }
 0x41f   : > { %v10105_v21 = vpop.f32.mrb[51].mxu1  ;;  %v2332_v22 = vsel %vm2310_vm7, %v13234_v15, -inf }
 0x420   : > { %2333 = vmax.xlane.f32.xlu1 %v2332_v22  ;;  %v11437_v21 = vpack.c.bf16 %v2078_v57, %v2075_v60  ;;  %v2082_v22 = vpop.f32.mrb[40].mxu0 }
 0x422   : > { %v13238_v23 = vpop.f32.mrb[52].mxu1  ;;  %11438 = vmatpush3.bf16.msra.mxu1 %v11437_v21 }
 0x423   : > { %v10108_v34 = vpop.f32.mrb[53].mxu1  ;;  %v2335_v43 = vsel %vm2310_vm7, %v13238_v23, -inf  ;;  %11439 = vmatprep.subr.bf16.mxu1 %v16817_v39 }
 0x424   : > { %2336 = vmax.xlane.f32.xlu0 %v2335_v43  ;;  %v2083_v34 = vadd.f32 %v13259_v45, %v2082_v22  ;;  %v10034_v43 = vpop.f32.mrb[41].mxu0 }
 0x425   : > { %v2085_v3 = vpop.f32.mrb[42].mxu0 }
 0x426   : > { %v2086_v28 = vadd.f32 %v13259_v45, %v2085_v3  ;;  %v10035_v48 = vpop.f32.mrb[43].mxu0 }
 0x427   : > { %v2090_v63 = vpop.f32.mrb[44].mxu0 }
 0x428   : > { %v11440_v40 = vpack.c.bf16 %v2086_v28, %v2083_v34  ;;  %v2091_v60 = vadd.f32 %v13259_v45, %v2090_v63  ;;  %v10038_v59 = vpop.f32.mrb[45].mxu0 }
 0x429   : > { %v2093_v57 = vpop.f32.mrb[46].mxu0 }
 0x42a   : > { %11441 = vmatpush3.bf16.msra.mxu1 %v11440_v40  ;;  %v2094_v0 = vadd.f32 %v13259_v45, %v2093_v57  ;;  %v10039_v21 = vpop.f32.mrb[47].mxu0 }
 0x42b   : > { %11442 = vmatprep.subr.bf16.mxu1 %v16817_v39  ;;  %v2098_v28 = vpop.f32.mrb[48].mxu0 }
 0x42c   : > { %v11443_v43 = vpack.c.bf16 %v2094_v0, %v2091_v60  ;;  %v10042_v40 = vpop.f32.mrb[49].mxu0 }
 0x42e   : > { %11444 = vmatpush3.bf16.msra.mxu1 %v11443_v43 }
 0x42f   : > { %11445 = vmatprep.subr.bf16.mxu1 %v16817_v39 }
 0x491   : > { %v2313_v38 = vpop.xlane.xlu0 %2312 }
 0x492   : > { %v2338_v5 = vsub.f32 %v13206_v26, %v2313_v38  ;;  %v2099_v38 = vadd.f32 %v13259_v45, %v2098_v28 }
 0x494   : > { %v2347_v52 = vmul.f32 1.442695, %v2338_v5  ;;  %v2101_v5 = vpop.f32.mrb[50].mxu0 }
 0x495   : > { %v2316_v1 = vpop.xlane.xlu0 %2315  ;;  %v10043_v63 = vpop.f32.mrb[51].mxu0 }
 0x496   : > { %11795 = vpow2.f32 %v2347_v52  ;;  %v2339_v10 = vsub.f32 %v13210_v42, %v2316_v1  ;;  %v2102_v52 = vadd.f32 %v13259_v45, %v2101_v5  ;;  %v2106_v63 = vpop.f32.mrb[52].mxu0 }
 0x498   : > { %v2349_v22 = vmul.f32 1.442695, %v2339_v10  ;;  %v11446_v10 = vpack.c.bf16 %v2102_v52, %v2099_v38 }
 0x499   : > { %v2319_v34 = vpop.xlane.xlu1 %2318 }
 0x49a   : > { %11797 = vpow2.f32 %v2349_v22  ;;  %v2340_v26 = vsub.f32 %v13214_v51, %v2319_v34  ;;  %11447 = vmatpush3.bf16.msra.mxu1 %v11446_v10 }
 0x49b   : > { %10125 = vmatprep.subr.mxu1 %v16815_v27 }
 0x49c   : > { %v2351_v3 = vmul.f32 1.442695, %v2340_v26 }
 0x49d   : > { %v2322_v48 = vpop.xlane.xlu1 %2321 }
 0x49e   : > { %11799 = vpow2.f32 %v2351_v3  ;;  %v2341_v42 = vsub.f32 %v13218_v61, %v2322_v48 }
 0x4a0   : > { %v13276_v1 = vpop.eup %11795  ;;  %v2353_v60 = vmul.f32 1.442695, %v2341_v42 }
 0x4a1   : > { %v2325_v51 = vpop.xlane.xlu0 %2324  ;;  %v2365_v59 = vsel %vm2310_vm7, %v13276_v1, 0.0 }
 0x4a2   : > { %11801 = vpow2.f32 %v2353_v60  ;;  %v2342_v57 = vsub.f32 %v13222_v11, %v2325_v51  ;;  %2366 = vadd.xlane.f32.xlu1 %v2365_v59  ;;  %v10046_v51 = vpop.f32.mrb[53].mxu0 }
 0x4a3   : > { %v2109_v10 = vpop.f32.mrb[54].mxu0 }
 0x4a4   : > { %v13281_v0 = vpop.eup %11797  ;;  %v2355_v61 = vmul.f32 1.442695, %v2342_v57  ;;  %v10047_v57 = vpop.f32.mrb[55].mxu0 }
 0x4a5   : > { %v2328_v21 = vpop.xlane.xlu1 %2327  ;;  %v2368_v22 = vsel %vm2310_vm7, %v13281_v0, 0.0 }
 0x4a6   : > { %11803 = vpow2.f32 %v2355_v61  ;;  %v2343_v34 = vsub.f32 %v13226_v62, %v2328_v21  ;;  %2369 = vadd.xlane.f32.xlu0 %v2368_v22  ;;  %v2114_v22 = vpop.f32.mrb[56].mxu0 }
 0x4a8   : > { %v13287_v43 = vpop.eup %11799  ;;  %v2357_v26 = vmul.f32 1.442695, %v2343_v34 }
 0x4a9   : > { %v2331_v3 = vpop.xlane.xlu0 %2330  ;;  %v2371_v11 = vsel %vm2310_vm7, %v13287_v43, 0.0 }
 0x4aa   : > { %11805 = vpow2.f32 %v2357_v26  ;;  %v2344_v28 = vsub.f32 %v13230_v16, %v2331_v3  ;;  %2372 = vadd.xlane.f32.xlu1 %v2371_v11  ;;  %v13308_v26 = vadd.f32 %v13259_v45, %v2109_v10  ;;  %v13311_v3 = vadd.f32 %v13259_v45, %v2114_v22  ;;  %v10050_v11 = vpop.f32.mrb[57].mxu0 }
 0x4ac   : > { %v13292_v48 = vpop.eup %11801  ;;  %v2359_v38 = vmul.f32 1.442695, %v2344_v28 }
 0x4ad   : > { %v2334_v40 = vpop.xlane.xlu1 %2333  ;;  %v2374_v42 = vsel %vm2310_vm7, %v13292_v48, 0.0 }
 0x4ae   : > { %11807 = vpow2.f32 %v2359_v38  ;;  %v2345_v62 = vsub.f32 %v13234_v15, %v2334_v40  ;;  %2375 = vadd.xlane.f32.xlu0 %v2374_v42  ;;  %v2107_v15 = vadd.f32 %v13259_v45, %v2106_v63 }
 0x4b0   : > { %v13297_v5 = vpop.eup %11803  ;;  %v2361_v52 = vmul.f32 1.442695, %v2345_v62  ;;  %10126 = vmatpush3.msra.mxu1 %v2107_v15 }
 0x4b1   : > { %v2337_v60 = vpop.xlane.xlu0 %2336  ;;  %v2377_v16 = vsel %vm2310_vm7, %v13297_v5, 0.0  ;;  %11448 = vmatprep.subr.bf16.mxu1 %v16817_v39 }
 0x4b2   : > { %11809 = vpow2.f32 %v2361_v52  ;;  %v2346_v59 = vsub.f32 %v13238_v23, %v2337_v60  ;;  %2378 = vadd.xlane.f32.xlu1 %v2377_v16  ;;  %v11465_v23 = vpack.c.bf16 %v13311_v3, %v13308_v26 }
 0x4b4   : > { %v13302_v61 = vpop.eup %11805  ;;  %v2363_v21 = vmul.f32 1.442695, %v2346_v59 }
 0x4b5   : > { %v2380_v34 = vsel %vm2310_vm7, %v13302_v61, 0.0 }
 0x4b6   : > { %11811 = vpow2.f32 %v2363_v21  ;;  %2381 = vadd.xlane.f32.xlu0 %v2380_v34 }
 0x4b8   : > { %v11808_v28 = vpop.eup %11807 }
 0x4b9   : > { %v2383_v38 = vsel %vm2310_vm7, %v11808_v28, 0.0 }
 0x4ba   : > { %2384 = vadd.xlane.f32.xlu1 %v2383_v38 }
 0x4bc   : > { %v11810_v40 = vpop.eup %11809 }
 0x4bd   : > { %v2386_v42 = vsel %vm2310_vm7, %v11810_v40, 0.0 }
 0x4be   : > { %2387 = vadd.xlane.f32.xlu0 %v2386_v42 }
 0x4c0   : > { %v11812_v62 = vpop.eup %11811 }
 0x4c1   : > { %v2389_v52 = vsel %vm2310_vm7, %v11812_v62, 0.0 }
 0x4c2   : > { %2390 = vadd.xlane.f32.xlu1 %v2389_v52 }
 0x52f   : > { %v2367_v63 = vpop.xlane.xlu1 %2366 }
 0x530   : > { %11813 = vrcp.f32 %v2367_v63 }
 0x533   : > { %v2370_v60 = vpop.xlane.xlu0 %2369 }
 0x534   : > { %11815 = vrcp.f32 %v2370_v60 }
 0x537   : > { %v2373_v16 = vpop.xlane.xlu1 %2372 }
 0x538   : > { %11817 = vrcp.f32 %v2373_v16 }
 0x53a   : > { %v11814_v51 = vpop.eup %11813 }
 0x53b   : > { %v13320_v59 = vmul.f32 %v11814_v51, %v13276_v1  ;;  %v2376_v10 = vpop.xlane.xlu0 %2375 }
 0x53c   : > { %11819 = vrcp.f32 %v2376_v10 }
 0x53d   : > { %16928 = vst [vmem:[#allocation28_spill] sm:$0xff] %v13320_v59  ;;  %10128 = vmatmul.mubr.msk.f32.vlgmr.msra.gmra.mrb[54].mxu1 %vm2310_vm7, %v13320_v59 }
 0x53e   : > { %v11816_v57 = vpop.eup %11815  ;;  %11451 = vmatpush3.bf16.xpose.msk.msra.mxu1 %vm13062_vm6, %v11449_v8  ;;  %10130 = vmatprep.mubr.msk.f32.mxu1 %vm12268_vm3, %v16815_v27 }
 0x53f   : > { %v2379_v21 = vpop.xlane.xlu1 %2378  ;;  %v13332_v15 = vmul.f32 %v11816_v57, %v13281_v0  ;;  %11452 = vmatprep.subr.bf16.mxu1 %v16817_v39 }
 0x540   : > { %11821 = vrcp.f32 %v2379_v21 }
 0x541   : > { %16929 = vst [vmem:[#allocation29_spill] sm:$0xff] %v13332_v15  ;;  %10131 = vmatmul.mubr.msk.f32.gmra.mrb[56].mxu1 %vm2310_vm7, %v13332_v15 }
 0x542   : > { %v11818_v1 = vpop.eup %11817  ;;  %10133 = vmatprep.mubr.msk.f32.mxu1 %vm12268_vm3, %v16815_v27 }
 0x543   : > { %v2382_v55 = vpop.xlane.xlu0 %2381  ;;  %v13340_v56 = vmul.f32 %v11818_v1, %v13287_v43 }
 0x544   : > { %11823 = vrcp.f32 %v2382_v55 }
 0x545   : > { %16930 = vst [vmem:[#allocation30_spill] sm:$0xff] %v13340_v56  ;;  %10134 = vmatmul.mubr.msk.f32.gmra.mrb[58].mxu1 %vm2310_vm7, %v13340_v56 }
 0x546   : > { %v11820_v8 = vpop.eup %11819  ;;  %11455 = vmatpush3.bf16.xpose.msk.msra.mxu1 %vm13062_vm6, %v11453_v2  ;;  %10136 = vmatprep.mubr.msk.f32.mxu1 %vm12268_vm3, %v16815_v27 }
 0x547   : > { %v2385_v0 = vpop.xlane.xlu1 %2384  ;;  %v13352_v22 = vmul.f32 %v11820_v8, %v13292_v48  ;;  %11456 = vmatprep.subr.bf16.mxu1 %v16817_v39 }
 0x548   : > { %11825 = vrcp.f32 %v2385_v0 }
 0x549   : > { %16931 = vst [vmem:[#allocation31_spill] sm:$0xff] %v13352_v22  ;;  %10137 = vmatmul.mubr.msk.f32.gmra.mrb[60].mxu1 %vm2310_vm7, %v13352_v22 }
 0x54a   : > { %v11822_v43 = vpop.eup %11821  ;;  %10139 = vmatprep.mubr.msk.f32.mxu1 %vm12268_vm3, %v16815_v27 }
 0x54b   : > { %v2388_v13 = vpop.xlane.xlu0 %2387  ;;  %v13360_v18 = vmul.f32 %v11822_v43, %v13297_v5 }
 0x54c   : > { %11827 = vrcp.f32 %v2388_v13 }
 0x54d   : > { %16932 = vst [vmem:[#allocation32_spill] sm:$0xff] %v13360_v18  ;;  %10140 = vmatmul.mubr.msk.f32.gmra.mrb[62].mxu1 %vm2310_vm7, %v13360_v18 }
 0x54e   : > { %v11824_v2 = vpop.eup %11823  ;;  %11459 = vmatpush3.bf16.xpose.msk.msra.mxu1 %vm13062_vm6, %v11457_v6  ;;  %10142 = vmatprep.mubr.msk.f32.mxu1 %vm12268_vm3, %v16815_v27 }
 0x54f   : > { %v2391_v48 = vpop.xlane.xlu1 %2390  ;;  %v13372_v34 = vmul.f32 %v11824_v2, %v13302_v61  ;;  %11460 = vmatprep.subr.bf16.mxu1 %v16817_v39 }
 0x550   : > { %11829 = vrcp.f32 %v2391_v48 }
 0x551   : > { %16933 = vst [vmem:[#allocation33_spill] sm:$0xff] %v13372_v34  ;;  %10143 = vmatmul.mubr.msk.f32.gmra.mrb[64].mxu1 %vm2310_vm7, %v13372_v34 }
 0x552   : > { %v11826_v5 = vpop.eup %11825  ;;  %10145 = vmatprep.mubr.msk.f32.mxu1 %vm12268_vm3, %v16815_v27 }
 0x553   : > { %v13379_v41 = vmul.f32 %v11826_v5, %v11808_v28 }
 0x555   : > { %16934 = vst [vmem:[#allocation34_spill] sm:$0xff] %v13379_v41  ;;  %10146 = vmatmul.mubr.msk.f32.gmra.mrb[66].mxu1 %vm2310_vm7, %v13379_v41  ;;  %v16946_v41 = vmov 0.0|0.0  }
 0x556   : > { %v11828_v36 = vpop.eup %11827  ;;  %11463 = vmatpush3.bf16.xpose.msk.msra.mxu1 %vm13062_vm6, %v11461_v31  ;;  %10148 = vmatprep.mubr.msk.f32.mxu1 %vm12268_vm3, %v16815_v27  ;;  %v1838_v31 = vadd.f32 %v13086_v44, %v13248_v37  ;;  %v1854_v37 = vadd.f32 %v13086_v44, %v13256_v53 }
 0x557   : > { %v13390_v6 = vmul.f32 %v11828_v36, %v11810_v40  ;;  %10170 = vmatprep.subr.mxu1 %v16815_v27 }
 0x559   : > { %16935 = vst [vmem:[#allocation35_spill] sm:$0xff] %v13390_v6  ;;  %10149 = vmatmul.mubr.msk.f32.gmra.mrb[68].mxu1 %vm2310_vm7, %v13390_v6 }
 0x55a   : > { %v11830_v61 = vpop.eup %11829  ;;  %10151 = vmatprep.mubr.msk.f32.mxu1 %vm12268_vm3, %v16815_v27 }
 0x55b   : > { %v13397_v11 = vmul.f32 %v11830_v61, %v11812_v62 }
 0x55d   : > { %16936 = vst [vmem:[#allocation36_spill] sm:$0xff] %v13397_v11  ;;  %10152 = vmatmul.mubr.msk.f32.gmra.mrb[70].mxu1 %vm2310_vm7, %v13397_v11 }
 0x55e   : > { %10171 = vmatpush3.xpose.msk.msra.mxu1 %vm2145_vm5, %v1998_v24  ;;  %10172 = vmatprep.mubr.msk.f32.mxu1 %vm12268_vm3, %v16815_v27 }
 0x55f   : > { %11464 = vmatprep.subr.bf16.mxu1 %v16817_v39 }
 0x561   : > { %10173 = vmatmul.mubr.msk.f32.vlgmr.msra.gmra.mrb[72].mxu1 %vm2145_vm5, %v1822_v7 }
 0x562   : > { %11466 = vmatpush3.bf16.msra.mxu1 %v11465_v23  ;;  %10175 = vmatprep.mubr.msk.f32.mxu1 %vm12268_vm3, %v16815_v27 }
 0x563   : > { %11467 = vmatprep.subr.bf16.mxu1 %v16817_v39 }
 0x565   : > { %10176 = vmatmul.mubr.msk.f32.gmra.mrb[74].mxu1 %vm2145_vm5, %v1827_v50 }
 0x566   : > { %10178 = vmatprep.mubr.msk.f32.mxu1 %vm12268_vm3, %v16815_v27 }
 0x569   : > { %10179 = vmatmul.mubr.msk.f32.gmra.mrb[76].mxu1 %vm2145_vm5, %v1830_v54 }
 0x56a   : > { %10181 = vmatprep.mubr.msk.f32.mxu1 %vm12268_vm3, %v16815_v27 }
 0x56d   : > { %10182 = vmatmul.mubr.msk.f32.gmra.mrb[78].mxu1 %vm2145_vm5, %v1835_v17 }
 0x56e   : > { %10184 = vmatprep.mubr.msk.f32.mxu1 %vm12268_vm3, %v16815_v27 }
 0x571   : > { %10185 = vmatmul.mubr.msk.f32.gmra.mrb[80].mxu1 %vm2145_vm5, %v1838_v31 }
 0x572   : > { %10187 = vmatprep.mubr.msk.f32.mxu1 %vm12268_vm3, %v16815_v27 }
 0x575   : > { %10188 = vmatmul.mubr.msk.f32.gmra.mrb[82].mxu1 %vm2145_vm5, %v1843_v4 }
 0x576   : > { %10190 = vmatprep.mubr.msk.f32.mxu1 %vm12268_vm3, %v16815_v27 }
 0x579   : > { %10191 = vmatmul.mubr.msk.f32.gmra.mrb[84].mxu1 %vm2145_vm5, %v1846_v20 }
 0x57a   : > { %10193 = vmatprep.mubr.msk.f32.mxu1 %vm12268_vm3, %v16815_v27 }
 0x57d   : > { %10194 = vmatmul.mubr.msk.f32.gmra.mrb[86].mxu1 %vm2145_vm5, %v1851_v35 }
 0x57e   : > { %10196 = vmatprep.mubr.msk.f32.mxu1 %vm12268_vm3, %v16815_v27 }
 0x581   : > { %10197 = vmatmul.mubr.msk.f32.gmra.mrb[88].mxu1 %vm2145_vm5, %v1854_v37 }
 0x582   : > { %10217 = vmatprep.mubr.msk.f32.mxu1 %vm12268_vm3, %v16815_v27 }
 0x610   : > { %v13456_v14 = vpop.f32.mrb[54].mxu1 }
 0x611   : > { %v10129_v29 = vpop.f32.mrb[55].mxu1 }
 0x614   : > { %v13458_v26 = vpop.f32.mrb[56].mxu1 }
 0x615   : > { %v10132_v3 = vpop.f32.mrb[57].mxu1 }
 0x618   : > { %v13462_v23 = vpop.f32.mrb[58].mxu1 }
 0x619   : > { %v10135_v28 = vpop.f32.mrb[59].mxu1 }
 0x61c   : > { %v13464_v38 = vpop.f32.mrb[60].mxu1 }
 0x61d   : > { %v10138_v53 = vpop.f32.mrb[61].mxu1 }
 0x620   : > { %v13468_v40 = vpop.f32.mrb[62].mxu1 }
 0x621   : > { %v10141_v42 = vpop.f32.mrb[63].mxu1 }
 0x624   : > { %v13470_v62 = vpop.f32.mrb[64].mxu1 }
 0x625   : > { %v10144_v63 = vpop.f32.mrb[65].mxu1 }
 0x628   : > { %v13474_v60 = vpop.f32.mrb[66].mxu1 }
 0x629   : > { %v10147_v16 = vpop.f32.mrb[67].mxu1 }
 0x62c   : > { %v13476_v51 = vpop.f32.mrb[68].mxu1 }
 0x62d   : > { %v10150_v57 = vpop.f32.mrb[69].mxu1 }
 0x62e   : > { %v2117_v57 = vpop.f32.mrb[58].mxu0 }
 0x630   : > { %v13480_v21 = vpop.f32.mrb[70].mxu1 }
 0x631   : > { %v10153_v1 = vpop.f32.mrb[71].mxu1 }
 0x632   : > { %v2118_v1 = vadd.f32 %v13259_v45, %v2117_v57 }
 0x634   : > { %v13482_v55 = vpop.f32.mrb[72].mxu1 }
 0x635   : > { %v10174_v8 = vpop.f32.mrb[73].mxu1  ;;  %v2711_v0 = vsel %vm2310_vm7, %v13482_v55, -inf }
 0x636   : > { %2712 = vmax.xlane.f32.xlu0 %v2711_v0  ;;  %v10051_v8 = vpop.f32.mrb[59].mxu0 }
 0x637   : > { %v2122_v0 = vpop.f32.mrb[60].mxu0 }
 0x638   : > { %v13486_v43 = vpop.f32.mrb[74].mxu1 }
 0x639   : > { %v10177_v13 = vpop.f32.mrb[75].mxu1  ;;  %v2714_v2 = vsel %vm2310_vm7, %v13486_v43, -inf }
 0x63a   : > { %2715 = vmax.xlane.f32.xlu1 %v2714_v2  ;;  %v2123_v13 = vadd.f32 %v13259_v45, %v2122_v0  ;;  %v10054_v2 = vpop.f32.mrb[61].mxu0 }
 0x63c   : > { %v13490_v48 = vpop.f32.mrb[76].mxu1 }
 0x63d   : > { %v10180_v5 = vpop.f32.mrb[77].mxu1  ;;  %v2717_v36 = vsel %vm2310_vm7, %v13490_v48, -inf }
 0x63e   : > { %2718 = vmax.xlane.f32.xlu0 %v2717_v36  ;;  %v2125_v5 = vpop.f32.mrb[62].mxu0  ;;  %v11468_v36 = vpack.c.bf16 %v2123_v13, %v2118_v1 }
 0x640   : > { %v13494_v61 = vpop.f32.mrb[78].mxu1  ;;  %11469 = vmatpush3.bf16.msra.mxu1 %v11468_v36 }
 0x641   : > { %v10183_v24 = vpop.f32.mrb[79].mxu1  ;;  %v2720_v7 = vsel %vm2310_vm7, %v13494_v61, -inf  ;;  %11470 = vmatprep.subr.bf16.mxu1 %v16817_v39 }
 0x642   : > { %2721 = vmax.xlane.f32.xlu1 %v2720_v7  ;;  %v2126_v24 = vadd.f32 %v13259_v45, %v2125_v5  ;;  %v10055_v7 = vpop.f32.mrb[63].mxu0 }
 0x644   : > { %v13498_v50 = vpop.f32.mrb[80].mxu1 }
 0x645   : > { %v10186_v54 = vpop.f32.mrb[81].mxu1  ;;  %v2723_v17 = vsel %vm2310_vm7, %v13498_v50, -inf }
 0x646   : > { %2724 = vmax.xlane.f32.xlu0 %v2723_v17  ;;  %v2130_v54 = vpop.f32.mrb[64].mxu0 }
 0x647   : > { %v2131_v17 = vadd.f32 %v13259_v45, %v2130_v54 }
 0x648   : > { %v13502_v31 = vpop.f32.mrb[82].mxu1 }
 0x649   : > { %v10189_v4 = vpop.f32.mrb[83].mxu1  ;;  %v2726_v20 = vsel %vm2310_vm7, %v13502_v31, -inf }
 0x64a   : > { %2727 = vmax.xlane.f32.xlu1 %v2726_v20  ;;  %v10058_v4 = vpop.f32.mrb[65].mxu0 }
 0x64b   : > { %v2133_v20 = vpop.f32.mrb[66].mxu0 }
 0x64c   : > { %v13506_v35 = vpop.f32.mrb[84].mxu1 }
 0x64d   : > { %v10192_v37 = vpop.f32.mrb[85].mxu1  ;;  %v2729_v29 = vsel %vm2310_vm7, %v13506_v35, -inf }
 0x64e   : > { %2730 = vmax.xlane.f32.xlu0 %v2729_v29  ;;  %v11471_v37 = vpack.c.bf16 %v2131_v17, %v2126_v24  ;;  %v2134_v29 = vadd.f32 %v13259_v45, %v2133_v20 }
 0x650   : > { %v13510_v3 = vpop.f32.mrb[86].mxu1  ;;  %11472 = vmatpush3.bf16.msra.mxu1 %v11471_v37 }
 0x651   : > { %v10195_v28 = vpop.f32.mrb[87].mxu1  ;;  %v2732_v53 = vsel %vm2310_vm7, %v13510_v3, -inf  ;;  %11473 = vmatprep.subr.bf16.mxu1 %v16817_v39 }
 0x652   : > { %2733 = vmax.xlane.f32.xlu1 %v2732_v53  ;;  %v10059_v28 = vpop.f32.mrb[67].mxu0 }
 0x653   : > { %v2138_v53 = vpop.f32.mrb[68].mxu0 }
 0x654   : > { %v13514_v42 = vpop.f32.mrb[88].mxu1 }
 0x655   : > { %v10198_v63 = vpop.f32.mrb[89].mxu1  ;;  %v2735_v16 = vsel %vm2310_vm7, %v13514_v42, -inf }
 0x656   : > { %2736 = vmax.xlane.f32.xlu0 %v2735_v16  ;;  %v2139_v63 = vadd.f32 %v13259_v45, %v2138_v53  ;;  %v10062_v16 = vpop.f32.mrb[69].mxu0 }
 0x658   : > { %v11474_v57 = vpack.c.bf16 %v2139_v63, %v2134_v29 }
 0x65a   : > { %11475 = vmatpush3.bf16.msra.mxu1 %v11474_v57 }
 0x65b   : > { %10215 = vmatprep.subr.mxu1 %v16815_v27 }
 0x6c3   : > { %v2713_v1 = vpop.xlane.xlu0 %2712 }
 0x6c4   : > { %v2738_v8 = vsub.f32 %v13482_v55, %v2713_v1 }
 0x6c6   : > { %v2747_v0 = vmul.f32 1.442695, %v2738_v8 }
 0x6c7   : > { %v2716_v13 = vpop.xlane.xlu1 %2715 }
 0x6c8   : > { %11831 = vpow2.f32 %v2747_v0  ;;  %v2739_v2 = vsub.f32 %v13486_v43, %v2716_v13 }
 0x6ca   : > { %v2749_v5 = vmul.f32 1.442695, %v2739_v2 }
 0x6cb   : > { %v2719_v36 = vpop.xlane.xlu0 %2718 }
 0x6cc   : > { %11833 = vpow2.f32 %v2749_v5  ;;  %v2740_v24 = vsub.f32 %v13490_v48, %v2719_v36 }
 0x6ce   : > { %v2751_v7 = vmul.f32 1.442695, %v2740_v24 }
 0x6cf   : > { %v2722_v54 = vpop.xlane.xlu1 %2721 }
 0x6d0   : > { %11835 = vpow2.f32 %v2751_v7  ;;  %v2741_v17 = vsub.f32 %v13494_v61, %v2722_v54  ;;  %v2141_v54 = vpop.f32.mrb[70].mxu0 }
 0x6d2   : > { %v13531_v4 = vpop.eup %11831  ;;  %v2753_v20 = vmul.f32 1.442695, %v2741_v17 }
 0x6d3   : > { %v2725_v37 = vpop.xlane.xlu0 %2724  ;;  %v2765_v55 = vsel %vm2310_vm7, %v13531_v4, 0.0 }
 0x6d4   : > { %11837 = vpow2.f32 %v2753_v20  ;;  %v2742_v43 = vsub.f32 %v13498_v50, %v2725_v37  ;;  %2766 = vadd.xlane.f32.xlu1 %v2765_v55  ;;  %v10063_v37 = vpop.f32.mrb[71].mxu0  ;;  %v2142_v55 = vadd.f32 %v13259_v45, %v2141_v54 }
 0x6d6   : > { %v13536_v29 = vpop.eup %11833  ;;  %v2755_v28 = vmul.f32 1.442695, %v2742_v43  ;;  %10216 = vmatpush3.msra.mxu1 %v2142_v55 }
 0x6d7   : > { %v2728_v48 = vpop.xlane.xlu1 %2727  ;;  %v2768_v53 = vsel %vm2310_vm7, %v13536_v29, 0.0  ;;  %10288 = vmatprep.subr.bf16.mxu1 %v16815_v27 }
 0x6d8   : > { %11839 = vpow2.f32 %v2755_v28  ;;  %v2743_v61 = vsub.f32 %v13502_v31, %v2728_v48  ;;  %2769 = vadd.xlane.f32.xlu0 %v2768_v53 }
 0x6da   : > { %v13541_v63 = vpop.eup %11835  ;;  %v2757_v16 = vmul.f32 1.442695, %v2743_v61  ;;  %v11751_v61 = vld [vmem:[%s16917_s28 + $0x20] sm:$0xff]  }
 0x6db   : > { %v2731_v57 = vpop.xlane.xlu0 %2730  ;;  %v2771_v1 = vsel %vm2310_vm7, %v13541_v63, 0.0  ;;  %10245 = vmatpush3.bf16.msra.mxu0 %v11751_v61 }
 0x6dc   : > { %11841 = vpow2.f32 %v2757_v16  ;;  %v2744_v50 = vsub.f32 %v13506_v35, %v2731_v57  ;;  %2772 = vadd.xlane.f32.xlu1 %v2771_v1  ;;  %10246 = vmatprep.subr.bf16.mxu0 %v16815_v27  ;;  %v11752_v16 = vld [vmem:[%s16917_s28 + $0x28] sm:$0xff]   ;;  %v11753_v57 = vld [vmem:[%s16917_s28 + $0x30] sm:$0xff]   ;;  %v11754_v1 = vld [vmem:[%s16917_s28 + $0x38] sm:$0xff]  }
 0x6de   : > { %v13546_v8 = vpop.eup %11837  ;;  %v2759_v0 = vmul.f32 1.442695, %v2744_v50 }
 0x6df   : > { %v2734_v13 = vpop.xlane.xlu1 %2733  ;;  %v2774_v2 = vsel %vm2310_vm7, %v13546_v8, 0.0  ;;  %10247 = vmatpush3.bf16.msra.mxu0 %v11752_v16 }
 0x6e0   : > { %11843 = vpow2.f32 %v2759_v0  ;;  %v2745_v31 = vsub.f32 %v13510_v3, %v2734_v13  ;;  %2775 = vadd.xlane.f32.xlu0 %v2774_v2  ;;  %10248 = vmatprep.subr.bf16.mxu0 %v16815_v27 }
 0x6e2   : > { %v13551_v5 = vpop.eup %11839  ;;  %v2761_v36 = vmul.f32 1.442695, %v2745_v31  ;;  %v11747_v31 = vld [vmem:[%s16916_s20 + $0x20] sm:$0xff]  }
 0x6e3   : > { %v2737_v24 = vpop.xlane.xlu0 %2736  ;;  %v2777_v7 = vsel %vm2310_vm7, %v13551_v5, 0.0  ;;  %10249 = vmatpush3.bf16.msra.mxu0 %v11753_v57 }
 0x6e4   : > { %11845 = vpow2.f32 %v2761_v36  ;;  %v2746_v35 = vsub.f32 %v13514_v42, %v2737_v24  ;;  %2778 = vadd.xlane.f32.xlu1 %v2777_v7  ;;  %10250 = vmatprep.subr.bf16.mxu0 %v16815_v27 }
 0x6e6   : > { %v13556_v17 = vpop.eup %11841  ;;  %v2763_v20 = vmul.f32 1.442695, %v2746_v35  ;;  %v11748_v35 = vld [vmem:[%s16916_s20 + $0x28] sm:$0xff]  }
 0x6e7   : > { %v2780_v3 = vsel %vm2310_vm7, %v13556_v17, 0.0  ;;  %10251 = vmatpush3.bf16.msra.mxu0 %v11754_v1 }
 0x6e8   : > { %11847 = vpow2.f32 %v2763_v20  ;;  %2781 = vadd.xlane.f32.xlu0 %v2780_v3  ;;  %10332 = vmatprep.subr.bf16.mxu0 %v16815_v27 }
 0x6ea   : > { %v13561_v43 = vpop.eup %11843  ;;  %10253 = vmatmul.mubr.msk.bf16.vlgmr.msra.gmra.mrb[72].mxu0 %vm1724_vm4, %v12960_v25 }
 0x6eb   : > { %v2783_v42 = vsel %vm2310_vm7, %v13561_v43, 0.0  ;;  %10256 = vmatprep.mubr.msk.bf16.mxu0 %vm12268_vm3, %v16815_v27 }
 0x6ec   : > { %2784 = vadd.xlane.f32.xlu1 %v2783_v42  ;;  %v11750_v42 = vld [vmem:[%s16916_s20 + $0x38] sm:$0xff]  }
 0x6ee   : > { %v13566_v28 = vpop.eup %11845 }
 0x6ef   : > { %v2786_v48 = vsel %vm2310_vm7, %v13566_v28, 0.0 }
 0x6f0   : > { %2787 = vadd.xlane.f32.xlu0 %v2786_v48 }
 0x6f2   : > { %v13570_v45 = vpop.eup %11847  ;;  %10257 = vmatmul.mubr.msk.bf16.gmra.mrb[76].mxu0 %vm1724_vm4, %v12969_v30 }
 0x6f3   : > { %v2789_v53 = vsel %vm2310_vm7, %v13570_v45, 0.0  ;;  %10260 = vmatprep.mubr.msk.bf16.mxu0 %vm12268_vm3, %v16815_v27 }
 0x6f4   : > { %2790 = vadd.xlane.f32.xlu1 %v2789_v53 }
 0x6fa   : > { %10261 = vmatmul.mubr.msk.bf16.gmra.mrb[80].mxu0 %vm1724_vm4, %v12980_v32 }
 0x6fb   : > { %10264 = vmatprep.mubr.msk.bf16.mxu0 %vm12268_vm3, %v16815_v27 }
 0x702   : > { %10265 = vmatmul.mubr.msk.bf16.gmra.mrb[84].mxu0 %vm1724_vm4, %v12990_v9 }
 0x703   : > { %10268 = vmatprep.mubr.msk.bf16.mxu0 %vm12268_vm3, %v16815_v27 }
 0x70a   : > { %10269 = vmatmul.mubr.msk.bf16.gmra.mrb[88].mxu0 %vm1724_vm4, %v13000_v47 }
 0x70b   : > { %10272 = vmatprep.mubr.msk.bf16.mxu0 %vm12268_vm3, %v16815_v27 }
 0x712   : > { %10273 = vmatmul.mubr.msk.bf16.gmra.mrb[92].mxu0 %vm1724_vm4, %v13010_v12 }
 0x713   : > { %10276 = vmatprep.mubr.msk.bf16.mxu0 %vm12268_vm3, %v16815_v27 }
 0x71a   : > { %10277 = vmatmul.mubr.msk.bf16.gmra.mrb[96].mxu0 %vm1724_vm4, %v13025_v19 }
 0x71b   : > { %10280 = vmatprep.mubr.msk.bf16.mxu0 %vm12268_vm3, %v16815_v27 }
 0x722   : > { %10281 = vmatmul.mubr.msk.bf16.gmra.mrb[100].mxu0 %vm1724_vm4, %v13035_v46 }
 0x723   : > { %10284 = vmatprep.mubr.msk.bf16.mxu0 %vm12268_vm3, %v16815_v27 }
 0x72a   : > { %10285 = vmatmul.mubr.msk.bf16.gmra.mrb[104].mxu0 %vm1724_vm4, %v13045_v49 }
 0x72b   : > { %10340 = vmatprep.mubr.msk.bf16.mxu0 %vm12268_vm3, %v16815_v27 }
 0x761   : > { %v2767_v50 = vpop.xlane.xlu1 %2766 }
 0x762   : > { %11849 = vrcp.f32 %v2767_v50 }
 0x765   : > { %v2770_v0 = vpop.xlane.xlu0 %2769 }
 0x766   : > { %11851 = vrcp.f32 %v2770_v0 }
 0x769   : > { %v2773_v13 = vpop.xlane.xlu1 %2772 }
 0x76a   : > { %11853 = vrcp.f32 %v2773_v13 }
 0x76c   : > { %v11850_v2 = vpop.eup %11849 }
 0x76d   : > { %v13612_v36 = vmul.f32 %v11850_v2, %v13531_v4  ;;  %v2776_v24 = vpop.xlane.xlu0 %2775  ;;  %v11757_v2 = vld [vmem:[%s12481_s25 + $0x30] sm:$0xff]  }
 0x76e   : > { %11855 = vrcp.f32 %v2776_v24 }
 0x76f   : > { %16937 = vst [vmem:[#allocation37_spill] sm:$0xff] %v13612_v36  ;;  %10218 = vmatmul.mubr.msk.f32.vlgmr.msra.gmra.mrb[90].mxu1 %vm2310_vm7, %v13612_v36 }
 0x770   : > { %v11852_v7 = vpop.eup %11851  ;;  %10220 = vmatprep.mubr.msk.f32.mxu1 %vm12268_vm3, %v16815_v27  ;;  %10289 = vmatpush3.bf16.msra.mxu1 %v11747_v31  ;;  %v11758_v31 = vld [vmem:[%s12481_s25 + $0x38] sm:$0xff]  }
 0x771   : > { %v2779_v54 = vpop.xlane.xlu1 %2778  ;;  %v13620_v20 = vmul.f32 %v11852_v7, %v13536_v29  ;;  %10290 = vmatprep.subr.bf16.mxu1 %v16815_v27  ;;  %v11749_v29 = vld [vmem:[%s16916_s20 + $0x30] sm:$0xff]  }
 0x772   : > { %11857 = vrcp.f32 %v2779_v54 }
 0x773   : > { %16938 = vst [vmem:[#allocation38_spill] sm:$0xff] %v13620_v20  ;;  %10221 = vmatmul.mubr.msk.f32.gmra.mrb[92].mxu1 %vm2310_vm7, %v13620_v20 }
 0x774   : > { %v11854_v4 = vpop.eup %11853  ;;  %10223 = vmatprep.mubr.msk.f32.mxu1 %vm12268_vm3, %v16815_v27  ;;  %10291 = vmatpush3.bf16.msra.mxu1 %v11748_v35 }
 0x775   : > { %v2782_v37 = vpop.xlane.xlu0 %2781  ;;  %v13633_v3 = vmul.f32 %v11854_v4, %v13541_v63  ;;  %10292 = vmatprep.subr.bf16.mxu1 %v16815_v27 }
 0x776   : > { %11859 = vrcp.f32 %v2782_v37 }
 0x777   : > { %16939 = vst [vmem:[#allocation39_spill] sm:$0xff] %v13633_v3  ;;  %10224 = vmatmul.mubr.msk.f32.gmra.mrb[94].mxu1 %vm2310_vm7, %v13633_v3 }
 0x778   : > { %v11856_v55 = vpop.eup %11855  ;;  %10226 = vmatprep.mubr.msk.f32.mxu1 %vm12268_vm3, %v16815_v27  ;;  %10293 = vmatpush3.bf16.msra.mxu1 %v11749_v29 }
 0x779   : > { %v2785_v48 = vpop.xlane.xlu1 %2784  ;;  %v13642_v53 = vmul.f32 %v11856_v55, %v13546_v8  ;;  %10294 = vmatprep.subr.bf16.mxu1 %v16815_v27 }
 0x77a   : > { %11861 = vrcp.f32 %v2785_v48 }
 0x77b   : > { %16940 = vst [vmem:[#allocation40_spill] sm:$0xff] %v13642_v53  ;;  %10227 = vmatmul.mubr.msk.f32.gmra.mrb[96].mxu1 %vm2310_vm7, %v13642_v53 }
 0x77c   : > { %v11858_v63 = vpop.eup %11857  ;;  %10229 = vmatprep.mubr.msk.f32.mxu1 %vm12268_vm3, %v16815_v27  ;;  %10295 = vmatpush3.bf16.msra.mxu1 %v11750_v42 }
 0x77d   : > { %v2788_v61 = vpop.xlane.xlu0 %2787  ;;  %v13654_v8 = vmul.f32 %v11858_v63, %v13551_v5  ;;  %11476 = vmatprep.subr.bf16.mxu1 %v16817_v39 }
 0x77e   : > { %11863 = vrcp.f32 %v2788_v61 }
 0x77f   : > { %16941 = vst [vmem:[#allocation41_spill] sm:$0xff] %v13654_v8  ;;  %10230 = vmatmul.mubr.msk.f32.gmra.mrb[98].mxu1 %vm2310_vm7, %v13654_v8 }
 0x780   : > { %v11860_v16 = vpop.eup %11859  ;;  %10232 = vmatprep.mubr.msk.f32.mxu1 %vm12268_vm3, %v16815_v27 }
 0x781   : > { %v2791_v57 = vpop.xlane.xlu1 %2790  ;;  %v13662_v1 = vmul.f32 %v11860_v16, %v13556_v17 }
 0x782   : > { %11865 = vrcp.f32 %v2791_v57 }
 0x783   : > { %16942 = vst [vmem:[#allocation42_spill] sm:$0xff] %v13662_v1  ;;  %10233 = vmatmul.mubr.msk.f32.gmra.mrb[100].mxu1 %vm2310_vm7, %v13662_v1 }
 0x784   : > { %v11862_v5 = vpop.eup %11861  ;;  %10235 = vmatprep.mubr.msk.f32.mxu1 %vm12268_vm3, %v16815_v27 }
 0x785   : > { %v13669_v50 = vmul.f32 %v11862_v5, %v13561_v43 }
 0x787   : > { %16943 = vst [vmem:[#allocation43_spill] sm:$0xff] %v13669_v50  ;;  %10236 = vmatmul.mubr.msk.f32.gmra.mrb[102].mxu1 %vm2310_vm7, %v13669_v50 }
 0x788   : > { %v11864_v0 = vpop.eup %11863  ;;  %10238 = vmatprep.mubr.msk.f32.mxu1 %vm12268_vm3, %v16815_v27 }
 0x789   : > { %v13676_v17 = vmul.f32 %v11864_v0, %v13566_v28  ;;  %v11755_v28 = vld [vmem:[%s12481_s25 + $0x20] sm:$0xff]  }
 0x78a   : > { %10333 = vmatpush3.bf16.msra.mxu0 %v11755_v28 }
 0x78b   : > { %16944 = vst [vmem:[#allocation44_spill] sm:$0xff] %v13676_v17  ;;  %10239 = vmatmul.mubr.msk.f32.gmra.mrb[104].mxu1 %vm2310_vm7, %v13676_v17  ;;  %10334 = vmatprep.subr.bf16.mxu0 %v16815_v27 }
 0x78c   : > { %v11866_v13 = vpop.eup %11865  ;;  %10241 = vmatprep.mubr.msk.f32.mxu1 %vm12268_vm3, %v16815_v27 }
 0x78d   : > { %v13683_v43 = vmul.f32 %v11866_v13, %v13570_v45  ;;  %v11756_v45 = vld [vmem:[%s12481_s25 + $0x28] sm:$0xff]  }
 0x78e   : > { %10335 = vmatpush3.bf16.msra.mxu0 %v11756_v45 }
 0x78f   : > { %16945 = vst [vmem:[#allocation45_spill] sm:$0xff] %v13683_v43  ;;  %10242 = vmatmul.mubr.msk.f32.gmra.mrb[106].mxu1 %vm2310_vm7, %v13683_v43  ;;  %10336 = vmatprep.subr.bf16.mxu0 %v16815_v27 }
 0x790   : > { %10296 = vmatprep.mubr.msk.bf16.mxu1 %vm12268_vm3, %v16815_v27 }
 0x792   : > { %10337 = vmatpush3.bf16.msra.mxu0 %v11757_v2 }
 0x793   : > { %10297 = vmatmul.mubr.msk.bf16.vlgmr.msra.gmra.mrb[108].mxu1 %vm1724_vm4, %v12960_v25  ;;  %10338 = vmatprep.subr.bf16.mxu0 %v16815_v27 }
 0x794   : > { %10300 = vmatprep.mubr.msk.bf16.mxu1 %vm12268_vm3, %v16815_v27 }
 0x796   : > { %10339 = vmatpush3.bf16.msra.mxu0 %v11758_v31 }
 0x797   : > { %11504 = vmatprep.subr.bf16.mxu0 %v16817_v39 }
 0x799   : > { %10341 = vmatmul.mubr.msk.bf16.vlgmr.msra.gmra.mrb[108].mxu0 %vm1724_vm4, %v12960_v25 }
 0x79a   : > { %10344 = vmatprep.mubr.msk.bf16.mxu0 %vm12268_vm3, %v16815_v27 }
 0x79b   : > { %10301 = vmatmul.mubr.msk.bf16.gmra.mrb[112].mxu1 %vm1724_vm4, %v12969_v30 }
 0x79c   : > { %10304 = vmatprep.mubr.msk.bf16.mxu1 %vm12268_vm3, %v16815_v27 }
 0x7a1   : > { %10345 = vmatmul.mubr.msk.bf16.gmra.mrb[112].mxu0 %vm1724_vm4, %v12969_v30 }
 0x7a2   : > { %10348 = vmatprep.mubr.msk.bf16.mxu0 %vm12268_vm3, %v16815_v27 }
 0x7a3   : > { %10305 = vmatmul.mubr.msk.bf16.gmra.mrb[116].mxu1 %vm1724_vm4, %v12980_v32 }
 0x7a4   : > { %10308 = vmatprep.mubr.msk.bf16.mxu1 %vm12268_vm3, %v16815_v27 }
 0x7a9   : > { %10349 = vmatmul.mubr.msk.bf16.gmra.mrb[116].mxu0 %vm1724_vm4, %v12980_v32 }
 0x7aa   : > { %10352 = vmatprep.mubr.msk.bf16.mxu0 %vm12268_vm3, %v16815_v27 }
 0x7ab   : > { %10309 = vmatmul.mubr.msk.bf16.gmra.mrb[120].mxu1 %vm1724_vm4, %v12990_v9 }
 0x7ac   : > { %10312 = vmatprep.mubr.msk.bf16.mxu1 %vm12268_vm3, %v16815_v27 }
 0x7b1   : > { %10353 = vmatmul.mubr.msk.bf16.gmra.mrb[120].mxu0 %vm1724_vm4, %v12990_v9 }
 0x7b2   : > { %10356 = vmatprep.mubr.msk.bf16.mxu0 %vm12268_vm3, %v16815_v27 }
 0x7b3   : > { %10313 = vmatmul.mubr.msk.bf16.gmra.mrb[124].mxu1 %vm1724_vm4, %v13000_v47 }
 0x7b4   : > { %10316 = vmatprep.mubr.msk.bf16.mxu1 %vm12268_vm3, %v16815_v27 }
 0x7b9   : > { %10357 = vmatmul.mubr.msk.bf16.gmra.mrb[124].mxu0 %vm1724_vm4, %v13000_v47 }
 0x7ba   : > { %10360 = vmatprep.mubr.msk.bf16.mxu0 %vm12268_vm3, %v16815_v27 }
 0x7bb   : > { %10317 = vmatmul.mubr.msk.bf16.gmra.mrb[128].mxu1 %vm1724_vm4, %v13010_v12 }
 0x7bc   : > { %10320 = vmatprep.mubr.msk.bf16.mxu1 %vm12268_vm3, %v16815_v27 }
 0x7bd   : > { %v13753_v24 = vpop.f32.mrb[72].mxu0 }
 0x7be   : > { %v10254_v7 = vpop.f32.mrb[73].mxu0 }
 0x7bf   : > { %v13755_v35 = vpop.f32.mrb[74].mxu0 }
 0x7c0   : > { %v10255_v54 = vpop.f32.mrb[75].mxu0 }
 0x7c1   : > { %10361 = vmatmul.mubr.msk.bf16.gmra.mrb[128].mxu0 %vm1724_vm4, %v13010_v12 }
 0x7c2   : > { %10364 = vmatprep.mubr.msk.bf16.mxu0 %vm12268_vm3, %v16815_v27 }
 0x7c3   : > { %10321 = vmatmul.mubr.msk.bf16.gmra.mrb[132].mxu1 %vm1724_vm4, %v13025_v19 }
 0x7c4   : > { %10324 = vmatprep.mubr.msk.bf16.mxu1 %vm12268_vm3, %v16815_v27 }
 0x7c5   : > { %v13761_v4 = vpop.f32.mrb[76].mxu0 }
 0x7c6   : > { %v10258_v29 = vpop.f32.mrb[77].mxu0 }
 0x7c7   : > { %v13763_v37 = vpop.f32.mrb[78].mxu0 }
 0x7c8   : > { %v10259_v55 = vpop.f32.mrb[79].mxu0 }
 0x7c9   : > { %10365 = vmatmul.mubr.msk.bf16.gmra.mrb[132].mxu0 %vm1724_vm4, %v13025_v19 }
 0x7ca   : > { %10368 = vmatprep.mubr.msk.bf16.mxu0 %vm12268_vm3, %v16815_v27 }
 0x7cb   : > { %10325 = vmatmul.mubr.msk.bf16.gmra.mrb[136].mxu1 %vm1724_vm4, %v13035_v46 }
 0x7cc   : > { %10328 = vmatprep.mubr.msk.bf16.mxu1 %vm12268_vm3, %v16815_v27 }
 0x7cd   : > { %v13769_v42 = vpop.f32.mrb[80].mxu0 }
 0x7ce   : > { %v10262_v48 = vpop.f32.mrb[81].mxu0 }
 0x7cf   : > { %v13771_v63 = vpop.f32.mrb[82].mxu0 }
 0x7d0   : > { %v10263_v61 = vpop.f32.mrb[83].mxu0 }
 0x7d1   : > { %10369 = vmatmul.mubr.msk.bf16.gmra.mrb[136].mxu0 %vm1724_vm4, %v13035_v46 }
 0x7d2   : > { %10372 = vmatprep.mubr.msk.bf16.mxu0 %vm12268_vm3, %v16815_v27 }
 0x7d3   : > { %10329 = vmatmul.mubr.msk.bf16.gmra.mrb[140].mxu1 %vm1724_vm4, %v13045_v49 }
 0x7d4   : > { %10394 = vmatprep.mubr.msk.f32.mxu1 %vm12268_vm3, %v16815_v27 }
 0x7d5   : > { %v13777_v16 = vpop.f32.mrb[84].mxu0 }
 0x7d6   : > { %v10266_v57 = vpop.f32.mrb[85].mxu0 }
 0x7d7   : > { %v13779_v5 = vpop.f32.mrb[86].mxu0 }
 0x7d8   : > { %v10267_v0 = vpop.f32.mrb[87].mxu0 }
 0x7d9   : > { %10373 = vmatmul.mubr.msk.bf16.gmra.mrb[140].mxu0 %vm1724_vm4, %v13045_v49 }
 0x7da   : > { %10484 = vmatprep.mubr.msk.f32.mxu0 %vm12268_vm3, %v16815_v27 }
 0x7dd   : > { %v13785_v13 = vpop.f32.mrb[88].mxu0 }
 0x7de   : > { %v10270_v28 = vpop.f32.mrb[89].mxu0 }
 0x7df   : > { %v13787_v45 = vpop.f32.mrb[90].mxu0 }
 0x7e0   : > { %v10271_v2 = vpop.f32.mrb[91].mxu0 }
 0x7e5   : > { %v13789_v31 = vpop.f32.mrb[92].mxu0 }
 0x7e6   : > { %v10274_v7 = vpop.f32.mrb[93].mxu0 }
 0x7e7   : > { %v13791_v54 = vpop.f32.mrb[94].mxu0 }
 0x7e8   : > { %v10275_v29 = vpop.f32.mrb[95].mxu0 }
 0x7ed   : > { %v13793_v55 = vpop.f32.mrb[96].mxu0 }
 0x7ee   : > { %v10278_v48 = vpop.f32.mrb[97].mxu0 }
 0x7ef   : > { %v13795_v61 = vpop.f32.mrb[98].mxu0 }
 0x7f0   : > { %v10279_v57 = vpop.f32.mrb[99].mxu0 }
 0x7f5   : > { %v13801_v52 = vpop.f32.mrb[100].mxu0 }
 0x7f6   : > { %v10282_v2 = vpop.f32.mrb[101].mxu0 }
 0x7f7   : > { %v13805_v7 = vpop.f32.mrb[102].mxu0 }
 0x7f8   : > { %v10283_v33 = vpop.f32.mrb[103].mxu0 }
 0x7f9   : > { %v13834_v33 = vld [vmem:[%s12501_s26 + $0x1] ss:$0 sm:$0xff] }
 0x7fd   : > { %v13811_v39 = vpop.f32.mrb[104].mxu0 }
 0x7fe   : > { %v10286_v43 = vpop.f32.mrb[105].mxu0 }
 0x842   : > { %v13797_v0 = vpop.f32.mrb[90].mxu1 }
 0x843   : > { %v10219_v10 = vpop.f32.mrb[91].mxu1 }
 0x844   : > { %v13815_v10 = vpop.f32.mrb[106].mxu0 }
 0x845   : > { %v10287_v17 = vpop.f32.mrb[107].mxu0 }
 0x846   : > { %v13803_v44 = vpop.f32.mrb[92].mxu1 }
 0x847   : > { %v10222_v29 = vpop.f32.mrb[93].mxu1 }
 0x84a   : > { %v13807_v27 = vpop.f32.mrb[94].mxu1 }
 0x84b   : > { %v10225_v57 = vpop.f32.mrb[95].mxu1 }
 0x84e   : > { %v13813_v28 = vpop.f32.mrb[96].mxu1 }
 0x84f   : > { %v10228_v2 = vpop.f32.mrb[97].mxu1 }
 0x852   : > { %v13817_v50 = vpop.f32.mrb[98].mxu1 }
 0x853   : > { %v10231_v29 = vpop.f32.mrb[99].mxu1 }
 0x856   : > { %v13821_v1 = vpop.f32.mrb[100].mxu1 }
 0x857   : > { %v10234_v48 = vpop.f32.mrb[101].mxu1 }
 0x85a   : > { %v13823_v57 = vpop.f32.mrb[102].mxu1 }
 0x85b   : > { %v10237_v8 = vpop.f32.mrb[103].mxu1 }
 0x85e   : > { %v13827_v53 = vpop.f32.mrb[104].mxu1 }
 0x85f   : > { %v10240_v3 = vpop.f32.mrb[105].mxu1 }
 0x862   : > { %v13829_v2 = vpop.f32.mrb[106].mxu1 }
 0x863   : > { %v10243_v20 = vpop.f32.mrb[107].mxu1 }
 0x866   : > { %v3179_v29 = vpop.f32.mrb[108].mxu1 }
 0x867   : > { %v10298_v36 = vpop.f32.mrb[109].mxu1  ;;  %v3180_v11 = vadd.f32 %v13834_v33, %v3179_v29 }
 0x868   : > { %v3182_v48 = vpop.f32.mrb[110].mxu1 }
 0x869   : > { %v3183_v6 = vadd.f32 %v13834_v33, %v3182_v48  ;;  %v10299_v43 = vpop.f32.mrb[111].mxu1 }
 0x86b   : > { %v11477_v8 = vpack.c.bf16 %v3183_v6, %v3180_v11 }
 0x86d   : > { %11479 = vmatpush3.bf16.xpose.msk.msra.mxu1 %vm13062_vm6, %v11477_v8 }
 0x86e   : > { %v3187_v3 = vpop.f32.mrb[112].mxu1  ;;  %11480 = vmatprep.subr.bf16.mxu1 %v16946_v41 }
 0x86f   : > { %v10302_v34 = vpop.f32.mrb[113].mxu1  ;;  %v3188_v20 = vadd.f32 %v13834_v33, %v3187_v3 }
 0x870   : > { %v3190_v17 = vpop.f32.mrb[114].mxu1 }
 0x871   : > { %v3191_v18 = vadd.f32 %v13834_v33, %v3190_v17  ;;  %v10303_v36 = vpop.f32.mrb[115].mxu1 }
 0x873   : > { %v11481_v22 = vpack.c.bf16 %v3191_v18, %v3188_v20 }
 0x875   : > { %11483 = vmatpush3.bf16.xpose.msk.msra.mxu1 %vm13062_vm6, %v11481_v22 }
 0x876   : > { %v3195_v29 = vpop.f32.mrb[116].mxu1  ;;  %11484 = vmatprep.subr.bf16.mxu1 %v16946_v41 }
 0x877   : > { %v10306_v6 = vpop.f32.mrb[117].mxu1  ;;  %v3196_v43 = vadd.f32 %v13834_v33, %v3195_v29 }
 0x878   : > { %v3198_v11 = vpop.f32.mrb[118].mxu1 }
 0x879   : > { %v3199_v48 = vadd.f32 %v13834_v33, %v3198_v11  ;;  %v10307_v34 = vpop.f32.mrb[119].mxu1  ;;  %v16947_v11 = vmov 0.0  }
 0x87b   : > { %v11485_v8 = vpack.c.bf16 %v3199_v48, %v3196_v43 }
 0x87d   : > { %11487 = vmatpush3.bf16.xpose.msk.msra.mxu1 %vm13062_vm6, %v11485_v8  ;;  %v13857_v8 = vld [vmem:[%s12496_s27 + $0x1] ss:$0 sm:$0xff] }
 0x87e   : > { %v3203_v17 = vpop.f32.mrb[120].mxu1  ;;  %11488 = vmatprep.subr.bf16.mxu1 %v16946_v41 }
 0x87f   : > { %v10310_v18 = vpop.f32.mrb[121].mxu1  ;;  %v3204_v3 = vadd.f32 %v13834_v33, %v3203_v17  ;;  %v3034_v17 = vadd.f32 %v13857_v8, %v13753_v24  ;;  %v3037_v24 = vadd.f32 %v13857_v8, %v13755_v35 }
 0x880   : > { %v3206_v22 = vpop.f32.mrb[122].mxu1 }
 0x881   : > { %v3207_v20 = vadd.f32 %v13834_v33, %v3206_v22  ;;  %v10311_v36 = vpop.f32.mrb[123].mxu1 }
 0x883   : > { %v11489_v6 = vpack.c.bf16 %v3207_v20, %v3204_v3 }
 0x885   : > { %11491 = vmatpush3.bf16.xpose.msk.msra.mxu1 %vm13062_vm6, %v11489_v6 }
 0x886   : > { %v3211_v29 = vpop.f32.mrb[124].mxu1  ;;  %10392 = vmatprep.subr.mxu1 %v16947_v11 }
 0x887   : > { %v10314_v43 = vpop.f32.mrb[125].mxu1  ;;  %v3212_v18 = vadd.f32 %v13834_v33, %v3211_v29  ;;  %v3042_v29 = vadd.f32 %v13857_v8, %v13761_v4  ;;  %v3045_v4 = vadd.f32 %v13857_v8, %v13763_v37 }
 0x888   : > { %v3214_v48 = vpop.f32.mrb[126].mxu1 }
 0x889   : > { %v10315_v34 = vpop.f32.mrb[127].mxu1  ;;  %v3215_v3 = vadd.f32 %v13834_v33, %v3214_v48 }
 0x88d   : > { %10393 = vmatpush3.xpose.msk.msra.mxu1 %vm2145_vm5, %v3212_v18 }
 0x88e   : > { %v3219_v22 = vpop.f32.mrb[128].mxu1  ;;  %11492 = vmatprep.subr.bf16.mxu1 %v16946_v41 }
 0x88f   : > { %v3220_v20 = vadd.f32 %v13834_v33, %v3219_v22  ;;  %v10318_v36 = vpop.f32.mrb[129].mxu1 }
 0x890   : > { %v3222_v6 = vpop.f32.mrb[130].mxu1  ;;  %10395 = vmatmul.mubr.msk.f32.vlgmr.msra.gmra.mrb[144].mxu1 %vm2145_vm5, %v3034_v17  ;;  %v3050_v36 = vadd.f32 %v13857_v8, %v13769_v42  ;;  %v3053_v42 = vadd.f32 %v13857_v8, %v13771_v63 }
 0x891   : > { %v11505_v43 = vpack.c.bf16 %v3220_v20, %v3215_v3  ;;  %v10319_v34 = vpop.f32.mrb[131].mxu1  ;;  %10397 = vmatprep.mubr.msk.f32.mxu1 %vm12268_vm3, %v16947_v11  ;;  %v3223_v18 = vadd.f32 %v13834_v33, %v3222_v6 }
 0x893   : > { %11507 = vmatpush3.bf16.xpose.msk.msra.mxu0 %vm13062_vm6, %v11505_v43 }
 0x894   : > { %10398 = vmatmul.mubr.msk.f32.gmra.mrb[146].mxu1 %vm2145_vm5, %v3037_v24  ;;  %11508 = vmatprep.subr.bf16.mxu0 %v16946_v41 }
 0x895   : > { %10400 = vmatprep.mubr.msk.f32.mxu1 %vm12268_vm3, %v16947_v11 }
 0x896   : > { %v3227_v48 = vpop.f32.mrb[132].mxu1 }
 0x897   : > { %v3228_v17 = vadd.f32 %v13834_v33, %v3227_v48  ;;  %v10322_v22 = vpop.f32.mrb[133].mxu1 }
 0x898   : > { %v3230_v35 = vpop.f32.mrb[134].mxu1  ;;  %10401 = vmatmul.mubr.msk.f32.gmra.mrb[148].mxu1 %vm2145_vm5, %v3042_v29 }
 0x899   : > { %v11509_v3 = vpack.c.bf16 %v3228_v17, %v3223_v18  ;;  %v10323_v20 = vpop.f32.mrb[135].mxu1  ;;  %10403 = vmatprep.mubr.msk.f32.mxu1 %vm12268_vm3, %v16947_v11  ;;  %v3231_v43 = vadd.f32 %v13834_v33, %v3230_v35  ;;  %v3058_v18 = vadd.f32 %v13857_v8, %v13777_v16  ;;  %v3061_v16 = vadd.f32 %v13857_v8, %v13779_v5 }
 0x89a   : > { %v3069_v5 = vadd.f32 %v13857_v8, %v13787_v45 }
 0x89b   : > { %11511 = vmatpush3.bf16.xpose.msk.msra.mxu0 %vm13062_vm6, %v11509_v3 }
 0x89c   : > { %10404 = vmatmul.mubr.msk.f32.gmra.mrb[150].mxu1 %vm2145_vm5, %v3045_v4  ;;  %11512 = vmatprep.subr.bf16.mxu0 %v16946_v41 }
 0x89d   : > { %10406 = vmatprep.mubr.msk.f32.mxu1 %vm12268_vm3, %v16947_v11 }
 0x89e   : > { %v3235_v6 = vpop.f32.mrb[136].mxu1 }
 0x89f   : > { %v3236_v34 = vadd.f32 %v13834_v33, %v3235_v6  ;;  %v10326_v24 = vpop.f32.mrb[137].mxu1 }
 0x8a0   : > { %v3238_v37 = vpop.f32.mrb[138].mxu1  ;;  %10407 = vmatmul.mubr.msk.f32.gmra.mrb[152].mxu1 %vm2145_vm5, %v3050_v36  ;;  %v3066_v36 = vadd.f32 %v13857_v8, %v13785_v13  ;;  %v3074_v13 = vadd.f32 %v13857_v8, %v13789_v31  ;;  %v3077_v24 = vadd.f32 %v13857_v8, %v13791_v54 }
 0x8a1   : > { %v11513_v29 = vpack.c.bf16 %v3236_v34, %v3231_v43  ;;  %v10327_v48 = vpop.f32.mrb[139].mxu1  ;;  %10409 = vmatprep.mubr.msk.f32.mxu1 %vm12268_vm3, %v16947_v11  ;;  %v3239_v22 = vadd.f32 %v13834_v33, %v3238_v37  ;;  %v13938_v43 = vld [vmem:[%s12506_s22 + $0x1] ss:$0 sm:$0xff] }
 0x8a2   : > { %v3082_v48 = vadd.f32 %v13857_v8, %v13793_v55  ;;  %v3085_v55 = vadd.f32 %v13857_v8, %v13795_v61 }
 0x8a3   : > { %11515 = vmatpush3.bf16.xpose.msk.msra.mxu0 %vm13062_vm6, %v11513_v29 }
 0x8a4   : > { %10410 = vmatmul.mubr.msk.f32.gmra.mrb[154].mxu1 %vm2145_vm5, %v3053_v42  ;;  %11516 = vmatprep.subr.bf16.mxu0 %v16946_v41 }
 0x8a5   : > { %10412 = vmatprep.mubr.msk.f32.mxu1 %vm12268_vm3, %v16947_v11 }
 0x8a6   : > { %v3243_v17 = vpop.f32.mrb[140].mxu1 }
 0x8a7   : > { %v3244_v35 = vadd.f32 %v13834_v33, %v3243_v17  ;;  %v10330_v3 = vpop.f32.mrb[141].mxu1 }
 0x8a8   : > { %v3246_v63 = vpop.f32.mrb[142].mxu1  ;;  %10413 = vmatmul.mubr.msk.f32.gmra.mrb[156].mxu1 %vm2145_vm5, %v3058_v18 }
 0x8a9   : > { %v11517_v20 = vpack.c.bf16 %v3244_v35, %v3239_v22  ;;  %v10331_v4 = vpop.f32.mrb[143].mxu1  ;;  %10415 = vmatprep.mubr.msk.f32.mxu1 %vm12268_vm3, %v16947_v11  ;;  %v3247_v6 = vadd.f32 %v13834_v33, %v3246_v63  ;;  %v3325_v33 = vpop.f32.mrb[108].mxu0  ;;  %v3090_v63 = vadd.f32 %v13857_v8, %v13801_v52  ;;  %v3093_v52 = vadd.f32 %v13857_v8, %v13805_v7 }
 0x8aa   : > { %v3326_v45 = vadd.f32 %v13938_v43, %v3325_v33  ;;  %v10342_v34 = vpop.f32.mrb[109].mxu0 }
 0x8ab   : > { %11519 = vmatpush3.bf16.xpose.msk.msra.mxu0 %vm13062_vm6, %v11517_v20  ;;  %v3328_v31 = vpop.f32.mrb[110].mxu0 }
 0x8ac   : > { %10416 = vmatmul.mubr.msk.f32.gmra.mrb[158].mxu1 %vm2145_vm5, %v3061_v16  ;;  %10482 = vmatprep.subr.mxu0 %v16947_v11  ;;  %v3329_v37 = vadd.f32 %v13938_v43, %v3328_v31  ;;  %v10343_v29 = vpop.f32.mrb[111].mxu0 }
 0x8ad   : > { %10418 = vmatprep.mubr.msk.f32.mxu1 %vm12268_vm3, %v16947_v11  ;;  %v3333_v18 = vpop.f32.mrb[112].mxu0 }
 0x8ae   : > { %v11493_v42 = vpack.c.bf16 %v3329_v37, %v3326_v45  ;;  %v3334_v54 = vadd.f32 %v13938_v43, %v3333_v18  ;;  %v10346_v17 = vpop.f32.mrb[113].mxu0 }
 0x8af   : > { %v3336_v22 = vpop.f32.mrb[114].mxu0 }
 0x8b0   : > { %10419 = vmatmul.mubr.msk.f32.gmra.mrb[160].mxu1 %vm2145_vm5, %v3066_v36  ;;  %v3337_v35 = vadd.f32 %v13938_v43, %v3336_v22  ;;  %v10347_v3 = vpop.f32.mrb[115].mxu0 }
 0x8b1   : > { %10439 = vmatprep.mubr.msk.f32.mxu1 %vm12268_vm3, %v16947_v11  ;;  %11494 = vmatpush3.bf16.msra.mxu1 %v11493_v42  ;;  %v3341_v4 = vpop.f32.mrb[116].mxu0 }
 0x8b2   : > { %11495 = vmatprep.subr.bf16.mxu1 %v16946_v41  ;;  %v11496_v20 = vpack.c.bf16 %v3337_v35, %v3334_v54  ;;  %v3342_v61 = vadd.f32 %v13938_v43, %v3341_v4  ;;  %v10350_v16 = vpop.f32.mrb[117].mxu0 }
 0x8b3   : > { %10483 = vmatpush3.xpose.msk.msra.mxu0 %vm2145_vm5, %v3247_v6  ;;  %v3344_v36 = vpop.f32.mrb[118].mxu0 }
 0x8b4   : > { %10556 = vmatprep.subr.bf16.mxu0 %v16947_v11  ;;  %v3345_v6 = vadd.f32 %v13938_v43, %v3344_v36 }
 0x8b5   : > { %11497 = vmatpush3.bf16.msra.mxu1 %v11496_v20 }
 0x8b6   : > { %10485 = vmatmul.mubr.msk.f32.vlgmr.msra.gmra.mrb[144].mxu0 %vm2145_vm5, %v3069_v5  ;;  %11498 = vmatprep.subr.bf16.mxu1 %v16946_v41  ;;  %v10351_v5 = vpop.f32.mrb[119].mxu0  ;;  %v11499_v33 = vpack.c.bf16 %v3345_v6, %v3342_v61 }
 0x8b7   : > { %10487 = vmatprep.mubr.msk.f32.mxu0 %vm12268_vm3, %v16947_v11  ;;  %v3349_v45 = vpop.f32.mrb[120].mxu0 }
 0x8b8   : > { %v3350_v7 = vadd.f32 %v13938_v43, %v3349_v45  ;;  %v10354_v34 = vpop.f32.mrb[121].mxu0 }
 0x8b9   : > { %11500 = vmatpush3.bf16.msra.mxu1 %v11499_v33 }
 0x8ba   : > { %10488 = vmatmul.mubr.msk.f32.gmra.mrb[146].mxu0 %vm2145_vm5, %v3074_v13  ;;  %v3098_v13 = vadd.f32 %v13857_v8, %v13811_v39  ;;  %11501 = vmatprep.subr.bf16.mxu1 %v16946_v41  ;;  %v3101_v39 = vadd.f32 %v13857_v8, %v13815_v10 }
 0x8bb   : > { %10490 = vmatprep.mubr.msk.f32.mxu0 %vm12268_vm3, %v16947_v11 }
 0x8be   : > { %10491 = vmatmul.mubr.msk.f32.gmra.mrb[148].mxu0 %vm2145_vm5, %v3077_v24  ;;  %v3352_v24 = vpop.f32.mrb[122].mxu0 }
 0x8bf   : > { %10493 = vmatprep.mubr.msk.f32.mxu0 %vm12268_vm3, %v16947_v11  ;;  %v3353_v31 = vadd.f32 %v13938_v43, %v3352_v24  ;;  %v10355_v37 = vpop.f32.mrb[123].mxu0 }
 0x8c1   : > { %v11502_v29 = vpack.c.bf16 %v3353_v31, %v3350_v7 }
 0x8c2   : > { %10494 = vmatmul.mubr.msk.f32.gmra.mrb[150].mxu0 %vm2145_vm5, %v3082_v48  ;;  %v3357_v48 = vpop.f32.mrb[124].mxu0 }
 0x8c3   : > { %10496 = vmatprep.mubr.msk.f32.mxu0 %vm12268_vm3, %v16947_v11  ;;  %11503 = vmatpush3.bf16.msra.mxu1 %v11502_v29  ;;  %v3358_v42 = vadd.f32 %v13938_v43, %v3357_v48  ;;  %v10358_v18 = vpop.f32.mrb[125].mxu0 }
 0x8c4   : > { %10437 = vmatprep.subr.mxu1 %v16947_v11  ;;  %v3360_v54 = vpop.f32.mrb[126].mxu0 }
 0x8c5   : > { %v10359_v17 = vpop.f32.mrb[127].mxu0  ;;  %v13993_v10 = vadd.f32 %v13938_v43, %v3360_v54 }
 0x8c6   : > { %10497 = vmatmul.mubr.msk.f32.gmra.mrb[152].mxu0 %vm2145_vm5, %v3085_v55  ;;  %v3365_v8 = vpop.f32.mrb[128].mxu0 }
 0x8c7   : > { %10499 = vmatprep.mubr.msk.f32.mxu0 %vm12268_vm3, %v16947_v11  ;;  %10438 = vmatpush3.msra.mxu1 %v3358_v42  ;;  %v13996_v55 = vadd.f32 %v13938_v43, %v3365_v8  ;;  %v10362_v22 = vpop.f32.mrb[129].mxu0 }
 0x8c8   : > { %11520 = vmatprep.subr.bf16.mxu1 %v16946_v41  ;;  %v3368_v3 = vpop.f32.mrb[130].mxu0 }
 0x8c9   : > { %v10363_v20 = vpop.f32.mrb[131].mxu0 }
 0x8ca   : > { %10500 = vmatmul.mubr.msk.f32.gmra.mrb[154].mxu0 %vm2145_vm5, %v3090_v63  ;;  %v14001_v63 = vadd.f32 %v13938_v43, %v3368_v3  ;;  %v3373_v4 = vpop.f32.mrb[132].mxu0 }
 0x8cb   : > { %10502 = vmatprep.mubr.msk.f32.mxu0 %vm12268_vm3, %v16947_v11  ;;  %v14004_v61 = vadd.f32 %v13938_v43, %v3373_v4  ;;  %v10366_v16 = vpop.f32.mrb[133].mxu0 }
 0x8cc   : > { %v3376_v36 = vpop.f32.mrb[134].mxu0 }
 0x8cd   : > { %v14009_v6 = vadd.f32 %v13938_v43, %v3376_v36  ;;  %v10367_v5 = vpop.f32.mrb[135].mxu0 }
 0x8ce   : > { %10503 = vmatmul.mubr.msk.f32.gmra.mrb[156].mxu0 %vm2145_vm5, %v3093_v52 }
 0x8cf   : > { %10505 = vmatprep.mubr.msk.f32.mxu0 %vm12268_vm3, %v16947_v11 }
 0x8d2   : > { %10506 = vmatmul.mubr.msk.f32.gmra.mrb[158].mxu0 %vm2145_vm5, %v3098_v13  ;;  %v3381_v13 = vpop.f32.mrb[136].mxu0 }
 0x8d3   : > { %10508 = vmatprep.mubr.msk.f32.mxu0 %vm12268_vm3, %v16947_v11  ;;  %v14012_v33 = vadd.f32 %v13938_v43, %v3381_v13  ;;  %v10370_v45 = vpop.f32.mrb[137].mxu0 }
 0x8d4   : > { %v3384_v34 = vpop.f32.mrb[138].mxu0 }
 0x8d5   : > { %v10371_v24 = vpop.f32.mrb[139].mxu0 }
 0x8d6   : > { %10509 = vmatmul.mubr.msk.f32.gmra.mrb[160].mxu0 %vm2145_vm5, %v3101_v39  ;;  %v14017_v39 = vadd.f32 %v13938_v43, %v3384_v34  ;;  %v3389_v31 = vpop.f32.mrb[140].mxu0 }
 0x8d7   : > { %10558 = vmatprep.mubr.msk.bf16.mxu0 %vm12268_vm3, %v16947_v11  ;;  %v14020_v37 = vadd.f32 %v13938_v43, %v3389_v31  ;;  %v10374_v29 = vpop.f32.mrb[141].mxu0 }
 0x8d8   : > { %v14024_v42 = vpop.f32.mrb[142].mxu0 }
 0x8d9   : > { %v10375_v18 = vpop.f32.mrb[143].mxu0 }
 0x963   : > { %v14026_v54 = vpop.f32.mrb[144].mxu1 }
 0x964   : > { %v3560_v17 = vsel %vm2310_vm7, %v14026_v54, -inf  ;;  %v10396_v8 = vpop.f32.mrb[145].mxu1 }
 0x965   : > { %3561 = vmax.xlane.f32.xlu0 %v3560_v17 }
 0x967   : > { %v14030_v22 = vpop.f32.mrb[146].mxu1 }
 0x968   : > { %v10399_v3 = vpop.f32.mrb[147].mxu1  ;;  %v3563_v20 = vsel %vm2310_vm7, %v14030_v22, -inf }
 0x969   : > { %3564 = vmax.xlane.f32.xlu1 %v3563_v20 }
 0x96b   : > { %v14034_v4 = vpop.f32.mrb[148].mxu1 }
 0x96c   : > { %v3566_v16 = vsel %vm2310_vm7, %v14034_v4, -inf  ;;  %v10402_v36 = vpop.f32.mrb[149].mxu1 }
 0x96d   : > { %3567 = vmax.xlane.f32.xlu0 %v3566_v16 }
 0x96f   : > { %v14038_v5 = vpop.f32.mrb[150].mxu1 }
 0x970   : > { %v10405_v13 = vpop.f32.mrb[151].mxu1  ;;  %v3569_v45 = vsel %vm2310_vm7, %v14038_v5, -inf }
 0x971   : > { %3570 = vmax.xlane.f32.xlu1 %v3569_v45 }
 0x973   : > { %v14042_v34 = vpop.f32.mrb[152].mxu1 }
 0x974   : > { %v3572_v24 = vsel %vm2310_vm7, %v14042_v34, -inf  ;;  %v10408_v31 = vpop.f32.mrb[153].mxu1 }
 0x975   : > { %3573 = vmax.xlane.f32.xlu0 %v3572_v24 }
 0x977   : > { %v14046_v29 = vpop.f32.mrb[154].mxu1 }
 0x978   : > { %v10411_v18 = vpop.f32.mrb[155].mxu1  ;;  %v3575_v17 = vsel %vm2310_vm7, %v14046_v29, -inf }
 0x979   : > { %3576 = vmax.xlane.f32.xlu1 %v3575_v17 }
 0x97b   : > { %v14050_v8 = vpop.f32.mrb[156].mxu1 }
 0x97c   : > { %v3578_v3 = vsel %vm2310_vm7, %v14050_v8, -inf  ;;  %v10414_v20 = vpop.f32.mrb[157].mxu1 }
 0x97d   : > { %3579 = vmax.xlane.f32.xlu0 %v3578_v3 }
 0x97f   : > { %v14054_v16 = vpop.f32.mrb[158].mxu1 }
 0x980   : > { %v10417_v36 = vpop.f32.mrb[159].mxu1  ;;  %v3581_v13 = vsel %vm2310_vm7, %v14054_v16, -inf }
 0x981   : > { %3582 = vmax.xlane.f32.xlu1 %v3581_v13 }
 0x983   : > { %v14058_v45 = vpop.f32.mrb[160].mxu1 }
 0x984   : > { %v3584_v24 = vsel %vm2310_vm7, %v14058_v45, -inf  ;;  %v10420_v31 = vpop.f32.mrb[161].mxu1 }
 0x985   : > { %3585 = vmax.xlane.f32.xlu0 %v3584_v24 }
 0x989   : > { %v14062_v18 = vpop.f32.mrb[144].mxu0 }
 0x98a   : > { %v10486_v17 = vpop.f32.mrb[145].mxu0  ;;  %v3969_v3 = vsel %vm2310_vm7, %v14062_v18, -inf }
 0x98b   : > { %3970 = vmax.xlane.f32.xlu1 %v3969_v3 }
 0x98d   : > { %v14066_v20 = vpop.f32.mrb[146].mxu0 }
 0x98e   : > { %v3972_v36 = vsel %vm2310_vm7, %v14066_v20, -inf  ;;  %v10489_v13 = vpop.f32.mrb[147].mxu0 }
 0x98f   : > { %3973 = vmax.xlane.f32.xlu0 %v3972_v36 }
 0x991   : > { %v14070_v48 = vpop.f32.mrb[148].mxu0 }
 0x992   : > { %v10492_v7 = vpop.f32.mrb[149].mxu0  ;;  %v3975_v24 = vsel %vm2310_vm7, %v14070_v48, -inf }
 0x993   : > { %3976 = vmax.xlane.f32.xlu1 %v3975_v24 }
 0x995   : > { %v14074_v31 = vpop.f32.mrb[150].mxu0 }
 0x996   : > { %v3978_v17 = vsel %vm2310_vm7, %v14074_v31, -inf  ;;  %v10495_v3 = vpop.f32.mrb[151].mxu0 }
 0x997   : > { %3979 = vmax.xlane.f32.xlu0 %v3978_v17 }
 0x999   : > { %v14078_v52 = vpop.f32.mrb[152].mxu0 }
 0x99a   : > { %v10498_v35 = vpop.f32.mrb[153].mxu0  ;;  %v3981_v36 = vsel %vm2310_vm7, %v14078_v52, -inf }
 0x99b   : > { %3982 = vmax.xlane.f32.xlu1 %v3981_v36 }
 0x99d   : > { %v14082_v13 = vpop.f32.mrb[154].mxu0 }
 0x99e   : > { %v3984_v7 = vsel %vm2310_vm7, %v14082_v13, -inf  ;;  %v10501_v24 = vpop.f32.mrb[155].mxu0 }
 0x99f   : > { %3985 = vmax.xlane.f32.xlu0 %v3984_v7 }
 0x9a1   : > { %v14086_v56 = vpop.f32.mrb[156].mxu0 }
 0x9a2   : > { %v10504_v15 = vpop.f32.mrb[157].mxu0  ;;  %v3987_v17 = vsel %vm2310_vm7, %v14086_v56, -inf }
 0x9a3   : > { %3988 = vmax.xlane.f32.xlu1 %v3987_v17 }
 0x9a5   : > { %v14090_v3 = vpop.f32.mrb[158].mxu0 }
 0x9a6   : > { %v3990_v35 = vsel %vm2310_vm7, %v14090_v3, -inf  ;;  %v10507_v36 = vpop.f32.mrb[159].mxu0 }
 0x9a7   : > { %3991 = vmax.xlane.f32.xlu0 %v3990_v35 }
 0x9a9   : > { %v14094_v59 = vpop.f32.mrb[160].mxu0 }
 0x9aa   : > { %v10510_v58 = vpop.f32.mrb[161].mxu0  ;;  %v3993_v7 = vsel %vm2310_vm7, %v14094_v59, -inf }
 0x9ab   : > { %3994 = vmax.xlane.f32.xlu1 %v3993_v7 }
 0x9f2   : > { %v3562_v24 = vpop.xlane.xlu0 %3561 }
 0x9f3   : > { %v3587_v15 = vsub.f32 %v14026_v54, %v3562_v24 }
 0x9f5   : > { %v3596_v49 = vmul.f32 1.442695, %v3587_v15 }
 0x9f6   : > { %v3565_v46 = vpop.xlane.xlu1 %3564 }
 0x9f7   : > { %11867 = vpow2.f32 %v3596_v49  ;;  %v3588_v17 = vsub.f32 %v14030_v22, %v3565_v46 }
 0x9f9   : > { %v3598_v19 = vmul.f32 1.442695, %v3588_v17 }
 0x9fa   : > { %v3568_v12 = vpop.xlane.xlu0 %3567 }
 0x9fb   : > { %11869 = vpow2.f32 %v3598_v19  ;;  %v3589_v35 = vsub.f32 %v14034_v4, %v3568_v12 }
 0x9fd   : > { %v3600_v36 = vmul.f32 1.442695, %v3589_v35 }
 0x9fe   : > { %v3571_v47 = vpop.xlane.xlu1 %3570 }
 0x9ff   : > { %11871 = vpow2.f32 %v3600_v36  ;;  %v3590_v58 = vsub.f32 %v14038_v5, %v3571_v47 }
 0xa01   : > { %v14102_v9 = vpop.eup %11867  ;;  %v3602_v7 = vmul.f32 1.442695, %v3590_v58 }
 0xa02   : > { %v3574_v32 = vpop.xlane.xlu0 %3573  ;;  %v3614_v54 = vsel %vm2310_vm7, %v14102_v9, 0.0 }
 0xa03   : > { %11873 = vpow2.f32 %v3602_v7  ;;  %v3591_v46 = vsub.f32 %v14042_v34, %v3574_v32  ;;  %3615 = vadd.xlane.f32.xlu0 %v3614_v54 }
 0xa05   : > { %v14107_v49 = vpop.eup %11869  ;;  %v3604_v19 = vmul.f32 1.442695, %v3591_v46 }
 0xa06   : > { %v3577_v12 = vpop.xlane.xlu1 %3576  ;;  %v3617_v22 = vsel %vm2310_vm7, %v14107_v49, 0.0 }
 0xa07   : > { %11875 = vpow2.f32 %v3604_v19  ;;  %v3592_v47 = vsub.f32 %v14046_v29, %v3577_v12  ;;  %3618 = vadd.xlane.f32.xlu1 %v3617_v22 }
 0xa09   : > { %v14112_v4 = vpop.eup %11871  ;;  %v3606_v5 = vmul.f32 1.442695, %v3592_v47 }
 0xa0a   : > { %v3580_v24 = vpop.xlane.xlu0 %3579  ;;  %v3620_v15 = vsel %vm2310_vm7, %v14112_v4, 0.0 }
 0xa0b   : > { %11877 = vpow2.f32 %v3606_v5  ;;  %v3593_v32 = vsub.f32 %v14050_v8, %v3580_v24  ;;  %3621 = vadd.xlane.f32.xlu0 %v3620_v15 }
 0xa0d   : > { %v14117_v34 = vpop.eup %11873  ;;  %v3608_v17 = vmul.f32 1.442695, %v3593_v32 }
 0xa0e   : > { %v3583_v35 = vpop.xlane.xlu1 %3582  ;;  %v3623_v36 = vsel %vm2310_vm7, %v14117_v34, 0.0 }
 0xa0f   : > { %11879 = vpow2.f32 %v3608_v17  ;;  %v3594_v29 = vsub.f32 %v14054_v16, %v3583_v35  ;;  %3624 = vadd.xlane.f32.xlu1 %v3623_v36 }
 0xa11   : > { %v14122_v58 = vpop.eup %11875  ;;  %v3610_v7 = vmul.f32 1.442695, %v3594_v29 }
 0xa12   : > { %v3586_v54 = vpop.xlane.xlu0 %3585  ;;  %v3626_v46 = vsel %vm2310_vm7, %v14122_v58, 0.0 }
 0xa13   : > { %11881 = vpow2.f32 %v3610_v7  ;;  %v3595_v8 = vsub.f32 %v14058_v45, %v3586_v54  ;;  %3627 = vadd.xlane.f32.xlu0 %v3626_v46 }
 0xa15   : > { %v14127_v19 = vpop.eup %11877  ;;  %v3612_v12 = vmul.f32 1.442695, %v3595_v8 }
 0xa16   : > { %v3629_v22 = vsel %vm2310_vm7, %v14127_v19, 0.0 }
 0xa17   : > { %11883 = vpow2.f32 %v3612_v12  ;;  %3630 = vadd.xlane.f32.xlu1 %v3629_v22 }
 0xa18   : > { %v3971_v16 = vpop.xlane.xlu1 %3970 }
 0xa19   : > { %v14131_v47 = vpop.eup %11879  ;;  %v3996_v5 = vsub.f32 %v14062_v18, %v3971_v16 }
 0xa1a   : > { %v3632_v24 = vsel %vm2310_vm7, %v14131_v47, 0.0 }
 0xa1b   : > { %v4005_v15 = vmul.f32 1.442695, %v3996_v5  ;;  %3633 = vadd.xlane.f32.xlu0 %v3632_v24 }
 0xa1c   : > { %v3974_v45 = vpop.xlane.xlu0 %3973 }
 0xa1d   : > { %v14136_v32 = vpop.eup %11881  ;;  %11885 = vpow2.f32 %v4005_v15  ;;  %v3997_v17 = vsub.f32 %v14066_v20, %v3974_v45 }
 0xa1e   : > { %v3635_v35 = vsel %vm2310_vm7, %v14136_v32, 0.0 }
 0xa1f   : > { %v4007_v36 = vmul.f32 1.442695, %v3997_v17  ;;  %3636 = vadd.xlane.f32.xlu1 %v3635_v35 }
 0xa20   : > { %v3977_v29 = vpop.xlane.xlu1 %3976 }
 0xa21   : > { %v14141_v7 = vpop.eup %11883  ;;  %11887 = vpow2.f32 %v4007_v36  ;;  %v3998_v18 = vsub.f32 %v14070_v48, %v3977_v29 }
 0xa22   : > { %v3638_v54 = vsel %vm2310_vm7, %v14141_v7, 0.0 }
 0xa23   : > { %v4009_v46 = vmul.f32 1.442695, %v3998_v18  ;;  %3639 = vadd.xlane.f32.xlu0 %v3638_v54 }
 0xa24   : > { %v3980_v8 = vpop.xlane.xlu0 %3979 }
 0xa25   : > { %11889 = vpow2.f32 %v4009_v46  ;;  %v3999_v20 = vsub.f32 %v14074_v31, %v3980_v8 }
 0xa27   : > { %v14147_v12 = vpop.eup %11885  ;;  %v4011_v22 = vmul.f32 1.442695, %v3999_v20 }
 0xa28   : > { %v3983_v16 = vpop.xlane.xlu1 %3982  ;;  %v4023_v5 = vsel %vm2310_vm7, %v14147_v12, 0.0 }
 0xa29   : > { %11891 = vpow2.f32 %v4011_v22  ;;  %v4000_v24 = vsub.f32 %v14078_v52, %v3983_v16  ;;  %4024 = vadd.xlane.f32.xlu1 %v4023_v5 }
 0xa2b   : > { %v14152_v48 = vpop.eup %11887  ;;  %v4013_v15 = vmul.f32 1.442695, %v4000_v24 }
 0xa2c   : > { %v3986_v45 = vpop.xlane.xlu0 %3985  ;;  %v4026_v17 = vsel %vm2310_vm7, %v14152_v48, 0.0 }
 0xa2d   : > { %11893 = vpow2.f32 %v4013_v15  ;;  %v4001_v31 = vsub.f32 %v14082_v13, %v3986_v45  ;;  %4027 = vadd.xlane.f32.xlu0 %v4026_v17 }
 0xa2f   : > { %v14157_v35 = vpop.eup %11889  ;;  %v4015_v36 = vmul.f32 1.442695, %v4001_v31 }
 0xa30   : > { %v3989_v29 = vpop.xlane.xlu1 %3988  ;;  %v4029_v18 = vsel %vm2310_vm7, %v14157_v35, 0.0 }
 0xa31   : > { %11895 = vpow2.f32 %v4015_v36  ;;  %v4002_v52 = vsub.f32 %v14086_v56, %v3989_v29  ;;  %4030 = vadd.xlane.f32.xlu1 %v4029_v18 }
 0xa33   : > { %v14162_v54 = vpop.eup %11891  ;;  %v4017_v46 = vmul.f32 1.442695, %v4002_v52 }
 0xa34   : > { %v3992_v8 = vpop.xlane.xlu0 %3991  ;;  %v4032_v20 = vsel %vm2310_vm7, %v14162_v54, 0.0 }
 0xa35   : > { %11897 = vpow2.f32 %v4017_v46  ;;  %v4003_v13 = vsub.f32 %v14090_v3, %v3992_v8  ;;  %4033 = vadd.xlane.f32.xlu0 %v4032_v20 }
 0xa37   : > { %v14167_v22 = vpop.eup %11893  ;;  %v4019_v16 = vmul.f32 1.442695, %v4003_v13 }
 0xa38   : > { %v3995_v5 = vpop.xlane.xlu1 %3994  ;;  %v4035_v24 = vsel %vm2310_vm7, %v14167_v22, 0.0 }
 0xa39   : > { %11899 = vpow2.f32 %v4019_v16  ;;  %v4004_v56 = vsub.f32 %v14094_v59, %v3995_v5  ;;  %4036 = vadd.xlane.f32.xlu1 %v4035_v24  ;;  %v16948_v24 = vpack.c.bf16 %v13996_v55, %v13993_v10 }
 0xa3b   : > { %v14172_v15 = vpop.eup %11895  ;;  %v4021_v45 = vmul.f32 1.442695, %v4004_v56 }
 0xa3c   : > { %v4038_v17 = vsel %vm2310_vm7, %v14172_v15, 0.0 }
 0xa3d   : > { %11901 = vpow2.f32 %v4021_v45  ;;  %4039 = vadd.xlane.f32.xlu0 %v4038_v17  ;;  %v16949_v17 = vpack.c.bf16 %v14004_v61, %v14001_v63 }
 0xa3f   : > { %v14176_v3 = vpop.eup %11897 }
 0xa40   : > { %v4041_v31 = vsel %vm2310_vm7, %v14176_v3, 0.0 }
 0xa41   : > { %4042 = vadd.xlane.f32.xlu1 %v4041_v31  ;;  %v16950_v31 = vpack.c.bf16 %v14012_v33, %v14009_v6 }
 0xa43   : > { %v14180_v36 = vpop.eup %11899 }
 0xa44   : > { %v4044_v59 = vsel %vm2310_vm7, %v14180_v36, 0.0 }
 0xa45   : > { %4045 = vadd.xlane.f32.xlu0 %v4044_v59  ;;  %v16951_v59 = vpack.c.bf16 %v14020_v37, %v14017_v39 }
 0xa47   : > { %v14184_v29 = vpop.eup %11901 }
 0xa48   : > { %v4047_v18 = vsel %vm2310_vm7, %v14184_v29, 0.0 }
 0xa49   : > { %4048 = vadd.xlane.f32.xlu1 %v4047_v18 }
 0xa90   : > { %v3616_v52 = vpop.xlane.xlu0 %3615 }
 0xa91   : > { %11903 = vrcp.f32 %v3616_v52 }
 0xa94   : > { %v3619_v46 = vpop.xlane.xlu1 %3618 }
 0xa95   : > { %11905 = vrcp.f32 %v3619_v46 }
 0xa98   : > { %v3622_v8 = vpop.xlane.xlu0 %3621 }
 0xa99   : > { %11907 = vrcp.f32 %v3622_v8 }
 0xa9b   : > { %v11904_v20 = vpop.eup %11903 }
 0xa9c   : > { %v14189_v13 = vmul.f32 %v11904_v20, %v14102_v9  ;;  %v3625_v16 = vpop.xlane.xlu1 %3624 }
 0xa9d   : > { %11909 = vrcp.f32 %v3625_v16  ;;  %v11759_v16 = vld [vmem:[%s12486_s8] sm:$0xff]  }
 0xa9e   : > { %10440 = vmatmul.mubr.msk.f32.vlgmr.msra.gmra.mrb[162].mxu1 %vm2310_vm7, %v14189_v13 }
 0xa9f   : > { %v11906_v5 = vpop.eup %11905  ;;  %11522 = vmatpush3.bf16.msra.mxu1 %v16948_v24  ;;  %10442 = vmatprep.mubr.msk.f32.mxu1 %vm12268_vm3, %v16947_v11 }
 0xaa0   : > { %v3628_v56 = vpop.xlane.xlu0 %3627  ;;  %11523 = vmatprep.subr.bf16.mxu1 %v16946_v41  ;;  %v14200_v45 = vmul.f32 %v11906_v5, %v14107_v49 }
 0xaa1   : > { %11911 = vrcp.f32 %v3628_v56 }
 0xaa2   : > { %10443 = vmatmul.mubr.msk.f32.gmra.mrb[164].mxu1 %vm2310_vm7, %v14200_v45 }
 0xaa3   : > { %v11908_v9 = vpop.eup %11907  ;;  %11525 = vmatpush3.bf16.msra.mxu1 %v16949_v17  ;;  %10445 = vmatprep.mubr.msk.f32.mxu1 %vm12268_vm3, %v16947_v11 }
 0xaa4   : > { %v3631_v10 = vpop.xlane.xlu1 %3630  ;;  %11526 = vmatprep.subr.bf16.mxu1 %v16946_v41  ;;  %v14211_v55 = vmul.f32 %v11908_v9, %v14112_v4 }
 0xaa5   : > { %11913 = vrcp.f32 %v3631_v10 }
 0xaa6   : > { %10446 = vmatmul.mubr.msk.f32.gmra.mrb[166].mxu1 %vm2310_vm7, %v14211_v55 }
 0xaa7   : > { %v11910_v49 = vpop.eup %11909  ;;  %11528 = vmatpush3.bf16.msra.mxu1 %v16950_v31  ;;  %10448 = vmatprep.mubr.msk.f32.mxu1 %vm12268_vm3, %v16947_v11 }
 0xaa8   : > { %v3634_v63 = vpop.xlane.xlu0 %3633  ;;  %11529 = vmatprep.subr.bf16.mxu1 %v16946_v41  ;;  %v14222_v61 = vmul.f32 %v11910_v49, %v14117_v34  ;;  %v3393_v34 = vadd.f32 %v13938_v43, %v14024_v42 }
 0xaa9   : > { %11915 = vrcp.f32 %v3634_v63 }
 0xaaa   : > { %10449 = vmatmul.mubr.msk.f32.gmra.mrb[168].mxu1 %vm2310_vm7, %v14222_v61 }
 0xaab   : > { %v11912_v4 = vpop.eup %11911  ;;  %11531 = vmatpush3.bf16.msra.mxu1 %v16951_v59  ;;  %10451 = vmatprep.mubr.msk.f32.mxu1 %vm12268_vm3, %v16947_v11 }
 0xaac   : > { %v3637_v6 = vpop.xlane.xlu1 %3636  ;;  %10527 = vmatprep.subr.mxu1 %v16947_v11  ;;  %v14233_v33 = vmul.f32 %v11912_v4, %v14122_v58 }
 0xaad   : > { %11917 = vrcp.f32 %v3637_v6 }
 0xaae   : > { %10452 = vmatmul.mubr.msk.f32.gmra.mrb[170].mxu1 %vm2310_vm7, %v14233_v33 }
 0xaaf   : > { %v11914_v18 = vpop.eup %11913  ;;  %10528 = vmatpush3.msra.mxu1 %v3393_v34  ;;  %10454 = vmatprep.mubr.msk.f32.mxu1 %vm12268_vm3, %v16947_v11 }
 0xab0   : > { %v3640_v39 = vpop.xlane.xlu0 %3639  ;;  %v14242_v37 = vmul.f32 %v11914_v18, %v14127_v19  ;;  %10594 = vmatprep.subr.bf16.mxu1 %v16947_v11 }
 0xab1   : > { %11919 = vrcp.f32 %v3640_v39 }
 0xab2   : > { %10455 = vmatmul.mubr.msk.f32.gmra.mrb[172].mxu1 %vm2310_vm7, %v14242_v37 }
 0xab3   : > { %v11916_v43 = vpop.eup %11915  ;;  %10457 = vmatprep.mubr.msk.f32.mxu1 %vm12268_vm3, %v16947_v11 }
 0xab4   : > { %v14250_v42 = vmul.f32 %v11916_v43, %v14131_v47  ;;  %v16953_v43 = vpack.c.bf16 %v13464_v38, %v13462_v23  ;;  %v11762_v23 = vld [vmem:[%s16916_s20 + $0x48] sm:$0xff]   ;;  %v11763_v38 = vld [vmem:[%s16916_s20 + $0x50] sm:$0xff]  }
 0xab6   : > { %10458 = vmatmul.mubr.msk.f32.gmra.mrb[174].mxu1 %vm2310_vm7, %v14250_v42  ;;  %v4025_v58 = vpop.xlane.xlu1 %4024 }
 0xab7   : > { %v11918_v19 = vpop.eup %11917  ;;  %11921 = vrcp.f32 %v4025_v58  ;;  %10460 = vmatprep.mubr.msk.f32.mxu1 %vm12268_vm3, %v16947_v11  ;;  %v11761_v58 = vld [vmem:[%s16916_s20 + $0x40] sm:$0xff]  }
 0xab8   : > { %v14257_v52 = vmul.f32 %v11918_v19, %v14136_v32 }
 0xaba   : > { %v4028_v46 = vpop.xlane.xlu0 %4027  ;;  %10461 = vmatmul.mubr.msk.f32.gmra.mrb[176].mxu1 %vm2310_vm7, %v14257_v52 }
 0xabb   : > { %v11920_v8 = vpop.eup %11919  ;;  %11923 = vrcp.f32 %v4028_v46  ;;  %10463 = vmatprep.mubr.msk.f32.mxu1 %vm12268_vm3, %v16947_v11 }
 0xabc   : > { %v14264_v47 = vmul.f32 %v11920_v8, %v14141_v7  ;;  %v11765_v8 = vld [vmem:[%s16917_s28 + $0x40] sm:$0xff]  }
 0xabe   : > { %10464 = vmatmul.mubr.msk.f32.gmra.mrb[178].mxu1 %vm2310_vm7, %v14264_v47  ;;  %v4031_v20 = vpop.xlane.xlu1 %4030 }
 0xabf   : > { %11925 = vrcp.f32 %v4031_v20  ;;  %10529 = vmatprep.mubr.msk.f32.mxu1 %vm12268_vm3, %v16947_v11 }
 0xac1   : > { %v11922_v32 = vpop.eup %11921 }
 0xac2   : > { %v14272_v5 = vmul.f32 %v11922_v32, %v14147_v12  ;;  %v4034_v24 = vpop.xlane.xlu0 %4033 }
 0xac3   : > { %11927 = vrcp.f32 %v4034_v24  ;;  %v11766_v24 = vld [vmem:[%s16917_s28 + $0x48] sm:$0xff]  }
 0xac4   : > { %10530 = vmatmul.mubr.msk.f32.vlgmr.msra.gmra.mrb[180].mxu1 %vm2310_vm7, %v14272_v5 }
 0xac5   : > { %v11924_v7 = vpop.eup %11923  ;;  %10532 = vmatprep.mubr.msk.f32.mxu1 %vm12268_vm3, %v16947_v11  ;;  %10595 = vmatpush3.bf16.msra.mxu1 %v11759_v16 }
 0xac6   : > { %v4037_v56 = vpop.xlane.xlu1 %4036  ;;  %v14279_v9 = vmul.f32 %v11924_v7, %v14152_v48  ;;  %10676 = vmatprep.subr.bf16.mxu1 %v16947_v11 }
 0xac7   : > { %11929 = vrcp.f32 %v4037_v56 }
 0xac8   : > { %10533 = vmatmul.mubr.msk.f32.gmra.mrb[182].mxu1 %vm2310_vm7, %v14279_v9 }
 0xac9   : > { %v11926_v12 = vpop.eup %11925  ;;  %10535 = vmatprep.mubr.msk.f32.mxu1 %vm12268_vm3, %v16947_v11 }
 0xaca   : > { %v4040_v17 = vpop.xlane.xlu0 %4039  ;;  %v14287_v10 = vmul.f32 %v11926_v12, %v14157_v35  ;;  %v11767_v12 = vld [vmem:[%s16917_s28 + $0x50] sm:$0xff]  }
 0xacb   : > { %11931 = vrcp.f32 %v4040_v17 }
 0xacc   : > { %10536 = vmatmul.mubr.msk.f32.gmra.mrb[184].mxu1 %vm2310_vm7, %v14287_v10 }
 0xacd   : > { %v11928_v48 = vpop.eup %11927  ;;  %10538 = vmatprep.mubr.msk.f32.mxu1 %vm12268_vm3, %v16947_v11 }
 0xace   : > { %v4043_v49 = vpop.xlane.xlu1 %4042  ;;  %v14294_v31 = vmul.f32 %v11928_v48, %v14162_v54 }
 0xacf   : > { %11933 = vrcp.f32 %v4043_v49 }
 0xad0   : > { %10539 = vmatmul.mubr.msk.f32.gmra.mrb[186].mxu1 %vm2310_vm7, %v14294_v31 }
 0xad1   : > { %v11930_v63 = vpop.eup %11929  ;;  %10541 = vmatprep.mubr.msk.f32.mxu1 %vm12268_vm3, %v16947_v11 }
 0xad2   : > { %v4046_v35 = vpop.xlane.xlu0 %4045  ;;  %v14301_v4 = vmul.f32 %v11930_v63, %v14167_v22  ;;  %v11768_v63 = vld [vmem:[%s16917_s28 + $0x58] sm:$0xff]  }
 0xad3   : > { %11935 = vrcp.f32 %v4046_v35 }
 0xad4   : > { %10542 = vmatmul.mubr.msk.f32.gmra.mrb[188].mxu1 %vm2310_vm7, %v14301_v4 }
 0xad5   : > { %v11932_v59 = vpop.eup %11931  ;;  %10544 = vmatprep.mubr.msk.f32.mxu1 %vm12268_vm3, %v16947_v11 }
 0xad6   : > { %v4049_v54 = vpop.xlane.xlu1 %4048  ;;  %v14308_v6 = vmul.f32 %v11932_v59, %v14172_v15 }
 0xad7   : > { %11937 = vrcp.f32 %v4049_v54 }
 0xad8   : > { %10545 = vmatmul.mubr.msk.f32.gmra.mrb[190].mxu1 %vm2310_vm7, %v14308_v6 }
 0xad9   : > { %v11934_v34 = vpop.eup %11933  ;;  %10547 = vmatprep.mubr.msk.f32.mxu1 %vm12268_vm3, %v16947_v11 }
 0xada   : > { %v14315_v22 = vmul.f32 %v11934_v34, %v14176_v3 }
 0xadc   : > { %10548 = vmatmul.mubr.msk.f32.gmra.mrb[192].mxu1 %vm2310_vm7, %v14315_v22 }
 0xadd   : > { %v11936_v18 = vpop.eup %11935  ;;  %10550 = vmatprep.mubr.msk.f32.mxu1 %vm12268_vm3, %v16947_v11 }
 0xade   : > { %v14322_v15 = vmul.f32 %v11936_v18, %v14180_v36  ;;  %v16952_v36 = vpack.c.bf16 %v13458_v26, %v13456_v14  ;;  %v16954_v14 = vpack.c.bf16 %v13470_v62, %v13468_v40  ;;  %v16955_v26 = vpack.c.bf16 %v13476_v51, %v13474_v60  ;;  %v11764_v62 = vld [vmem:[%s16916_s20 + $0x58] sm:$0xff]  }
 0xadf   : > { %v16956_v40 = vpack.c.bf16 %v13797_v0, %v13480_v21  ;;  %v16957_v60 = vpack.c.bf16 %v13807_v27, %v13803_v44  ;;  %v16958_v51 = vpack.c.bf16 %v13817_v50, %v13813_v28  ;;  %v16959_v21 = vpack.c.bf16 %v13823_v57, %v13821_v1  ;;  %v16961_v44 = vld [vmem:[#allocation20_spill] sm:$0xff]  ;;  %v16963_v1 = vld [vmem:[#allocation22_spill] sm:$0xff]  ;;  %v16964_v50 = vld [vmem:[#allocation23_spill] sm:$0xff] }
 0xae0   : > { %10551 = vmatmul.mubr.msk.f32.gmra.mrb[194].mxu1 %vm2310_vm7, %v14322_v15  ;;  %v16960_v27 = vpack.c.bf16 %v13829_v2, %v13827_v53  ;;  %v16962_v53 = vld [vmem:[#allocation21_spill] sm:$0xff]  ;;  %v16965_v0 = vld [vmem:[#allocation24_spill] sm:$0xff]  ;;  %v16967_v57 = vld [vmem:[#allocation26_spill] sm:$0xff] }
 0xae1   : > { %v11938_v39 = vpop.eup %11937  ;;  %10553 = vmatprep.mubr.msk.f32.mxu1 %vm12268_vm3, %v16947_v11  ;;  %v16966_v28 = vld [vmem:[#allocation25_spill] sm:$0xff] }
 0xae2   : > { %v14329_v3 = vmul.f32 %v11938_v39, %v14184_v29  ;;  %v11760_v29 = vld [vmem:[%s12486_s8 + $0x8] sm:$0xff]  }
 0xae3   : > { %10557 = vmatpush3.bf16.msra.mxu0 %v11760_v29 }
 0xae4   : > { %10554 = vmatmul.mubr.msk.f32.gmra.mrb[196].mxu1 %vm2310_vm7, %v14329_v3  ;;  %10632 = vmatprep.subr.bf16.mxu0 %v16947_v11 }
 0xae5   : > { %10596 = vmatprep.mubr.msk.bf16.mxu1 %vm12268_vm3, %v16947_v11 }
 0xae8   : > { %10597 = vmatmul.mubr.msk.bf16.vlgmr.msra.gmra.mrb[200].mxu1 %vm2145_vm5, %v16952_v36 }
 0xae9   : > { %10600 = vmatprep.mubr.msk.bf16.mxu1 %vm12268_vm3, %v16947_v11  ;;  %10677 = vmatpush3.bf16.msra.mxu1 %v11761_v58 }
 0xaea   : > { %10678 = vmatprep.subr.bf16.mxu1 %v16947_v11 }
 0xaed   : > { %10679 = vmatpush3.bf16.msra.mxu1 %v11762_v23 }
 0xaee   : > { %10680 = vmatprep.subr.bf16.mxu1 %v16947_v11 }
 0xaf0   : > { %10601 = vmatmul.mubr.msk.bf16.gmra.mrb[204].mxu1 %vm2145_vm5, %v16953_v43 }
 0xaf1   : > { %10604 = vmatprep.mubr.msk.bf16.mxu1 %vm12268_vm3, %v16947_v11  ;;  %10681 = vmatpush3.bf16.msra.mxu1 %v11763_v38 }
 0xaf2   : > { %10682 = vmatprep.subr.bf16.mxu1 %v16947_v11 }
 0xaf5   : > { %10683 = vmatpush3.bf16.msra.mxu1 %v11764_v62 }
 0xaf6   : > { %11532 = vmatprep.subr.bf16.mxu1 %v16946_v41 }
 0xaf8   : > { %10605 = vmatmul.mubr.msk.bf16.gmra.mrb[208].mxu1 %vm2145_vm5, %v16954_v14 }
 0xaf9   : > { %10608 = vmatprep.mubr.msk.bf16.mxu1 %vm12268_vm3, %v16947_v11 }
 0xb00   : > { %10609 = vmatmul.mubr.msk.bf16.gmra.mrb[212].mxu1 %vm2145_vm5, %v16955_v26 }
 0xb01   : > { %10612 = vmatprep.mubr.msk.bf16.mxu1 %vm12268_vm3, %v16947_v11 }
 0xb08   : > { %10613 = vmatmul.mubr.msk.bf16.gmra.mrb[216].mxu1 %vm2145_vm5, %v16956_v40 }
 0xb09   : > { %10616 = vmatprep.mubr.msk.bf16.mxu1 %vm12268_vm3, %v16947_v11 }
 0xb10   : > { %10617 = vmatmul.mubr.msk.bf16.gmra.mrb[220].mxu1 %vm2145_vm5, %v16957_v60 }
 0xb11   : > { %10620 = vmatprep.mubr.msk.bf16.mxu1 %vm12268_vm3, %v16947_v11 }
 0xb18   : > { %10621 = vmatmul.mubr.msk.bf16.gmra.mrb[224].mxu1 %vm2145_vm5, %v16958_v51 }
 0xb19   : > { %10624 = vmatprep.mubr.msk.bf16.mxu1 %vm12268_vm3, %v16947_v11 }
 0xb20   : > { %10625 = vmatmul.mubr.msk.bf16.gmra.mrb[228].mxu1 %vm2145_vm5, %v16959_v21 }
 0xb21   : > { %10628 = vmatprep.mubr.msk.bf16.mxu1 %vm12268_vm3, %v16947_v11 }
 0xb28   : > { %10629 = vmatmul.mubr.msk.bf16.gmra.mrb[232].mxu1 %vm2145_vm5, %v16960_v27 }
 0xb29   : > { %10684 = vmatprep.mubr.msk.bf16.mxu1 %vm12268_vm3, %v16947_v11 }
 0xb30   : > { %10685 = vmatmul.mubr.msk.bf16.vlgmr.msra.gmra.mrb[236].mxu1 %vm1724_vm4, %v12960_v25 }
 0xb31   : > { %10688 = vmatprep.mubr.msk.bf16.mxu1 %vm12268_vm3, %v16947_v11 }
 0xb38   : > { %10689 = vmatmul.mubr.msk.bf16.gmra.mrb[240].mxu1 %vm1724_vm4, %v12969_v30 }
 0xb39   : > { %10692 = vmatprep.mubr.msk.bf16.mxu1 %vm12268_vm3, %v16947_v11 }
 0xb40   : > { %10693 = vmatmul.mubr.msk.bf16.gmra.mrb[244].mxu1 %vm1724_vm4, %v16961_v44 }
 0xb41   : > { %10696 = vmatprep.mubr.msk.bf16.mxu1 %vm12268_vm3, %v16947_v11 }
 0xb48   : > { %10697 = vmatmul.mubr.msk.bf16.gmra.mrb[248].mxu1 %vm1724_vm4, %v16962_v53 }
 0xb49   : > { %10700 = vmatprep.mubr.msk.bf16.mxu1 %vm12268_vm3, %v16947_v11 }
 0xb50   : > { %10701 = vmatmul.mubr.msk.bf16.gmra.mrb[252].mxu1 %vm1724_vm4, %v16963_v1 }
 0xb51   : > { %10704 = vmatprep.mubr.msk.bf16.mxu1 %vm12268_vm3, %v16947_v11 }
 0xb58   : > { %10705 = vmatmul.mubr.msk.bf16.gmra.mrb[0].mxu1 %vm1724_vm4, %v16964_v50 }
 0xb59   : > { %10708 = vmatprep.mubr.msk.bf16.mxu1 %vm12268_vm3, %v16947_v11 }
 0xb60   : > { %10709 = vmatmul.mubr.msk.bf16.gmra.mrb[4].mxu1 %vm1724_vm4, %v16965_v0 }
 0xb61   : > { %10712 = vmatprep.mubr.msk.bf16.mxu1 %vm12268_vm3, %v16947_v11 }
 0xb68   : > { %10713 = vmatmul.mubr.msk.bf16.gmra.mrb[8].mxu1 %vm1724_vm4, %v16966_v28 }
 0xb69   : > { %10716 = vmatprep.mubr.msk.bf16.mxu1 %vm12268_vm3, %v16947_v11 }
 0xb70   : > { %10717 = vmatmul.mubr.msk.bf16.gmra.mrb[12].mxu1 %vm1724_vm4, %v16967_v57 }
 0xb71   : > { %v3761_v2 = vpop.f32.mrb[162].mxu1  ;;  %10782 = vmatprep.mubr.msk.f32.mxu1 %vm12268_vm3, %v16947_v11 }
 0xb72   : > { %v10441_v19 = vpop.f32.mrb[163].mxu1 }
 0xb75   : > { %v3766_v46 = vpop.f32.mrb[164].mxu1 }
 0xb76   : > { %v4214_v20 = vpack.c.bf16 %v3766_v46, %v3761_v2  ;;  %v10444_v32 = vpop.f32.mrb[165].mxu1 }
 0xb78   : > { %10559 = vmatmul.mubr.msk.bf16.vlgmr.msra.gmra.mrb[164].mxu0 %vm2145_vm5, %v4214_v20 }
 0xb79   : > { %v3771_v16 = vpop.f32.mrb[166].mxu1  ;;  %10562 = vmatprep.mubr.msk.bf16.mxu0 %vm12268_vm3, %v16947_v11  ;;  %10633 = vmatpush3.bf16.msra.mxu0 %v11765_v8 }
 0xb7a   : > { %v10447_v7 = vpop.f32.mrb[167].mxu1  ;;  %10634 = vmatprep.subr.bf16.mxu0 %v16947_v11 }
 0xb7d   : > { %v3776_v56 = vpop.f32.mrb[168].mxu1  ;;  %10635 = vmatpush3.bf16.msra.mxu0 %v11766_v24 }
 0xb7e   : > { %v4215_v17 = vpack.c.bf16 %v3776_v56, %v3771_v16  ;;  %v10450_v48 = vpop.f32.mrb[169].mxu1  ;;  %10636 = vmatprep.subr.bf16.mxu0 %v16947_v11 }
 0xb80   : > { %10563 = vmatmul.mubr.msk.bf16.gmra.mrb[168].mxu0 %vm2145_vm5, %v4215_v17 }
 0xb81   : > { %v3781_v49 = vpop.f32.mrb[170].mxu1  ;;  %10566 = vmatprep.mubr.msk.bf16.mxu0 %vm12268_vm3, %v16947_v11  ;;  %10637 = vmatpush3.bf16.msra.mxu0 %v11767_v12 }
 0xb82   : > { %v10453_v35 = vpop.f32.mrb[171].mxu1  ;;  %10638 = vmatprep.subr.bf16.mxu0 %v16947_v11 }
 0xb85   : > { %v3786_v59 = vpop.f32.mrb[172].mxu1  ;;  %10639 = vmatpush3.bf16.msra.mxu0 %v11768_v63 }
 0xb86   : > { %v4216_v54 = vpack.c.bf16 %v3786_v59, %v3781_v49  ;;  %v10456_v34 = vpop.f32.mrb[173].mxu1  ;;  %10720 = vmatprep.subr.bf16.mxu0 %v16947_v11 }
 0xb88   : > { %10567 = vmatmul.mubr.msk.bf16.gmra.mrb[172].mxu0 %vm2145_vm5, %v4216_v54 }
 0xb89   : > { %v3791_v18 = vpop.f32.mrb[174].mxu1  ;;  %10570 = vmatprep.mubr.msk.bf16.mxu0 %vm12268_vm3, %v16947_v11 }
 0xb8a   : > { %v10459_v39 = vpop.f32.mrb[175].mxu1 }
 0xb8d   : > { %v3796_v36 = vpop.f32.mrb[176].mxu1 }
 0xb8e   : > { %v4217_v43 = vpack.c.bf16 %v3796_v36, %v3791_v18  ;;  %v10462_v29 = vpop.f32.mrb[177].mxu1 }
 0xb90   : > { %10571 = vmatmul.mubr.msk.bf16.gmra.mrb[176].mxu0 %vm2145_vm5, %v4217_v43 }
 0xb91   : > { %v3801_v58 = vpop.f32.mrb[178].mxu1  ;;  %10574 = vmatprep.mubr.msk.bf16.mxu0 %vm12268_vm3, %v16947_v11 }
 0xb92   : > { %v10465_v14 = vpop.f32.mrb[179].mxu1 }
 0xb97   : > { %v4170_v26 = vpop.f32.mrb[180].mxu1 }
 0xb98   : > { %v4218_v23 = vpack.c.bf16 %v4170_v26, %v3801_v58  ;;  %v10531_v38 = vpop.f32.mrb[181].mxu1  ;;  %v11769_v26 = vld [vmem:[%s12481_s25 + $0x40] sm:$0xff]  }
 0xb9a   : > { %10575 = vmatmul.mubr.msk.bf16.gmra.mrb[180].mxu0 %vm2145_vm5, %v4218_v23 }
 0xb9b   : > { %v4175_v40 = vpop.f32.mrb[182].mxu1  ;;  %10578 = vmatprep.mubr.msk.bf16.mxu0 %vm12268_vm3, %v16947_v11 }
 0xb9c   : > { %v10534_v62 = vpop.f32.mrb[183].mxu1 }
 0xb9f   : > { %v4180_v60 = vpop.f32.mrb[184].mxu1 }
 0xba0   : > { %v4219_v51 = vpack.c.bf16 %v4180_v60, %v4175_v40  ;;  %v10537_v21 = vpop.f32.mrb[185].mxu1 }
 0xba2   : > { %10579 = vmatmul.mubr.msk.bf16.gmra.mrb[184].mxu0 %vm2145_vm5, %v4219_v51 }
 0xba3   : > { %v4185_v27 = vpop.f32.mrb[186].mxu1  ;;  %10582 = vmatprep.mubr.msk.bf16.mxu0 %vm12268_vm3, %v16947_v11 }
 0xba4   : > { %v10540_v2 = vpop.f32.mrb[187].mxu1 }
 0xba5   : > { %v11770_v2 = vld [vmem:[%s12481_s25 + $0x48] sm:$0xff]  }
 0xba7   : > { %v4190_v19 = vpop.f32.mrb[188].mxu1 }
 0xba8   : > { %v4220_v46 = vpack.c.bf16 %v4190_v19, %v4185_v27  ;;  %v10543_v8 = vpop.f32.mrb[189].mxu1 }
 0xba9   : > { %v11771_v8 = vld [vmem:[%s12481_s25 + $0x50] sm:$0xff]  }
 0xbaa   : > { %10583 = vmatmul.mubr.msk.bf16.gmra.mrb[188].mxu0 %vm2145_vm5, %v4220_v46 }
 0xbab   : > { %v4195_v20 = vpop.f32.mrb[190].mxu1  ;;  %10586 = vmatprep.mubr.msk.bf16.mxu0 %vm12268_vm3, %v16947_v11 }
 0xbac   : > { %v10546_v32 = vpop.f32.mrb[191].mxu1 }
 0xbaf   : > { %v4200_v16 = vpop.f32.mrb[192].mxu1 }
 0xbb0   : > { %v4221_v24 = vpack.c.bf16 %v4200_v16, %v4195_v20  ;;  %v10549_v7 = vpop.f32.mrb[193].mxu1  ;;  %v11772_v16 = vld [vmem:[%s12481_s25 + $0x58] sm:$0xff]  }
 0xbb2   : > { %10587 = vmatmul.mubr.msk.bf16.gmra.mrb[192].mxu0 %vm2145_vm5, %v4221_v24 }
 0xbb3   : > { %v4205_v56 = vpop.f32.mrb[194].mxu1  ;;  %10590 = vmatprep.mubr.msk.bf16.mxu0 %vm12268_vm3, %v16947_v11 }
 0xbb4   : > { %v10552_v12 = vpop.f32.mrb[195].mxu1 }
 0xbb7   : > { %v4210_v17 = vpop.f32.mrb[196].mxu1 }
 0xbb8   : > { %v4222_v48 = vpack.c.bf16 %v4210_v17, %v4205_v56  ;;  %v10555_v49 = vpop.f32.mrb[197].mxu1 }
 0xbba   : > { %10591 = vmatmul.mubr.msk.bf16.gmra.mrb[196].mxu0 %vm2145_vm5, %v4222_v48 }
 0xbbb   : > { %v14468_v63 = vpop.f32.mrb[200].mxu1  ;;  %10640 = vmatprep.mubr.msk.bf16.mxu0 %vm12268_vm3, %v16947_v11 }
 0xbbc   : > { %v10598_v35 = vpop.f32.mrb[201].mxu1 }
 0xbbd   : > { %v14472_v59 = vpop.f32.mrb[202].mxu1 }
 0xbbe   : > { %v10599_v54 = vpop.f32.mrb[203].mxu1 }
 0xbc2   : > { %10641 = vmatmul.mubr.msk.bf16.vlgmr.msra.gmra.mrb[200].mxu0 %vm1724_vm4, %v12960_v25 }
 0xbc3   : > { %v14476_v34 = vpop.f32.mrb[204].mxu1  ;;  %10644 = vmatprep.mubr.msk.bf16.mxu0 %vm12268_vm3, %v16947_v11  ;;  %10721 = vmatpush3.bf16.msra.mxu0 %v11769_v26 }
 0xbc4   : > { %v10602_v18 = vpop.f32.mrb[205].mxu1  ;;  %10722 = vmatprep.subr.bf16.mxu0 %v16947_v11 }
 0xbc5   : > { %v14480_v39 = vpop.f32.mrb[206].mxu1 }
 0xbc6   : > { %v10603_v36 = vpop.f32.mrb[207].mxu1 }
 0xbc7   : > { %10723 = vmatpush3.bf16.msra.mxu0 %v11770_v2 }
 0xbc8   : > { %10724 = vmatprep.subr.bf16.mxu0 %v16947_v11 }
 0xbca   : > { %10645 = vmatmul.mubr.msk.bf16.gmra.mrb[204].mxu0 %vm1724_vm4, %v12969_v30 }
 0xbcb   : > { %v14484_v43 = vpop.f32.mrb[208].mxu1  ;;  %10648 = vmatprep.mubr.msk.bf16.mxu0 %vm12268_vm3, %v16947_v11  ;;  %10725 = vmatpush3.bf16.msra.mxu0 %v11771_v8 }
 0xbcc   : > { %v10606_v29 = vpop.f32.mrb[209].mxu1  ;;  %10726 = vmatprep.subr.bf16.mxu0 %v16947_v11 }
 0xbcd   : > { %v14488_v58 = vpop.f32.mrb[210].mxu1 }
 0xbce   : > { %v10607_v14 = vpop.f32.mrb[211].mxu1 }
 0xbcf   : > { %10727 = vmatpush3.bf16.msra.mxu0 %v11772_v16  ;;  %v14547_v14 = vld [vmem:[%s12501_s26 + $0x2] ss:$0 sm:$0xff] }
 0xbd0   : > { %11560 = vmatprep.subr.bf16.mxu0 %v16946_v41 }
 0xbd2   : > { %10649 = vmatmul.mubr.msk.bf16.gmra.mrb[208].mxu0 %vm1724_vm4, %v16961_v44 }
 0xbd3   : > { %v14494_v23 = vpop.f32.mrb[212].mxu1  ;;  %10652 = vmatprep.mubr.msk.bf16.mxu0 %vm12268_vm3, %v16947_v11 }
 0xbd4   : > { %v10610_v38 = vpop.f32.mrb[213].mxu1 }
 0xbd5   : > { %v14498_v40 = vpop.f32.mrb[214].mxu1 }
 0xbd6   : > { %v10611_v62 = vpop.f32.mrb[215].mxu1 }
 0xbda   : > { %10653 = vmatmul.mubr.msk.bf16.gmra.mrb[212].mxu0 %vm1724_vm4, %v16962_v53 }
 0xbdb   : > { %v14502_v60 = vpop.f32.mrb[216].mxu1  ;;  %10656 = vmatprep.mubr.msk.bf16.mxu0 %vm12268_vm3, %v16947_v11 }
 0xbdc   : > { %v10614_v51 = vpop.f32.mrb[217].mxu1 }
 0xbdd   : > { %v14506_v21 = vpop.f32.mrb[218].mxu1 }
 0xbde   : > { %v10615_v27 = vpop.f32.mrb[219].mxu1 }
 0xbe2   : > { %10657 = vmatmul.mubr.msk.bf16.gmra.mrb[216].mxu0 %vm1724_vm4, %v16963_v1 }
 0xbe3   : > { %v14511_v19 = vpop.f32.mrb[220].mxu1  ;;  %10660 = vmatprep.mubr.msk.bf16.mxu0 %vm12268_vm3, %v16947_v11 }
 0xbe4   : > { %v10618_v46 = vpop.f32.mrb[221].mxu1 }
 0xbe5   : > { %v14517_v20 = vpop.f32.mrb[222].mxu1 }
 0xbe6   : > { %v10619_v32 = vpop.f32.mrb[223].mxu1 }
 0xbea   : > { %10661 = vmatmul.mubr.msk.bf16.gmra.mrb[220].mxu0 %vm1724_vm4, %v16964_v50 }
 0xbeb   : > { %v14523_v24 = vpop.f32.mrb[224].mxu1  ;;  %10664 = vmatprep.mubr.msk.bf16.mxu0 %vm12268_vm3, %v16947_v11 }
 0xbec   : > { %v10622_v7 = vpop.f32.mrb[225].mxu1 }
 0xbed   : > { %v14528_v56 = vpop.f32.mrb[226].mxu1 }
 0xbee   : > { %v10623_v12 = vpop.f32.mrb[227].mxu1 }
 0xbf2   : > { %10665 = vmatmul.mubr.msk.bf16.gmra.mrb[224].mxu0 %vm1724_vm4, %v16965_v0 }
 0xbf3   : > { %v14532_v17 = vpop.f32.mrb[228].mxu1  ;;  %10668 = vmatprep.mubr.msk.bf16.mxu0 %vm12268_vm3, %v16947_v11 }
 0xbf4   : > { %v10626_v48 = vpop.f32.mrb[229].mxu1 }
 0xbf5   : > { %v14536_v49 = vpop.f32.mrb[230].mxu1 }
 0xbf6   : > { %v10627_v35 = vpop.f32.mrb[231].mxu1 }
 0xbfa   : > { %10669 = vmatmul.mubr.msk.bf16.gmra.mrb[228].mxu0 %vm1724_vm4, %v16966_v28 }
 0xbfb   : > { %v14540_v54 = vpop.f32.mrb[232].mxu1  ;;  %10672 = vmatprep.mubr.msk.bf16.mxu0 %vm12268_vm3, %v16947_v11 }
 0xbfc   : > { %v10630_v18 = vpop.f32.mrb[233].mxu1 }
 0xbfd   : > { %v14544_v36 = vpop.f32.mrb[234].mxu1 }
 0xbfe   : > { %v10631_v29 = vpop.f32.mrb[235].mxu1 }
 0xc02   : > { %10673 = vmatmul.mubr.msk.bf16.gmra.mrb[232].mxu0 %vm1724_vm4, %v16967_v57 }
 0xc03   : > { %v4723_v26 = vpop.f32.mrb[236].mxu1  ;;  %10728 = vmatprep.mubr.msk.bf16.mxu0 %vm12268_vm3, %v16947_v11 }
 0xc04   : > { %v4724_v38 = vadd.f32 %v14547_v14, %v4723_v26  ;;  %v10686_v62 = vpop.f32.mrb[237].mxu1 }
 0xc05   : > { %v4726_v51 = vpop.f32.mrb[238].mxu1 }
 0xc06   : > { %v4727_v27 = vadd.f32 %v14547_v14, %v4726_v51  ;;  %v10687_v2 = vpop.f32.mrb[239].mxu1 }
 0xc08   : > { %v11533_v46 = vpack.c.bf16 %v4727_v27, %v4724_v38 }
 0xc0a   : > { %10729 = vmatmul.mubr.msk.bf16.vlgmr.msra.gmra.mrb[236].mxu0 %vm1724_vm4, %v12960_v25  ;;  %11535 = vmatpush3.bf16.xpose.msk.msra.mxu1 %vm13062_vm6, %v11533_v46 }
 0xc0b   : > { %v4731_v32 = vpop.f32.mrb[240].mxu1  ;;  %10732 = vmatprep.mubr.msk.bf16.mxu0 %vm12268_vm3, %v16947_v11  ;;  %11536 = vmatprep.subr.bf16.mxu1 %v16946_v41 }
 0xc0c   : > { %v4732_v16 = vadd.f32 %v14547_v14, %v4731_v32  ;;  %v10690_v7 = vpop.f32.mrb[241].mxu1 }
 0xc0d   : > { %v4734_v12 = vpop.f32.mrb[242].mxu1 }
 0xc0e   : > { %v4735_v48 = vadd.f32 %v14547_v14, %v4734_v12  ;;  %v10691_v35 = vpop.f32.mrb[243].mxu1 }
 0xc10   : > { %v11537_v18 = vpack.c.bf16 %v4735_v48, %v4732_v16 }
 0xc12   : > { %10733 = vmatmul.mubr.msk.bf16.gmra.mrb[240].mxu0 %vm1724_vm4, %v12969_v30  ;;  %11539 = vmatpush3.bf16.xpose.msk.msra.mxu1 %vm13062_vm6, %v11537_v18 }
 0xc13   : > { %v4739_v29 = vpop.f32.mrb[244].mxu1  ;;  %10736 = vmatprep.mubr.msk.bf16.mxu0 %vm12268_vm3, %v16947_v11  ;;  %11540 = vmatprep.subr.bf16.mxu1 %v16946_v41 }
 0xc14   : > { %v4740_v26 = vadd.f32 %v14547_v14, %v4739_v29  ;;  %v10694_v38 = vpop.f32.mrb[245].mxu1 }
 0xc15   : > { %v4742_v62 = vpop.f32.mrb[246].mxu1 }
 0xc16   : > { %v4743_v51 = vadd.f32 %v14547_v14, %v4742_v62  ;;  %v10695_v27 = vpop.f32.mrb[247].mxu1 }
 0xc18   : > { %v11541_v2 = vpack.c.bf16 %v4743_v51, %v4740_v26 }
 0xc1a   : > { %10737 = vmatmul.mubr.msk.bf16.gmra.mrb[244].mxu0 %vm1724_vm4, %v16961_v44  ;;  %11543 = vmatpush3.bf16.xpose.msk.msra.mxu1 %vm13062_vm6, %v11541_v2 }
 0xc1b   : > { %v4747_v46 = vpop.f32.mrb[248].mxu1  ;;  %10740 = vmatprep.mubr.msk.bf16.mxu0 %vm12268_vm3, %v16947_v11  ;;  %11544 = vmatprep.subr.bf16.mxu1 %v16946_v41 }
 0xc1c   : > { %v4748_v32 = vadd.f32 %v14547_v14, %v4747_v46  ;;  %v10698_v16 = vpop.f32.mrb[249].mxu1 }
 0xc1d   : > { %v4750_v7 = vpop.f32.mrb[250].mxu1 }
 0xc1e   : > { %v4751_v12 = vadd.f32 %v14547_v14, %v4750_v7  ;;  %v10699_v48 = vpop.f32.mrb[251].mxu1 }
 0xc20   : > { %v11545_v35 = vpack.c.bf16 %v4751_v12, %v4748_v32 }
 0xc22   : > { %10741 = vmatmul.mubr.msk.bf16.gmra.mrb[248].mxu0 %vm1724_vm4, %v16962_v53  ;;  %11547 = vmatpush3.bf16.xpose.msk.msra.mxu1 %vm13062_vm6, %v11545_v35 }
 0xc23   : > { %v4755_v18 = vpop.f32.mrb[252].mxu1  ;;  %10744 = vmatprep.mubr.msk.bf16.mxu0 %vm12268_vm3, %v16947_v11  ;;  %10780 = vmatprep.subr.mxu1 %v16947_v11 }
 0xc24   : > { %v10702_v29 = vpop.f32.mrb[253].mxu1  ;;  %v4756_v38 = vadd.f32 %v14547_v14, %v4755_v18 }
 0xc25   : > { %v4758_v26 = vpop.f32.mrb[254].mxu1 }
 0xc26   : > { %v10703_v62 = vpop.f32.mrb[255].mxu1  ;;  %v4759_v51 = vadd.f32 %v14547_v14, %v4758_v26 }
 0xc2a   : > { %10745 = vmatmul.mubr.msk.bf16.gmra.mrb[252].mxu0 %vm1724_vm4, %v16963_v1  ;;  %10781 = vmatpush3.xpose.msk.msra.mxu1 %vm2145_vm5, %v4756_v38 }
 0xc2b   : > { %v4763_v27 = vpop.f32.mrb[0].mxu1  ;;  %10748 = vmatprep.mubr.msk.bf16.mxu0 %vm12268_vm3, %v16947_v11  ;;  %11548 = vmatprep.subr.bf16.mxu1 %v16946_v41 }
 0xc2c   : > { %v4764_v2 = vadd.f32 %v14547_v14, %v4763_v27  ;;  %v10706_v46 = vpop.f32.mrb[1].mxu1 }
 0xc2d   : > { %v4766_v32 = vpop.f32.mrb[2].mxu1 }
 0xc2e   : > { %v11561_v16 = vpack.c.bf16 %v4764_v2, %v4759_v51  ;;  %v10707_v7 = vpop.f32.mrb[3].mxu1  ;;  %v4767_v12 = vadd.f32 %v14547_v14, %v4766_v32 }
 0xc30   : > { %11563 = vmatpush3.bf16.xpose.msk.msra.mxu0 %vm13062_vm6, %v11561_v16 }
 0xc31   : > { %11564 = vmatprep.subr.bf16.mxu0 %v16946_v41 }
 0xc32   : > { %10749 = vmatmul.mubr.msk.bf16.gmra.mrb[0].mxu0 %vm1724_vm4, %v16964_v50 }
 0xc33   : > { %v4771_v48 = vpop.f32.mrb[4].mxu1  ;;  %10752 = vmatprep.mubr.msk.bf16.mxu0 %vm12268_vm3, %v16947_v11 }
 0xc34   : > { %v4772_v35 = vadd.f32 %v14547_v14, %v4771_v48  ;;  %v10710_v18 = vpop.f32.mrb[5].mxu1 }
 0xc35   : > { %v4774_v29 = vpop.f32.mrb[6].mxu1 }
 0xc36   : > { %v11565_v26 = vpack.c.bf16 %v4772_v35, %v4767_v12  ;;  %v10711_v38 = vpop.f32.mrb[7].mxu1  ;;  %v4775_v62 = vadd.f32 %v14547_v14, %v4774_v29 }
 0xc38   : > { %11567 = vmatpush3.bf16.xpose.msk.msra.mxu0 %vm13062_vm6, %v11565_v26 }
 0xc39   : > { %11568 = vmatprep.subr.bf16.mxu0 %v16946_v41 }
 0xc3a   : > { %10753 = vmatmul.mubr.msk.bf16.gmra.mrb[4].mxu0 %vm1724_vm4, %v16965_v0 }
 0xc3b   : > { %v4779_v51 = vpop.f32.mrb[8].mxu1  ;;  %10756 = vmatprep.mubr.msk.bf16.mxu0 %vm12268_vm3, %v16947_v11 }
 0xc3c   : > { %v4780_v27 = vadd.f32 %v14547_v14, %v4779_v51  ;;  %v10714_v2 = vpop.f32.mrb[9].mxu1 }
 0xc3d   : > { %v4782_v46 = vpop.f32.mrb[10].mxu1 }
 0xc3e   : > { %v11569_v32 = vpack.c.bf16 %v4780_v27, %v4775_v62  ;;  %v10715_v16 = vpop.f32.mrb[11].mxu1  ;;  %v4783_v7 = vadd.f32 %v14547_v14, %v4782_v46 }
 0xc40   : > { %11571 = vmatpush3.bf16.xpose.msk.msra.mxu0 %vm13062_vm6, %v11569_v32 }
 0xc41   : > { %11572 = vmatprep.subr.bf16.mxu0 %v16946_v41 }
 0xc42   : > { %10757 = vmatmul.mubr.msk.bf16.gmra.mrb[8].mxu0 %vm1724_vm4, %v16966_v28 }
 0xc43   : > { %v4787_v12 = vpop.f32.mrb[12].mxu1  ;;  %10760 = vmatprep.mubr.msk.bf16.mxu0 %vm12268_vm3, %v16947_v11 }
 0xc44   : > { %v4788_v48 = vadd.f32 %v14547_v14, %v4787_v12  ;;  %v10718_v35 = vpop.f32.mrb[13].mxu1 }
 0xc45   : > { %v4790_v18 = vpop.f32.mrb[14].mxu1 }
 0xc46   : > { %v11573_v29 = vpack.c.bf16 %v4788_v48, %v4783_v7  ;;  %v10719_v26 = vpop.f32.mrb[15].mxu1  ;;  %v4791_v51 = vadd.f32 %v14547_v14, %v4790_v18 }
 0xc48   : > { %11575 = vmatpush3.bf16.xpose.msk.msra.mxu0 %vm13062_vm6, %v11573_v29 }
 0xc49   : > { %10870 = vmatprep.subr.mxu0 %v16947_v11 }
 0xc4a   : > { %10761 = vmatmul.mubr.msk.bf16.gmra.mrb[12].mxu0 %vm1724_vm4, %v16967_v57 }
 0xc4b   : > { %v4293_v38 = vpop.f32.mrb[164].mxu0  ;;  %10872 = vmatprep.mubr.msk.f32.mxu0 %vm12268_vm3, %v16947_v11 }
 0xc4c   : > { %v10560_v62 = vpop.f32.mrb[165].mxu0  ;;  %v14634_v27 = vadd.f32 %v14468_v63, %v4293_v38 }
 0xc4d   : > { %v4296_v2 = vpop.f32.mrb[166].mxu0 }
 0xc4e   : > { %16969 = vst [vmem:[#allocation46_spill] sm:$0xff] %v14634_v27  ;;  %v10561_v46 = vpop.f32.mrb[167].mxu0  ;;  %v14637_v32 = vadd.f32 %v14472_v59, %v4296_v2 }
 0xc50   : > { %16970 = vst [vmem:[#allocation47_spill] sm:$0xff] %v14637_v32  ;;  %10871 = vmatpush3.xpose.msk.msra.mxu0 %vm2145_vm5, %v4791_v51 }
 0xc51   : > { %10944 = vmatprep.subr.bf16.mxu0 %v16947_v11 }
 0xc53   : > { %v4301_v16 = vpop.f32.mrb[168].mxu0 }
 0xc54   : > { %v10564_v7 = vpop.f32.mrb[169].mxu0  ;;  %v14642_v12 = vadd.f32 %v14476_v34, %v4301_v16 }
 0xc55   : > { %v4304_v48 = vpop.f32.mrb[170].mxu0 }
 0xc56   : > { %16971 = vst [vmem:[#allocation48_spill] sm:$0xff] %v14642_v12  ;;  %v10565_v35 = vpop.f32.mrb[171].mxu0  ;;  %v14645_v14 = vadd.f32 %v14480_v39, %v4304_v48 }
 0xc58   : > { %16972 = vst [vmem:[#allocation49_spill] sm:$0xff] %v14645_v14 }
 0xc5b   : > { %v4309_v63 = vpop.f32.mrb[172].mxu0 }
 0xc5c   : > { %v10568_v18 = vpop.f32.mrb[173].mxu0  ;;  %v14648_v29 = vadd.f32 %v14484_v43, %v4309_v63 }
 0xc5d   : > { %v4312_v59 = vpop.f32.mrb[174].mxu0 }
 0xc5e   : > { %16973 = vst [vmem:[#allocation50_spill] sm:$0xff] %v14648_v29  ;;  %v10569_v26 = vpop.f32.mrb[175].mxu0  ;;  %v14651_v38 = vadd.f32 %v14488_v58, %v4312_v59 }
 0xc60   : > { %16974 = vst [vmem:[#allocation51_spill] sm:$0xff] %v14651_v38 }
 0xc63   : > { %v4317_v62 = vpop.f32.mrb[176].mxu0 }
 0xc64   : > { %v10572_v51 = vpop.f32.mrb[177].mxu0  ;;  %v14654_v34 = vadd.f32 %v14494_v23, %v4317_v62 }
 0xc65   : > { %v4320_v2 = vpop.f32.mrb[178].mxu0 }
 0xc66   : > { %16975 = vst [vmem:[#allocation52_spill] sm:$0xff] %v14654_v34  ;;  %v10573_v46 = vpop.f32.mrb[179].mxu0  ;;  %v14657_v39 = vadd.f32 %v14498_v40, %v4320_v2 }
 0xc68   : > { %16976 = vst [vmem:[#allocation53_spill] sm:$0xff] %v14657_v39 }
 0xc6d   : > { %v4325_v16 = vpop.f32.mrb[180].mxu0 }
 0xc6e   : > { %v10576_v7 = vpop.f32.mrb[181].mxu0  ;;  %v14660_v43 = vadd.f32 %v14502_v60, %v4325_v16 }
 0xc6f   : > { %v4328_v48 = vpop.f32.mrb[182].mxu0 }
 0xc70   : > { %16977 = vst [vmem:[#allocation54_spill] sm:$0xff] %v14660_v43  ;;  %v10577_v35 = vpop.f32.mrb[183].mxu0  ;;  %v14663_v58 = vadd.f32 %v14506_v21, %v4328_v48 }
 0xc72   : > { %16978 = vst [vmem:[#allocation55_spill] sm:$0xff] %v14663_v58 }
 0xc75   : > { %v4333_v63 = vpop.f32.mrb[184].mxu0 }
 0xc76   : > { %v10580_v18 = vpop.f32.mrb[185].mxu0  ;;  %v14666_v23 = vadd.f32 %v14511_v19, %v4333_v63 }
 0xc77   : > { %v4336_v59 = vpop.f32.mrb[186].mxu0 }
 0xc78   : > { %16979 = vst [vmem:[#allocation56_spill] sm:$0xff] %v14666_v23  ;;  %v10581_v26 = vpop.f32.mrb[187].mxu0  ;;  %v14669_v40 = vadd.f32 %v14517_v20, %v4336_v59 }
 0xc7a   : > { %16980 = vst [vmem:[#allocation57_spill] sm:$0xff] %v14669_v40 }
 0xc7d   : > { %v4341_v62 = vpop.f32.mrb[188].mxu0 }
 0xc7e   : > { %v10584_v51 = vpop.f32.mrb[189].mxu0  ;;  %v14672_v60 = vadd.f32 %v14523_v24, %v4341_v62  ;;  %v14690_v62 = vld [vmem:[%s12496_s27 + $0x2] ss:$0 sm:$0xff] }
 0xc7f   : > { %v4344_v2 = vpop.f32.mrb[190].mxu0 }
 0xc80   : > { %16981 = vst [vmem:[#allocation58_spill] sm:$0xff] %v14672_v60  ;;  %v10585_v46 = vpop.f32.mrb[191].mxu0  ;;  %v14675_v21 = vadd.f32 %v14528_v56, %v4344_v2 }
 0xc82   : > { %16982 = vst [vmem:[#allocation59_spill] sm:$0xff] %v14675_v21 }
 0xc85   : > { %v4349_v16 = vpop.f32.mrb[192].mxu0 }
 0xc86   : > { %v10588_v7 = vpop.f32.mrb[193].mxu0  ;;  %v14678_v19 = vadd.f32 %v14532_v17, %v4349_v16 }
 0xc87   : > { %v4352_v48 = vpop.f32.mrb[194].mxu0 }
 0xc88   : > { %16983 = vst [vmem:[#allocation60_spill] sm:$0xff] %v14678_v19  ;;  %v10589_v35 = vpop.f32.mrb[195].mxu0  ;;  %v14681_v20 = vadd.f32 %v14536_v49, %v4352_v48 }
 0xc8a   : > { %16984 = vst [vmem:[#allocation61_spill] sm:$0xff] %v14681_v20 }
 0xc8d   : > { %v4357_v63 = vpop.f32.mrb[196].mxu0 }
 0xc8e   : > { %v10592_v18 = vpop.f32.mrb[197].mxu0  ;;  %v14684_v24 = vadd.f32 %v14540_v54, %v4357_v63 }
 0xc8f   : > { %v4360_v59 = vpop.f32.mrb[198].mxu0 }
 0xc90   : > { %16985 = vst [vmem:[#allocation62_spill] sm:$0xff] %v14684_v24  ;;  %v10593_v26 = vpop.f32.mrb[199].mxu0  ;;  %v14687_v56 = vadd.f32 %v14544_v36, %v4360_v59 }
 0xc92   : > { %16986 = vst [vmem:[#allocation63_spill] sm:$0xff] %v14687_v56 }
 0xc95   : > { %v4577_v51 = vpop.f32.mrb[200].mxu0 }
 0xc96   : > { %v4578_v17 = vadd.f32 %v14690_v62, %v4577_v51  ;;  %v10642_v2 = vpop.f32.mrb[201].mxu0 }
 0xc97   : > { %v4580_v46 = vpop.f32.mrb[202].mxu0 }
 0xc98   : > { %v10643_v16 = vpop.f32.mrb[203].mxu0  ;;  %10783 = vmatmul.mubr.msk.f32.vlgmr.msra.gmra.mrb[198].mxu1 %vm2145_vm5, %v4578_v17  ;;  %v4581_v49 = vadd.f32 %v14690_v62, %v4580_v46 }
 0xc99   : > { %10785 = vmatprep.mubr.msk.f32.mxu1 %vm12268_vm3, %v16947_v11 }
 0xc9c   : > { %10786 = vmatmul.mubr.msk.f32.gmra.mrb[16].mxu1 %vm2145_vm5, %v4581_v49 }
 0xc9d   : > { %v4585_v54 = vpop.f32.mrb[204].mxu0  ;;  %10788 = vmatprep.mubr.msk.f32.mxu1 %vm12268_vm3, %v16947_v11 }
 0xc9e   : > { %v4586_v36 = vadd.f32 %v14690_v62, %v4585_v54  ;;  %v10646_v7 = vpop.f32.mrb[205].mxu0 }
 0xc9f   : > { %v4588_v48 = vpop.f32.mrb[206].mxu0 }
 0xca0   : > { %v10647_v35 = vpop.f32.mrb[207].mxu0  ;;  %10789 = vmatmul.mubr.msk.f32.gmra.mrb[18].mxu1 %vm2145_vm5, %v4586_v36  ;;  %v4589_v63 = vadd.f32 %v14690_v62, %v4588_v48 }
 0xca1   : > { %10791 = vmatprep.mubr.msk.f32.mxu1 %vm12268_vm3, %v16947_v11 }
 0xca4   : > { %10792 = vmatmul.mubr.msk.f32.gmra.mrb[20].mxu1 %vm2145_vm5, %v4589_v63 }
 0xca5   : > { %v4593_v18 = vpop.f32.mrb[208].mxu0  ;;  %10794 = vmatprep.mubr.msk.f32.mxu1 %vm12268_vm3, %v16947_v11 }
 0xca6   : > { %v4594_v59 = vadd.f32 %v14690_v62, %v4593_v18  ;;  %v10650_v26 = vpop.f32.mrb[209].mxu0 }
 0xca7   : > { %v4596_v51 = vpop.f32.mrb[210].mxu0 }
 0xca8   : > { %v10651_v17 = vpop.f32.mrb[211].mxu0  ;;  %10795 = vmatmul.mubr.msk.f32.gmra.mrb[22].mxu1 %vm2145_vm5, %v4594_v59  ;;  %v4597_v2 = vadd.f32 %v14690_v62, %v4596_v51 }
 0xca9   : > { %10797 = vmatprep.mubr.msk.f32.mxu1 %vm12268_vm3, %v16947_v11 }
 0xcac   : > { %10798 = vmatmul.mubr.msk.f32.gmra.mrb[24].mxu1 %vm2145_vm5, %v4597_v2 }
 0xcad   : > { %v4601_v46 = vpop.f32.mrb[212].mxu0  ;;  %10800 = vmatprep.mubr.msk.f32.mxu1 %vm12268_vm3, %v16947_v11 }
 0xcae   : > { %v4602_v16 = vadd.f32 %v14690_v62, %v4601_v46  ;;  %v10654_v49 = vpop.f32.mrb[213].mxu0 }
 0xcaf   : > { %v4604_v54 = vpop.f32.mrb[214].mxu0 }
 0xcb0   : > { %v10655_v36 = vpop.f32.mrb[215].mxu0  ;;  %10801 = vmatmul.mubr.msk.f32.gmra.mrb[26].mxu1 %vm2145_vm5, %v4602_v16  ;;  %v4605_v7 = vadd.f32 %v14690_v62, %v4604_v54 }
 0xcb1   : > { %10803 = vmatprep.mubr.msk.f32.mxu1 %vm12268_vm3, %v16947_v11 }
 0xcb4   : > { %10804 = vmatmul.mubr.msk.f32.gmra.mrb[28].mxu1 %vm2145_vm5, %v4605_v7 }
 0xcb5   : > { %v4609_v48 = vpop.f32.mrb[216].mxu0  ;;  %10806 = vmatprep.mubr.msk.f32.mxu1 %vm12268_vm3, %v16947_v11 }
 0xcb6   : > { %v4610_v35 = vadd.f32 %v14690_v62, %v4609_v48  ;;  %v10658_v63 = vpop.f32.mrb[217].mxu0 }
 0xcb7   : > { %v4612_v18 = vpop.f32.mrb[218].mxu0 }
 0xcb8   : > { %v4613_v59 = vadd.f32 %v14690_v62, %v4612_v18  ;;  %v10659_v26 = vpop.f32.mrb[219].mxu0  ;;  %10807 = vmatmul.mubr.msk.f32.gmra.mrb[30].mxu1 %vm2145_vm5, %v4610_v35 }
 0xcb9   : > { %10827 = vmatprep.mubr.msk.f32.mxu1 %vm12268_vm3, %v16947_v11 }
 0xcba   : > { %10873 = vmatmul.mubr.msk.f32.vlgmr.msra.gmra.mrb[162].mxu0 %vm2145_vm5, %v4613_v59 }
 0xcbb   : > { %10875 = vmatprep.mubr.msk.f32.mxu0 %vm12268_vm3, %v16947_v11 }
 0xcbd   : > { %v4617_v51 = vpop.f32.mrb[220].mxu0 }
 0xcbe   : > { %v4618_v17 = vadd.f32 %v14690_v62, %v4617_v51  ;;  %v10662_v2 = vpop.f32.mrb[221].mxu0 }
 0xcbf   : > { %v4620_v46 = vpop.f32.mrb[222].mxu0 }
 0xcc0   : > { %v10663_v16 = vpop.f32.mrb[223].mxu0  ;;  %10876 = vmatmul.mubr.msk.f32.gmra.mrb[16].mxu0 %vm2145_vm5, %v4618_v17  ;;  %v4621_v49 = vadd.f32 %v14690_v62, %v4620_v46 }
 0xcc1   : > { %10878 = vmatprep.mubr.msk.f32.mxu0 %vm12268_vm3, %v16947_v11 }
 0xcc4   : > { %10879 = vmatmul.mubr.msk.f32.gmra.mrb[18].mxu0 %vm2145_vm5, %v4621_v49 }
 0xcc5   : > { %v4625_v54 = vpop.f32.mrb[224].mxu0  ;;  %10881 = vmatprep.mubr.msk.f32.mxu0 %vm12268_vm3, %v16947_v11 }
 0xcc6   : > { %v4626_v36 = vadd.f32 %v14690_v62, %v4625_v54  ;;  %v10666_v7 = vpop.f32.mrb[225].mxu0 }
 0xcc7   : > { %v4628_v48 = vpop.f32.mrb[226].mxu0 }
 0xcc8   : > { %v10667_v35 = vpop.f32.mrb[227].mxu0  ;;  %10882 = vmatmul.mubr.msk.f32.gmra.mrb[20].mxu0 %vm2145_vm5, %v4626_v36  ;;  %v4629_v63 = vadd.f32 %v14690_v62, %v4628_v48  ;;  %v14762_v48 = vld [vmem:[%s12506_s22 + $0x2] ss:$0 sm:$0xff] }
 0xcc9   : > { %10884 = vmatprep.mubr.msk.f32.mxu0 %vm12268_vm3, %v16947_v11 }
 0xccc   : > { %10885 = vmatmul.mubr.msk.f32.gmra.mrb[22].mxu0 %vm2145_vm5, %v4629_v63 }
 0xccd   : > { %v4633_v18 = vpop.f32.mrb[228].mxu0  ;;  %10887 = vmatprep.mubr.msk.f32.mxu0 %vm12268_vm3, %v16947_v11 }
 0xcce   : > { %v4634_v59 = vadd.f32 %v14690_v62, %v4633_v18  ;;  %v10670_v26 = vpop.f32.mrb[229].mxu0 }
 0xccf   : > { %v4636_v51 = vpop.f32.mrb[230].mxu0 }
 0xcd0   : > { %v10671_v17 = vpop.f32.mrb[231].mxu0  ;;  %10888 = vmatmul.mubr.msk.f32.gmra.mrb[24].mxu0 %vm2145_vm5, %v4634_v59  ;;  %v4637_v2 = vadd.f32 %v14690_v62, %v4636_v51 }
 0xcd1   : > { %10890 = vmatprep.mubr.msk.f32.mxu0 %vm12268_vm3, %v16947_v11 }
 0xcd4   : > { %10891 = vmatmul.mubr.msk.f32.gmra.mrb[26].mxu0 %vm2145_vm5, %v4637_v2 }
 0xcd5   : > { %v4641_v46 = vpop.f32.mrb[232].mxu0  ;;  %10893 = vmatprep.mubr.msk.f32.mxu0 %vm12268_vm3, %v16947_v11 }
 0xcd6   : > { %v4642_v16 = vadd.f32 %v14690_v62, %v4641_v46  ;;  %v10674_v49 = vpop.f32.mrb[233].mxu0 }
 0xcd7   : > { %v4644_v54 = vpop.f32.mrb[234].mxu0 }
 0xcd8   : > { %v10675_v36 = vpop.f32.mrb[235].mxu0  ;;  %10894 = vmatmul.mubr.msk.f32.gmra.mrb[28].mxu0 %vm2145_vm5, %v4642_v16  ;;  %v4645_v7 = vadd.f32 %v14690_v62, %v4644_v54 }
 0xcd9   : > { %10896 = vmatprep.mubr.msk.f32.mxu0 %vm12268_vm3, %v16947_v11 }
 0xcdc   : > { %10897 = vmatmul.mubr.msk.f32.gmra.mrb[30].mxu0 %vm2145_vm5, %v4645_v7 }
 0xcdd   : > { %v4869_v35 = vpop.f32.mrb[236].mxu0  ;;  %10946 = vmatprep.mubr.msk.bf16.mxu0 %vm12268_vm3, %v16947_v11 }
 0xcde   : > { %v4870_v63 = vadd.f32 %v14762_v48, %v4869_v35  ;;  %v10730_v18 = vpop.f32.mrb[237].mxu0 }
 0xcdf   : > { %v4872_v59 = vpop.f32.mrb[238].mxu0 }
 0xce0   : > { %v4873_v26 = vadd.f32 %v14762_v48, %v4872_v59  ;;  %v10731_v51 = vpop.f32.mrb[239].mxu0 }
 0xce2   : > { %v11549_v17 = vpack.c.bf16 %v4873_v26, %v4870_v63 }
 0xce4   : > { %11550 = vmatpush3.bf16.msra.mxu1 %v11549_v17 }
 0xce5   : > { %v4877_v2 = vpop.f32.mrb[240].mxu0  ;;  %11551 = vmatprep.subr.bf16.mxu1 %v16946_v41 }
 0xce6   : > { %v4878_v62 = vadd.f32 %v14762_v48, %v4877_v2  ;;  %v10734_v46 = vpop.f32.mrb[241].mxu0 }
 0xce7   : > { %v4880_v16 = vpop.f32.mrb[242].mxu0 }
 0xce8   : > { %v4881_v49 = vadd.f32 %v14762_v48, %v4880_v16  ;;  %v10735_v54 = vpop.f32.mrb[243].mxu0 }
 0xcea   : > { %v11552_v36 = vpack.c.bf16 %v4881_v49, %v4878_v62 }
 0xcec   : > { %11553 = vmatpush3.bf16.msra.mxu1 %v11552_v36 }
 0xced   : > { %v4885_v7 = vpop.f32.mrb[244].mxu0  ;;  %11554 = vmatprep.subr.bf16.mxu1 %v16946_v41 }
 0xcee   : > { %v4886_v35 = vadd.f32 %v14762_v48, %v4885_v7  ;;  %v10738_v18 = vpop.f32.mrb[245].mxu0 }
 0xcef   : > { %v4888_v63 = vpop.f32.mrb[246].mxu0 }
 0xcf0   : > { %v4889_v59 = vadd.f32 %v14762_v48, %v4888_v63  ;;  %v10739_v26 = vpop.f32.mrb[247].mxu0 }
 0xcf2   : > { %v11555_v51 = vpack.c.bf16 %v4889_v59, %v4886_v35 }
 0xcf4   : > { %11556 = vmatpush3.bf16.msra.mxu1 %v11555_v51 }
 0xcf5   : > { %v4893_v17 = vpop.f32.mrb[248].mxu0  ;;  %11557 = vmatprep.subr.bf16.mxu1 %v16946_v41 }
 0xcf6   : > { %v4894_v2 = vadd.f32 %v14762_v48, %v4893_v17  ;;  %v10742_v46 = vpop.f32.mrb[249].mxu0 }
 0xcf7   : > { %v4896_v62 = vpop.f32.mrb[250].mxu0 }
 0xcf8   : > { %v4897_v16 = vadd.f32 %v14762_v48, %v4896_v62  ;;  %v10743_v49 = vpop.f32.mrb[251].mxu0 }
 0xcfa   : > { %v11558_v54 = vpack.c.bf16 %v4897_v16, %v4894_v2 }
 0xcfc   : > { %11559 = vmatpush3.bf16.msra.mxu1 %v11558_v54 }
 0xcfd   : > { %v4901_v36 = vpop.f32.mrb[252].mxu0  ;;  %10825 = vmatprep.subr.mxu1 %v16947_v11 }
 0xcfe   : > { %v4902_v7 = vadd.f32 %v14762_v48, %v4901_v36  ;;  %v10746_v18 = vpop.f32.mrb[253].mxu0 }
 0xcff   : > { %v4904_v35 = vpop.f32.mrb[254].mxu0 }
 0xd00   : > { %v10747_v63 = vpop.f32.mrb[255].mxu0  ;;  %10826 = vmatpush3.msra.mxu1 %v4902_v7  ;;  %v14782_v59 = vadd.f32 %v14762_v48, %v4904_v35 }
 0xd01   : > { %11576 = vmatprep.subr.bf16.mxu1 %v16946_v41 }
 0xd05   : > { %v4909_v26 = vpop.f32.mrb[0].mxu0 }
 0xd06   : > { %v14785_v51 = vadd.f32 %v14762_v48, %v4909_v26  ;;  %v10750_v17 = vpop.f32.mrb[1].mxu0 }
 0xd07   : > { %v4912_v2 = vpop.f32.mrb[2].mxu0 }
 0xd08   : > { %v10751_v62 = vpop.f32.mrb[3].mxu0  ;;  %v14790_v16 = vadd.f32 %v14762_v48, %v4912_v2 }
 0xd0d   : > { %v4917_v49 = vpop.f32.mrb[4].mxu0 }
 0xd0e   : > { %v14793_v54 = vadd.f32 %v14762_v48, %v4917_v49  ;;  %v10754_v36 = vpop.f32.mrb[5].mxu0 }
 0xd0f   : > { %v4920_v7 = vpop.f32.mrb[6].mxu0 }
 0xd10   : > { %v10755_v35 = vpop.f32.mrb[7].mxu0  ;;  %v14798_v63 = vadd.f32 %v14762_v48, %v4920_v7 }
 0xd15   : > { %v4925_v26 = vpop.f32.mrb[8].mxu0 }
 0xd16   : > { %v14801_v17 = vadd.f32 %v14762_v48, %v4925_v26  ;;  %v10758_v62 = vpop.f32.mrb[9].mxu0 }
 0xd17   : > { %v4928_v2 = vpop.f32.mrb[10].mxu0 }
 0xd18   : > { %v10759_v49 = vpop.f32.mrb[11].mxu0  ;;  %v14806_v36 = vadd.f32 %v14762_v48, %v4928_v2 }
 0xd1d   : > { %v4933_v8 = vpop.f32.mrb[12].mxu0 }
 0xd1e   : > { %v14809_v18 = vadd.f32 %v14762_v48, %v4933_v8  ;;  %v10762_v35 = vpop.f32.mrb[13].mxu0 }
 0xd1f   : > { %v14811_v7 = vpop.f32.mrb[14].mxu0 }
 0xd20   : > { %v10763_v56 = vpop.f32.mrb[15].mxu0 }
 0xd6b   : > { %v14815_v62 = vpop.f32.mrb[198].mxu1 }
 0xd6c   : > { %v5104_v46 = vsel %vm2310_vm7, %v14815_v62, -inf  ;;  %v10784_v49 = vpop.f32.mrb[199].mxu1 }
 0xd6d   : > { %5105 = vmax.xlane.f32.xlu0 %v5104_v46 }
 0xd6f   : > { %v14819_v2 = vpop.f32.mrb[16].mxu1 }
 0xd70   : > { %v10787_v24 = vpop.f32.mrb[17].mxu1  ;;  %v5107_v8 = vsel %vm2310_vm7, %v14819_v2, -inf }
 0xd71   : > { %5108 = vmax.xlane.f32.xlu1 %v5107_v8 }
 0xd73   : > { %v14823_v35 = vpop.f32.mrb[18].mxu1 }
 0xd74   : > { %v5110_v26 = vsel %vm2310_vm7, %v14823_v35, -inf  ;;  %v10790_v56 = vpop.f32.mrb[19].mxu1 }
 0xd75   : > { %5111 = vmax.xlane.f32.xlu0 %v5110_v26 }
 0xd77   : > { %v14827_v20 = vpop.f32.mrb[20].mxu1 }
 0xd78   : > { %v10793_v19 = vpop.f32.mrb[21].mxu1  ;;  %v5113_v46 = vsel %vm2310_vm7, %v14827_v20, -inf }
 0xd79   : > { %5114 = vmax.xlane.f32.xlu1 %v5113_v46 }
 0xd7b   : > { %v14831_v49 = vpop.f32.mrb[22].mxu1 }
 0xd7c   : > { %v5116_v24 = vsel %vm2310_vm7, %v14831_v49, -inf  ;;  %v10796_v8 = vpop.f32.mrb[23].mxu1 }
 0xd7d   : > { %5117 = vmax.xlane.f32.xlu0 %v5116_v24 }
 0xd7f   : > { %v14835_v21 = vpop.f32.mrb[24].mxu1 }
 0xd80   : > { %v10799_v60 = vpop.f32.mrb[25].mxu1  ;;  %v5119_v26 = vsel %vm2310_vm7, %v14835_v21, -inf }
 0xd81   : > { %5120 = vmax.xlane.f32.xlu1 %v5119_v26 }
 0xd83   : > { %v14839_v56 = vpop.f32.mrb[26].mxu1 }
 0xd84   : > { %v5122_v19 = vsel %vm2310_vm7, %v14839_v56, -inf  ;;  %v10802_v46 = vpop.f32.mrb[27].mxu1 }
 0xd85   : > { %5123 = vmax.xlane.f32.xlu0 %v5122_v19 }
 0xd87   : > { %v14843_v40 = vpop.f32.mrb[28].mxu1 }
 0xd88   : > { %v10805_v23 = vpop.f32.mrb[29].mxu1  ;;  %v5125_v24 = vsel %vm2310_vm7, %v14843_v40, -inf }
 0xd89   : > { %5126 = vmax.xlane.f32.xlu1 %v5125_v24 }
 0xd8b   : > { %v14847_v8 = vpop.f32.mrb[30].mxu1 }
 0xd8c   : > { %v5128_v60 = vsel %vm2310_vm7, %v14847_v8, -inf  ;;  %v10808_v26 = vpop.f32.mrb[31].mxu1 }
 0xd8d   : > { %5129 = vmax.xlane.f32.xlu0 %v5128_v60  ;;  %v14851_v58 = vpop.f32.mrb[162].mxu0 }
 0xd8e   : > { %v10874_v43 = vpop.f32.mrb[163].mxu0  ;;  %v5513_v19 = vsel %vm2310_vm7, %v14851_v58, -inf }
 0xd8f   : > { %5514 = vmax.xlane.f32.xlu1 %v5513_v19 }
 0xd93   : > { %v14855_v46 = vpop.f32.mrb[16].mxu0 }
 0xd94   : > { %v5516_v23 = vsel %vm2310_vm7, %v14855_v46, -inf  ;;  %v10877_v24 = vpop.f32.mrb[17].mxu0 }
 0xd95   : > { %5517 = vmax.xlane.f32.xlu0 %v5516_v23 }
 0xd97   : > { %v14859_v39 = vpop.f32.mrb[18].mxu0 }
 0xd98   : > { %v10880_v34 = vpop.f32.mrb[19].mxu0  ;;  %v5519_v60 = vsel %vm2310_vm7, %v14859_v39, -inf }
 0xd99   : > { %5520 = vmax.xlane.f32.xlu1 %v5519_v60 }
 0xd9b   : > { %v14863_v26 = vpop.f32.mrb[20].mxu0 }
 0xd9c   : > { %v5522_v43 = vsel %vm2310_vm7, %v14863_v26, -inf  ;;  %v10883_v19 = vpop.f32.mrb[21].mxu0 }
 0xd9d   : > { %5523 = vmax.xlane.f32.xlu0 %v5522_v43 }
 0xd9f   : > { %v14867_v38 = vpop.f32.mrb[22].mxu0 }
 0xda0   : > { %v10886_v29 = vpop.f32.mrb[23].mxu0  ;;  %v5525_v23 = vsel %vm2310_vm7, %v14867_v38, -inf }
 0xda1   : > { %5526 = vmax.xlane.f32.xlu1 %v5525_v23 }
 0xda3   : > { %v14871_v24 = vpop.f32.mrb[24].mxu0 }
 0xda4   : > { %v5528_v34 = vsel %vm2310_vm7, %v14871_v24, -inf  ;;  %v10889_v60 = vpop.f32.mrb[25].mxu0 }
 0xda5   : > { %5529 = vmax.xlane.f32.xlu0 %v5528_v34 }
 0xda7   : > { %v14875_v14 = vpop.f32.mrb[26].mxu0 }
 0xda8   : > { %v10892_v12 = vpop.f32.mrb[27].mxu0  ;;  %v5531_v43 = vsel %vm2310_vm7, %v14875_v14, -inf }
 0xda9   : > { %5532 = vmax.xlane.f32.xlu1 %v5531_v43 }
 0xdab   : > { %v14879_v19 = vpop.f32.mrb[28].mxu0 }
 0xdac   : > { %v5534_v29 = vsel %vm2310_vm7, %v14879_v19, -inf  ;;  %v10895_v23 = vpop.f32.mrb[29].mxu0 }
 0xdad   : > { %5535 = vmax.xlane.f32.xlu0 %v5534_v29 }
 0xdaf   : > { %v14883_v32 = vpop.f32.mrb[30].mxu0 }
 0xdb0   : > { %v10898_v27 = vpop.f32.mrb[31].mxu0  ;;  %v5537_v34 = vsel %vm2310_vm7, %v14883_v32, -inf }
 0xdb1   : > { %5538 = vmax.xlane.f32.xlu1 %v5537_v34 }
 0xdfa   : > { %v5106_v60 = vpop.xlane.xlu0 %5105 }
 0xdfb   : > { %v5131_v12 = vsub.f32 %v14815_v62, %v5106_v60 }
 0xdfd   : > { %v5140_v57 = vmul.f32 1.442695, %v5131_v12 }
 0xdfe   : > { %v5109_v28 = vpop.xlane.xlu1 %5108 }
 0xdff   : > { %11939 = vpow2.f32 %v5140_v57  ;;  %v5132_v43 = vsub.f32 %v14819_v2, %v5109_v28 }
 0xe01   : > { %v5142_v0 = vmul.f32 1.442695, %v5132_v43 }
 0xe02   : > { %v5112_v50 = vpop.xlane.xlu0 %5111 }
 0xe03   : > { %11941 = vpow2.f32 %v5142_v0  ;;  %v5133_v29 = vsub.f32 %v14823_v35, %v5112_v50 }
 0xe05   : > { %v5144_v23 = vmul.f32 1.442695, %v5133_v29 }
 0xe06   : > { %v5115_v1 = vpop.xlane.xlu1 %5114 }
 0xe07   : > { %11943 = vpow2.f32 %v5144_v23  ;;  %v5134_v27 = vsub.f32 %v14827_v20, %v5115_v1 }
 0xe09   : > { %v14891_v53 = vpop.eup %11939  ;;  %v5146_v34 = vmul.f32 1.442695, %v5134_v27 }
 0xe0a   : > { %v5118_v44 = vpop.xlane.xlu0 %5117  ;;  %v5158_v62 = vsel %vm2310_vm7, %v14891_v53, 0.0 }
 0xe0b   : > { %11945 = vpow2.f32 %v5146_v34  ;;  %v5135_v28 = vsub.f32 %v14831_v49, %v5118_v44  ;;  %5159 = vadd.xlane.f32.xlu0 %v5158_v62 }
 0xe0d   : > { %v14896_v57 = vpop.eup %11941  ;;  %v5148_v0 = vmul.f32 1.442695, %v5135_v28 }
 0xe0e   : > { %v5121_v50 = vpop.xlane.xlu1 %5120  ;;  %v5161_v2 = vsel %vm2310_vm7, %v14896_v57, 0.0 }
 0xe0f   : > { %11947 = vpow2.f32 %v5148_v0  ;;  %v5136_v1 = vsub.f32 %v14835_v21, %v5121_v50  ;;  %5162 = vadd.xlane.f32.xlu1 %v5161_v2 }
 0xe11   : > { %v14901_v20 = vpop.eup %11943  ;;  %v5150_v35 = vmul.f32 1.442695, %v5136_v1 }
 0xe12   : > { %v5124_v60 = vpop.xlane.xlu0 %5123  ;;  %v5164_v12 = vsel %vm2310_vm7, %v14901_v20, 0.0 }
 0xe13   : > { %11949 = vpow2.f32 %v5150_v35  ;;  %v5137_v44 = vsub.f32 %v14839_v56, %v5124_v60  ;;  %5165 = vadd.xlane.f32.xlu0 %v5164_v12 }
 0xe15   : > { %v14906_v49 = vpop.eup %11945  ;;  %v5152_v43 = vmul.f32 1.442695, %v5137_v44 }
 0xe16   : > { %v5127_v29 = vpop.xlane.xlu1 %5126  ;;  %v5167_v23 = vsel %vm2310_vm7, %v14906_v49, 0.0 }
 0xe17   : > { %11951 = vpow2.f32 %v5152_v43  ;;  %v5138_v21 = vsub.f32 %v14843_v40, %v5127_v29  ;;  %5168 = vadd.xlane.f32.xlu1 %v5167_v23 }
 0xe19   : > { %v14911_v27 = vpop.eup %11947  ;;  %v5154_v34 = vmul.f32 1.442695, %v5138_v21 }
 0xe1a   : > { %v5130_v62 = vpop.xlane.xlu0 %5129  ;;  %v5170_v28 = vsel %vm2310_vm7, %v14911_v27, 0.0 }
 0xe1b   : > { %11953 = vpow2.f32 %v5154_v34  ;;  %v5139_v56 = vsub.f32 %v14847_v8, %v5130_v62  ;;  %5171 = vadd.xlane.f32.xlu0 %v5170_v28 }
 0xe1c   : > { %v5515_v0 = vpop.xlane.xlu1 %5514 }
 0xe1d   : > { %v14916_v50 = vpop.eup %11949  ;;  %v5156_v2 = vmul.f32 1.442695, %v5139_v56  ;;  %v5540_v1 = vsub.f32 %v14851_v58, %v5515_v0 }
 0xe1e   : > { %v5173_v40 = vsel %vm2310_vm7, %v14916_v50, 0.0 }
 0xe1f   : > { %11955 = vpow2.f32 %v5156_v2  ;;  %v5549_v35 = vmul.f32 1.442695, %v5540_v1  ;;  %5174 = vadd.xlane.f32.xlu1 %v5173_v40 }
 0xe21   : > { %v14921_v60 = vpop.eup %11951  ;;  %11957 = vpow2.f32 %v5549_v35 }
 0xe22   : > { %v5518_v12 = vpop.xlane.xlu0 %5517  ;;  %v5176_v8 = vsel %vm2310_vm7, %v14921_v60, 0.0 }
 0xe23   : > { %v5541_v44 = vsub.f32 %v14855_v46, %v5518_v12  ;;  %5177 = vadd.xlane.f32.xlu0 %v5176_v8 }
 0xe25   : > { %v14926_v43 = vpop.eup %11953  ;;  %v5551_v29 = vmul.f32 1.442695, %v5541_v44 }
 0xe26   : > { %v5521_v58 = vpop.xlane.xlu1 %5520  ;;  %v5179_v23 = vsel %vm2310_vm7, %v14926_v43, 0.0 }
 0xe27   : > { %11959 = vpow2.f32 %v5551_v29  ;;  %v5542_v21 = vsub.f32 %v14859_v39, %v5521_v58  ;;  %5180 = vadd.xlane.f32.xlu1 %v5179_v23 }
 0xe29   : > { %v14931_v34 = vpop.eup %11955  ;;  %v5553_v62 = vmul.f32 1.442695, %v5542_v21 }
 0xe2a   : > { %v5524_v28 = vpop.xlane.xlu0 %5523  ;;  %v5182_v56 = vsel %vm2310_vm7, %v14931_v34, 0.0 }
 0xe2b   : > { %v14935_v46 = vpop.eup %11957  ;;  %11961 = vpow2.f32 %v5553_v62  ;;  %v5543_v0 = vsub.f32 %v14863_v26, %v5524_v28  ;;  %5183 = vadd.xlane.f32.xlu0 %v5182_v56 }
 0xe2c   : > { %v5567_v2 = vsel %vm2310_vm7, %v14935_v46, 0.0 }
 0xe2d   : > { %v5555_v1 = vmul.f32 1.442695, %v5543_v0  ;;  %5568 = vadd.xlane.f32.xlu1 %v5567_v2 }
 0xe2e   : > { %v5527_v39 = vpop.xlane.xlu1 %5526 }
 0xe2f   : > { %11963 = vpow2.f32 %v5555_v1  ;;  %v5544_v40 = vsub.f32 %v14867_v38, %v5527_v39 }
 0xe31   : > { %v14941_v35 = vpop.eup %11959  ;;  %v5557_v12 = vmul.f32 1.442695, %v5544_v40 }
 0xe32   : > { %v5530_v8 = vpop.xlane.xlu0 %5529  ;;  %v5570_v44 = vsel %vm2310_vm7, %v14941_v35, 0.0 }
 0xe33   : > { %11965 = vpow2.f32 %v5557_v12  ;;  %v5545_v26 = vsub.f32 %v14871_v24, %v5530_v8  ;;  %5571 = vadd.xlane.f32.xlu0 %v5570_v44 }
 0xe35   : > { %v14946_v29 = vpop.eup %11961  ;;  %v5559_v58 = vmul.f32 1.442695, %v5545_v26 }
 0xe36   : > { %v5533_v23 = vpop.xlane.xlu1 %5532  ;;  %v5573_v21 = vsel %vm2310_vm7, %v14946_v29, 0.0 }
 0xe37   : > { %11967 = vpow2.f32 %v5559_v58  ;;  %v5546_v38 = vsub.f32 %v14875_v14, %v5533_v23  ;;  %5574 = vadd.xlane.f32.xlu1 %v5573_v21 }
 0xe39   : > { %v14951_v62 = vpop.eup %11963  ;;  %v5561_v28 = vmul.f32 1.442695, %v5546_v38 }
 0xe3a   : > { %v5536_v56 = vpop.xlane.xlu0 %5535  ;;  %v5576_v0 = vsel %vm2310_vm7, %v14951_v62, 0.0 }
 0xe3b   : > { %11969 = vpow2.f32 %v5561_v28  ;;  %v5547_v24 = vsub.f32 %v14879_v19, %v5536_v56  ;;  %5577 = vadd.xlane.f32.xlu0 %v5576_v0 }
 0xe3d   : > { %v14956_v2 = vpop.eup %11965  ;;  %v5563_v1 = vmul.f32 1.442695, %v5547_v24  ;;  %v16987_v24 = vld [vmem:[#allocation28_spill] sm:$0xff] }
 0xe3e   : > { %v5539_v39 = vpop.xlane.xlu1 %5538  ;;  %v5579_v40 = vsel %vm2310_vm7, %v14956_v2, 0.0 }
 0xe3f   : > { %11971 = vpow2.f32 %v5563_v1  ;;  %v5548_v14 = vsub.f32 %v14883_v32, %v5539_v39  ;;  %5580 = vadd.xlane.f32.xlu1 %v5579_v40  ;;  %v3659_v1 = vadd.f32 %v14189_v13, %v16987_v24 }
 0xe41   : > { %v14961_v12 = vpop.eup %11967  ;;  %v5565_v8 = vmul.f32 1.442695, %v5548_v14 }
 0xe42   : > { %v5582_v44 = vsel %vm2310_vm7, %v14961_v12, 0.0 }
 0xe43   : > { %11973 = vpow2.f32 %v5565_v8  ;;  %5583 = vadd.xlane.f32.xlu0 %v5582_v44  ;;  %v16988_v44 = vpack.c.bf16 %v14785_v51, %v14782_v59  ;;  %v16990_v59 = vpack.c.bf16 %v14793_v54, %v14790_v16  ;;  %v16991_v51 = vld [vmem:[#allocation30_spill] sm:$0xff]  ;;  %v16992_v16 = vpack.c.bf16 %v14801_v17, %v14798_v63  ;;  %v16993_v54 = vld [vmem:[#allocation31_spill] sm:$0xff]  ;;  %v16995_v17 = vld [vmem:[#allocation32_spill] sm:$0xff] }
 0xe44   : > { %v16994_v63 = vpack.c.bf16 %v14809_v18, %v14806_v36  ;;  %v16996_v36 = vld [vmem:[#allocation33_spill] sm:$0xff] }
 0xe45   : > { %v14965_v19 = vpop.eup %11969 }
 0xe46   : > { %v5585_v26 = vsel %vm2310_vm7, %v14965_v19, 0.0 }
 0xe47   : > { %5586 = vadd.xlane.f32.xlu1 %v5585_v26  ;;  %v16989_v26 = vld [vmem:[#allocation29_spill] sm:$0xff] }
 0xe49   : > { %v14969_v58 = vpop.eup %11971 }
 0xe4a   : > { %v5588_v32 = vsel %vm2310_vm7, %v14969_v58, 0.0 }
 0xe4b   : > { %5589 = vadd.xlane.f32.xlu0 %v5588_v32  ;;  %v3660_v32 = vadd.f32 %v14200_v45, %v16989_v26  ;;  %v3661_v45 = vadd.f32 %v14211_v55, %v16991_v51  ;;  %v3662_v55 = vadd.f32 %v14222_v61, %v16993_v54  ;;  %v3663_v61 = vadd.f32 %v14233_v33, %v16995_v17 }
 0xe4c   : > { %v3664_v33 = vadd.f32 %v14242_v37, %v16996_v36 }
 0xe4d   : > { %v14973_v23 = vpop.eup %11973 }
 0xe4e   : > { %v5591_v21 = vsel %vm2310_vm7, %v14973_v23, 0.0 }
 0xe4f   : > { %5592 = vadd.xlane.f32.xlu1 %v5591_v21 }
 0xe98   : > { %v5160_v38 = vpop.xlane.xlu0 %5159 }
 0xe99   : > { %11975 = vrcp.f32 %v5160_v38 }
 0xe9c   : > { %v5163_v28 = vpop.xlane.xlu1 %5162 }
 0xe9d   : > { %11977 = vrcp.f32 %v5163_v28 }
 0xea0   : > { %v5166_v56 = vpop.xlane.xlu0 %5165 }
 0xea1   : > { %11979 = vrcp.f32 %v5166_v56 }
 0xea3   : > { %v11976_v0 = vpop.eup %11975 }
 0xea4   : > { %v5194_v39 = vmul.f32 %v11976_v0, %v14891_v53  ;;  %v5169_v40 = vpop.xlane.xlu1 %5168 }
 0xea5   : > { %11981 = vrcp.f32 %v5169_v40 }
 0xea6   : > { %v14980_v14 = vadd.f32 %v5194_v39, %v3659_v1  ;;  %10828 = vmatmul.mubr.msk.f32.vlgmr.msra.gmra.mrb[32].mxu1 %vm2310_vm7, %v5194_v39 }
 0xea7   : > { %v11978_v8 = vpop.eup %11977  ;;  %11578 = vmatpush3.bf16.msra.mxu1 %v16988_v44  ;;  %10830 = vmatprep.mubr.msk.f32.mxu1 %vm12268_vm3, %v16947_v11 }
 0xea8   : > { %v5195_v13 = vmul.f32 %v11978_v8, %v14896_v57  ;;  %v5172_v53 = vpop.xlane.xlu0 %5171  ;;  %11579 = vmatprep.subr.bf16.mxu1 %v16946_v41  ;;  %v4937_v8 = vadd.f32 %v14762_v48, %v14811_v7 }
 0xea9   : > { %11983 = vrcp.f32 %v5172_v53 }
 0xeaa   : > { %v14992_v21 = vadd.f32 %v5195_v13, %v3660_v32  ;;  %10831 = vmatmul.mubr.msk.f32.gmra.mrb[34].mxu1 %vm2310_vm7, %v5195_v13  ;;  %v16997_v13 = vld [vmem:[#allocation34_spill] sm:$0xff] }
 0xeab   : > { %v11980_v38 = vpop.eup %11979  ;;  %11581 = vmatpush3.bf16.msra.mxu1 %v16990_v59  ;;  %10833 = vmatprep.mubr.msk.f32.mxu1 %vm12268_vm3, %v16947_v11  ;;  %v3665_v53 = vadd.f32 %v14250_v42, %v16997_v13  ;;  %v16998_v59 = vld [vmem:[#allocation35_spill] sm:$0xff] }
 0xeac   : > { %v5196_v57 = vmul.f32 %v11980_v38, %v14901_v20  ;;  %v5175_v28 = vpop.xlane.xlu1 %5174  ;;  %11582 = vmatprep.subr.bf16.mxu1 %v16946_v41  ;;  %v3666_v51 = vadd.f32 %v14257_v52, %v16998_v59  ;;  %v17000_v52 = vld [vmem:[#allocation37_spill] sm:$0xff] }
 0xead   : > { %11985 = vrcp.f32 %v5175_v28 }
 0xeae   : > { %v15004_v56 = vadd.f32 %v5196_v57, %v3661_v45  ;;  %10834 = vmatmul.mubr.msk.f32.gmra.mrb[36].mxu1 %vm2310_vm7, %v5196_v57 }
 0xeaf   : > { %v11982_v0 = vpop.eup %11981  ;;  %11584 = vmatpush3.bf16.msra.mxu1 %v16992_v16  ;;  %10836 = vmatprep.mubr.msk.f32.mxu1 %vm12268_vm3, %v16947_v11 }
 0xeb0   : > { %v5197_v20 = vmul.f32 %v11982_v0, %v14906_v49  ;;  %v5178_v24 = vpop.xlane.xlu0 %5177  ;;  %11585 = vmatprep.subr.bf16.mxu1 %v16946_v41 }
 0xeb1   : > { %11987 = vrcp.f32 %v5178_v24 }
 0xeb2   : > { %v15016_v1 = vadd.f32 %v5197_v20, %v3662_v55  ;;  %10837 = vmatmul.mubr.msk.f32.gmra.mrb[38].mxu1 %vm2310_vm7, %v5197_v20 }
 0xeb3   : > { %v11984_v39 = vpop.eup %11983  ;;  %11587 = vmatpush3.bf16.msra.mxu1 %v16994_v63  ;;  %10839 = vmatprep.mubr.msk.f32.mxu1 %vm12268_vm3, %v16947_v11 }
 0xeb4   : > { %v5198_v49 = vmul.f32 %v11984_v39, %v14911_v27  ;;  %v5181_v40 = vpop.xlane.xlu1 %5180  ;;  %10915 = vmatprep.subr.mxu1 %v16947_v11 }
 0xeb5   : > { %11989 = vrcp.f32 %v5181_v40  ;;  %v17002_v40 = vld [vmem:[#allocation39_spill] sm:$0xff] }
 0xeb6   : > { %v15030_v44 = vadd.f32 %v5198_v49, %v3663_v61  ;;  %10840 = vmatmul.mubr.msk.f32.gmra.mrb[40].mxu1 %vm2310_vm7, %v5198_v49 }
 0xeb7   : > { %v11986_v18 = vpop.eup %11985  ;;  %10916 = vmatpush3.msra.mxu1 %v4937_v8  ;;  %10842 = vmatprep.mubr.msk.f32.mxu1 %vm12268_vm3, %v16947_v11  ;;  %v4070_v8 = vadd.f32 %v14287_v10, %v17002_v40 }
 0xeb8   : > { %v5199_v27 = vmul.f32 %v11986_v18, %v14916_v50  ;;  %v5184_v26 = vpop.xlane.xlu0 %5183  ;;  %10982 = vmatprep.subr.bf16.mxu1 %v16947_v11 }
 0xeb9   : > { %11991 = vrcp.f32 %v5184_v26 }
 0xeba   : > { %v15039_v48 = vadd.f32 %v5199_v27, %v3664_v33  ;;  %10843 = vmatmul.mubr.msk.f32.gmra.mrb[42].mxu1 %vm2310_vm7, %v5199_v27  ;;  %v5569_v7 = vpop.xlane.xlu1 %5568  ;;  %v17003_v33 = vld [vmem:[#allocation40_spill] sm:$0xff] }
 0xebb   : > { %v11988_v32 = vpop.eup %11987  ;;  %11993 = vrcp.f32 %v5569_v7  ;;  %10845 = vmatprep.mubr.msk.f32.mxu1 %vm12268_vm3, %v16947_v11  ;;  %v4071_v27 = vadd.f32 %v14294_v31, %v17003_v33  ;;  %v11776_v33 = vld [vmem:[%s16916_s20 + $0x70] sm:$0xff]  }
 0xebc   : > { %v5200_v37 = vmul.f32 %v11988_v32, %v14921_v60  ;;  %v16999_v60 = vld [vmem:[#allocation36_spill] sm:$0xff]  ;;  %v17004_v32 = vld [vmem:[#allocation41_spill] sm:$0xff] }
 0xebd   : > { %v3667_v0 = vadd.f32 %v14264_v47, %v16999_v60  ;;  %v4072_v13 = vadd.f32 %v14301_v4, %v17004_v32  ;;  %v11777_v32 = vld [vmem:[%s16916_s20 + $0x78] sm:$0xff]  }
 0xebe   : > { %v15047_v50 = vadd.f32 %v5200_v37, %v3665_v53  ;;  %10846 = vmatmul.mubr.msk.f32.gmra.mrb[44].mxu1 %vm2310_vm7, %v5200_v37 }
 0xebf   : > { %v11990_v38 = vpop.eup %11989  ;;  %10848 = vmatprep.mubr.msk.f32.mxu1 %vm12268_vm3, %v16947_v11 }
 0xec0   : > { %v5201_v45 = vmul.f32 %v11990_v38, %v14926_v43  ;;  %v5572_v57 = vpop.xlane.xlu0 %5571  ;;  %v4068_v43 = vadd.f32 %v14272_v5, %v17000_v52  ;;  %v17001_v5 = vld [vmem:[#allocation38_spill] sm:$0xff] }
 0xec1   : > { %11995 = vrcp.f32 %v5572_v57  ;;  %v4069_v63 = vadd.f32 %v14279_v9, %v17001_v5  ;;  %v17005_v38 = vld [vmem:[#allocation42_spill] sm:$0xff]  ;;  %v17006_v57 = vld [vmem:[#allocation43_spill] sm:$0xff] }
 0xec2   : > { %v15055_v28 = vadd.f32 %v5201_v45, %v3666_v51  ;;  %10849 = vmatmul.mubr.msk.f32.gmra.mrb[46].mxu1 %vm2310_vm7, %v5201_v45  ;;  %v4073_v59 = vadd.f32 %v14308_v6, %v17005_v38 }
 0xec3   : > { %v11992_v42 = vpop.eup %11991  ;;  %10851 = vmatprep.mubr.msk.f32.mxu1 %vm12268_vm3, %v16947_v11 }
 0xec4   : > { %v5202_v16 = vmul.f32 %v11992_v42, %v14931_v34  ;;  %v5575_v54 = vpop.xlane.xlu1 %5574  ;;  %v4074_v42 = vadd.f32 %v14315_v22, %v17006_v57 }
 0xec5   : > { %v11994_v55 = vpop.eup %11993  ;;  %11997 = vrcp.f32 %v5575_v54 }
 0xec6   : > { %v15065_v20 = vadd.f32 %v5202_v16, %v3667_v0  ;;  %v5603_v24 = vmul.f32 %v11994_v55, %v14935_v46  ;;  %10852 = vmatmul.mubr.msk.f32.gmra.mrb[48].mxu1 %vm2310_vm7, %v5202_v16 }
 0xec7   : > { %10917 = vmatprep.mubr.msk.f32.mxu1 %vm12268_vm3, %v16947_v11 }
 0xec8   : > { %v15071_v39 = vadd.f32 %v5603_v24, %v4068_v43  ;;  %v5578_v47 = vpop.xlane.xlu0 %5577 }
 0xec9   : > { %11999 = vrcp.f32 %v5578_v47  ;;  %v11779_v47 = vld [vmem:[%s16917_s28 + $0x68] sm:$0xff]  }
 0xeca   : > { %10918 = vmatmul.mubr.msk.f32.vlgmr.msra.gmra.mrb[50].mxu1 %vm2310_vm7, %v5603_v24 }
 0xecb   : > { %v11996_v34 = vpop.eup %11995  ;;  %10920 = vmatprep.mubr.msk.f32.mxu1 %vm12268_vm3, %v16947_v11 }
 0xecc   : > { %v5604_v46 = vmul.f32 %v11996_v34, %v14941_v35  ;;  %v5581_v17 = vpop.xlane.xlu1 %5580 }
 0xecd   : > { %12001 = vrcp.f32 %v5581_v17  ;;  %v17010_v17 = vld [vmem:[#allocation20_spill] sm:$0xff] }
 0xece   : > { %v15079_v61 = vadd.f32 %v5604_v46, %v4069_v63  ;;  %10921 = vmatmul.mubr.msk.f32.gmra.mrb[52].mxu1 %vm2310_vm7, %v5604_v46  ;;  %v11774_v46 = vld [vmem:[%s16916_s20 + $0x60] sm:$0xff]  }
 0xecf   : > { %v11998_v49 = vpop.eup %11997  ;;  %10923 = vmatprep.mubr.msk.f32.mxu1 %vm12268_vm3, %v16947_v11 }
 0xed0   : > { %v5605_v18 = vmul.f32 %v11998_v49, %v14946_v29  ;;  %v5584_v36 = vpop.xlane.xlu0 %5583 }
 0xed1   : > { %12003 = vrcp.f32 %v5584_v36 }
 0xed2   : > { %v15087_v9 = vadd.f32 %v5605_v18, %v4070_v8  ;;  %10924 = vmatmul.mubr.msk.f32.gmra.mrb[54].mxu1 %vm2310_vm7, %v5605_v18  ;;  %v11775_v18 = vld [vmem:[%s16916_s20 + $0x68] sm:$0xff]  }
 0xed3   : > { %v12000_v35 = vpop.eup %11999  ;;  %10926 = vmatprep.mubr.msk.f32.mxu1 %vm12268_vm3, %v16947_v11 }
 0xed4   : > { %v5606_v26 = vmul.f32 %v12000_v35, %v14951_v62  ;;  %v5587_v7 = vpop.xlane.xlu1 %5586 }
 0xed5   : > { %12005 = vrcp.f32 %v5587_v7 }
 0xed6   : > { %v15095_v10 = vadd.f32 %v5606_v26, %v4071_v27  ;;  %10927 = vmatmul.mubr.msk.f32.gmra.mrb[56].mxu1 %vm2310_vm7, %v5606_v26  ;;  %v17011_v27 = vld [vmem:[#allocation21_spill] sm:$0xff] }
 0xed7   : > { %v12002_v29 = vpop.eup %12001  ;;  %10929 = vmatprep.mubr.msk.f32.mxu1 %vm12268_vm3, %v16947_v11 }
 0xed8   : > { %v5607_v53 = vmul.f32 %v12002_v29, %v14956_v2  ;;  %v5590_v37 = vpop.xlane.xlu0 %5589 }
 0xed9   : > { %12007 = vrcp.f32 %v5590_v37  ;;  %v17012_v37 = vld [vmem:[#allocation22_spill] sm:$0xff] }
 0xeda   : > { %v15103_v31 = vadd.f32 %v5607_v53, %v4072_v13  ;;  %10930 = vmatmul.mubr.msk.f32.gmra.mrb[58].mxu1 %vm2310_vm7, %v5607_v53 }
 0xedb   : > { %v12004_v62 = vpop.eup %12003  ;;  %10932 = vmatprep.mubr.msk.f32.mxu1 %vm12268_vm3, %v16947_v11 }
 0xedc   : > { %v5608_v51 = vmul.f32 %v12004_v62, %v14961_v12  ;;  %v5593_v45 = vpop.xlane.xlu1 %5592  ;;  %v17007_v12 = vld [vmem:[#allocation44_spill] sm:$0xff] }
 0xedd   : > { %12009 = vrcp.f32 %v5593_v45  ;;  %v4075_v16 = vadd.f32 %v14322_v15, %v17007_v12  ;;  %v11773_v15 = vld [vmem:[%s12486_s8 + $0x10] sm:$0xff]  }
 0xede   : > { %v15111_v4 = vadd.f32 %v5608_v51, %v4073_v59  ;;  %10933 = vmatmul.mubr.msk.f32.gmra.mrb[60].mxu1 %vm2310_vm7, %v5608_v51  ;;  %10945 = vmatpush3.bf16.msra.mxu0 %v11773_v15  ;;  %v17015_v15 = vld [vmem:[#allocation25_spill] sm:$0xff] }
 0xedf   : > { %v12006_v2 = vpop.eup %12005  ;;  %10935 = vmatprep.mubr.msk.f32.mxu1 %vm12268_vm3, %v16947_v11  ;;  %11026 = vmatprep.subr.bf16.mxu0 %v16947_v11 }
 0xee0   : > { %v5609_v60 = vmul.f32 %v12006_v2, %v14965_v19  ;;  %v17008_v19 = vld [vmem:[#allocation45_spill] sm:$0xff]  ;;  %v17013_v2 = vld [vmem:[#allocation23_spill] sm:$0xff] }
 0xee1   : > { %v4076_v52 = vadd.f32 %v14329_v3, %v17008_v19  ;;  %v11780_v3 = vld [vmem:[%s16917_s28 + $0x70] sm:$0xff]  }
 0xee2   : > { %v15119_v0 = vadd.f32 %v5609_v60, %v4074_v42  ;;  %10936 = vmatmul.mubr.msk.f32.gmra.mrb[62].mxu1 %vm2310_vm7, %v5609_v60 }
 0xee3   : > { %v12008_v6 = vpop.eup %12007  ;;  %10938 = vmatprep.mubr.msk.f32.mxu1 %vm12268_vm3, %v16947_v11 }
 0xee4   : > { %v5610_v54 = vmul.f32 %v12008_v6, %v14969_v58  ;;  %v11778_v58 = vld [vmem:[%s16917_s28 + $0x60] sm:$0xff]  }
 0xee5   : > { %10983 = vmatpush3.bf16.msra.mxu1 %v11778_v58 }
 0xee6   : > { %v15127_v55 = vadd.f32 %v5610_v54, %v4075_v16  ;;  %10939 = vmatmul.mubr.msk.f32.gmra.mrb[64].mxu1 %vm2310_vm7, %v5610_v54  ;;  %10984 = vmatprep.subr.bf16.mxu1 %v16947_v11  ;;  %v17014_v16 = vld [vmem:[#allocation24_spill] sm:$0xff] }
 0xee7   : > { %v12010_v22 = vpop.eup %12009  ;;  %10941 = vmatprep.mubr.msk.f32.mxu1 %vm12268_vm3, %v16947_v11 }
 0xee8   : > { %v5611_v43 = vmul.f32 %v12010_v22, %v14973_v23  ;;  %v11781_v23 = vld [vmem:[%s16917_s28 + $0x78] sm:$0xff]  }
 0xee9   : > { %10985 = vmatpush3.bf16.msra.mxu1 %v11779_v47 }
 0xeea   : > { %v15135_v24 = vadd.f32 %v5611_v43, %v4076_v52  ;;  %10942 = vmatmul.mubr.msk.f32.gmra.mrb[66].mxu1 %vm2310_vm7, %v5611_v43  ;;  %10986 = vmatprep.subr.bf16.mxu1 %v16947_v11 }
 0xeeb   : > { %10990 = vmatprep.mubr.msk.bf16.mxu1 %vm12268_vm3, %v16947_v11 }
 0xeec   : > { %17009 = vst [vmem:[#allocation28_spill] sm:$0xff] %v15135_v24  ;;  %v17049_v24 = vld [vmem:[#allocation63_spill] sm:$0xff] }
 0xeed   : > { %10987 = vmatpush3.bf16.msra.mxu1 %v11780_v3 }
 0xeee   : > { %10988 = vmatprep.subr.bf16.mxu1 %v16947_v11 }
 0xef1   : > { %10989 = vmatpush3.bf16.msra.mxu1 %v11781_v23 }
 0xef2   : > { %11070 = vmatprep.subr.bf16.mxu1 %v16947_v11 }
 0xef4   : > { %10991 = vmatmul.mubr.msk.bf16.vlgmr.msra.gmra.mrb[68].mxu1 %vm1724_vm4, %v12960_v25 }
 0xef5   : > { %10994 = vmatprep.mubr.msk.bf16.mxu1 %vm12268_vm3, %v16947_v11 }
 0xefc   : > { %10995 = vmatmul.mubr.msk.bf16.gmra.mrb[72].mxu1 %vm1724_vm4, %v12969_v30 }
 0xefd   : > { %10998 = vmatprep.mubr.msk.bf16.mxu1 %vm12268_vm3, %v16947_v11 }
 0xf04   : > { %10999 = vmatmul.mubr.msk.bf16.gmra.mrb[76].mxu1 %vm1724_vm4, %v17010_v17 }
 0xf05   : > { %11002 = vmatprep.mubr.msk.bf16.mxu1 %vm12268_vm3, %v16947_v11 }
 0xf0c   : > { %11003 = vmatmul.mubr.msk.bf16.gmra.mrb[80].mxu1 %vm1724_vm4, %v17011_v27 }
 0xf0d   : > { %11006 = vmatprep.mubr.msk.bf16.mxu1 %vm12268_vm3, %v16947_v11 }
 0xf14   : > { %11007 = vmatmul.mubr.msk.bf16.gmra.mrb[84].mxu1 %vm1724_vm4, %v17012_v37 }
 0xf15   : > { %11010 = vmatprep.mubr.msk.bf16.mxu1 %vm12268_vm3, %v16947_v11 }
 0xf1c   : > { %11011 = vmatmul.mubr.msk.bf16.gmra.mrb[88].mxu1 %vm1724_vm4, %v17013_v2 }
 0xf1d   : > { %11014 = vmatprep.mubr.msk.bf16.mxu1 %vm12268_vm3, %v16947_v11 }
 0xf24   : > { %11015 = vmatmul.mubr.msk.bf16.gmra.mrb[92].mxu1 %vm1724_vm4, %v17014_v16 }
 0xf25   : > { %11018 = vmatprep.mubr.msk.bf16.mxu1 %vm12268_vm3, %v16947_v11 }
 0xf2c   : > { %11019 = vmatmul.mubr.msk.bf16.gmra.mrb[96].mxu1 %vm1724_vm4, %v17015_v15 }
 0xf2d   : > { %11022 = vmatprep.mubr.msk.bf16.mxu1 %vm12268_vm3, %v16947_v11 }
 0xf79   : > { %v5305_v34 = vpop.f32.mrb[32].mxu1 }
 0xf7a   : > { %v10829_v5 = vpop.f32.mrb[33].mxu1 }
 0xf7b   : > { %v17016_v5 = vld [vmem:[#allocation26_spill] sm:$0xff] }
 0xf7c   : > { %11023 = vmatmul.mubr.msk.bf16.gmra.mrb[100].mxu1 %vm1724_vm4, %v17016_v5 }
 0xf7d   : > { %v5310_v63 = vpop.f32.mrb[34].mxu1  ;;  %11078 = vmatprep.mubr.msk.bf16.mxu1 %vm12268_vm3, %v16947_v11 }
 0xf7e   : > { %v5758_v49 = vpack.c.bf16 %v5310_v63, %v5305_v34  ;;  %v10832_v40 = vpop.f32.mrb[35].mxu1 }
 0xf80   : > { %10947 = vmatmul.mubr.msk.bf16.vlgmr.msra.gmra.mrb[32].mxu0 %vm2145_vm5, %v5758_v49 }
 0xf81   : > { %v5315_v8 = vpop.f32.mrb[36].mxu1  ;;  %10950 = vmatprep.mubr.msk.bf16.mxu0 %vm12268_vm3, %v16947_v11  ;;  %11027 = vmatpush3.bf16.msra.mxu0 %v11774_v46 }
 0xf82   : > { %v10835_v36 = vpop.f32.mrb[37].mxu1  ;;  %11028 = vmatprep.subr.bf16.mxu0 %v16947_v11 }
 0xf85   : > { %v5320_v35 = vpop.f32.mrb[38].mxu1  ;;  %11029 = vmatpush3.bf16.msra.mxu0 %v11775_v18 }
 0xf86   : > { %v5759_v26 = vpack.c.bf16 %v5320_v35, %v5315_v8  ;;  %v10838_v7 = vpop.f32.mrb[39].mxu1  ;;  %11030 = vmatprep.subr.bf16.mxu0 %v16947_v11 }
 0xf88   : > { %10951 = vmatmul.mubr.msk.bf16.gmra.mrb[36].mxu0 %vm2145_vm5, %v5759_v26 }
 0xf89   : > { %v5325_v29 = vpop.f32.mrb[40].mxu1  ;;  %10954 = vmatprep.mubr.msk.bf16.mxu0 %vm12268_vm3, %v16947_v11  ;;  %11031 = vmatpush3.bf16.msra.mxu0 %v11776_v33 }
 0xf8a   : > { %v10841_v13 = vpop.f32.mrb[41].mxu1  ;;  %11032 = vmatprep.subr.bf16.mxu0 %v16947_v11 }
 0xf8d   : > { %v5330_v53 = vpop.f32.mrb[42].mxu1  ;;  %11033 = vmatpush3.bf16.msra.mxu0 %v11777_v32 }
 0xf8e   : > { %v5760_v62 = vpack.c.bf16 %v5330_v53, %v5325_v29  ;;  %v10844_v38 = vpop.f32.mrb[43].mxu1  ;;  %11588 = vmatprep.subr.bf16.mxu0 %v16946_v41 }
 0xf90   : > { %10955 = vmatmul.mubr.msk.bf16.gmra.mrb[40].mxu0 %vm2145_vm5, %v5760_v62 }
 0xf91   : > { %v5335_v59 = vpop.f32.mrb[44].mxu1  ;;  %10958 = vmatprep.mubr.msk.bf16.mxu0 %vm12268_vm3, %v16947_v11 }
 0xf92   : > { %v10847_v51 = vpop.f32.mrb[45].mxu1 }
 0xf95   : > { %v5340_v45 = vpop.f32.mrb[46].mxu1 }
 0xf96   : > { %v5761_v57 = vpack.c.bf16 %v5340_v45, %v5335_v59  ;;  %v10850_v42 = vpop.f32.mrb[47].mxu1 }
 0xf98   : > { %10959 = vmatmul.mubr.msk.bf16.gmra.mrb[44].mxu0 %vm2145_vm5, %v5761_v57 }
 0xf99   : > { %v5345_v60 = vpop.f32.mrb[48].mxu1  ;;  %10962 = vmatprep.mubr.msk.bf16.mxu0 %vm12268_vm3, %v16947_v11 }
 0xf9a   : > { %v10853_v6 = vpop.f32.mrb[49].mxu1 }
 0xf9b   : > { %v17017_v6 = vld [vmem:[#allocation46_spill] sm:$0xff] }
 0xf9d   : > { %v5714_v12 = vpop.f32.mrb[50].mxu1 }
 0xf9e   : > { %v5762_v54 = vpack.c.bf16 %v5714_v12, %v5345_v60  ;;  %v10919_v22 = vpop.f32.mrb[51].mxu1 }
 0xfa0   : > { %10963 = vmatmul.mubr.msk.bf16.gmra.mrb[48].mxu0 %vm2145_vm5, %v5762_v54 }
 0xfa1   : > { %v5719_v19 = vpop.f32.mrb[52].mxu1  ;;  %10966 = vmatprep.mubr.msk.bf16.mxu0 %vm12268_vm3, %v16947_v11 }
 0xfa2   : > { %v10922_v52 = vpop.f32.mrb[53].mxu1 }
 0xfa5   : > { %v5724_v43 = vpop.f32.mrb[54].mxu1 }
 0xfa6   : > { %v5763_v58 = vpack.c.bf16 %v5724_v43, %v5719_v19  ;;  %v10925_v47 = vpop.f32.mrb[55].mxu1  ;;  %v17019_v43 = vld [vmem:[#allocation47_spill] sm:$0xff] }
 0xfa8   : > { %10967 = vmatmul.mubr.msk.bf16.gmra.mrb[52].mxu0 %vm2145_vm5, %v5763_v58 }
 0xfa9   : > { %v5729_v3 = vpop.f32.mrb[56].mxu1  ;;  %10970 = vmatprep.mubr.msk.bf16.mxu0 %vm12268_vm3, %v16947_v11 }
 0xfaa   : > { %v10928_v23 = vpop.f32.mrb[57].mxu1 }
 0xfad   : > { %v5734_v34 = vpop.f32.mrb[58].mxu1 }
 0xfae   : > { %v5764_v63 = vpack.c.bf16 %v5734_v34, %v5729_v3  ;;  %v10931_v46 = vpop.f32.mrb[59].mxu1 }
 0xfb0   : > { %10971 = vmatmul.mubr.msk.bf16.gmra.mrb[56].mxu0 %vm2145_vm5, %v5764_v63  ;;  %v17021_v63 = vld [vmem:[#allocation48_spill] sm:$0xff] }
 0xfb1   : > { %v5739_v49 = vpop.f32.mrb[60].mxu1  ;;  %10974 = vmatprep.mubr.msk.bf16.mxu0 %vm12268_vm3, %v16947_v11 }
 0xfb2   : > { %v10934_v40 = vpop.f32.mrb[61].mxu1 }
 0xfb5   : > { %v5744_v8 = vpop.f32.mrb[62].mxu1 }
 0xfb6   : > { %v5765_v18 = vpack.c.bf16 %v5744_v8, %v5739_v49  ;;  %v10937_v36 = vpop.f32.mrb[63].mxu1 }
 0xfb7   : > { %v17023_v36 = vld [vmem:[#allocation49_spill] sm:$0xff] }
 0xfb8   : > { %10975 = vmatmul.mubr.msk.bf16.gmra.mrb[60].mxu0 %vm2145_vm5, %v5765_v18 }
 0xfb9   : > { %v5749_v35 = vpop.f32.mrb[64].mxu1  ;;  %10978 = vmatprep.mubr.msk.bf16.mxu0 %vm12268_vm3, %v16947_v11 }
 0xfba   : > { %v10940_v33 = vpop.f32.mrb[65].mxu1 }
 0xfbd   : > { %v5754_v26 = vpop.f32.mrb[66].mxu1 }
 0xfbe   : > { %v5766_v7 = vpack.c.bf16 %v5754_v26, %v5749_v35  ;;  %v10943_v29 = vpop.f32.mrb[67].mxu1 }
 0xfc0   : > { %10979 = vmatmul.mubr.msk.bf16.gmra.mrb[64].mxu0 %vm2145_vm5, %v5766_v7 }
 0xfc1   : > { %11034 = vmatprep.mubr.msk.bf16.mxu0 %vm12268_vm3, %v16947_v11 }
 0xfc7   : > { %v15257_v32 = vpop.f32.mrb[68].mxu1 }
 0xfc8   : > { %11035 = vmatmul.mubr.msk.bf16.vlgmr.msra.gmra.mrb[68].mxu0 %vm1724_vm4, %v12960_v25  ;;  %v10992_v13 = vpop.f32.mrb[69].mxu1 }
 0xfc9   : > { %11038 = vmatprep.mubr.msk.bf16.mxu0 %vm12268_vm3, %v16947_v11  ;;  %v15259_v53 = vpop.f32.mrb[70].mxu1  ;;  %v17025_v13 = vld [vmem:[#allocation50_spill] sm:$0xff] }
 0xfca   : > { %v10993_v62 = vpop.f32.mrb[71].mxu1 }
 0xfcf   : > { %v15261_v38 = vpop.f32.mrb[72].mxu1 }
 0xfd0   : > { %11039 = vmatmul.mubr.msk.bf16.gmra.mrb[72].mxu0 %vm1724_vm4, %v12969_v30  ;;  %v10996_v59 = vpop.f32.mrb[73].mxu1 }
 0xfd1   : > { %11042 = vmatprep.mubr.msk.bf16.mxu0 %vm12268_vm3, %v16947_v11  ;;  %v15263_v51 = vpop.f32.mrb[74].mxu1 }
 0xfd2   : > { %v10997_v45 = vpop.f32.mrb[75].mxu1 }
 0xfd7   : > { %v15265_v57 = vpop.f32.mrb[76].mxu1 }
 0xfd8   : > { %11043 = vmatmul.mubr.msk.bf16.gmra.mrb[76].mxu0 %vm1724_vm4, %v17010_v17  ;;  %v11000_v42 = vpop.f32.mrb[77].mxu1 }
 0xfd9   : > { %11046 = vmatprep.mubr.msk.bf16.mxu0 %vm12268_vm3, %v16947_v11  ;;  %v15270_v22 = vpop.f32.mrb[78].mxu1 }
 0xfda   : > { %v11001_v52 = vpop.f32.mrb[79].mxu1 }
 0xfdf   : > { %v15275_v3 = vpop.f32.mrb[80].mxu1 }
 0xfe0   : > { %11047 = vmatmul.mubr.msk.bf16.gmra.mrb[80].mxu0 %vm1724_vm4, %v17011_v27  ;;  %v11004_v23 = vpop.f32.mrb[81].mxu1 }
 0xfe1   : > { %11050 = vmatprep.mubr.msk.bf16.mxu0 %vm12268_vm3, %v16947_v11  ;;  %v15280_v40 = vpop.f32.mrb[82].mxu1  ;;  %v17029_v23 = vld [vmem:[#allocation52_spill] sm:$0xff] }
 0xfe2   : > { %v11005_v18 = vpop.f32.mrb[83].mxu1 }
 0xfe7   : > { %v15285_v26 = vpop.f32.mrb[84].mxu1 }
 0xfe8   : > { %11051 = vmatmul.mubr.msk.bf16.gmra.mrb[84].mxu0 %vm1724_vm4, %v17012_v37  ;;  %v11008_v7 = vpop.f32.mrb[85].mxu1 }
 0xfe9   : > { %11054 = vmatprep.mubr.msk.bf16.mxu0 %vm12268_vm3, %v16947_v11  ;;  %v15290_v45 = vpop.f32.mrb[86].mxu1 }
 0xff0   : > { %11055 = vmatmul.mubr.msk.bf16.gmra.mrb[88].mxu0 %vm1724_vm4, %v17013_v2 }
 0xff1   : > { %11058 = vmatprep.mubr.msk.bf16.mxu0 %vm12268_vm3, %v16947_v11 }
 0xff8   : > { %11059 = vmatmul.mubr.msk.bf16.gmra.mrb[92].mxu0 %vm1724_vm4, %v17014_v16 }
 0xff9   : > { %11062 = vmatprep.mubr.msk.bf16.mxu0 %vm12268_vm3, %v16947_v11 }
0x1000   : > { %11063 = vmatmul.mubr.msk.bf16.gmra.mrb[96].mxu0 %vm1724_vm4, %v17015_v15 }
0x1001   : > { %11066 = vmatprep.mubr.msk.bf16.mxu0 %vm12268_vm3, %v16947_v11 }
0x1008   : > { %11067 = vmatmul.mubr.msk.bf16.gmra.mrb[100].mxu0 %vm1724_vm4, %v17016_v5 }
0x1009   : > { %11132 = vmatprep.mubr.msk.f32.mxu0 %vm12268_vm3, %v16947_v11 }
0x1053   : > { %v5837_v60 = vpop.f32.mrb[32].mxu0 }
0x1054   : > { %v15268_v12 = vadd.f32 %v5837_v60, %v17017_v6  ;;  %v10948_v54 = vpop.f32.mrb[33].mxu0  ;;  %v11009_v60 = vpop.f32.mrb[87].mxu1  ;;  %v17027_v6 = vld [vmem:[#allocation51_spill] sm:$0xff] }
0x1055   : > { %v5840_v19 = vpop.f32.mrb[34].mxu0  ;;  %v15295_v52 = vpop.f32.mrb[88].mxu1 }
0x1056   : > { %17018 = vst [vmem:[#allocation29_spill] sm:$0xff] %v15268_v12  ;;  %v15273_v58 = vadd.f32 %v5840_v19, %v17019_v43  ;;  %v10949_v47 = vpop.f32.mrb[35].mxu0 }
0x1057   : > { %v11012_v47 = vpop.f32.mrb[89].mxu1 }
0x1058   : > { %17020 = vst [vmem:[#allocation30_spill] sm:$0xff] %v15273_v58 }
0x105b   : > { %v5845_v34 = vpop.f32.mrb[36].mxu0 }
0x105c   : > { %v15278_v46 = vadd.f32 %v5845_v34, %v17021_v63  ;;  %v10952_v49 = vpop.f32.mrb[37].mxu0 }
0x105d   : > { %v5848_v8 = vpop.f32.mrb[38].mxu0  ;;  %v15300_v49 = vpop.f32.mrb[90].mxu1 }
0x105e   : > { %17022 = vst [vmem:[#allocation31_spill] sm:$0xff] %v15278_v46  ;;  %v15283_v35 = vadd.f32 %v5848_v8, %v17023_v36  ;;  %v10953_v33 = vpop.f32.mrb[39].mxu0  ;;  %v11013_v18 = vpop.f32.mrb[91].mxu1  ;;  %v17031_v36 = vld [vmem:[#allocation53_spill] sm:$0xff] }
0x1060   : > { %17024 = vst [vmem:[#allocation32_spill] sm:$0xff] %v15283_v35 }
0x1063   : > { %v5853_v29 = vpop.f32.mrb[40].mxu0 }
0x1064   : > { %v15288_v62 = vadd.f32 %v5853_v29, %v17025_v13  ;;  %v10956_v59 = vpop.f32.mrb[41].mxu0  ;;  %v15305_v29 = vpop.f32.mrb[92].mxu1 }
0x1065   : > { %v5856_v42 = vpop.f32.mrb[42].mxu0  ;;  %v11016_v59 = vpop.f32.mrb[93].mxu1 }
0x1066   : > { %17026 = vst [vmem:[#allocation33_spill] sm:$0xff] %v15288_v62  ;;  %v15293_v54 = vadd.f32 %v5856_v42, %v17027_v6  ;;  %v10957_v19 = vpop.f32.mrb[43].mxu0  ;;  %v17033_v42 = vld [vmem:[#allocation54_spill] sm:$0xff] }
0x1067   : > { %v15310_v19 = vpop.f32.mrb[94].mxu1 }
0x1068   : > { %17028 = vst [vmem:[#allocation34_spill] sm:$0xff] %v15293_v54  ;;  %v11017_v47 = vpop.f32.mrb[95].mxu1 }
0x106b   : > { %v5861_v43 = vpop.f32.mrb[44].mxu0 }
0x106c   : > { %v15298_v34 = vadd.f32 %v5861_v43, %v17029_v23  ;;  %v10960_v63 = vpop.f32.mrb[45].mxu0  ;;  %v17035_v23 = vld [vmem:[#allocation55_spill] sm:$0xff] }
0x106d   : > { %v5864_v8 = vpop.f32.mrb[46].mxu0 }
0x106e   : > { %17030 = vst [vmem:[#allocation35_spill] sm:$0xff] %v15298_v34  ;;  %v15303_v33 = vadd.f32 %v5864_v8, %v17031_v36  ;;  %v10961_v7 = vpop.f32.mrb[47].mxu0  ;;  %v15315_v34 = vpop.f32.mrb[96].mxu1 }
0x106f   : > { %v11020_v36 = vpop.f32.mrb[97].mxu1  ;;  %v17037_v7 = vld [vmem:[#allocation56_spill] sm:$0xff] }
0x1070   : > { %17032 = vst [vmem:[#allocation36_spill] sm:$0xff] %v15303_v33  ;;  %v15320_v54 = vpop.f32.mrb[98].mxu1 }
0x1073   : > { %v5869_v13 = vpop.f32.mrb[48].mxu0 }
0x1074   : > { %v15308_v60 = vadd.f32 %v5869_v13, %v17033_v42  ;;  %v10964_v6 = vpop.f32.mrb[49].mxu0  ;;  %v11021_v42 = vpop.f32.mrb[99].mxu1 }
0x1075   : > { %v5872_v43 = vpop.f32.mrb[50].mxu0  ;;  %v17039_v6 = vld [vmem:[#allocation57_spill] sm:$0xff]  ;;  %v15325_v62 = vpop.f32.mrb[100].mxu1 }
0x1076   : > { %17034 = vst [vmem:[#allocation37_spill] sm:$0xff] %v15308_v60  ;;  %v15313_v63 = vadd.f32 %v5872_v43, %v17035_v23  ;;  %v10965_v18 = vpop.f32.mrb[51].mxu0  ;;  %v11024_v23 = vpop.f32.mrb[101].mxu1 }
0x1077   : > { %v17041_v18 = vld [vmem:[#allocation58_spill] sm:$0xff]  ;;  %v15330_v35 = vpop.f32.mrb[102].mxu1  ;;  %v17046_v23 = vld [vmem:[#allocation61_spill] sm:$0xff] }
0x1078   : > { %17036 = vst [vmem:[#allocation38_spill] sm:$0xff] %v15313_v63 }
0x107b   : > { %v5877_v8 = vpop.f32.mrb[52].mxu0 }
0x107c   : > { %v15318_v33 = vadd.f32 %v5877_v8, %v17037_v7  ;;  %v10968_v59 = vpop.f32.mrb[53].mxu0  ;;  %v11025_v7 = vpop.f32.mrb[103].mxu1 }
0x107d   : > { %v5880_v13 = vpop.f32.mrb[54].mxu0  ;;  %v17043_v59 = vld [vmem:[#allocation59_spill] sm:$0xff] }
0x107e   : > { %17038 = vst [vmem:[#allocation39_spill] sm:$0xff] %v15318_v33  ;;  %v15323_v60 = vadd.f32 %v5880_v13, %v17039_v6  ;;  %v10969_v47 = vpop.f32.mrb[55].mxu0  ;;  %v17044_v6 = vld [vmem:[#allocation60_spill] sm:$0xff] }
0x1080   : > { %17040 = vst [vmem:[#allocation40_spill] sm:$0xff] %v15323_v60 }
0x1083   : > { %v5885_v43 = vpop.f32.mrb[56].mxu0 }
0x1084   : > { %v15328_v63 = vadd.f32 %v5885_v43, %v17041_v18  ;;  %v10972_v36 = vpop.f32.mrb[57].mxu0 }
0x1085   : > { %v5888_v8 = vpop.f32.mrb[58].mxu0  ;;  %v17048_v36 = vld [vmem:[#allocation62_spill] sm:$0xff] }
0x1086   : > { %17042 = vst [vmem:[#allocation41_spill] sm:$0xff] %v15328_v63  ;;  %v15333_v33 = vadd.f32 %v5888_v8, %v17043_v59  ;;  %v10973_v42 = vpop.f32.mrb[59].mxu0 }
0x1087   : > { %v15348_v42 = vld [vmem:[%s12501_s26 + $0x3] ss:$0 sm:$0xff] }
0x108b   : > { %v5893_v13 = vpop.f32.mrb[60].mxu0 }
0x108c   : > { %v15336_v47 = vadd.f32 %v5893_v13, %v17044_v6  ;;  %v10976_v60 = vpop.f32.mrb[61].mxu0 }
0x108d   : > { %v5896_v46 = vpop.f32.mrb[62].mxu0 }
0x108e   : > { %17045 = vst [vmem:[#allocation42_spill] sm:$0xff] %v15336_v47  ;;  %v15339_v58 = vadd.f32 %v5896_v46, %v17046_v23  ;;  %v10977_v43 = vpop.f32.mrb[63].mxu0 }
0x1090   : > { %17047 = vst [vmem:[#allocation43_spill] sm:$0xff] %v15339_v58 }
0x1093   : > { %v5901_v18 = vpop.f32.mrb[64].mxu0 }
0x1094   : > { %v15342_v63 = vadd.f32 %v5901_v18, %v17048_v36  ;;  %v10980_v12 = vpop.f32.mrb[65].mxu0 }
0x1095   : > { %v5904_v7 = vpop.f32.mrb[66].mxu0 }
0x1096   : > { %v15345_v8 = vadd.f32 %v5904_v7, %v17049_v24  ;;  %v10981_v59 = vpop.f32.mrb[67].mxu0 }
0x109b   : > { %v6147_v13 = vpop.f32.mrb[68].mxu0 }
0x109c   : > { %v11036_v6 = vpop.f32.mrb[69].mxu0  ;;  %v6148_v47 = vadd.f32 %v15348_v42, %v6147_v13 }
0x109d   : > { %v6150_v60 = vpop.f32.mrb[70].mxu0 }
0x109e   : > { %v6151_v46 = vadd.f32 %v15348_v42, %v6150_v60  ;;  %v11037_v23 = vpop.f32.mrb[71].mxu0 }
0x10a0   : > { %v11589_v43 = vpack.c.bf16 %v6151_v46, %v6148_v47 }
0x10a2   : > { %11591 = vmatpush3.bf16.xpose.msk.msra.mxu0 %vm13062_vm6, %v11589_v43 }
0x10a3   : > { %v6155_v12 = vpop.f32.mrb[72].mxu0  ;;  %11592 = vmatprep.subr.bf16.mxu0 %v16946_v41 }
0x10a4   : > { %v11040_v24 = vpop.f32.mrb[73].mxu0  ;;  %v6156_v36 = vadd.f32 %v15348_v42, %v6155_v12 }
0x10a5   : > { %v6158_v18 = vpop.f32.mrb[74].mxu0 }
0x10a6   : > { %v6159_v7 = vadd.f32 %v15348_v42, %v6158_v18  ;;  %v11041_v59 = vpop.f32.mrb[75].mxu0 }
0x10a8   : > { %v11593_v6 = vpack.c.bf16 %v6159_v7, %v6156_v36 }
0x10aa   : > { %11595 = vmatpush3.bf16.xpose.msk.msra.mxu0 %vm13062_vm6, %v11593_v6 }
0x10ab   : > { %v6163_v13 = vpop.f32.mrb[76].mxu0  ;;  %11596 = vmatprep.subr.bf16.mxu0 %v16946_v41 }
0x10ac   : > { %v11044_v47 = vpop.f32.mrb[77].mxu0  ;;  %v6164_v46 = vadd.f32 %v15348_v42, %v6163_v13 }
0x10ad   : > { %v6166_v60 = vpop.f32.mrb[78].mxu0 }
0x10ae   : > { %v6167_v23 = vadd.f32 %v15348_v42, %v6166_v60  ;;  %v11045_v43 = vpop.f32.mrb[79].mxu0 }
0x10b0   : > { %v11597_v24 = vpack.c.bf16 %v6167_v23, %v6164_v46  ;;  %v15371_v23 = vld [vmem:[%s12496_s27 + $0x3] ss:$0 sm:$0xff]  ;;  %s17053_s27 = scalar_lea.vmem %s16782_s13, %s12464_s1 }
0x10b1   : > { %v6037_v58 = vadd.f32 %v15371_v23, %v15290_v45  ;;  %v6050_v45 = vadd.f32 %v15371_v23, %v15305_v29  ;;  %v6061_v29 = vadd.f32 %v15371_v23, %v15320_v54  ;;  %v11782_v54 = vld [vmem:[%s12481_s25 + $0x60] sm:$0xff]  }
0x10b2   : > { %11599 = vmatpush3.bf16.xpose.msk.msra.mxu0 %vm13062_vm6, %v11597_v24  ;;  %11071 = vmatpush3.bf16.msra.mxu1 %v11782_v54 }
0x10b3   : > { %v6171_v12 = vpop.f32.mrb[80].mxu0  ;;  %11600 = vmatprep.subr.bf16.mxu0 %v16946_v41  ;;  %11072 = vmatprep.subr.bf16.mxu1 %v16947_v11 }
0x10b4   : > { %v11048_v18 = vpop.f32.mrb[81].mxu0  ;;  %v6172_v7 = vadd.f32 %v15348_v42, %v6171_v12  ;;  %v6002_v12 = vadd.f32 %v15371_v23, %v15257_v32  ;;  %v6005_v32 = vadd.f32 %v15371_v23, %v15259_v53 }
0x10b5   : > { %v6174_v36 = vpop.f32.mrb[82].mxu0 }
0x10b6   : > { %v6175_v59 = vadd.f32 %v15348_v42, %v6174_v36  ;;  %v11049_v6 = vpop.f32.mrb[83].mxu0 }
0x10b8   : > { %v11601_v47 = vpack.c.bf16 %v6175_v59, %v6172_v7 }
0x10ba   : > { %11603 = vmatpush3.bf16.xpose.msk.msra.mxu0 %vm13062_vm6, %v11601_v47 }
0x10bb   : > { %v6179_v13 = vpop.f32.mrb[84].mxu0  ;;  %11130 = vmatprep.subr.mxu0 %v16947_v11 }
0x10bc   : > { %v11052_v60 = vpop.f32.mrb[85].mxu0  ;;  %v6180_v24 = vadd.f32 %v15348_v42, %v6179_v13 }
0x10bd   : > { %v6182_v46 = vpop.f32.mrb[86].mxu0  ;;  %v6010_v60 = vadd.f32 %v15371_v23, %v15261_v38  ;;  %v6013_v38 = vadd.f32 %v15371_v23, %v15263_v51 }
0x10be   : > { %v11053_v43 = vpop.f32.mrb[87].mxu0  ;;  %v6183_v36 = vadd.f32 %v15348_v42, %v6182_v46 }
0x10c2   : > { %11131 = vmatpush3.xpose.msk.msra.mxu0 %vm2145_vm5, %v6180_v24 }
0x10c3   : > { %v6187_v18 = vpop.f32.mrb[88].mxu0  ;;  %11616 = vmatprep.subr.bf16.mxu0 %v16946_v41 }
0x10c4   : > { %v6188_v7 = vadd.f32 %v15348_v42, %v6187_v18  ;;  %v11056_v59 = vpop.f32.mrb[89].mxu0 }
0x10c5   : > { %11133 = vmatmul.mubr.msk.f32.vlgmr.msra.gmra.mrb[104].mxu0 %vm2145_vm5, %v6002_v12  ;;  %v6190_v6 = vpop.f32.mrb[90].mxu0 }
0x10c6   : > { %v11617_v47 = vpack.c.bf16 %v6188_v7, %v6183_v36  ;;  %11135 = vmatprep.mubr.msk.f32.mxu0 %vm12268_vm3, %v16947_v11  ;;  %v11057_v13 = vpop.f32.mrb[91].mxu0  ;;  %v6191_v43 = vadd.f32 %v15348_v42, %v6190_v6  ;;  %v6018_v7 = vadd.f32 %v15371_v23, %v15265_v57  ;;  %v6021_v57 = vadd.f32 %v15371_v23, %v15270_v22 }
0x10c8   : > { %11619 = vmatpush3.bf16.xpose.msk.msra.mxu0 %vm13062_vm6, %v11617_v47 }
0x10c9   : > { %11136 = vmatmul.mubr.msk.f32.gmra.mrb[106].mxu0 %vm2145_vm5, %v6005_v32  ;;  %11620 = vmatprep.subr.bf16.mxu0 %v16946_v41 }
0x10ca   : > { %11138 = vmatprep.mubr.msk.f32.mxu0 %vm12268_vm3, %v16947_v11 }
0x10cb   : > { %v6195_v46 = vpop.f32.mrb[92].mxu0 }
0x10cc   : > { %v6196_v24 = vadd.f32 %v15348_v42, %v6195_v46  ;;  %v11060_v12 = vpop.f32.mrb[93].mxu0  ;;  %v6026_v46 = vadd.f32 %v15371_v23, %v15275_v3  ;;  %v6029_v3 = vadd.f32 %v15371_v23, %v15280_v40  ;;  %v6042_v40 = vadd.f32 %v15371_v23, %v15295_v52 }
0x10cd   : > { %11139 = vmatmul.mubr.msk.f32.gmra.mrb[108].mxu0 %vm2145_vm5, %v6010_v60  ;;  %v6198_v53 = vpop.f32.mrb[94].mxu0  ;;  %v6053_v52 = vadd.f32 %v15371_v23, %v15310_v19  ;;  %v6066_v19 = vadd.f32 %v15371_v23, %v15325_v62  ;;  %v11783_v62 = vld [vmem:[%s12481_s25 + $0x68] sm:$0xff]  }
0x10ce   : > { %v11621_v18 = vpack.c.bf16 %v6196_v24, %v6191_v43  ;;  %11141 = vmatprep.mubr.msk.f32.mxu0 %vm12268_vm3, %v16947_v11  ;;  %v11061_v36 = vpop.f32.mrb[95].mxu0  ;;  %v6199_v6 = vadd.f32 %v15348_v42, %v6198_v53  ;;  %11073 = vmatpush3.bf16.msra.mxu1 %v11783_v62 }
0x10cf   : > { %11074 = vmatprep.subr.bf16.mxu1 %v16947_v11 }
0x10d0   : > { %11623 = vmatpush3.bf16.xpose.msk.msra.mxu0 %vm13062_vm6, %v11621_v18 }
0x10d1   : > { %11142 = vmatmul.mubr.msk.f32.gmra.mrb[110].mxu0 %vm2145_vm5, %v6013_v38  ;;  %11624 = vmatprep.subr.bf16.mxu0 %v16946_v41  ;;  %v6034_v38 = vadd.f32 %v15371_v23, %v15285_v26  ;;  %v6045_v26 = vadd.f32 %v15371_v23, %v15300_v49  ;;  %v6058_v49 = vadd.f32 %v15371_v23, %v15315_v34 }
0x10d2   : > { %11144 = vmatprep.mubr.msk.f32.mxu0 %vm12268_vm3, %v16947_v11  ;;  %v6069_v34 = vadd.f32 %v15371_v23, %v15330_v35 }
0x10d3   : > { %v6203_v59 = vpop.f32.mrb[96].mxu0 }
0x10d4   : > { %v6204_v47 = vadd.f32 %v15348_v42, %v6203_v59  ;;  %v11064_v13 = vpop.f32.mrb[97].mxu0  ;;  %v11785_v59 = vld [vmem:[%s12481_s25 + $0x78] sm:$0xff]  }
0x10d5   : > { %11145 = vmatmul.mubr.msk.f32.gmra.mrb[112].mxu0 %vm2145_vm5, %v6018_v7  ;;  %v6206_v51 = vpop.f32.mrb[98].mxu0 }
0x10d6   : > { %v11625_v32 = vpack.c.bf16 %v6204_v47, %v6199_v6  ;;  %11147 = vmatprep.mubr.msk.f32.mxu0 %vm12268_vm3, %v16947_v11  ;;  %v11065_v60 = vpop.f32.mrb[99].mxu0  ;;  %v6207_v24 = vadd.f32 %v15348_v42, %v6206_v51 }
0x10d8   : > { %11627 = vmatpush3.bf16.xpose.msk.msra.mxu0 %vm13062_vm6, %v11625_v32 }
0x10d9   : > { %11148 = vmatmul.mubr.msk.f32.gmra.mrb[114].mxu0 %vm2145_vm5, %v6021_v57  ;;  %11628 = vmatprep.subr.bf16.mxu0 %v16946_v41 }
0x10da   : > { %11150 = vmatprep.mubr.msk.f32.mxu0 %vm12268_vm3, %v16947_v11 }
0x10db   : > { %v6211_v43 = vpop.f32.mrb[100].mxu0 }
0x10dc   : > { %v6212_v12 = vadd.f32 %v15348_v42, %v6211_v43  ;;  %v11068_v53 = vpop.f32.mrb[101].mxu0 }
0x10dd   : > { %11151 = vmatmul.mubr.msk.f32.gmra.mrb[116].mxu0 %vm2145_vm5, %v6026_v46  ;;  %v6214_v22 = vpop.f32.mrb[102].mxu0 }
0x10de   : > { %v11629_v18 = vpack.c.bf16 %v6212_v12, %v6207_v24  ;;  %11153 = vmatprep.mubr.msk.f32.mxu0 %vm12268_vm3, %v16947_v11  ;;  %v11069_v36 = vpop.f32.mrb[103].mxu0  ;;  %v6215_v7 = vadd.f32 %v15348_v42, %v6214_v22  ;;  %v11784_v42 = vld [vmem:[%s12481_s25 + $0x70] sm:$0xff]  }
0x10df   : > { %11075 = vmatpush3.bf16.msra.mxu1 %v11784_v42 }
0x10e0   : > { %11631 = vmatpush3.bf16.xpose.msk.msra.mxu0 %vm13062_vm6, %v11629_v18  ;;  %11076 = vmatprep.subr.bf16.mxu1 %v16947_v11 }
0x10e1   : > { %11154 = vmatmul.mubr.msk.f32.gmra.mrb[118].mxu0 %vm2145_vm5, %v6029_v3  ;;  %11220 = vmatprep.subr.mxu0 %v16947_v11 }
0x10e2   : > { %11156 = vmatprep.mubr.msk.f32.mxu0 %vm12268_vm3, %v16947_v11 }
0x10e3   : > { %11077 = vmatpush3.bf16.msra.mxu1 %v11785_v59 }
0x10e4   : > { %11604 = vmatprep.subr.bf16.mxu1 %v16946_v41 }
0x10e5   : > { %11157 = vmatmul.mubr.msk.f32.gmra.mrb[120].mxu0 %vm2145_vm5, %v6034_v38 }
0x10e6   : > { %11222 = vmatprep.mubr.msk.f32.mxu0 %vm12268_vm3, %v16947_v11  ;;  %11079 = vmatmul.mubr.msk.bf16.vlgmr.msra.gmra.mrb[104].mxu1 %vm1724_vm4, %v12960_v25 }
0x10e7   : > { %11082 = vmatprep.mubr.msk.bf16.mxu1 %vm12268_vm3, %v16947_v11 }
0x10e8   : > { %11221 = vmatpush3.xpose.msk.msra.mxu0 %vm2145_vm5, %v6215_v7 }
0x10e9   : > { %11294 = vmatprep.subr.bf16.mxu0 %v16947_v11 }
0x10eb   : > { %11223 = vmatmul.mubr.msk.f32.vlgmr.msra.gmra.mrb[122].mxu0 %vm2145_vm5, %v6037_v58 }
0x10ec   : > { %11225 = vmatprep.mubr.msk.f32.mxu0 %vm12268_vm3, %v16947_v11 }
0x10ee   : > { %11083 = vmatmul.mubr.msk.bf16.gmra.mrb[108].mxu1 %vm1724_vm4, %v12969_v30 }
0x10ef   : > { %11226 = vmatmul.mubr.msk.f32.gmra.mrb[124].mxu0 %vm2145_vm5, %v6042_v40  ;;  %11086 = vmatprep.mubr.msk.bf16.mxu1 %vm12268_vm3, %v16947_v11 }
0x10f0   : > { %11228 = vmatprep.mubr.msk.f32.mxu0 %vm12268_vm3, %v16947_v11 }
0x10f3   : > { %11229 = vmatmul.mubr.msk.f32.gmra.mrb[126].mxu0 %vm2145_vm5, %v6045_v26 }
0x10f4   : > { %11231 = vmatprep.mubr.msk.f32.mxu0 %vm12268_vm3, %v16947_v11 }
0x10f6   : > { %11087 = vmatmul.mubr.msk.bf16.gmra.mrb[112].mxu1 %vm1724_vm4, %v17010_v17 }
0x10f7   : > { %11232 = vmatmul.mubr.msk.f32.gmra.mrb[128].mxu0 %vm2145_vm5, %v6050_v45  ;;  %11090 = vmatprep.mubr.msk.bf16.mxu1 %vm12268_vm3, %v16947_v11 }
0x10f8   : > { %11234 = vmatprep.mubr.msk.f32.mxu0 %vm12268_vm3, %v16947_v11 }
0x10fb   : > { %11235 = vmatmul.mubr.msk.f32.gmra.mrb[130].mxu0 %vm2145_vm5, %v6053_v52 }
0x10fc   : > { %11237 = vmatprep.mubr.msk.f32.mxu0 %vm12268_vm3, %v16947_v11 }
0x10fe   : > { %11091 = vmatmul.mubr.msk.bf16.gmra.mrb[116].mxu1 %vm1724_vm4, %v17011_v27 }
0x10ff   : > { %11238 = vmatmul.mubr.msk.f32.gmra.mrb[132].mxu0 %vm2145_vm5, %v6058_v49  ;;  %11094 = vmatprep.mubr.msk.bf16.mxu1 %vm12268_vm3, %v16947_v11 }
0x1100   : > { %11240 = vmatprep.mubr.msk.f32.mxu0 %vm12268_vm3, %v16947_v11 }
0x1103   : > { %11241 = vmatmul.mubr.msk.f32.gmra.mrb[134].mxu0 %vm2145_vm5, %v6061_v29 }
0x1104   : > { %11243 = vmatprep.mubr.msk.f32.mxu0 %vm12268_vm3, %v16947_v11 }
0x1106   : > { %11095 = vmatmul.mubr.msk.bf16.gmra.mrb[120].mxu1 %vm1724_vm4, %v17012_v37 }
0x1107   : > { %11244 = vmatmul.mubr.msk.f32.gmra.mrb[136].mxu0 %vm2145_vm5, %v6066_v19  ;;  %11098 = vmatprep.mubr.msk.bf16.mxu1 %vm12268_vm3, %v16947_v11 }
0x1108   : > { %11246 = vmatprep.mubr.msk.f32.mxu0 %vm12268_vm3, %v16947_v11 }
0x110b   : > { %11247 = vmatmul.mubr.msk.f32.gmra.mrb[138].mxu0 %vm2145_vm5, %v6069_v34 }
0x110c   : > { %11296 = vmatprep.mubr.msk.bf16.mxu0 %vm12268_vm3, %v16947_v11 }
0x110e   : > { %11099 = vmatmul.mubr.msk.bf16.gmra.mrb[124].mxu1 %vm1724_vm4, %v17013_v2 }
0x110f   : > { %11102 = vmatprep.mubr.msk.bf16.mxu1 %vm12268_vm3, %v16947_v11 }
0x1116   : > { %11103 = vmatmul.mubr.msk.bf16.gmra.mrb[128].mxu1 %vm1724_vm4, %v17014_v16 }
0x1117   : > { %11106 = vmatprep.mubr.msk.bf16.mxu1 %vm12268_vm3, %v16947_v11 }
0x111e   : > { %11107 = vmatmul.mubr.msk.bf16.gmra.mrb[132].mxu1 %vm1724_vm4, %v17015_v15 }
0x111f   : > { %11110 = vmatprep.mubr.msk.bf16.mxu1 %vm12268_vm3, %v16947_v11 }
0x1126   : > { %11111 = vmatmul.mubr.msk.bf16.gmra.mrb[136].mxu1 %vm1724_vm4, %v17016_v5 }
0x1127   : > { %11177 = vmatprep.mubr.msk.f32.mxu1 %vm12268_vm3, %v16947_v11 }
0x1198   : > { %v15533_v25 = vpop.f32.mrb[104].mxu0 }
0x1199   : > { %v6528_v30 = vsel %vm2310_vm7, %v15533_v25, -inf  ;;  %v11134_v17 = vpop.f32.mrb[105].mxu0 }
0x119a   : > { %6529 = vmax.xlane.f32.xlu0 %v6528_v30 }
0x119c   : > { %v15537_v27 = vpop.f32.mrb[106].mxu0 }
0x119d   : > { %v6531_v37 = vsel %vm2310_vm7, %v15537_v27, -inf  ;;  %v11137_v2 = vpop.f32.mrb[107].mxu0 }
0x119e   : > { %6532 = vmax.xlane.f32.xlu1 %v6531_v37 }
0x11a0   : > { %v15541_v16 = vpop.f32.mrb[108].mxu0 }
0x11a1   : > { %v6534_v15 = vsel %vm2310_vm7, %v15541_v16, -inf  ;;  %v11140_v5 = vpop.f32.mrb[109].mxu0 }
0x11a2   : > { %6535 = vmax.xlane.f32.xlu0 %v6534_v15 }
0x11a4   : > { %v15545_v35 = vpop.f32.mrb[110].mxu0 }
0x11a5   : > { %v6537_v23 = vsel %vm2310_vm7, %v15545_v35, -inf  ;;  %v11143_v6 = vpop.f32.mrb[111].mxu0 }
0x11a6   : > { %6538 = vmax.xlane.f32.xlu1 %v6537_v23 }
0x11a8   : > { %v15549_v47 = vpop.f32.mrb[112].mxu0 }
0x11a9   : > { %v6540_v13 = vsel %vm2310_vm7, %v15549_v47, -inf  ;;  %v11146_v51 = vpop.f32.mrb[113].mxu0 }
0x11aa   : > { %6541 = vmax.xlane.f32.xlu0 %v6540_v13 }
0x11ac   : > { %v15553_v32 = vpop.f32.mrb[114].mxu0 }
0x11ad   : > { %v6543_v60 = vsel %vm2310_vm7, %v15553_v32, -inf  ;;  %v11149_v57 = vpop.f32.mrb[115].mxu0 }
0x11ae   : > { %6544 = vmax.xlane.f32.xlu1 %v6543_v60 }
0x11b0   : > { %v15557_v46 = vpop.f32.mrb[116].mxu0 }
0x11b1   : > { %v6546_v43 = vsel %vm2310_vm7, %v15557_v46, -inf  ;;  %v11152_v24 = vpop.f32.mrb[117].mxu0 }
0x11b2   : > { %6547 = vmax.xlane.f32.xlu0 %v6546_v43  ;;  %v15606_v43 = vld [vmem:[%s12506_s22 + $0x3] ss:$0 sm:$0xff]  ;;  %s17068_s22 = sld [smem:[#allocation77_spill]] }
0x11b4   : > { %v15561_v12 = vpop.f32.mrb[118].mxu0 }
0x11b5   : > { %v6549_v53 = vsel %vm2310_vm7, %v15561_v12, -inf  ;;  %v11155_v22 = vpop.f32.mrb[119].mxu0 }
0x11b6   : > { %6550 = vmax.xlane.f32.xlu1 %v6549_v53 }
0x11b8   : > { %v15565_v18 = vpop.f32.mrb[120].mxu0  ;;  %s17069_s0 = scalar_lea.vmem %s17068_s22, %s12464_s1 }
0x11b9   : > { %v6552_v36 = vsel %vm2310_vm7, %v15565_v18, -inf  ;;  %v11158_v3 = vpop.f32.mrb[121].mxu0  ;;  %v6293_v22 = vpop.f32.mrb[104].mxu1 }
0x11ba   : > { %6553 = vmax.xlane.f32.xlu0 %v6552_v36  ;;  %v6294_v36 = vadd.f32 %v15606_v43, %v6293_v22  ;;  %v11080_v3 = vpop.f32.mrb[105].mxu1 }
0x11be   : > { %v15569_v38 = vpop.f32.mrb[122].mxu0 }
0x11bf   : > { %v6937_v7 = vsel %vm2310_vm7, %v15569_v38, -inf  ;;  %v11224_v58 = vpop.f32.mrb[123].mxu0 }
0x11c0   : > { %6938 = vmax.xlane.f32.xlu1 %v6937_v7  ;;  %v6296_v58 = vpop.f32.mrb[106].mxu1 }
0x11c2   : > { %v15573_v40 = vpop.f32.mrb[124].mxu0 }
0x11c3   : > { %v6940_v26 = vsel %vm2310_vm7, %v15573_v40, -inf  ;;  %v11227_v45 = vpop.f32.mrb[125].mxu0 }
0x11c4   : > { %6941 = vmax.xlane.f32.xlu0 %v6940_v26  ;;  %v6297_v45 = vadd.f32 %v15606_v43, %v6296_v58 }
0x11c6   : > { %v15577_v52 = vpop.f32.mrb[126].mxu0 }
0x11c7   : > { %v6943_v49 = vsel %vm2310_vm7, %v15577_v52, -inf  ;;  %v11230_v29 = vpop.f32.mrb[127].mxu0 }
0x11c8   : > { %6944 = vmax.xlane.f32.xlu1 %v6943_v49  ;;  %v11081_v49 = vpop.f32.mrb[107].mxu1 }
0x11ca   : > { %v15581_v19 = vpop.f32.mrb[128].mxu0 }
0x11cb   : > { %v6946_v34 = vsel %vm2310_vm7, %v15581_v19, -inf  ;;  %v11233_v54 = vpop.f32.mrb[129].mxu0 }
0x11cc   : > { %6947 = vmax.xlane.f32.xlu0 %v6946_v34  ;;  %v11605_v34 = vpack.c.bf16 %v6297_v45, %v6294_v36 }
0x11ce   : > { %v15585_v62 = vpop.f32.mrb[130].mxu0  ;;  %11606 = vmatpush3.bf16.msra.mxu1 %v11605_v34 }
0x11cf   : > { %v6949_v42 = vsel %vm2310_vm7, %v15585_v62, -inf  ;;  %v11236_v59 = vpop.f32.mrb[131].mxu0  ;;  %11607 = vmatprep.subr.bf16.mxu1 %v16946_v41 }
0x11d0   : > { %6950 = vmax.xlane.f32.xlu1 %v6949_v42  ;;  %v6301_v59 = vpop.f32.mrb[108].mxu1 }
0x11d2   : > { %v15589_v30 = vpop.f32.mrb[132].mxu0 }
0x11d3   : > { %v6952_v17 = vsel %vm2310_vm7, %v15589_v30, -inf  ;;  %v11239_v37 = vpop.f32.mrb[133].mxu0 }
0x11d4   : > { %6953 = vmax.xlane.f32.xlu0 %v6952_v17  ;;  %v6302_v17 = vadd.f32 %v15606_v43, %v6301_v59  ;;  %v11084_v37 = vpop.f32.mrb[109].mxu1 }
0x11d6   : > { %v15593_v2 = vpop.f32.mrb[134].mxu0 }
0x11d7   : > { %v6955_v15 = vsel %vm2310_vm7, %v15593_v2, -inf  ;;  %v11242_v5 = vpop.f32.mrb[135].mxu0 }
0x11d8   : > { %6956 = vmax.xlane.f32.xlu1 %v6955_v15  ;;  %v6304_v5 = vpop.f32.mrb[110].mxu1 }
0x11da   : > { %v15597_v23 = vpop.f32.mrb[136].mxu0 }
0x11db   : > { %v6958_v6 = vsel %vm2310_vm7, %v15597_v23, -inf  ;;  %v11245_v13 = vpop.f32.mrb[137].mxu0 }
0x11dc   : > { %6959 = vmax.xlane.f32.xlu0 %v6958_v6  ;;  %v6305_v13 = vadd.f32 %v15606_v43, %v6304_v5 }
0x11de   : > { %v15601_v51 = vpop.f32.mrb[138].mxu0 }
0x11df   : > { %v6961_v60 = vsel %vm2310_vm7, %v15601_v51, -inf  ;;  %v11248_v57 = vpop.f32.mrb[139].mxu0 }
0x11e0   : > { %6962 = vmax.xlane.f32.xlu1 %v6961_v60  ;;  %v11085_v60 = vpop.f32.mrb[111].mxu1  ;;  %v11608_v57 = vpack.c.bf16 %v6305_v13, %v6302_v17 }
0x11e1   : > { %v6309_v3 = vpop.f32.mrb[112].mxu1 }
0x11e2   : > { %11609 = vmatpush3.bf16.msra.mxu1 %v11608_v57  ;;  %v11088_v58 = vpop.f32.mrb[113].mxu1 }
0x11e3   : > { %11610 = vmatprep.subr.bf16.mxu1 %v16946_v41  ;;  %v6312_v45 = vpop.f32.mrb[114].mxu1 }
0x11e4   : > { %v6313_v34 = vadd.f32 %v15606_v43, %v6312_v45 }
0x1227   : > { %v6530_v24 = vpop.xlane.xlu0 %6529 }
0x1228   : > { %v6555_v53 = vsub.f32 %v15533_v25, %v6530_v24 }
0x122a   : > { %v6564_v7 = vmul.f32 1.442695, %v6555_v53 }
0x122b   : > { %v6533_v26 = vpop.xlane.xlu1 %6532 }
0x122c   : > { %12011 = vpow2.f32 %v6564_v7  ;;  %v6556_v29 = vsub.f32 %v15537_v27, %v6533_v26  ;;  %v6310_v7 = vadd.f32 %v15606_v43, %v6309_v3 }
0x122e   : > { %v6566_v54 = vmul.f32 1.442695, %v6556_v29 }
0x122f   : > { %v6536_v42 = vpop.xlane.xlu0 %6535 }
0x1230   : > { %12013 = vpow2.f32 %v6566_v54  ;;  %v6557_v25 = vsub.f32 %v15541_v16, %v6536_v42  ;;  %v11089_v54 = vpop.f32.mrb[115].mxu1  ;;  %v11611_v42 = vpack.c.bf16 %v6313_v34, %v6310_v7 }
0x1232   : > { %v6568_v15 = vmul.f32 1.442695, %v6557_v25  ;;  %11612 = vmatpush3.bf16.msra.mxu1 %v11611_v42 }
0x1233   : > { %v6539_v6 = vpop.xlane.xlu1 %6538  ;;  %11613 = vmatprep.subr.bf16.mxu1 %v16946_v41 }
0x1234   : > { %12015 = vpow2.f32 %v6568_v15  ;;  %v6558_v27 = vsub.f32 %v15545_v35, %v6539_v6 }
0x1236   : > { %v15617_v24 = vpop.eup %12011  ;;  %v6570_v53 = vmul.f32 1.442695, %v6558_v27  ;;  %v6317_v27 = vpop.f32.mrb[116].mxu1 }
0x1237   : > { %v6542_v16 = vpop.xlane.xlu0 %6541  ;;  %v6582_v22 = vsel %vm2310_vm7, %v15617_v24, 0.0  ;;  %v6318_v58 = vadd.f32 %v15606_v43, %v6317_v27 }
0x1238   : > { %12017 = vpow2.f32 %v6570_v53  ;;  %v6559_v36 = vsub.f32 %v15549_v47, %v6542_v16  ;;  %6583 = vadd.xlane.f32.xlu0 %v6582_v22  ;;  %v11092_v16 = vpop.f32.mrb[117].mxu1 }
0x123a   : > { %v15624_v35 = vpop.eup %12013  ;;  %v6572_v26 = vmul.f32 1.442695, %v6559_v36  ;;  %v6320_v36 = vpop.f32.mrb[118].mxu1 }
0x123b   : > { %v6545_v49 = vpop.xlane.xlu1 %6544  ;;  %v6585_v29 = vsel %vm2310_vm7, %v15624_v35, 0.0  ;;  %v11093_v7 = vpop.f32.mrb[119].mxu1 }
0x123c   : > { %12019 = vpow2.f32 %v6572_v26  ;;  %v6560_v47 = vsub.f32 %v15553_v32, %v6545_v49  ;;  %6586 = vadd.xlane.f32.xlu1 %v6585_v29  ;;  %v6325_v34 = vpop.f32.mrb[120].mxu1 }
0x123e   : > { %v15630_v25 = vpop.eup %12015  ;;  %v6574_v59 = vmul.f32 1.442695, %v6560_v47  ;;  %v11096_v47 = vpop.f32.mrb[121].mxu1 }
0x123f   : > { %v6548_v17 = vpop.xlane.xlu0 %6547  ;;  %v6588_v37 = vsel %vm2310_vm7, %v15630_v25, 0.0 }
0x1240   : > { %12021 = vpow2.f32 %v6574_v59  ;;  %v6561_v15 = vsub.f32 %v15557_v46, %v6548_v17  ;;  %6589 = vadd.xlane.f32.xlu0 %v6588_v37  ;;  %v6328_v59 = vpop.f32.mrb[122].mxu1 }
0x1241   : > { %v11097_v37 = vpop.f32.mrb[123].mxu1 }
0x1242   : > { %v15636_v5 = vpop.eup %12017  ;;  %v6576_v6 = vmul.f32 1.442695, %v6561_v15 }
0x1243   : > { %v6551_v32 = vpop.xlane.xlu1 %6550  ;;  %v6591_v13 = vsel %vm2310_vm7, %v15636_v5, 0.0 }
0x1244   : > { %12023 = vpow2.f32 %v6576_v6  ;;  %v6562_v60 = vsub.f32 %v15561_v12, %v6551_v32  ;;  %6592 = vadd.xlane.f32.xlu1 %v6591_v13  ;;  %v6321_v12 = vadd.f32 %v15606_v43, %v6320_v36  ;;  %v6333_v6 = vpop.f32.mrb[124].mxu1  ;;  %v6326_v13 = vadd.f32 %v15606_v43, %v6325_v34 }
0x1245   : > { %v15663_v27 = vadd.f32 %v15606_v43, %v6333_v6 }
0x1246   : > { %v15641_v57 = vpop.eup %12019  ;;  %v6578_v53 = vmul.f32 1.442695, %v6562_v60  ;;  %v11614_v29 = vpack.c.bf16 %v6321_v12, %v6318_v58  ;;  %v15660_v60 = vadd.f32 %v15606_v43, %v6328_v59 }
0x1247   : > { %v6554_v46 = vpop.xlane.xlu0 %6553  ;;  %v6594_v22 = vsel %vm2310_vm7, %v15641_v57, 0.0 }
0x1248   : > { %12025 = vpow2.f32 %v6578_v53  ;;  %v6563_v3 = vsub.f32 %v15565_v18, %v6554_v46  ;;  %6595 = vadd.xlane.f32.xlu0 %v6594_v22  ;;  %11615 = vmatpush3.bf16.msra.mxu1 %v11614_v29  ;;  %v11633_v22 = vpack.c.bf16 %v15663_v27, %v15660_v60 }
0x1249   : > { %11175 = vmatprep.subr.mxu1 %v16947_v11 }
0x124a   : > { %v15648_v26 = vpop.eup %12021  ;;  %v6580_v45 = vmul.f32 1.442695, %v6563_v3 }
0x124b   : > { %v6597_v49 = vsel %vm2310_vm7, %v15648_v26, 0.0 }
0x124c   : > { %12027 = vpow2.f32 %v6580_v45  ;;  %6598 = vadd.xlane.f32.xlu1 %v6597_v49  ;;  %11176 = vmatpush3.msra.mxu1 %v6326_v13 }
0x124d   : > { %v6939_v54 = vpop.xlane.xlu1 %6938  ;;  %11632 = vmatprep.subr.bf16.mxu1 %v16946_v41 }
0x124e   : > { %v15652_v18 = vpop.eup %12023  ;;  %v6964_v42 = vsub.f32 %v15569_v38, %v6939_v54  ;;  %v11100_v38 = vpop.f32.mrb[125].mxu1 }
0x124f   : > { %v6600_v17 = vsel %vm2310_vm7, %v15652_v18, 0.0  ;;  %v6336_v12 = vpop.f32.mrb[126].mxu1 }
0x1250   : > { %v6973_v15 = vmul.f32 1.442695, %v6964_v42  ;;  %6601 = vadd.xlane.f32.xlu0 %v6600_v17  ;;  %v11101_v45 = vpop.f32.mrb[127].mxu1  ;;  %v15679_v54 = vadd.f32 %v15606_v43, %v6336_v12 }
0x1251   : > { %v6942_v32 = vpop.xlane.xlu0 %6941  ;;  %v6341_v29 = vpop.f32.mrb[128].mxu1 }
0x1252   : > { %v15665_v53 = vpop.eup %12025  ;;  %12029 = vpow2.f32 %v6973_v15  ;;  %v6965_v16 = vsub.f32 %v15573_v40, %v6942_v32  ;;  %v15682_v47 = vadd.f32 %v15606_v43, %v6341_v29  ;;  %v11104_v42 = vpop.f32.mrb[129].mxu1 }
0x1253   : > { %v6603_v46 = vsel %vm2310_vm7, %v15665_v53, 0.0  ;;  %v6344_v13 = vpop.f32.mrb[130].mxu1 }
0x1254   : > { %v6975_v36 = vmul.f32 1.442695, %v6965_v16  ;;  %6604 = vadd.xlane.f32.xlu1 %v6603_v46  ;;  %v11105_v38 = vpop.f32.mrb[131].mxu1 }
0x1255   : > { %v6945_v3 = vpop.xlane.xlu1 %6944 }
0x1256   : > { %v15673_v7 = vpop.eup %12027  ;;  %12031 = vpow2.f32 %v6975_v36  ;;  %v6966_v58 = vsub.f32 %v15577_v52, %v6945_v3  ;;  %v11636_v52 = vpack.c.bf16 %v15682_v47, %v15679_v54 }
0x1257   : > { %v6606_v40 = vsel %vm2310_vm7, %v15673_v7, 0.0 }
0x1258   : > { %v6977_v49 = vmul.f32 1.442695, %v6966_v58  ;;  %6607 = vadd.xlane.f32.xlu0 %v6606_v40  ;;  %v15697_v58 = vadd.f32 %v15606_v43, %v6344_v13 }
0x1259   : > { %v6948_v34 = vpop.xlane.xlu0 %6947 }
0x125a   : > { %12033 = vpow2.f32 %v6977_v49  ;;  %v6967_v59 = vsub.f32 %v15581_v19, %v6948_v34  ;;  %v6349_v19 = vpop.f32.mrb[132].mxu1 }
0x125b   : > { %v15700_v12 = vadd.f32 %v15606_v43, %v6349_v19  ;;  %v11108_v40 = vpop.f32.mrb[133].mxu1 }
0x125c   : > { %v15687_v17 = vpop.eup %12029  ;;  %v6979_v37 = vmul.f32 1.442695, %v6967_v59 }
0x125d   : > { %v6951_v15 = vpop.xlane.xlu1 %6950  ;;  %v6991_v6 = vsel %vm2310_vm7, %v15687_v17, 0.0  ;;  %v11639_v45 = vpack.c.bf16 %v15700_v12, %v15697_v58 }
0x125e   : > { %12035 = vpow2.f32 %v6979_v37  ;;  %v6968_v32 = vsub.f32 %v15585_v62, %v6951_v15  ;;  %6992 = vadd.xlane.f32.xlu1 %v6991_v6  ;;  %v6352_v37 = vpop.f32.mrb[134].mxu1 }
0x125f   : > { %v11109_v15 = vpop.f32.mrb[135].mxu1 }
0x1260   : > { %v15692_v16 = vpop.eup %12031  ;;  %v6981_v46 = vmul.f32 1.442695, %v6968_v32  ;;  %v6357_v32 = vpop.f32.mrb[136].mxu1 }
0x1261   : > { %v6954_v36 = vpop.xlane.xlu0 %6953  ;;  %v6994_v3 = vsel %vm2310_vm7, %v15692_v16, 0.0  ;;  %v15718_v19 = vadd.f32 %v15606_v43, %v6357_v32 }
0x1262   : > { %12037 = vpow2.f32 %v6981_v46  ;;  %v6969_v62 = vsub.f32 %v15589_v30, %v6954_v36  ;;  %6995 = vadd.xlane.f32.xlu0 %v6994_v3  ;;  %v15715_v46 = vadd.f32 %v15606_v43, %v6352_v37  ;;  %v11112_v36 = vpop.f32.mrb[137].mxu1 }
0x1264   : > { %v15705_v49 = vpop.eup %12033  ;;  %v6983_v29 = vmul.f32 1.442695, %v6969_v62  ;;  %v11642_v3 = vpack.c.bf16 %v15718_v19, %v15715_v46 }
0x1265   : > { %v6957_v34 = vpop.xlane.xlu1 %6956  ;;  %v6997_v42 = vsel %vm2310_vm7, %v15705_v49, 0.0 }
0x1266   : > { %12039 = vpow2.f32 %v6983_v29  ;;  %v6970_v59 = vsub.f32 %v15593_v2, %v6957_v34  ;;  %6998 = vadd.xlane.f32.xlu1 %v6997_v42 }
0x1268   : > { %v15710_v6 = vpop.eup %12035  ;;  %v6985_v30 = vmul.f32 1.442695, %v6970_v59  ;;  %v15728_v59 = vpop.f32.mrb[138].mxu1 }
0x1269   : > { %v6960_v13 = vpop.xlane.xlu0 %6959  ;;  %v7000_v38 = vsel %vm2310_vm7, %v15710_v6, 0.0  ;;  %v11113_v15 = vpop.f32.mrb[139].mxu1 }
0x126a   : > { %12041 = vpow2.f32 %v6985_v30  ;;  %v6971_v2 = vsub.f32 %v15597_v23, %v6960_v13  ;;  %7001 = vadd.xlane.f32.xlu0 %v7000_v38 }
0x126c   : > { %v15723_v40 = vpop.eup %12037  ;;  %v6987_v62 = vmul.f32 1.442695, %v6971_v2 }
0x126d   : > { %v6963_v29 = vpop.xlane.xlu1 %6962  ;;  %v7003_v34 = vsel %vm2310_vm7, %v15723_v40, 0.0 }
0x126e   : > { %12043 = vpow2.f32 %v6987_v62  ;;  %v6972_v42 = vsub.f32 %v15601_v51, %v6963_v29  ;;  %7004 = vadd.xlane.f32.xlu1 %v7003_v34 }
0x1270   : > { %v15730_v37 = vpop.eup %12039  ;;  %v6989_v23 = vmul.f32 1.442695, %v6972_v42 }
0x1271   : > { %v7006_v30 = vsel %vm2310_vm7, %v15730_v37, 0.0 }
0x1272   : > { %12045 = vpow2.f32 %v6989_v23  ;;  %7007 = vadd.xlane.f32.xlu0 %v7006_v30 }
0x1274   : > { %v15734_v32 = vpop.eup %12041 }
0x1275   : > { %v7009_v13 = vsel %vm2310_vm7, %v15734_v32, 0.0 }
0x1276   : > { %7010 = vadd.xlane.f32.xlu1 %v7009_v13 }
0x1278   : > { %v15738_v38 = vpop.eup %12043 }
0x1279   : > { %v7012_v51 = vsel %vm2310_vm7, %v15738_v38, 0.0 }
0x127a   : > { %7013 = vadd.xlane.f32.xlu0 %v7012_v51 }
0x127c   : > { %v15742_v36 = vpop.eup %12045 }
0x127d   : > { %v7015_v2 = vsel %vm2310_vm7, %v15742_v36, 0.0 }
0x127e   : > { %7016 = vadd.xlane.f32.xlu1 %v7015_v2 }
0x12c5   : > { %v6584_v62 = vpop.xlane.xlu0 %6583 }
0x12c6   : > { %12047 = vrcp.f32 %v6584_v62 }
0x12c9   : > { %v6587_v29 = vpop.xlane.xlu1 %6586 }
0x12ca   : > { %12049 = vrcp.f32 %v6587_v29 }
0x12cd   : > { %v6590_v34 = vpop.xlane.xlu0 %6589 }
0x12ce   : > { %12051 = vrcp.f32 %v6590_v34 }
0x12d0   : > { %v12048_v42 = vpop.eup %12047 }
0x12d1   : > { %v6618_v23 = vmul.f32 %v12048_v42, %v15617_v24  ;;  %v6593_v15 = vpop.xlane.xlu1 %6592 }
0x12d2   : > { %12053 = vrcp.f32 %v6593_v15 }
0x12d3   : > { %v6627_v30 = vadd.f32 %v6618_v23, %v14980_v14  ;;  %11178 = vmatmul.mubr.msk.f32.vlgmr.msra.gmra.mrb[140].mxu1 %vm2310_vm7, %v6618_v23 }
0x12d4   : > { %v12050_v13 = vpop.eup %12049  ;;  %11180 = vmatprep.mubr.msk.f32.mxu1 %vm12268_vm3, %v16947_v11  ;;  %11634 = vmatpush3.bf16.msra.mxu1 %v11633_v22 }
0x12d5   : > { %v7350_v51 = vmul.f32 0.25, %v6627_v30  ;;  %v6619_v2 = vmul.f32 %v12050_v13, %v15624_v35  ;;  %v6596_v62 = vpop.xlane.xlu0 %6595  ;;  %11635 = vmatprep.subr.bf16.mxu1 %v16946_v41 }
0x12d6   : > { %12055 = vrcp.f32 %v6596_v62 }
0x12d7   : > { %7359 = vst.msk [vmem:[%s12542_s14] sm:$0xff] %vm2310_vm7, %v7350_v51  ;;  %v6628_v14 = vadd.f32 %v6619_v2, %v14992_v21  ;;  %11181 = vmatmul.mubr.msk.f32.gmra.mrb[142].mxu1 %vm2310_vm7, %v6619_v2 }
0x12d8   : > { %v12052_v24 = vpop.eup %12051  ;;  %11183 = vmatprep.mubr.msk.f32.mxu1 %vm12268_vm3, %v16947_v11  ;;  %11637 = vmatpush3.bf16.msra.mxu1 %v11636_v52 }
0x12d9   : > { %v7351_v60 = vmul.f32 0.25, %v6628_v14  ;;  %v6620_v35 = vmul.f32 %v12052_v24, %v15630_v25  ;;  %v6599_v27 = vpop.xlane.xlu1 %6598  ;;  %11638 = vmatprep.subr.bf16.mxu1 %v16946_v41 }
0x12da   : > { %12057 = vrcp.f32 %v6599_v27 }
0x12db   : > { %7360 = vst.msk [vmem:[%s12542_s14 + $0x8] sm:$0xff] %vm2310_vm7, %v7351_v60  ;;  %v6629_v21 = vadd.f32 %v6620_v35, %v15004_v56  ;;  %11184 = vmatmul.mubr.msk.f32.gmra.mrb[144].mxu1 %vm2310_vm7, %v6620_v35 }
0x12dc   : > { %v12054_v22 = vpop.eup %12053  ;;  %11186 = vmatprep.mubr.msk.f32.mxu1 %vm12268_vm3, %v16947_v11  ;;  %11640 = vmatpush3.bf16.msra.mxu1 %v11639_v45 }
0x12dd   : > { %v7352_v54 = vmul.f32 0.25, %v6629_v21  ;;  %v6621_v25 = vmul.f32 %v12054_v22, %v15636_v5  ;;  %v6602_v47 = vpop.xlane.xlu0 %6601  ;;  %11641 = vmatprep.subr.bf16.mxu1 %v16946_v41  ;;  %v6361_v5 = vadd.f32 %v15606_v43, %v15728_v59 }
0x12de   : > { %12059 = vrcp.f32 %v6602_v47 }
0x12df   : > { %7361 = vst.msk [vmem:[%s12542_s14 + $0x10] sm:$0xff] %vm2310_vm7, %v7352_v54  ;;  %v6630_v56 = vadd.f32 %v6621_v25, %v15016_v1  ;;  %11187 = vmatmul.mubr.msk.f32.gmra.mrb[146].mxu1 %vm2310_vm7, %v6621_v25 }
0x12e0   : > { %v12056_v52 = vpop.eup %12055  ;;  %11189 = vmatprep.mubr.msk.f32.mxu1 %vm12268_vm3, %v16947_v11  ;;  %11643 = vmatpush3.bf16.msra.mxu1 %v11642_v3 }
0x12e1   : > { %v7353_v58 = vmul.f32 0.25, %v6630_v56  ;;  %v6622_v41 = vmul.f32 %v12056_v52, %v15641_v57  ;;  %v6605_v12 = vpop.xlane.xlu1 %6604  ;;  %11265 = vmatprep.subr.mxu1 %v16947_v11 }
0x12e2   : > { %12061 = vrcp.f32 %v6605_v12 }
0x12e3   : > { %7362 = vst.msk [vmem:[%s12542_s14 + $0x18] sm:$0xff] %vm2310_vm7, %v7353_v58  ;;  %v6631_v1 = vadd.f32 %v6622_v41, %v15030_v44  ;;  %11190 = vmatmul.mubr.msk.f32.gmra.mrb[148].mxu1 %vm2310_vm7, %v6622_v41 }
0x12e4   : > { %v12058_v45 = vpop.eup %12057  ;;  %11192 = vmatprep.mubr.msk.f32.mxu1 %vm12268_vm3, %v16947_v11  ;;  %11266 = vmatpush3.msra.mxu1 %v6361_v5 }
0x12e5   : > { %v7354_v43 = vmul.f32 0.25, %v6631_v1  ;;  %v6623_v46 = vmul.f32 %v12058_v45, %v15648_v26  ;;  %v6608_v57 = vpop.xlane.xlu0 %6607  ;;  %11332 = vmatprep.subr.bf16.mxu1 %v16947_v11 }
0x12e6   : > { %12063 = vrcp.f32 %v6608_v57 }
0x12e7   : > { %7363 = vst.msk [vmem:[%s12542_s14 + $0x20] sm:$0xff] %vm2310_vm7, %v7354_v43  ;;  %v6632_v44 = vadd.f32 %v6623_v46, %v15039_v48  ;;  %11193 = vmatmul.mubr.msk.f32.gmra.mrb[150].mxu1 %vm2310_vm7, %v6623_v46 }
0x12e8   : > { %v12060_v19 = vpop.eup %12059  ;;  %11195 = vmatprep.mubr.msk.f32.mxu1 %vm12268_vm3, %v16947_v11 }
0x12e9   : > { %v7355_v3 = vmul.f32 0.25, %v6632_v44  ;;  %v6624_v59 = vmul.f32 %v12060_v19, %v15652_v18  ;;  %v17051_v44 = vld [vmem:[#allocation28_spill] sm:$0xff] }
0x12eb   : > { %7364 = vst.msk [vmem:[%s12542_s14 + $0x28] sm:$0xff] %vm2310_vm7, %v7355_v3  ;;  %v6633_v26 = vadd.f32 %v6624_v59, %v15047_v50  ;;  %11196 = vmatmul.mubr.msk.f32.gmra.mrb[152].mxu1 %vm2310_vm7, %v6624_v59  ;;  %v6993_v29 = vpop.xlane.xlu1 %6992 }
0x12ec   : > { %v12062_v34 = vpop.eup %12061  ;;  %12065 = vrcp.f32 %v6993_v29  ;;  %11198 = vmatprep.mubr.msk.f32.mxu1 %vm12268_vm3, %v16947_v11 }
0x12ed   : > { %v7356_v48 = vmul.f32 0.25, %v6633_v26  ;;  %v6625_v42 = vmul.f32 %v12062_v34, %v15665_v53 }
0x12ef   : > { %7365 = vst.msk [vmem:[%s12542_s14 + $0x30] sm:$0xff] %vm2310_vm7, %v7356_v48  ;;  %v6634_v18 = vadd.f32 %v6625_v42, %v15055_v28  ;;  %v6996_v23 = vpop.xlane.xlu0 %6995  ;;  %11199 = vmatmul.mubr.msk.f32.gmra.mrb[154].mxu1 %vm2310_vm7, %v6625_v42 }
0x12f0   : > { %v12064_v50 = vpop.eup %12063  ;;  %12067 = vrcp.f32 %v6996_v23  ;;  %11201 = vmatprep.mubr.msk.f32.mxu1 %vm12268_vm3, %v16947_v11 }
0x12f1   : > { %v7357_v15 = vmul.f32 0.25, %v6634_v18  ;;  %v6626_v30 = vmul.f32 %v12064_v50, %v15673_v7 }
0x12f3   : > { %7366 = vst.msk [vmem:[%s12542_s14 + $0x38] sm:$0xff] %vm2310_vm7, %v7357_v15  ;;  %v6635_v53 = vadd.f32 %v6626_v30, %v15065_v20  ;;  %11202 = vmatmul.mubr.msk.f32.gmra.mrb[156].mxu1 %vm2310_vm7, %v6626_v30  ;;  %v6999_v13 = vpop.xlane.xlu1 %6998 }
0x12f4   : > { %12069 = vrcp.f32 %v6999_v13  ;;  %11267 = vmatprep.mubr.msk.f32.mxu1 %vm12268_vm3, %v16947_v11 }
0x12f5   : > { %v7358_v28 = vmul.f32 0.25, %v6635_v53 }
0x12f6   : > { %v12066_v51 = vpop.eup %12065 }
0x12f7   : > { %7367 = vst.msk [vmem:[%s12542_s14 + $0x40] sm:$0xff] %vm2310_vm7, %v7358_v28  ;;  %v7027_v2 = vmul.f32 %v12066_v51, %v15687_v17  ;;  %v7002_v62 = vpop.xlane.xlu0 %7001 }
0x12f8   : > { %12071 = vrcp.f32 %v7002_v62 }
0x12f9   : > { %v7036_v7 = vadd.f32 %v7027_v2, %v15071_v39  ;;  %11268 = vmatmul.mubr.msk.f32.vlgmr.msra.gmra.mrb[158].mxu1 %vm2310_vm7, %v7027_v2 }
0x12fa   : > { %v12068_v20 = vpop.eup %12067  ;;  %11270 = vmatprep.mubr.msk.f32.mxu1 %vm12268_vm3, %v16947_v11 }
0x12fb   : > { %v7368_v14 = vmul.f32 0.25, %v7036_v7  ;;  %v7028_v24 = vmul.f32 %v12068_v20, %v15692_v16  ;;  %v7005_v60 = vpop.xlane.xlu1 %7004 }
0x12fc   : > { %12073 = vrcp.f32 %v7005_v60 }
0x12fd   : > { %9324 = vst.msk [vmem:[%s12542_s14 + $0x48] sm:$0xff] %vm2310_vm7, %v7368_v14  ;;  %v7037_v17 = vadd.f32 %v7028_v24, %v15079_v61  ;;  %11271 = vmatmul.mubr.msk.f32.gmra.mrb[160].mxu1 %vm2310_vm7, %v7028_v24 }
0x12fe   : > { %v12070_v39 = vpop.eup %12069  ;;  %11273 = vmatprep.mubr.msk.f32.mxu1 %vm12268_vm3, %v16947_v11 }
0x12ff   : > { %v7369_v35 = vmul.f32 0.25, %v7037_v17  ;;  %v7029_v27 = vmul.f32 %v12070_v39, %v15705_v49  ;;  %v7008_v21 = vpop.xlane.xlu0 %7007 }
0x1300   : > { %12075 = vrcp.f32 %v7008_v21 }
0x1301   : > { %9325 = vst.msk [vmem:[%s12542_s14 + $0x50] sm:$0xff] %vm2310_vm7, %v7369_v35  ;;  %v7038_v16 = vadd.f32 %v7029_v27, %v15087_v9  ;;  %11274 = vmatmul.mubr.msk.f32.gmra.mrb[162].mxu1 %vm2310_vm7, %v7029_v27 }
0x1302   : > { %v12072_v61 = vpop.eup %12071  ;;  %11276 = vmatprep.mubr.msk.f32.mxu1 %vm12268_vm3, %v16947_v11 }
0x1303   : > { %v7370_v22 = vmul.f32 0.25, %v7038_v16  ;;  %v7030_v54 = vmul.f32 %v12072_v61, %v15710_v6  ;;  %v7011_v25 = vpop.xlane.xlu1 %7010 }
0x1304   : > { %12077 = vrcp.f32 %v7011_v25 }
0x1305   : > { %9326 = vst.msk [vmem:[%s12542_s14 + $0x58] sm:$0xff] %vm2310_vm7, %v7370_v22  ;;  %v7039_v49 = vadd.f32 %v7030_v54, %v15095_v10  ;;  %11277 = vmatmul.mubr.msk.f32.gmra.mrb[164].mxu1 %vm2310_vm7, %v7030_v54 }
0x1306   : > { %v12074_v9 = vpop.eup %12073  ;;  %11279 = vmatprep.mubr.msk.f32.mxu1 %vm12268_vm3, %v16947_v11 }
0x1307   : > { %v7371_v47 = vmul.f32 0.25, %v7039_v49  ;;  %v7031_v56 = vmul.f32 %v12074_v9, %v15723_v40  ;;  %v7014_v52 = vpop.xlane.xlu0 %7013 }
0x1308   : > { %12079 = vrcp.f32 %v7014_v52 }
0x1309   : > { %9327 = vst.msk [vmem:[%s12542_s14 + $0x60] sm:$0xff] %vm2310_vm7, %v7371_v47  ;;  %v7040_v6 = vadd.f32 %v7031_v56, %v15103_v31  ;;  %11280 = vmatmul.mubr.msk.f32.gmra.mrb[166].mxu1 %vm2310_vm7, %v7031_v56 }
0x130a   : > { %v12076_v10 = vpop.eup %12075  ;;  %11282 = vmatprep.mubr.msk.f32.mxu1 %vm12268_vm3, %v16947_v11 }
0x130b   : > { %v7372_v5 = vmul.f32 0.25, %v7040_v6  ;;  %v7032_v58 = vmul.f32 %v12076_v10, %v15730_v37  ;;  %v7017_v41 = vpop.xlane.xlu1 %7016 }
0x130c   : > { %12081 = vrcp.f32 %v7017_v41 }
0x130d   : > { %9328 = vst.msk [vmem:[%s12542_s14 + $0x68] sm:$0xff] %vm2310_vm7, %v7372_v5  ;;  %v7041_v40 = vadd.f32 %v7032_v58, %v15111_v4  ;;  %11283 = vmatmul.mubr.msk.f32.gmra.mrb[168].mxu1 %vm2310_vm7, %v7032_v58 }
0x130e   : > { %v12078_v12 = vpop.eup %12077  ;;  %11285 = vmatprep.mubr.msk.f32.mxu1 %vm12268_vm3, %v16947_v11 }
0x130f   : > { %v7373_v31 = vmul.f32 0.25, %v7041_v40  ;;  %v7033_v1 = vmul.f32 %v12078_v12, %v15734_v32 }
0x1311   : > { %9329 = vst.msk [vmem:[%s12542_s14 + $0x70] sm:$0xff] %vm2310_vm7, %v7373_v31  ;;  %v7042_v37 = vadd.f32 %v7033_v1, %v15119_v0  ;;  %11286 = vmatmul.mubr.msk.f32.gmra.mrb[170].mxu1 %vm2310_vm7, %v7033_v1  ;;  %v17052_v31 = vld [vmem:[#allocation29_spill] sm:$0xff] }
0x1312   : > { %v12080_v45 = vpop.eup %12079  ;;  %11288 = vmatprep.mubr.msk.f32.mxu1 %vm12268_vm3, %v16947_v11 }
0x1313   : > { %v7374_v4 = vmul.f32 0.25, %v7042_v37  ;;  %v7034_v43 = vmul.f32 %v12080_v45, %v15738_v38  ;;  %v15926_v45 = vld [vmem:[%s17053_s27] ss:$0 sm:$0xff] }
0x1315   : > { %9330 = vst.msk [vmem:[%s12542_s14 + $0x78] sm:$0xff] %vm2310_vm7, %v7374_v4  ;;  %v7043_v46 = vadd.f32 %v7034_v43, %v15127_v55  ;;  %11289 = vmatmul.mubr.msk.f32.gmra.mrb[172].mxu1 %vm2310_vm7, %v7034_v43  ;;  %v11786_v55 = vld [vmem:[%s12486_s8 + $0x18] sm:$0xff]   ;;  %v12155_v43 = vld [vmem:[#allocation2] sm:$0xff] }
0x1316   : > { %v12082_v32 = vpop.eup %12081  ;;  %11291 = vmatprep.mubr.msk.f32.mxu1 %vm12268_vm3, %v16947_v11  ;;  %11295 = vmatpush3.bf16.msra.mxu0 %v11786_v55 }
0x1317   : > { %v7375_v0 = vmul.f32 0.25, %v7043_v46  ;;  %v7035_v57 = vmul.f32 %v12082_v32, %v15742_v36  ;;  %11376 = vmatprep.subr.bf16.mxu0 %v16947_v11  ;;  %v17054_v32 = vld [vmem:[#allocation30_spill] sm:$0xff] }
0x1319   : > { %9331 = vst.msk [vmem:[%s12542_s14 + $0x80] sm:$0xff] %vm2310_vm7, %v7375_v0  ;;  %v7044_v19 = vadd.f32 %v7035_v57, %v17051_v44  ;;  %11292 = vmatmul.mubr.msk.f32.gmra.mrb[174].mxu1 %vm2310_vm7, %v7035_v57 }
0x131a   : > { %11340 = vmatprep.mubr.msk.bf16.mxu1 %vm12268_vm3, %v16947_v11 }
0x131b   : > { %v7376_v38 = vmul.f32 0.25, %v7044_v19  ;;  %v12156_v19 = vld [vmem:[#allocation2 + $0x8] sm:$0xff] }
0x131d   : > { %9332 = vst.msk [vmem:[%s12542_s14 + $0x88] sm:$0xff] %vm2310_vm7, %v7376_v38 }
0x13a6   : > { %v6729_v3 = vpop.f32.mrb[140].mxu1 }
0x13a7   : > { %v11179_v59 = vpop.f32.mrb[141].mxu1 }
0x13aa   : > { %v6734_v26 = vpop.f32.mrb[142].mxu1 }
0x13ab   : > { %v7182_v36 = vpack.c.bf16 %v6734_v26, %v6729_v3  ;;  %v11182_v29 = vpop.f32.mrb[143].mxu1 }
0x13ad   : > { %11297 = vmatmul.mubr.msk.bf16.vlgmr.msra.gmra.mrb[140].mxu0 %vm2145_vm5, %v7182_v36  ;;  %v17055_v36 = vld [vmem:[#allocation31_spill] sm:$0xff] }
0x13ae   : > { %v6739_v34 = vpop.f32.mrb[144].mxu1  ;;  %11300 = vmatprep.mubr.msk.bf16.mxu0 %vm12268_vm3, %v16947_v11 }
0x13af   : > { %v11185_v48 = vpop.f32.mrb[145].mxu1 }
0x13b2   : > { %v6744_v42 = vpop.f32.mrb[146].mxu1 }
0x13b3   : > { %v7183_v18 = vpack.c.bf16 %v6744_v42, %v6739_v34  ;;  %v11188_v23 = vpop.f32.mrb[147].mxu1 }
0x13b4   : > { %v12157_v23 = vld [vmem:[#allocation2 + $0x10] sm:$0xff] }
0x13b5   : > { %11301 = vmatmul.mubr.msk.bf16.gmra.mrb[144].mxu0 %vm2145_vm5, %v7183_v18 }
0x13b6   : > { %v6749_v50 = vpop.f32.mrb[148].mxu1  ;;  %11304 = vmatprep.mubr.msk.bf16.mxu0 %vm12268_vm3, %v16947_v11 }
0x13b7   : > { %v11191_v15 = vpop.f32.mrb[149].mxu1 }
0x13b8   : > { %v17056_v15 = vld [vmem:[#allocation32_spill] sm:$0xff] }
0x13ba   : > { %v6754_v30 = vpop.f32.mrb[150].mxu1 }
0x13bb   : > { %v7184_v53 = vpack.c.bf16 %v6754_v30, %v6749_v50  ;;  %v11194_v13 = vpop.f32.mrb[151].mxu1 }
0x13bd   : > { %11305 = vmatmul.mubr.msk.bf16.gmra.mrb[148].mxu0 %vm2145_vm5, %v7184_v53 }
0x13be   : > { %v6759_v28 = vpop.f32.mrb[152].mxu1  ;;  %11308 = vmatprep.mubr.msk.bf16.mxu0 %vm12268_vm3, %v16947_v11 }
0x13bf   : > { %v11197_v51 = vpop.f32.mrb[153].mxu1 }
0x13c0   : > { %v12158_v51 = vld [vmem:[#allocation2 + $0x18] sm:$0xff] }
0x13c2   : > { %v6764_v2 = vpop.f32.mrb[154].mxu1 }
0x13c3   : > { %v7185_v62 = vpack.c.bf16 %v6764_v2, %v6759_v28  ;;  %v11200_v7 = vpop.f32.mrb[155].mxu1 }
0x13c5   : > { %11309 = vmatmul.mubr.msk.bf16.gmra.mrb[152].mxu0 %vm2145_vm5, %v7185_v62 }
0x13c6   : > { %v6769_v20 = vpop.f32.mrb[156].mxu1  ;;  %11312 = vmatprep.mubr.msk.bf16.mxu0 %vm12268_vm3, %v16947_v11 }
0x13c7   : > { %v11203_v14 = vpop.f32.mrb[157].mxu1 }
0x13cc   : > { %v7138_v24 = vpop.f32.mrb[158].mxu1 }
0x13cd   : > { %v7186_v60 = vpack.c.bf16 %v7138_v24, %v6769_v20  ;;  %v11269_v17 = vpop.f32.mrb[159].mxu1 }
0x13cf   : > { %11313 = vmatmul.mubr.msk.bf16.gmra.mrb[156].mxu0 %vm2145_vm5, %v7186_v60  ;;  %v17057_v60 = vld [vmem:[#allocation33_spill] sm:$0xff] }
0x13d0   : > { %v7143_v39 = vpop.f32.mrb[160].mxu1  ;;  %11316 = vmatprep.mubr.msk.bf16.mxu0 %vm12268_vm3, %v16947_v11 }
0x13d1   : > { %v11272_v35 = vpop.f32.mrb[161].mxu1 }
0x13d4   : > { %v7148_v27 = vpop.f32.mrb[162].mxu1 }
0x13d5   : > { %v7187_v21 = vpack.c.bf16 %v7148_v27, %v7143_v39  ;;  %v11275_v16 = vpop.f32.mrb[163].mxu1 }
0x13d6   : > { %v12159_v16 = vld [vmem:[#allocation2 + $0x20] sm:$0xff] }
0x13d7   : > { %11317 = vmatmul.mubr.msk.bf16.gmra.mrb[164].mxu0 %vm2145_vm5, %v7187_v21 }
0x13d8   : > { %v7153_v61 = vpop.f32.mrb[164].mxu1  ;;  %11320 = vmatprep.mubr.msk.bf16.mxu0 %vm12268_vm3, %v16947_v11 }
0x13d9   : > { %v11278_v22 = vpop.f32.mrb[165].mxu1 }
0x13da   : > { %v17058_v22 = vld [vmem:[#allocation34_spill] sm:$0xff] }
0x13dc   : > { %v7158_v54 = vpop.f32.mrb[166].mxu1 }
0x13dd   : > { %v7188_v25 = vpack.c.bf16 %v7158_v54, %v7153_v61  ;;  %v11281_v49 = vpop.f32.mrb[167].mxu1 }
0x13df   : > { %11321 = vmatmul.mubr.msk.bf16.gmra.mrb[168].mxu0 %vm2145_vm5, %v7188_v25 }
0x13e0   : > { %v7163_v9 = vpop.f32.mrb[168].mxu1  ;;  %11324 = vmatprep.mubr.msk.bf16.mxu0 %vm12268_vm3, %v16947_v11 }
0x13e1   : > { %v11284_v47 = vpop.f32.mrb[169].mxu1 }
0x13e2   : > { %v12160_v47 = vld [vmem:[#allocation2 + $0x28] sm:$0xff] }
0x13e4   : > { %v7168_v56 = vpop.f32.mrb[170].mxu1 }
0x13e5   : > { %v7189_v52 = vpack.c.bf16 %v7168_v56, %v7163_v9  ;;  %v11287_v6 = vpop.f32.mrb[171].mxu1 }
0x13e7   : > { %11325 = vmatmul.mubr.msk.bf16.gmra.mrb[172].mxu0 %vm2145_vm5, %v7189_v52 }
0x13e8   : > { %v7173_v10 = vpop.f32.mrb[172].mxu1  ;;  %11328 = vmatprep.mubr.msk.bf16.mxu0 %vm12268_vm3, %v16947_v11 }
0x13e9   : > { %v11290_v5 = vpop.f32.mrb[173].mxu1 }
0x13ec   : > { %v7178_v58 = vpop.f32.mrb[174].mxu1 }
0x13ed   : > { %v7190_v41 = vpack.c.bf16 %v7178_v58, %v7173_v10  ;;  %v11293_v40 = vpop.f32.mrb[175].mxu1 }
0x13ef   : > { %11329 = vmatmul.mubr.msk.bf16.gmra.mrb[176].mxu0 %vm2145_vm5, %v7190_v41  ;;  %v17059_v41 = vld [vmem:[#allocation35_spill] sm:$0xff] }
0x13f0   : > { %11384 = vmatprep.mubr.msk.bf16.mxu0 %vm12268_vm3, %v16947_v11 }
0x1480   : > { %v7261_v12 = vpop.f32.mrb[140].mxu0 }
0x1481   : > { %v7332_v1 = vadd.f32 %v7261_v12, %v17052_v31  ;;  %v11298_v37 = vpop.f32.mrb[141].mxu0 }
0x1482   : > { %v7264_v4 = vpop.f32.mrb[142].mxu0 }
0x1483   : > { %v7387_v46 = vadd.f32 %v12155_v43, %v7332_v1  ;;  %v7333_v0 = vadd.f32 %v7264_v4, %v17054_v32  ;;  %v11299_v57 = vpop.f32.mrb[143].mxu0  ;;  %v12161_v4 = vld [vmem:[#allocation2 + $0x30] sm:$0xff] }
0x1485   : > { %v15930_v44 = vadd.f32 %v15926_v45, %v7387_v46  ;;  %v7388_v38 = vadd.f32 %v12156_v19, %v7333_v0  ;;  %v17060_v46 = vld [vmem:[#allocation36_spill] sm:$0xff] }
0x1487   : > { %v15933_v55 = vadd.f32 %v15926_v45, %v7388_v38  ;;  %v7432_v3 = vsel %vm1724_vm4, %v15930_v44, 0.0  ;;  %v7505_v59 = vmul.f32 %v15930_v44, %v15930_v44  ;;  %v12162_v38 = vld [vmem:[#allocation2 + $0x38] sm:$0xff] }
0x1488   : > { %7433 = vadd.xlane.f32.xlu0 %v7432_v3  ;;  %v7269_v26 = vpop.f32.mrb[144].mxu0 }
0x1489   : > { %v7334_v29 = vadd.f32 %v7269_v26, %v17055_v36  ;;  %v11302_v34 = vpop.f32.mrb[145].mxu0  ;;  %v7435_v48 = vsel %vm1724_vm4, %v15933_v55, 0.0  ;;  %v7506_v42 = vmul.f32 %v15933_v55, %v15933_v55  ;;  %v7523_v13 = vsel %vm1724_vm4, %v7505_v59, 0.0 }
0x148a   : > { %7436 = vadd.xlane.f32.xlu1 %v7435_v48  ;;  %v7272_v18 = vpop.f32.mrb[146].mxu0 }
0x148b   : > { %v7389_v50 = vadd.f32 %v12157_v23, %v7334_v29  ;;  %v7335_v30 = vadd.f32 %v7272_v18, %v17056_v15  ;;  %v11303_v53 = vpop.f32.mrb[147].mxu0  ;;  %v7526_v62 = vsel %vm1724_vm4, %v7506_v42, 0.0  ;;  %v17061_v18 = vld [vmem:[#allocation37_spill] sm:$0xff] }
0x148c   : > { %7524 = vadd.xlane.f32.xlu0 %v7523_v13  ;;  %v12163_v53 = vld [vmem:[#allocation2 + $0x40] sm:$0xff] }
0x148d   : > { %v15947_v28 = vadd.f32 %v15926_v45, %v7389_v50  ;;  %v7390_v2 = vadd.f32 %v12158_v51, %v7335_v30  ;;  %v17062_v51 = vld [vmem:[#allocation38_spill] sm:$0xff] }
0x148e   : > { %7527 = vadd.xlane.f32.xlu1 %v7526_v62 }
0x148f   : > { %v15951_v7 = vadd.f32 %v15926_v45, %v7390_v2  ;;  %v7438_v20 = vsel %vm1724_vm4, %v15947_v28, 0.0  ;;  %v7507_v14 = vmul.f32 %v15947_v28, %v15947_v28 }
0x1490   : > { %7439 = vadd.xlane.f32.xlu0 %v7438_v20  ;;  %v7277_v24 = vpop.f32.mrb[148].mxu0 }
0x1491   : > { %v7336_v17 = vadd.f32 %v7277_v24, %v17057_v60  ;;  %v11306_v39 = vpop.f32.mrb[149].mxu0  ;;  %v7441_v35 = vsel %vm1724_vm4, %v15951_v7, 0.0  ;;  %v7508_v27 = vmul.f32 %v15951_v7, %v15951_v7  ;;  %v7529_v49 = vsel %vm1724_vm4, %v7507_v14, 0.0  ;;  %v11787_v14 = vld [vmem:[%s12519_s29] sm:$0xff]   ;;  %v12164_v60 = vld [vmem:[#allocation2 + $0x48] sm:$0xff] }
0x1492   : > { %7442 = vadd.xlane.f32.xlu1 %v7441_v35  ;;  %v7280_v21 = vpop.f32.mrb[150].mxu0  ;;  %11333 = vmatpush3.bf16.msra.mxu1 %v11787_v14 }
0x1493   : > { %v7391_v61 = vadd.f32 %v12159_v16, %v7336_v17  ;;  %v7337_v54 = vadd.f32 %v7280_v21, %v17058_v22  ;;  %v11307_v25 = vpop.f32.mrb[151].mxu0  ;;  %v7532_v52 = vsel %vm1724_vm4, %v7508_v27, 0.0  ;;  %11334 = vmatprep.subr.bf16.mxu1 %v16947_v11  ;;  %v11788_v21 = vld [vmem:[%s12519_s29 + $0x8] sm:$0xff]  }
0x1494   : > { %7530 = vadd.xlane.f32.xlu0 %v7529_v49 }
0x1495   : > { %v15965_v9 = vadd.f32 %v15926_v45, %v7391_v61  ;;  %v7392_v56 = vadd.f32 %v12160_v47, %v7337_v54  ;;  %v17063_v61 = vld [vmem:[#allocation39_spill] sm:$0xff] }
0x1496   : > { %7533 = vadd.xlane.f32.xlu1 %v7532_v52  ;;  %11335 = vmatpush3.bf16.msra.mxu1 %v11788_v21 }
0x1497   : > { %v15969_v6 = vadd.f32 %v15926_v45, %v7392_v56  ;;  %v7444_v10 = vsel %vm1724_vm4, %v15965_v9, 0.0  ;;  %v7509_v5 = vmul.f32 %v15965_v9, %v15965_v9  ;;  %11336 = vmatprep.subr.bf16.mxu1 %v16947_v11  ;;  %v12165_v56 = vld [vmem:[#allocation2 + $0x50] sm:$0xff] }
0x1498   : > { %7445 = vadd.xlane.f32.xlu0 %v7444_v10  ;;  %v7285_v58 = vpop.f32.mrb[152].mxu0  ;;  %v17064_v10 = vld [vmem:[#allocation40_spill] sm:$0xff] }
0x1499   : > { %v7338_v40 = vadd.f32 %v7285_v58, %v17059_v41  ;;  %v11310_v12 = vpop.f32.mrb[153].mxu0  ;;  %v7447_v31 = vsel %vm1724_vm4, %v15969_v6, 0.0  ;;  %v7510_v1 = vmul.f32 %v15969_v6, %v15969_v6  ;;  %v7535_v57 = vsel %vm1724_vm4, %v7509_v5, 0.0 }
0x149a   : > { %7448 = vadd.xlane.f32.xlu1 %v7447_v31  ;;  %v7288_v37 = vpop.f32.mrb[154].mxu0  ;;  %v12166_v31 = vld [vmem:[#allocation2 + $0x58] sm:$0xff] }
0x149b   : > { %v7393_v43 = vadd.f32 %v12161_v4, %v7338_v40  ;;  %v7339_v32 = vadd.f32 %v7288_v37, %v17060_v46  ;;  %v11311_v0 = vpop.f32.mrb[155].mxu0  ;;  %v7538_v59 = vsel %vm1724_vm4, %v7510_v1, 0.0  ;;  %v11789_v40 = vld [vmem:[%s12519_s29 + $0x10] sm:$0xff]  }
0x149c   : > { %7536 = vadd.xlane.f32.xlu0 %v7535_v57  ;;  %11337 = vmatpush3.bf16.msra.mxu1 %v11789_v40  ;;  %v17065_v57 = vld [vmem:[#allocation41_spill] sm:$0xff] }
0x149d   : > { %v15983_v19 = vadd.f32 %v15926_v45, %v7393_v43  ;;  %v7394_v3 = vadd.f32 %v12162_v38, %v7339_v32  ;;  %11338 = vmatprep.subr.bf16.mxu1 %v16947_v11  ;;  %v11790_v32 = vld [vmem:[%s12519_s29 + $0x18] sm:$0xff]  }
0x149e   : > { %7539 = vadd.xlane.f32.xlu1 %v7538_v59 }
0x149f   : > { %v15987_v26 = vadd.f32 %v15926_v45, %v7394_v3  ;;  %v7450_v36 = vsel %vm1724_vm4, %v15983_v19, 0.0  ;;  %v7511_v29 = vmul.f32 %v15983_v19, %v15983_v19 }
0x14a0   : > { %7451 = vadd.xlane.f32.xlu0 %v7450_v36  ;;  %11339 = vmatpush3.bf16.msra.mxu1 %v11790_v32 }
0x14a1   : > { %v7453_v34 = vsel %vm1724_vm4, %v15987_v26, 0.0  ;;  %v7512_v48 = vmul.f32 %v15987_v26, %v15987_v26  ;;  %v7541_v15 = vsel %vm1724_vm4, %v7511_v29, 0.0 }
0x14a2   : > { %7454 = vadd.xlane.f32.xlu1 %v7453_v34  ;;  %v7293_v42 = vpop.f32.mrb[156].mxu0  ;;  %v12167_v34 = vld [vmem:[#allocation2 + $0x60] sm:$0xff] }
0x14a3   : > { %v7340_v23 = vadd.f32 %v7293_v42, %v17061_v18  ;;  %v11314_v50 = vpop.f32.mrb[157].mxu0  ;;  %v7544_v20 = vsel %vm1724_vm4, %v7512_v48, 0.0 }
0x14a4   : > { %7542 = vadd.xlane.f32.xlu0 %v7541_v15  ;;  %v7296_v30 = vpop.f32.mrb[158].mxu0  ;;  %v12168_v15 = vld [vmem:[#allocation2 + $0x68] sm:$0xff] }
0x14a5   : > { %v7395_v13 = vadd.f32 %v12163_v53, %v7340_v23  ;;  %v7341_v2 = vadd.f32 %v7296_v30, %v17062_v51  ;;  %v11315_v62 = vpop.f32.mrb[159].mxu0 }
0x14a6   : > { %7545 = vadd.xlane.f32.xlu1 %v7544_v20  ;;  %v17066_v62 = vld [vmem:[#allocation42_spill] sm:$0xff] }
0x14a7   : > { %v16003_v24 = vadd.f32 %v15926_v45, %v7395_v13  ;;  %v7396_v17 = vadd.f32 %v12164_v60, %v7341_v2 }
0x14a9   : > { %v16007_v39 = vadd.f32 %v15926_v45, %v7396_v17  ;;  %v7456_v35 = vsel %vm1724_vm4, %v16003_v24, 0.0  ;;  %v7513_v27 = vmul.f32 %v16003_v24, %v16003_v24 }
0x14aa   : > { %7457 = vadd.xlane.f32.xlu0 %v7456_v35  ;;  %v7301_v16 = vpop.f32.mrb[164].mxu0 }
0x14ab   : > { %v7342_v22 = vadd.f32 %v7301_v16, %v17063_v61  ;;  %v11318_v54 = vpop.f32.mrb[165].mxu0  ;;  %v7459_v25 = vsel %vm1724_vm4, %v16007_v39, 0.0  ;;  %v7514_v49 = vmul.f32 %v16007_v39, %v16007_v39  ;;  %v7547_v41 = vsel %vm1724_vm4, %v7513_v27, 0.0  ;;  %v12169_v27 = vld [vmem:[#allocation2 + $0x70] sm:$0xff]  ;;  %v17067_v16 = vld [vmem:[#allocation43_spill] sm:$0xff] }
0x14ac   : > { %7460 = vadd.xlane.f32.xlu1 %v7459_v25  ;;  %v7304_v47 = vpop.f32.mrb[166].mxu0 }
0x14ad   : > { %v7397_v52 = vadd.f32 %v12165_v56, %v7342_v22  ;;  %v7343_v5 = vadd.f32 %v7304_v47, %v17064_v10  ;;  %v11319_v58 = vpop.f32.mrb[167].mxu0  ;;  %v7550_v37 = vsel %vm1724_vm4, %v7514_v49, 0.0  ;;  %v12170_v49 = vld [vmem:[#allocation2 + $0x78] sm:$0xff] }
0x14ae   : > { %7548 = vadd.xlane.f32.xlu0 %v7547_v41 }
0x14af   : > { %v16024_v12 = vadd.f32 %v15926_v45, %v7397_v52  ;;  %v7398_v1 = vadd.f32 %v12166_v31, %v7343_v5 }
0x14b0   : > { %7551 = vadd.xlane.f32.xlu1 %v7550_v37 }
0x14b1   : > { %v16029_v4 = vadd.f32 %v15926_v45, %v7398_v1  ;;  %v7462_v43 = vsel %vm1724_vm4, %v16024_v12, 0.0  ;;  %v7515_v46 = vmul.f32 %v16024_v12, %v16024_v12 }
0x14b2   : > { %7463 = vadd.xlane.f32.xlu0 %v7462_v43  ;;  %v7309_v0 = vpop.f32.mrb[168].mxu0  ;;  %v12171_v43 = vld [vmem:[#allocation2 + $0x80] sm:$0xff] }
0x14b3   : > { %v7344_v38 = vadd.f32 %v7309_v0, %v17065_v57  ;;  %v11322_v3 = vpop.f32.mrb[169].mxu0  ;;  %v7465_v59 = vsel %vm1724_vm4, %v16029_v4, 0.0  ;;  %v7516_v36 = vmul.f32 %v16029_v4, %v16029_v4  ;;  %v7553_v23 = vsel %vm1724_vm4, %v7515_v46, 0.0 }
0x14b4   : > { %7466 = vadd.xlane.f32.xlu1 %v7465_v59  ;;  %v7312_v29 = vpop.f32.mrb[170].mxu0 }
0x14b5   : > { %v7399_v48 = vadd.f32 %v12167_v34, %v7344_v38  ;;  %v7345_v42 = vadd.f32 %v7312_v29, %v15333_v33  ;;  %v11323_v18 = vpop.f32.mrb[171].mxu0  ;;  %v7556_v53 = vsel %vm1724_vm4, %v7516_v36, 0.0 }
0x14b6   : > { %7554 = vadd.xlane.f32.xlu0 %v7553_v23  ;;  %v11791_v18 = vld [vmem:[%s12528_s2] sm:$0xff]   ;;  %v11792_v23 = vld [vmem:[%s12528_s2 + $0x8] sm:$0xff]  }
0x14b7   : > { %v16044_v50 = vadd.f32 %v15926_v45, %v7399_v48  ;;  %v7400_v30 = vadd.f32 %v12168_v15, %v7345_v42  ;;  %11377 = vmatpush3.bf16.msra.mxu0 %v11791_v18 }
0x14b8   : > { %7557 = vadd.xlane.f32.xlu1 %v7556_v53  ;;  %11378 = vmatprep.subr.bf16.mxu0 %v16947_v11 }
0x14b9   : > { %v16048_v13 = vadd.f32 %v15926_v45, %v7400_v30  ;;  %v7468_v51 = vsel %vm1724_vm4, %v16044_v50, 0.0  ;;  %v7517_v33 = vmul.f32 %v16044_v50, %v16044_v50 }
0x14ba   : > { %7469 = vadd.xlane.f32.xlu0 %v7468_v51  ;;  %v7317_v2 = vpop.f32.mrb[172].mxu0 }
0x14bb   : > { %v7346_v20 = vadd.f32 %v7317_v2, %v17066_v62  ;;  %v11326_v14 = vpop.f32.mrb[173].mxu0  ;;  %v7471_v60 = vsel %vm1724_vm4, %v16048_v13, 0.0  ;;  %v7518_v17 = vmul.f32 %v16048_v13, %v16048_v13  ;;  %v7559_v54 = vsel %vm1724_vm4, %v7517_v33, 0.0  ;;  %11379 = vmatpush3.bf16.msra.mxu0 %v11792_v23 }
0x14bc   : > { %7472 = vadd.xlane.f32.xlu1 %v7471_v60  ;;  %v7320_v35 = vpop.f32.mrb[174].mxu0  ;;  %11380 = vmatprep.subr.bf16.mxu0 %v16947_v11 }
0x14bd   : > { %v7401_v21 = vadd.f32 %v12169_v27, %v7346_v20  ;;  %v7347_v61 = vadd.f32 %v7320_v35, %v17067_v16  ;;  %v11327_v22 = vpop.f32.mrb[175].mxu0  ;;  %v7562_v56 = vsel %vm1724_vm4, %v7518_v17, 0.0 }
0x14be   : > { %7560 = vadd.xlane.f32.xlu0 %v7559_v54 }
0x14bf   : > { %v16062_v25 = vadd.f32 %v15926_v45, %v7401_v21  ;;  %v7402_v47 = vadd.f32 %v12170_v49, %v7347_v61 }
0x14c0   : > { %7563 = vadd.xlane.f32.xlu1 %v7562_v56 }
0x14c1   : > { %v16066_v52 = vadd.f32 %v15926_v45, %v7402_v47  ;;  %v7474_v10 = vsel %vm1724_vm4, %v16062_v25, 0.0  ;;  %v7519_v5 = vmul.f32 %v16062_v25, %v16062_v25 }
0x14c2   : > { %7475 = vadd.xlane.f32.xlu0 %v7474_v10  ;;  %v7325_v58 = vpop.f32.mrb[176].mxu0 }
0x14c3   : > { %v7348_v41 = vadd.f32 %v7325_v58, %v15342_v63  ;;  %v11330_v40 = vpop.f32.mrb[177].mxu0  ;;  %v7477_v31 = vsel %vm1724_vm4, %v16066_v52, 0.0  ;;  %v7520_v1 = vmul.f32 %v16066_v52, %v16066_v52  ;;  %v7565_v57 = vsel %vm1724_vm4, %v7519_v5, 0.0  ;;  %v12172_v63 = vld [vmem:[#allocation2 + $0x88] sm:$0xff] }
0x14c4   : > { %7478 = vadd.xlane.f32.xlu1 %v7477_v31  ;;  %v7328_v37 = vpop.f32.mrb[178].mxu0 }
0x14c5   : > { %v7403_v46 = vadd.f32 %v12171_v43, %v7348_v41  ;;  %v7349_v32 = vadd.f32 %v7328_v37, %v15345_v8  ;;  %v11331_v0 = vpop.f32.mrb[179].mxu0  ;;  %v7568_v59 = vsel %vm1724_vm4, %v7520_v1, 0.0 }
0x14c6   : > { %7566 = vadd.xlane.f32.xlu0 %v7565_v57 }
0x14c7   : > { %v16080_v38 = vadd.f32 %v15926_v45, %v7403_v46  ;;  %v7404_v3 = vadd.f32 %v12172_v63, %v7349_v32 }
0x14c8   : > { %7569 = vadd.xlane.f32.xlu1 %v7568_v59 }
0x14c9   : > { %v16084_v36 = vadd.f32 %v15926_v45, %v7404_v3  ;;  %v7480_v8 = vsel %vm1724_vm4, %v16080_v38, 0.0  ;;  %v7521_v29 = vmul.f32 %v16080_v38, %v16080_v38  ;;  %v16110_v3 = vld [vmem:[%s17069_s0] ss:$0 sm:$0xff] }
0x14ca   : > { %7481 = vadd.xlane.f32.xlu0 %v7480_v8 }
0x14cb   : > { %v7483_v34 = vsel %vm1724_vm4, %v16084_v36, 0.0  ;;  %v7522_v48 = vmul.f32 %v16084_v36, %v16084_v36  ;;  %v7571_v42 = vsel %vm1724_vm4, %v7521_v29, 0.0 }
0x14cc   : > { %7484 = vadd.xlane.f32.xlu1 %v7483_v34 }
0x14cd   : > { %v7574_v45 = vsel %vm1724_vm4, %v7522_v48, 0.0 }
0x14ce   : > { %7572 = vadd.xlane.f32.xlu0 %v7571_v42 }
0x14d0   : > { %7575 = vadd.xlane.f32.xlu1 %v7574_v45 }
0x1515   : > { %v7434_v15 = vpop.xlane.xlu0 %7433 }
0x1516   : > { %v7487_v30 = vmul.f32 0.015625, %v7434_v15 }
0x1517   : > { %v7437_v53 = vpop.xlane.xlu1 %7436 }
0x1518   : > { %v7488_v51 = vmul.f32 0.015625, %v7437_v53  ;;  %v7595_v2 = vmul.f32 %v7487_v30, %v7487_v30  ;;  %v7631_v32 = vsub.f32 %v15930_v44, %v7487_v30  ;;  %v16123_v53 = vld [vmem:[%s17071_s21] ss:$0 sm:$0xff] }
0x1519   : > { %v7525_v33 = vpop.xlane.xlu0 %7524 }
0x151a   : > { %v7577_v62 = vmul.f32 0.015625, %v7525_v33  ;;  %v7596_v14 = vmul.f32 %v7488_v51, %v7488_v51  ;;  %v7632_v29 = vsub.f32 %v15933_v55, %v7488_v51 }
0x151b   : > { %v7528_v20 = vpop.xlane.xlu1 %7527 }
0x151c   : > { %v7613_v60 = vsub.f32 %v7577_v62, %v7595_v2  ;;  %v7578_v17 = vmul.f32 0.015625, %v7528_v20 }
0x151d   : > { %v7440_v35 = vpop.xlane.xlu0 %7439 }
0x151e   : > { %v7649_v27 = vadd.f32 1e-05, %v7613_v60  ;;  %v7614_v21 = vsub.f32 %v7578_v17, %v7596_v14  ;;  %v7489_v16 = vmul.f32 0.015625, %v7440_v35 }
0x151f   : > { %v7443_v61 = vpop.xlane.xlu1 %7442 }
0x1520   : > { %12083 = vrsqrt.f32 %v7649_v27  ;;  %v7650_v22 = vadd.f32 1e-05, %v7614_v21  ;;  %v7490_v54 = vmul.f32 0.015625, %v7443_v61  ;;  %v7597_v47 = vmul.f32 %v7489_v16, %v7489_v16 }
0x1521   : > { %v7531_v49 = vpop.xlane.xlu0 %7530  ;;  %v7633_v17 = vsub.f32 %v15947_v28, %v7489_v16 }
0x1522   : > { %12085 = vrsqrt.f32 %v7650_v22  ;;  %v7579_v56 = vmul.f32 0.015625, %v7531_v49  ;;  %v7598_v5 = vmul.f32 %v7490_v54, %v7490_v54 }
0x1523   : > { %v7534_v10 = vpop.xlane.xlu1 %7533 }
0x1524   : > { %v7615_v58 = vsub.f32 %v7579_v56, %v7597_v47  ;;  %v7580_v41 = vmul.f32 0.015625, %v7534_v10  ;;  %v7634_v47 = vsub.f32 %v15951_v7, %v7490_v54 }
0x1525   : > { %v7446_v40 = vpop.xlane.xlu0 %7445 }
0x1526   : > { %v7651_v31 = vadd.f32 1e-05, %v7615_v58  ;;  %v7616_v1 = vsub.f32 %v7580_v41, %v7598_v5  ;;  %v16100_v37 = vmul.f32 0.015625, %v7446_v40 }
0x1527   : > { %v7449_v43 = vpop.xlane.xlu1 %7448 }
0x1528   : > { %12087 = vrsqrt.f32 %v7651_v31  ;;  %v7652_v46 = vadd.f32 1e-05, %v7616_v1  ;;  %v16103_v0 = vmul.f32 0.015625, %v7449_v43  ;;  %v7599_v59 = vmul.f32 %v16100_v37, %v16100_v37 }
0x1529   : > { %v7537_v57 = vpop.xlane.xlu0 %7536 }
0x152a   : > { %v12084_v63 = vpop.eup %12083  ;;  %12089 = vrsqrt.f32 %v7652_v46  ;;  %v7581_v8 = vmul.f32 0.015625, %v7537_v57  ;;  %v7600_v42 = vmul.f32 %v16103_v0, %v16103_v0 }
0x152b   : > { %v7685_v34 = vmul.f32 %v12084_v63, %v7631_v32  ;;  %v7540_v44 = vpop.xlane.xlu1 %7539  ;;  %v7635_v63 = vsub.f32 %v15965_v9, %v16100_v37 }
0x152c   : > { %v12086_v48 = vpop.eup %12085  ;;  %v7617_v45 = vsub.f32 %v7581_v8, %v7599_v59  ;;  %v7582_v18 = vmul.f32 0.015625, %v7540_v44  ;;  %v7636_v44 = vsub.f32 %v15969_v6, %v16103_v0 }
0x152d   : > { %v7709_v23 = vmul.f32 %v16110_v3, %v7685_v34  ;;  %v7686_v15 = vmul.f32 %v12086_v48, %v7632_v29  ;;  %v7452_v30 = vpop.xlane.xlu0 %7451 }
0x152e   : > { %v7653_v33 = vadd.f32 1e-05, %v7617_v45  ;;  %v7618_v55 = vsub.f32 %v7582_v18, %v7600_v42  ;;  %v16125_v51 = vmul.f32 0.015625, %v7452_v30 }
0x152f   : > { %v7710_v2 = vmul.f32 %v16110_v3, %v7686_v15  ;;  %v7455_v62 = vpop.xlane.xlu1 %7454  ;;  %v16129_v14 = vadd.f32 %v16123_v53, %v7709_v23 }
0x1530   : > { %12091 = vrsqrt.f32 %v7653_v33  ;;  %v7654_v20 = vadd.f32 1e-05, %v7618_v55  ;;  %v16135_v35 = vmul.f32 0.015625, %v7455_v62  ;;  %v7601_v61 = vmul.f32 %v16125_v51, %v16125_v51 }
0x1531   : > { %v16132_v60 = vadd.f32 %v16123_v53, %v7710_v2  ;;  %v7543_v27 = vpop.xlane.xlu0 %7542 }
0x1532   : > { %v12088_v21 = vpop.eup %12087  ;;  %12093 = vrsqrt.f32 %v7654_v20  ;;  %v7583_v22 = vmul.f32 0.015625, %v7543_v27  ;;  %v7602_v28 = vmul.f32 %v16135_v35, %v16135_v35 }
0x1533   : > { %v7751_v49 = vpack.c.bf16 %v16132_v60, %v16129_v14  ;;  %v7687_v56 = vmul.f32 %v12088_v21, %v7633_v17  ;;  %v7546_v10 = vpop.xlane.xlu1 %7545  ;;  %v7637_v21 = vsub.f32 %v15983_v19, %v16125_v51 }
0x1534   : > { %v12090_v5 = vpop.eup %12089  ;;  %v7619_v16 = vsub.f32 %v7583_v22, %v7601_v61  ;;  %v7584_v58 = vmul.f32 0.015625, %v7546_v10 }
0x1535   : > { %v7711_v41 = vmul.f32 %v16110_v3, %v7687_v56  ;;  %v7688_v40 = vmul.f32 %v12090_v5, %v7634_v47  ;;  %11341 = vmatmul.mubr.msk.bf16.vlgmr.msra.gmra.mrb[176].mxu1 %vm1724_vm4, %v7751_v49  ;;  %v7638_v56 = vsub.f32 %v15987_v26, %v16135_v35 }
0x1536   : > { %v7655_v31 = vadd.f32 1e-05, %v7619_v16  ;;  %v7620_v1 = vsub.f32 %v7584_v58, %v7602_v28  ;;  %11344 = vmatprep.mubr.msk.bf16.mxu1 %vm12268_vm3, %v16947_v11 }
0x1537   : > { %v7712_v7 = vmul.f32 %v16110_v3, %v7688_v40  ;;  %v7458_v54 = vpop.xlane.xlu0 %7457  ;;  %v16152_v32 = vadd.f32 %v16123_v53, %v7711_v41 }
0x1538   : > { %12095 = vrsqrt.f32 %v7655_v31  ;;  %v7656_v43 = vadd.f32 1e-05, %v7620_v1  ;;  %v16149_v46 = vmul.f32 0.015625, %v7458_v54 }
0x1539   : > { %v16155_v57 = vadd.f32 %v16123_v53, %v7712_v7  ;;  %v7461_v59 = vpop.xlane.xlu1 %7460 }
0x153a   : > { %v12092_v8 = vpop.eup %12091  ;;  %12097 = vrsqrt.f32 %v7656_v43  ;;  %v16159_v29 = vmul.f32 0.015625, %v7461_v59  ;;  %v7603_v18 = vmul.f32 %v16149_v46, %v16149_v46 }
0x153b   : > { %v7752_v34 = vpack.c.bf16 %v16155_v57, %v16152_v32  ;;  %v7689_v48 = vmul.f32 %v12092_v8, %v7635_v63  ;;  %v7549_v42 = vpop.xlane.xlu0 %7548 }
0x153c   : > { %v12094_v45 = vpop.eup %12093  ;;  %v7585_v23 = vmul.f32 0.015625, %v7549_v42  ;;  %v7604_v30 = vmul.f32 %v16159_v29, %v16159_v29  ;;  %v7639_v42 = vsub.f32 %v16003_v24, %v16149_v46 }
0x153d   : > { %v7713_v9 = vmul.f32 %v16110_v3, %v7689_v48  ;;  %v7690_v37 = vmul.f32 %v12094_v45, %v7636_v44  ;;  %11345 = vmatmul.mubr.msk.bf16.gmra.mrb[180].mxu1 %vm1724_vm4, %v7752_v34  ;;  %v7552_v15 = vpop.xlane.xlu1 %7551 }
0x153e   : > { %v7621_v33 = vsub.f32 %v7585_v23, %v7603_v18  ;;  %v7586_v55 = vmul.f32 0.015625, %v7552_v15  ;;  %11348 = vmatprep.mubr.msk.bf16.mxu1 %vm12268_vm3, %v16947_v11  ;;  %v7640_v15 = vsub.f32 %v16007_v39, %v16159_v29 }
0x153f   : > { %v7714_v6 = vmul.f32 %v16110_v3, %v7690_v37  ;;  %v7464_v0 = vpop.xlane.xlu0 %7463  ;;  %v16177_v17 = vadd.f32 %v16123_v53, %v7713_v9 }
0x1540   : > { %v7657_v2 = vadd.f32 1e-05, %v7621_v33  ;;  %v7622_v62 = vsub.f32 %v7586_v55, %v7604_v30  ;;  %v16174_v20 = vmul.f32 0.015625, %v7464_v0 }
0x1541   : > { %v16180_v27 = vadd.f32 %v16123_v53, %v7714_v6  ;;  %v7467_v61 = vpop.xlane.xlu1 %7466 }
0x1542   : > { %v12096_v22 = vpop.eup %12095  ;;  %12099 = vrsqrt.f32 %v7657_v2  ;;  %v7658_v49 = vadd.f32 1e-05, %v7622_v62  ;;  %v16188_v5 = vmul.f32 0.015625, %v7467_v61  ;;  %v7605_v58 = vmul.f32 %v16174_v20, %v16174_v20 }
0x1543   : > { %v7753_v47 = vpack.c.bf16 %v16180_v27, %v16177_v17  ;;  %v7691_v10 = vmul.f32 %v12096_v22, %v7637_v21  ;;  %v7555_v28 = vpop.xlane.xlu0 %7554 }
0x1544   : > { %v12098_v16 = vpop.eup %12097  ;;  %12101 = vrsqrt.f32 %v7658_v49  ;;  %v7587_v19 = vmul.f32 0.015625, %v7555_v28  ;;  %v7606_v31 = vmul.f32 %v16188_v5, %v16188_v5 }
0x1545   : > { %v7715_v51 = vmul.f32 %v16110_v3, %v7691_v10  ;;  %v7692_v41 = vmul.f32 %v12098_v16, %v7638_v56  ;;  %11349 = vmatmul.mubr.msk.bf16.gmra.mrb[184].mxu1 %vm1724_vm4, %v7753_v47  ;;  %v7558_v40 = vpop.xlane.xlu1 %7557  ;;  %v7641_v10 = vsub.f32 %v16024_v12, %v16174_v20 }
0x1546   : > { %v7623_v26 = vsub.f32 %v7587_v19, %v7605_v58  ;;  %v7588_v35 = vmul.f32 0.015625, %v7558_v40  ;;  %11352 = vmatprep.mubr.msk.bf16.mxu1 %vm12268_vm3, %v16947_v11  ;;  %v7642_v40 = vsub.f32 %v16029_v4, %v16188_v5 }
0x1547   : > { %v7716_v1 = vmul.f32 %v16110_v3, %v7692_v41  ;;  %v7470_v7 = vpop.xlane.xlu0 %7469  ;;  %v16202_v59 = vadd.f32 %v16123_v53, %v7715_v51 }
0x1548   : > { %v7659_v54 = vadd.f32 1e-05, %v7623_v26  ;;  %v7624_v43 = vsub.f32 %v7588_v35, %v7606_v31  ;;  %v16199_v63 = vmul.f32 0.015625, %v7470_v7 }
0x1549   : > { %v16205_v8 = vadd.f32 %v16123_v53, %v7716_v1  ;;  %v7473_v34 = vpop.xlane.xlu1 %7472 }
0x154a   : > { %12103 = vrsqrt.f32 %v7659_v54  ;;  %v7660_v44 = vadd.f32 1e-05, %v7624_v43  ;;  %v16211_v45 = vmul.f32 0.015625, %v7473_v34  ;;  %v7607_v9 = vmul.f32 %v16199_v63, %v16199_v63 }
0x154b   : > { %v7754_v48 = vpack.c.bf16 %v16205_v8, %v16202_v59  ;;  %v7561_v18 = vpop.xlane.xlu0 %7560 }
0x154c   : > { %v12100_v23 = vpop.eup %12099  ;;  %12105 = vrsqrt.f32 %v7660_v44  ;;  %v7589_v37 = vmul.f32 0.015625, %v7561_v18  ;;  %v7608_v24 = vmul.f32 %v16211_v45, %v16211_v45 }
0x154d   : > { %v7693_v30 = vmul.f32 %v12100_v23, %v7639_v42  ;;  %11353 = vmatmul.mubr.msk.bf16.gmra.mrb[188].mxu1 %vm1724_vm4, %v7754_v48  ;;  %v7564_v33 = vpop.xlane.xlu1 %7563 }
0x154e   : > { %v12102_v55 = vpop.eup %12101  ;;  %v7625_v46 = vsub.f32 %v7589_v37, %v7607_v9  ;;  %v7590_v6 = vmul.f32 0.015625, %v7564_v33  ;;  %11356 = vmatprep.mubr.msk.bf16.mxu1 %vm12268_vm3, %v16947_v11  ;;  %v7643_v9 = vsub.f32 %v16044_v50, %v16199_v63 }
0x154f   : > { %v7717_v0 = vmul.f32 %v16110_v3, %v7693_v30  ;;  %v7694_v2 = vmul.f32 %v12102_v55, %v7640_v15  ;;  %v7476_v62 = vpop.xlane.xlu0 %7475 }
0x1550   : > { %v7661_v21 = vadd.f32 1e-05, %v7625_v46  ;;  %v7626_v61 = vsub.f32 %v7590_v6, %v7608_v24  ;;  %v16223_v39 = vmul.f32 0.015625, %v7476_v62  ;;  %v7644_v46 = vsub.f32 %v16048_v13, %v16211_v45 }
0x1551   : > { %v7718_v29 = vmul.f32 %v16110_v3, %v7694_v2  ;;  %v7479_v22 = vpop.xlane.xlu1 %7478  ;;  %v16227_v47 = vadd.f32 %v16123_v53, %v7717_v0 }
0x1552   : > { %12107 = vrsqrt.f32 %v7661_v21  ;;  %v7662_v49 = vadd.f32 1e-05, %v7626_v61  ;;  %v16234_v28 = vmul.f32 0.015625, %v7479_v22  ;;  %v7609_v19 = vmul.f32 %v16223_v39, %v16223_v39 }
0x1553   : > { %v16230_v56 = vadd.f32 %v16123_v53, %v7718_v29  ;;  %v7567_v16 = vpop.xlane.xlu0 %7566 }
0x1554   : > { %v12104_v58 = vpop.eup %12103  ;;  %12109 = vrsqrt.f32 %v7662_v49  ;;  %v7591_v51 = vmul.f32 0.015625, %v7567_v16  ;;  %v7610_v12 = vmul.f32 %v16234_v28, %v16234_v28  ;;  %v7645_v16 = vsub.f32 %v16062_v25, %v16223_v39 }
0x1555   : > { %v7755_v41 = vpack.c.bf16 %v16230_v56, %v16227_v47  ;;  %v7695_v31 = vmul.f32 %v12104_v58, %v7641_v10  ;;  %v7570_v26 = vpop.xlane.xlu1 %7569 }
0x1556   : > { %v12106_v35 = vpop.eup %12105  ;;  %v7627_v20 = vsub.f32 %v7591_v51, %v7609_v19  ;;  %v7592_v1 = vmul.f32 0.015625, %v7570_v26  ;;  %v7646_v51 = vsub.f32 %v16066_v52, %v16234_v28 }
0x1557   : > { %v7719_v7 = vmul.f32 %v16110_v3, %v7695_v31  ;;  %v7696_v54 = vmul.f32 %v12106_v35, %v7642_v40  ;;  %11357 = vmatmul.mubr.msk.bf16.gmra.mrb[192].mxu1 %vm1724_vm4, %v7755_v41  ;;  %v7482_v43 = vpop.xlane.xlu0 %7481 }
0x1558   : > { %v7663_v34 = vadd.f32 1e-05, %v7627_v20  ;;  %v7628_v44 = vsub.f32 %v7592_v1, %v7610_v12  ;;  %v7503_v48 = vmul.f32 0.015625, %v7482_v43  ;;  %11360 = vmatprep.mubr.msk.bf16.mxu1 %vm12268_vm3, %v16947_v11 }
0x1559   : > { %v7720_v4 = vmul.f32 %v16110_v3, %v7696_v54  ;;  %v7485_v5 = vpop.xlane.xlu1 %7484  ;;  %v16250_v18 = vadd.f32 %v16123_v53, %v7719_v7 }
0x155a   : > { %12111 = vrsqrt.f32 %v7663_v34  ;;  %v7664_v42 = vadd.f32 1e-05, %v7628_v44  ;;  %v7504_v37 = vmul.f32 0.015625, %v7485_v5  ;;  %v7611_v33 = vmul.f32 %v7503_v48, %v7503_v48 }
0x155b   : > { %v16253_v23 = vadd.f32 %v16123_v53, %v7720_v4  ;;  %v7573_v15 = vpop.xlane.xlu0 %7572  ;;  %v7647_v52 = vsub.f32 %v16080_v38, %v7503_v48  ;;  %v11793_v48 = vld [vmem:[%s12528_s2 + $0x10] sm:$0xff]   ;;  %v11794_v4 = vld [vmem:[%s12528_s2 + $0x18] sm:$0xff]  }
0x155c   : > { %v12108_v30 = vpop.eup %12107  ;;  %12113 = vrsqrt.f32 %v7664_v42  ;;  %v7593_v55 = vmul.f32 0.015625, %v7573_v15  ;;  %v7612_v62 = vmul.f32 %v7504_v37, %v7504_v37  ;;  %v7648_v20 = vsub.f32 %v16084_v36, %v7504_v37  ;;  %11381 = vmatpush3.bf16.msra.mxu0 %v11793_v48 }
0x155d   : > { %v7756_v24 = vpack.c.bf16 %v16253_v23, %v16250_v18  ;;  %v7697_v6 = vmul.f32 %v12108_v30, %v7643_v9  ;;  %v7576_v0 = vpop.xlane.xlu1 %7575  ;;  %11382 = vmatprep.subr.bf16.mxu0 %v16947_v11 }
0x155e   : > { %v12110_v2 = vpop.eup %12109  ;;  %v7629_v21 = vsub.f32 %v7593_v55, %v7611_v33  ;;  %v7594_v61 = vmul.f32 0.015625, %v7576_v0 }
0x155f   : > { %v7721_v50 = vmul.f32 %v16110_v3, %v7697_v6  ;;  %v7698_v63 = vmul.f32 %v12110_v2, %v7644_v46  ;;  %11361 = vmatmul.mubr.msk.bf16.gmra.mrb[200].mxu1 %vm1724_vm4, %v7756_v24 }
0x1560   : > { %v7665_v29 = vadd.f32 1e-05, %v7629_v21  ;;  %v7630_v22 = vsub.f32 %v7594_v61, %v7612_v62  ;;  %11364 = vmatprep.mubr.msk.bf16.mxu1 %vm12268_vm3, %v16947_v11  ;;  %11383 = vmatpush3.bf16.msra.mxu0 %v11794_v4 }
0x1561   : > { %v7722_v49 = vmul.f32 %v16110_v3, %v7698_v63  ;;  %v16267_v45 = vadd.f32 %v16123_v53, %v7721_v50 }
0x1562   : > { %12115 = vrsqrt.f32 %v7665_v29  ;;  %v7666_v13 = vadd.f32 1e-05, %v7630_v22 }
0x1563   : > { %v16270_v10 = vadd.f32 %v16123_v53, %v7722_v49 }
0x1564   : > { %v12112_v58 = vpop.eup %12111  ;;  %12117 = vrsqrt.f32 %v7666_v13 }
0x1565   : > { %v7757_v19 = vpack.c.bf16 %v16270_v10, %v16267_v45  ;;  %v7699_v41 = vmul.f32 %v12112_v58, %v7645_v16 }
0x1566   : > { %v12114_v40 = vpop.eup %12113 }
0x1567   : > { %v7723_v31 = vmul.f32 %v16110_v3, %v7699_v41  ;;  %v7700_v26 = vmul.f32 %v12114_v40, %v7646_v51  ;;  %11365 = vmatmul.mubr.msk.bf16.gmra.mrb[204].mxu1 %vm1724_vm4, %v7757_v19 }
0x1568   : > { %11368 = vmatprep.mubr.msk.bf16.mxu1 %vm12268_vm3, %v16947_v11 }
0x1569   : > { %v7724_v25 = vmul.f32 %v16110_v3, %v7700_v26  ;;  %v16284_v39 = vadd.f32 %v16123_v53, %v7723_v31 }
0x156b   : > { %v16287_v35 = vadd.f32 %v16123_v53, %v7724_v25 }
0x156c   : > { %v12116_v28 = vpop.eup %12115 }
0x156d   : > { %v7758_v12 = vpack.c.bf16 %v16287_v35, %v16284_v39  ;;  %v7701_v1 = vmul.f32 %v12116_v28, %v7647_v52 }
0x156e   : > { %v12118_v7 = vpop.eup %12117 }
0x156f   : > { %v7725_v54 = vmul.f32 %v16110_v3, %v7701_v1  ;;  %v7702_v43 = vmul.f32 %v12118_v7, %v7648_v20  ;;  %11369 = vmatmul.mubr.msk.bf16.gmra.mrb[208].mxu1 %vm1724_vm4, %v7758_v12 }
0x1570   : > { %11372 = vmatprep.mubr.msk.bf16.mxu1 %vm12268_vm3, %v16947_v11 }
0x1571   : > { %v7726_v38 = vmul.f32 %v16110_v3, %v7702_v43  ;;  %v16299_v34 = vadd.f32 %v16123_v53, %v7725_v54  ;;  %v16315_v3 = vld [vmem:[%s1020_s11] ss:$0 sm:$0xff] }
0x1573   : > { %v16302_v44 = vadd.f32 %v16123_v53, %v7726_v38 }
0x1575   : > { %v7759_v36 = vpack.c.bf16 %v16302_v44, %v16299_v34 }
0x1577   : > { %11373 = vmatmul.mubr.msk.bf16.gmra.mrb[212].mxu1 %vm1724_vm4, %v7759_v36 }
0x1608   : > { %v7860_v5 = vpop.f32.mrb[176].mxu1 }
0x1609   : > { %v7861_v53 = vadd.f32 %v16315_v3, %v7860_v5  ;;  %v11342_v42 = vpop.f32.mrb[177].mxu1 }
0x160a   : > { %v7863_v9 = vpop.f32.mrb[178].mxu1 }
0x160b   : > { %v7864_v37 = vadd.f32 %v16315_v3, %v7863_v9  ;;  %v11343_v15 = vpop.f32.mrb[179].mxu1  ;;  %v7931_v30 = vmax.f32 %v7861_v53, 0.0 }
0x160d   : > { %v7932_v33 = vmax.f32 %v7864_v37, 0.0 }
0x160f   : > { %v7949_v55 = vpack.c.bf16 %v7932_v33, %v7931_v30 }
0x1610   : > { %v7868_v24 = vpop.f32.mrb[180].mxu1 }
0x1611   : > { %v7869_v46 = vadd.f32 %v16315_v3, %v7868_v24  ;;  %v11346_v6 = vpop.f32.mrb[181].mxu1  ;;  %11385 = vmatmul.mubr.msk.bf16.vlgmr.msra.gmra.mrb[180].mxu0 %vm1724_vm4, %v7949_v55 }
0x1612   : > { %v7871_v0 = vpop.f32.mrb[182].mxu1  ;;  %11388 = vmatprep.mubr.msk.bf16.mxu0 %vm12268_vm3, %v16947_v11 }
0x1613   : > { %v7872_v2 = vadd.f32 %v16315_v3, %v7871_v0  ;;  %v11347_v62 = vpop.f32.mrb[183].mxu1  ;;  %v7933_v21 = vmax.f32 %v7869_v46, 0.0 }
0x1615   : > { %v7934_v61 = vmax.f32 %v7872_v2, 0.0 }
0x1617   : > { %v7950_v50 = vpack.c.bf16 %v7934_v61, %v7933_v21 }
0x1618   : > { %v7876_v63 = vpop.f32.mrb[184].mxu1 }
0x1619   : > { %v7877_v29 = vadd.f32 %v16315_v3, %v7876_v63  ;;  %v11350_v22 = vpop.f32.mrb[185].mxu1  ;;  %11389 = vmatmul.mubr.msk.bf16.gmra.mrb[184].mxu0 %vm1724_vm4, %v7950_v50 }
0x161a   : > { %v7879_v49 = vpop.f32.mrb[186].mxu1  ;;  %11392 = vmatprep.mubr.msk.bf16.mxu0 %vm12268_vm3, %v16947_v11 }
0x161b   : > { %v7880_v13 = vadd.f32 %v16315_v3, %v7879_v49  ;;  %v11351_v16 = vpop.f32.mrb[187].mxu1  ;;  %v7935_v58 = vmax.f32 %v7877_v29, 0.0 }
0x161d   : > { %v7936_v19 = vmax.f32 %v7880_v13, 0.0 }
0x161f   : > { %v7951_v51 = vpack.c.bf16 %v7936_v19, %v7935_v58 }
0x1620   : > { %v7884_v41 = vpop.f32.mrb[188].mxu1 }
0x1621   : > { %v7885_v40 = vadd.f32 %v16315_v3, %v7884_v41  ;;  %v11354_v31 = vpop.f32.mrb[189].mxu1  ;;  %11393 = vmatmul.mubr.msk.bf16.gmra.mrb[188].mxu0 %vm1724_vm4, %v7951_v51 }
0x1622   : > { %v7887_v26 = vpop.f32.mrb[190].mxu1  ;;  %11396 = vmatprep.mubr.msk.bf16.mxu0 %vm12268_vm3, %v16947_v11 }
0x1623   : > { %v7888_v25 = vadd.f32 %v16315_v3, %v7887_v26  ;;  %v11355_v52 = vpop.f32.mrb[191].mxu1  ;;  %v7937_v28 = vmax.f32 %v7885_v40, 0.0 }
0x1625   : > { %v7938_v12 = vmax.f32 %v7888_v25, 0.0 }
0x1627   : > { %v7952_v20 = vpack.c.bf16 %v7938_v12, %v7937_v28 }
0x1629   : > { %11397 = vmatmul.mubr.msk.bf16.gmra.mrb[192].mxu0 %vm1724_vm4, %v7952_v20 }
0x162a   : > { %v7892_v1 = vpop.f32.mrb[192].mxu1  ;;  %11400 = vmatprep.mubr.msk.bf16.mxu0 %vm12268_vm3, %v16947_v11 }
0x162b   : > { %v7893_v7 = vadd.f32 %v16315_v3, %v7892_v1  ;;  %v11358_v54 = vpop.f32.mrb[193].mxu1 }
0x162c   : > { %v7895_v43 = vpop.f32.mrb[194].mxu1 }
0x162d   : > { %v7896_v38 = vadd.f32 %v16315_v3, %v7895_v43  ;;  %v11359_v36 = vpop.f32.mrb[195].mxu1  ;;  %v7939_v48 = vmax.f32 %v7893_v7, 0.0  ;;  %v16365_v7 = vld [vmem:[%s1028_s4] ss:$0 sm:$0xff] }
0x162f   : > { %v7940_v4 = vmax.f32 %v7896_v38, 0.0 }
0x1631   : > { %v7953_v5 = vpack.c.bf16 %v7940_v4, %v7939_v48 }
0x1632   : > { %v7900_v53 = vpop.f32.mrb[200].mxu1 }
0x1633   : > { %v7901_v42 = vadd.f32 %v16315_v3, %v7900_v53  ;;  %v11362_v9 = vpop.f32.mrb[201].mxu1  ;;  %11401 = vmatmul.mubr.msk.bf16.gmra.mrb[196].mxu0 %vm1724_vm4, %v7953_v5 }
0x1634   : > { %v7903_v37 = vpop.f32.mrb[202].mxu1  ;;  %11404 = vmatprep.mubr.msk.bf16.mxu0 %vm12268_vm3, %v16947_v11 }
0x1635   : > { %v7904_v15 = vadd.f32 %v16315_v3, %v7903_v37  ;;  %v11363_v30 = vpop.f32.mrb[203].mxu1  ;;  %v7941_v33 = vmax.f32 %v7901_v42, 0.0 }
0x1637   : > { %v7942_v55 = vmax.f32 %v7904_v15, 0.0 }
0x1639   : > { %v7954_v24 = vpack.c.bf16 %v7942_v55, %v7941_v33 }
0x163a   : > { %v7908_v46 = vpop.f32.mrb[204].mxu1 }
0x163b   : > { %v7909_v6 = vadd.f32 %v16315_v3, %v7908_v46  ;;  %v11366_v0 = vpop.f32.mrb[205].mxu1  ;;  %11405 = vmatmul.mubr.msk.bf16.gmra.mrb[200].mxu0 %vm1724_vm4, %v7954_v24 }
0x163c   : > { %v7911_v2 = vpop.f32.mrb[206].mxu1  ;;  %11408 = vmatprep.mubr.msk.bf16.mxu0 %vm12268_vm3, %v16947_v11 }
0x163d   : > { %v7912_v62 = vadd.f32 %v16315_v3, %v7911_v2  ;;  %v11367_v21 = vpop.f32.mrb[207].mxu1  ;;  %v7943_v61 = vmax.f32 %v7909_v6, 0.0 }
0x163f   : > { %v7944_v50 = vmax.f32 %v7912_v62, 0.0 }
0x1641   : > { %v7955_v63 = vpack.c.bf16 %v7944_v50, %v7943_v61 }
0x1642   : > { %v7916_v29 = vpop.f32.mrb[208].mxu1 }
0x1643   : > { %v7917_v22 = vadd.f32 %v16315_v3, %v7916_v29  ;;  %v11370_v49 = vpop.f32.mrb[209].mxu1  ;;  %11409 = vmatmul.mubr.msk.bf16.gmra.mrb[204].mxu0 %vm1724_vm4, %v7955_v63 }
0x1644   : > { %v7919_v13 = vpop.f32.mrb[210].mxu1  ;;  %11412 = vmatprep.mubr.msk.bf16.mxu0 %vm12268_vm3, %v16947_v11 }
0x1645   : > { %v7920_v16 = vadd.f32 %v16315_v3, %v7919_v13  ;;  %v11371_v58 = vpop.f32.mrb[211].mxu1  ;;  %v7945_v19 = vmax.f32 %v7917_v22, 0.0 }
0x1647   : > { %v7946_v51 = vmax.f32 %v7920_v16, 0.0 }
0x1649   : > { %v7956_v41 = vpack.c.bf16 %v7946_v51, %v7945_v19 }
0x164a   : > { %v7924_v40 = vpop.f32.mrb[212].mxu1 }
0x164b   : > { %v7925_v31 = vadd.f32 %v16315_v3, %v7924_v40  ;;  %v11374_v26 = vpop.f32.mrb[213].mxu1  ;;  %11413 = vmatmul.mubr.msk.bf16.gmra.mrb[208].mxu0 %vm1724_vm4, %v7956_v41 }
0x164c   : > { %v7927_v25 = vpop.f32.mrb[214].mxu1  ;;  %11416 = vmatprep.mubr.msk.bf16.mxu0 %vm12268_vm3, %v16947_v11 }
0x164d   : > { %v7928_v52 = vadd.f32 %v16315_v3, %v7927_v25  ;;  %v11375_v28 = vpop.f32.mrb[215].mxu1  ;;  %v7947_v12 = vmax.f32 %v7925_v31, 0.0 }
0x164f   : > { %v7948_v20 = vmax.f32 %v7928_v52, 0.0 }
0x1651   : > { %v7957_v1 = vpack.c.bf16 %v7948_v20, %v7947_v12 }
0x1653   : > { %11417 = vmatmul.mubr.msk.bf16.gmra.mrb[212].mxu0 %vm1724_vm4, %v7957_v1 }
0x16e4   : > { %v8058_v54 = vpop.f32.mrb[180].mxu0 }
0x16e5   : > { %v8059_v43 = vadd.f32 %v16365_v7, %v8058_v54  ;;  %v11386_v38 = vpop.f32.mrb[181].mxu0 }
0x16e6   : > { %v8061_v36 = vpop.f32.mrb[182].mxu0 }
0x16e7   : > { %v16369_v11 = vadd.f32 %v8059_v43, %v16129_v14  ;;  %v8062_v3 = vadd.f32 %v16365_v7, %v8061_v36  ;;  %v11387_v48 = vpop.f32.mrb[183].mxu0 }
0x16e9   : > { %v16373_v4 = vadd.f32 %v8062_v3, %v16132_v60  ;;  %v8149_v5 = vsel %vm1724_vm4, %v16369_v11, 0.0  ;;  %v8221_v53 = vmul.f32 %v16369_v11, %v16369_v11 }
0x16ea   : > { %8150 = vadd.xlane.f32.xlu0 %v8149_v5 }
0x16eb   : > { %v8152_v42 = vsel %vm1724_vm4, %v16373_v4, 0.0  ;;  %v8222_v14 = vmul.f32 %v16373_v4, %v16373_v4  ;;  %v8239_v60 = vsel %vm1724_vm4, %v8221_v53, 0.0 }
0x16ec   : > { %8153 = vadd.xlane.f32.xlu1 %v8152_v42  ;;  %v8066_v9 = vpop.f32.mrb[184].mxu0 }
0x16ed   : > { %v8067_v37 = vadd.f32 %v16365_v7, %v8066_v9  ;;  %v11390_v15 = vpop.f32.mrb[185].mxu0  ;;  %v8242_v46 = vsel %vm1724_vm4, %v8222_v14, 0.0 }
0x16ee   : > { %8240 = vadd.xlane.f32.xlu0 %v8239_v60  ;;  %v8069_v30 = vpop.f32.mrb[186].mxu0 }
0x16ef   : > { %v16386_v33 = vadd.f32 %v8067_v37, %v16152_v32  ;;  %v8070_v55 = vadd.f32 %v16365_v7, %v8069_v30  ;;  %v11391_v24 = vpop.f32.mrb[187].mxu0 }
0x16f0   : > { %8243 = vadd.xlane.f32.xlu1 %v8242_v46 }
0x16f1   : > { %v16391_v6 = vadd.f32 %v8070_v55, %v16155_v57  ;;  %v8155_v0 = vsel %vm1724_vm4, %v16386_v33, 0.0  ;;  %v8223_v2 = vmul.f32 %v16386_v33, %v16386_v33 }
0x16f2   : > { %8156 = vadd.xlane.f32.xlu0 %v8155_v0 }
0x16f3   : > { %v8158_v32 = vsel %vm1724_vm4, %v16391_v6, 0.0  ;;  %v8224_v62 = vmul.f32 %v16391_v6, %v16391_v6  ;;  %v8245_v57 = vsel %vm1724_vm4, %v8223_v2, 0.0 }
0x16f4   : > { %8159 = vadd.xlane.f32.xlu1 %v8158_v32  ;;  %v8074_v21 = vpop.f32.mrb[188].mxu0 }
0x16f5   : > { %v8075_v61 = vadd.f32 %v16365_v7, %v8074_v21  ;;  %v11394_v50 = vpop.f32.mrb[189].mxu0  ;;  %v8248_v13 = vsel %vm1724_vm4, %v8224_v62, 0.0 }
0x16f6   : > { %8246 = vadd.xlane.f32.xlu0 %v8245_v57  ;;  %v8077_v63 = vpop.f32.mrb[190].mxu0 }
0x16f7   : > { %v16404_v29 = vadd.f32 %v8075_v61, %v16177_v17  ;;  %v8078_v22 = vadd.f32 %v16365_v7, %v8077_v63  ;;  %v11395_v49 = vpop.f32.mrb[191].mxu0 }
0x16f8   : > { %8249 = vadd.xlane.f32.xlu1 %v8248_v13 }
0x16f9   : > { %v16409_v16 = vadd.f32 %v8078_v22, %v16180_v27  ;;  %v8161_v58 = vsel %vm1724_vm4, %v16404_v29, 0.0  ;;  %v8225_v19 = vmul.f32 %v16404_v29, %v16404_v29 }
0x16fa   : > { %8162 = vadd.xlane.f32.xlu0 %v8161_v58 }
0x16fb   : > { %v8164_v17 = vsel %vm1724_vm4, %v16409_v16, 0.0  ;;  %v8226_v51 = vmul.f32 %v16409_v16, %v16409_v16  ;;  %v8251_v27 = vsel %vm1724_vm4, %v8225_v19, 0.0 }
0x16fc   : > { %8165 = vadd.xlane.f32.xlu1 %v8164_v17  ;;  %v8082_v41 = vpop.f32.mrb[192].mxu0 }
0x16fd   : > { %v8083_v40 = vadd.f32 %v16365_v7, %v8082_v41  ;;  %v11398_v31 = vpop.f32.mrb[193].mxu0  ;;  %v8254_v12 = vsel %vm1724_vm4, %v8226_v51, 0.0 }
0x16fe   : > { %8252 = vadd.xlane.f32.xlu0 %v8251_v27  ;;  %v8085_v26 = vpop.f32.mrb[194].mxu0 }
0x16ff   : > { %v16422_v25 = vadd.f32 %v8083_v40, %v16202_v59  ;;  %v8086_v52 = vadd.f32 %v16365_v7, %v8085_v26  ;;  %v11399_v28 = vpop.f32.mrb[195].mxu0 }
0x1700   : > { %8255 = vadd.xlane.f32.xlu1 %v8254_v12 }
0x1701   : > { %v16427_v20 = vadd.f32 %v8086_v52, %v16205_v8  ;;  %v8167_v1 = vsel %vm1724_vm4, %v16422_v25, 0.0  ;;  %v8227_v54 = vmul.f32 %v16422_v25, %v16422_v25 }
0x1702   : > { %8168 = vadd.xlane.f32.xlu0 %v8167_v1 }
0x1703   : > { %v8170_v59 = vsel %vm1724_vm4, %v16427_v20, 0.0  ;;  %v8228_v43 = vmul.f32 %v16427_v20, %v16427_v20  ;;  %v8257_v38 = vsel %vm1724_vm4, %v8227_v54, 0.0 }
0x1704   : > { %8171 = vadd.xlane.f32.xlu1 %v8170_v59 }
0x1705   : > { %v8260_v48 = vsel %vm1724_vm4, %v8228_v43, 0.0 }
0x1706   : > { %8258 = vadd.xlane.f32.xlu0 %v8257_v38  ;;  %v8090_v36 = vpop.f32.mrb[196].mxu0 }
0x1707   : > { %v8091_v8 = vadd.f32 %v16365_v7, %v8090_v36  ;;  %v11402_v3 = vpop.f32.mrb[197].mxu0 }
0x1708   : > { %8261 = vadd.xlane.f32.xlu1 %v8260_v48  ;;  %v8093_v5 = vpop.f32.mrb[198].mxu0 }
0x1709   : > { %v16441_v53 = vadd.f32 %v8091_v8, %v16227_v47  ;;  %v8094_v42 = vadd.f32 %v16365_v7, %v8093_v5  ;;  %v11403_v14 = vpop.f32.mrb[199].mxu0 }
0x170b   : > { %v16445_v9 = vadd.f32 %v8094_v42, %v16230_v56  ;;  %v8173_v37 = vsel %vm1724_vm4, %v16441_v53, 0.0  ;;  %v8229_v15 = vmul.f32 %v16441_v53, %v16441_v53 }
0x170c   : > { %8174 = vadd.xlane.f32.xlu0 %v8173_v37 }
0x170d   : > { %v8176_v60 = vsel %vm1724_vm4, %v16445_v9, 0.0  ;;  %v8230_v47 = vmul.f32 %v16445_v9, %v16445_v9  ;;  %v8263_v56 = vsel %vm1724_vm4, %v8229_v15, 0.0 }
0x170e   : > { %8177 = vadd.xlane.f32.xlu1 %v8176_v60  ;;  %v8098_v30 = vpop.f32.mrb[200].mxu0 }
0x170f   : > { %v8099_v55 = vadd.f32 %v16365_v7, %v8098_v30  ;;  %v11406_v24 = vpop.f32.mrb[201].mxu0  ;;  %v8266_v62 = vsel %vm1724_vm4, %v8230_v47, 0.0 }
0x1710   : > { %8264 = vadd.xlane.f32.xlu0 %v8263_v56  ;;  %v8101_v46 = vpop.f32.mrb[202].mxu0 }
0x1711   : > { %v16458_v0 = vadd.f32 %v8099_v55, %v16250_v18  ;;  %v8102_v2 = vadd.f32 %v16365_v7, %v8101_v46  ;;  %v11407_v32 = vpop.f32.mrb[203].mxu0 }
0x1712   : > { %8267 = vadd.xlane.f32.xlu1 %v8266_v62 }
0x1713   : > { %v16463_v21 = vadd.f32 %v8102_v2, %v16253_v23  ;;  %v8179_v61 = vsel %vm1724_vm4, %v16458_v0, 0.0  ;;  %v8231_v50 = vmul.f32 %v16458_v0, %v16458_v0 }
0x1714   : > { %8180 = vadd.xlane.f32.xlu0 %v8179_v61 }
0x1715   : > { %v8182_v18 = vsel %vm1724_vm4, %v16463_v21, 0.0  ;;  %v8232_v57 = vmul.f32 %v16463_v21, %v16463_v21  ;;  %v8269_v23 = vsel %vm1724_vm4, %v8231_v50, 0.0 }
0x1716   : > { %8183 = vadd.xlane.f32.xlu1 %v8182_v18  ;;  %v8106_v63 = vpop.f32.mrb[204].mxu0 }
0x1717   : > { %v8107_v22 = vadd.f32 %v16365_v7, %v8106_v63  ;;  %v11410_v49 = vpop.f32.mrb[205].mxu0  ;;  %v8272_v51 = vsel %vm1724_vm4, %v8232_v57, 0.0 }
0x1718   : > { %8270 = vadd.xlane.f32.xlu0 %v8269_v23  ;;  %v8109_v13 = vpop.f32.mrb[206].mxu0 }
0x1719   : > { %v16476_v58 = vadd.f32 %v8107_v22, %v16267_v45  ;;  %v8110_v19 = vadd.f32 %v16365_v7, %v8109_v13  ;;  %v11411_v17 = vpop.f32.mrb[207].mxu0 }
0x171a   : > { %8273 = vadd.xlane.f32.xlu1 %v8272_v51 }
0x171b   : > { %v16481_v41 = vadd.f32 %v8110_v19, %v16270_v10  ;;  %v8185_v40 = vsel %vm1724_vm4, %v16476_v58, 0.0  ;;  %v8233_v31 = vmul.f32 %v16476_v58, %v16476_v58 }
0x171c   : > { %8186 = vadd.xlane.f32.xlu0 %v8185_v40 }
0x171d   : > { %v8188_v45 = vsel %vm1724_vm4, %v16481_v41, 0.0  ;;  %v8234_v27 = vmul.f32 %v16481_v41, %v16481_v41  ;;  %v8275_v10 = vsel %vm1724_vm4, %v8233_v31, 0.0 }
0x171e   : > { %8189 = vadd.xlane.f32.xlu1 %v8188_v45  ;;  %v8114_v26 = vpop.f32.mrb[208].mxu0 }
0x171f   : > { %v8115_v52 = vadd.f32 %v16365_v7, %v8114_v26  ;;  %v11414_v28 = vpop.f32.mrb[209].mxu0  ;;  %v8278_v43 = vsel %vm1724_vm4, %v8234_v27, 0.0 }
0x1720   : > { %8276 = vadd.xlane.f32.xlu0 %v8275_v10  ;;  %v8117_v12 = vpop.f32.mrb[210].mxu0 }
0x1721   : > { %v16494_v1 = vadd.f32 %v8115_v52, %v16284_v39  ;;  %v8118_v54 = vadd.f32 %v16365_v7, %v8117_v12  ;;  %v11415_v59 = vpop.f32.mrb[211].mxu0 }
0x1722   : > { %8279 = vadd.xlane.f32.xlu1 %v8278_v43 }
0x1723   : > { %v16499_v38 = vadd.f32 %v8118_v54, %v16287_v35  ;;  %v8191_v36 = vsel %vm1724_vm4, %v16494_v1, 0.0  ;;  %v8235_v8 = vmul.f32 %v16494_v1, %v16494_v1 }
0x1724   : > { %8192 = vadd.xlane.f32.xlu0 %v8191_v36 }
0x1725   : > { %v8194_v39 = vsel %vm1724_vm4, %v16499_v38, 0.0  ;;  %v8236_v3 = vmul.f32 %v16499_v38, %v16499_v38  ;;  %v8281_v35 = vsel %vm1724_vm4, %v8235_v8, 0.0 }
0x1726   : > { %8195 = vadd.xlane.f32.xlu1 %v8194_v39  ;;  %v8122_v48 = vpop.f32.mrb[212].mxu0 }
0x1727   : > { %v8123_v5 = vadd.f32 %v16365_v7, %v8122_v48  ;;  %v11418_v42 = vpop.f32.mrb[213].mxu0  ;;  %v8284_v47 = vsel %vm1724_vm4, %v8236_v3, 0.0 }
0x1728   : > { %8282 = vadd.xlane.f32.xlu0 %v8281_v35  ;;  %v8125_v14 = vpop.f32.mrb[214].mxu0  ;;  %v16539_v35 = vld [vmem:[%s1031_s12] ss:$0 sm:$0xff]  ;;  %s17074_s12 = sld [smem:[#allocation13_spill]] }
0x1729   : > { %v16512_v37 = vadd.f32 %v8123_v5, %v16299_v34  ;;  %v8126_v15 = vadd.f32 %v16365_v7, %v8125_v14  ;;  %v11419_v60 = vpop.f32.mrb[215].mxu0 }
0x172a   : > { %8285 = vadd.xlane.f32.xlu1 %v8284_v47 }
0x172b   : > { %v16517_v30 = vadd.f32 %v8126_v15, %v16302_v44  ;;  %v8197_v55 = vsel %vm1724_vm4, %v16512_v37, 0.0  ;;  %v8237_v24 = vmul.f32 %v16512_v37, %v16512_v37 }
0x172c   : > { %8198 = vadd.xlane.f32.xlu0 %v8197_v55 }
0x172d   : > { %v8200_v34 = vsel %vm1724_vm4, %v16517_v30, 0.0  ;;  %v8238_v7 = vmul.f32 %v16517_v30, %v16517_v30  ;;  %v8287_v56 = vsel %vm1724_vm4, %v8237_v24, 0.0  ;;  %v16549_v24 = vld [vmem:[%s1034_s15] ss:$0 sm:$0xff] }
0x172e   : > { %8201 = vadd.xlane.f32.xlu1 %v8200_v34  ;;  %p9366_p12 = scmp.ne.s32.totalorder %s17074_s12, 2 }
0x172f   : > { %v8290_v44 = vsel %vm1724_vm4, %v8238_v7, 0.0  ;;  %s17075_s25 = sld [smem:[#allocation82_spill]] (!%p9366_p12)  ;;  %s17076_s29 = sld [smem:[#allocation83_spill]] (!%p9366_p12)  ;;  %vm8496_vm8 = vcmask (!%p9366_p12), 7168  }
0x1730   : > { %8288 = vadd.xlane.f32.xlu0 %v8287_v56  ;;  %s17077_s0 = sld [smem:[#allocation84_spill]] (!%p9366_p12) }
0x1732   : > { %8291 = vadd.xlane.f32.xlu1 %v8290_v44 }
0x1777   : > { %v8151_v46 = vpop.xlane.xlu0 %8150 }
0x1778   : > { %v8203_v2 = vmul.f32 0.015625, %v8151_v46 }
0x1779   : > { %v8154_v32 = vpop.xlane.xlu1 %8153 }
0x177a   : > { %v8204_v62 = vmul.f32 0.015625, %v8154_v32  ;;  %v8311_v50 = vmul.f32 %v8203_v2, %v8203_v2  ;;  %v8347_v3 = vsub.f32 %v16369_v11, %v8203_v2 }
0x177b   : > { %v8241_v61 = vpop.xlane.xlu0 %8240 }
0x177c   : > { %v8293_v18 = vmul.f32 0.015625, %v8241_v61  ;;  %v8312_v63 = vmul.f32 %v8204_v62, %v8204_v62  ;;  %v8348_v60 = vsub.f32 %v16373_v4, %v8204_v62 }
0x177d   : > { %v8244_v57 = vpop.xlane.xlu1 %8243 }
0x177e   : > { %v8329_v22 = vsub.f32 %v8293_v18, %v8311_v50  ;;  %v8294_v49 = vmul.f32 0.015625, %v8244_v57 }
0x177f   : > { %v8157_v23 = vpop.xlane.xlu0 %8156 }
0x1780   : > { %v8365_v13 = vadd.f32 1e-05, %v8329_v22  ;;  %v8330_v19 = vsub.f32 %v8294_v49, %v8312_v63  ;;  %v8205_v17 = vmul.f32 0.015625, %v8157_v23 }
0x1781   : > { %v8160_v51 = vpop.xlane.xlu1 %8159 }
0x1782   : > { %12119 = vrsqrt.f32 %v8365_v13  ;;  %v8366_v40 = vadd.f32 1e-05, %v8330_v19  ;;  %v8206_v31 = vmul.f32 0.015625, %v8160_v51  ;;  %v8313_v27 = vmul.f32 %v8205_v17, %v8205_v17 }
0x1783   : > { %v8247_v45 = vpop.xlane.xlu0 %8246  ;;  %v8349_v22 = vsub.f32 %v16386_v33, %v8205_v17 }
0x1784   : > { %12121 = vrsqrt.f32 %v8366_v40  ;;  %v8295_v26 = vmul.f32 0.015625, %v8247_v45  ;;  %v8314_v28 = vmul.f32 %v8206_v31, %v8206_v31  ;;  %v8350_v40 = vsub.f32 %v16391_v6, %v8206_v31 }
0x1785   : > { %v8250_v52 = vpop.xlane.xlu1 %8249 }
0x1786   : > { %v8331_v10 = vsub.f32 %v8295_v26, %v8313_v27  ;;  %v8296_v12 = vmul.f32 0.015625, %v8250_v52 }
0x1787   : > { %v8163_v54 = vpop.xlane.xlu0 %8162 }
0x1788   : > { %v8367_v59 = vadd.f32 1e-05, %v8331_v10  ;;  %v8332_v43 = vsub.f32 %v8296_v12, %v8314_v28  ;;  %v16529_v36 = vmul.f32 0.015625, %v8163_v54 }
0x1789   : > { %v8166_v8 = vpop.xlane.xlu1 %8165 }
0x178a   : > { %12123 = vrsqrt.f32 %v8367_v59  ;;  %v8368_v39 = vadd.f32 1e-05, %v8332_v43  ;;  %v16532_v48 = vmul.f32 0.015625, %v8166_v8  ;;  %v8315_v14 = vmul.f32 %v16529_v36, %v16529_v36 }
0x178b   : > { %v8253_v5 = vpop.xlane.xlu0 %8252 }
0x178c   : > { %v12120_v42 = vpop.eup %12119  ;;  %12125 = vrsqrt.f32 %v8368_v39  ;;  %v8297_v15 = vmul.f32 0.015625, %v8253_v5  ;;  %v8316_v34 = vmul.f32 %v16532_v48, %v16532_v48 }
0x178d   : > { %v8401_v47 = vmul.f32 %v12120_v42, %v8347_v3  ;;  %v8256_v55 = vpop.xlane.xlu1 %8255  ;;  %v8351_v3 = vsub.f32 %v16404_v29, %v16529_v36 }
0x178e   : > { %v12122_v11 = vpop.eup %12121  ;;  %v8333_v7 = vsub.f32 %v8297_v15, %v8315_v14  ;;  %v8298_v56 = vmul.f32 0.015625, %v8256_v55  ;;  %v8352_v15 = vsub.f32 %v16409_v16, %v16532_v48 }
0x178f   : > { %v8425_v44 = vmul.f32 %v16539_v35, %v8401_v47  ;;  %v8402_v46 = vmul.f32 %v12122_v11, %v8348_v60  ;;  %v8169_v2 = vpop.xlane.xlu0 %8168 }
0x1790   : > { %v8369_v32 = vadd.f32 1e-05, %v8333_v7  ;;  %v8334_v4 = vsub.f32 %v8298_v56, %v8316_v34  ;;  %v16554_v62 = vmul.f32 0.015625, %v8169_v2 }
0x1791   : > { %v8449_v61 = vadd.f32 %v16549_v24, %v8425_v44  ;;  %v8426_v50 = vmul.f32 %v16539_v35, %v8402_v46  ;;  %v8172_v18 = vpop.xlane.xlu1 %8171 }
0x1792   : > { %12127 = vrsqrt.f32 %v8369_v32  ;;  %v8370_v57 = vadd.f32 1e-05, %v8334_v4  ;;  %v16561_v49 = vmul.f32 0.015625, %v8172_v18  ;;  %v8317_v19 = vmul.f32 %v16554_v62, %v16554_v62 }
0x1793   : > { %8467 = vst.msk [vmem:[#allocation2] sm:$0xff] %vm1724_vm4, %v8449_v61  ;;  %v8450_v63 = vadd.f32 %v16549_v24, %v8426_v50  ;;  %v8259_v23 = vpop.xlane.xlu0 %8258  ;;  %v8353_v18 = vsub.f32 %v16422_v25, %v16554_v62 }
0x1794   : > { %v12124_v13 = vpop.eup %12123  ;;  %12129 = vrsqrt.f32 %v8370_v57  ;;  %v8299_v51 = vmul.f32 0.015625, %v8259_v23  ;;  %v8318_v52 = vmul.f32 %v16561_v49, %v16561_v49  ;;  %v8354_v23 = vsub.f32 %v16427_v20, %v16561_v49 }
0x1795   : > { %8468 = vst.msk [vmem:[#allocation2 + $0x8] sm:$0xff] %vm1724_vm4, %v8450_v63  ;;  %v8403_v45 = vmul.f32 %v12124_v13, %v8349_v22  ;;  %v8262_v27 = vpop.xlane.xlu1 %8261 }
0x1796   : > { %v12126_v26 = vpop.eup %12125  ;;  %v8335_v33 = vsub.f32 %v8299_v51, %v8317_v19  ;;  %v8300_v17 = vmul.f32 0.015625, %v8262_v27 }
0x1797   : > { %v8427_v28 = vmul.f32 %v16539_v35, %v8403_v45  ;;  %v8404_v10 = vmul.f32 %v12126_v26, %v8350_v40 }
0x1798   : > { %v8371_v12 = vadd.f32 1e-05, %v8335_v33  ;;  %v8336_v54 = vsub.f32 %v8300_v17, %v8318_v52 }
0x1799   : > { %v8451_v59 = vadd.f32 %v16549_v24, %v8427_v28  ;;  %v8428_v43 = vmul.f32 %v16539_v35, %v8404_v10  ;;  %v8175_v8 = vpop.xlane.xlu0 %8174 }
0x179a   : > { %12131 = vrsqrt.f32 %v8371_v12  ;;  %v8372_v6 = vadd.f32 1e-05, %v8336_v54  ;;  %v16572_v31 = vmul.f32 0.015625, %v8175_v8 }
0x179b   : > { %8469 = vst.msk [vmem:[#allocation2 + $0x10] sm:$0xff] %vm1724_vm4, %v8451_v59  ;;  %v8452_v39 = vadd.f32 %v16549_v24, %v8428_v43  ;;  %v8178_v5 = vpop.xlane.xlu1 %8177 }
0x179c   : > { %v12128_v42 = vpop.eup %12127  ;;  %12133 = vrsqrt.f32 %v8372_v6  ;;  %v16578_v14 = vmul.f32 0.015625, %v8178_v5  ;;  %v8319_v11 = vmul.f32 %v16572_v31, %v16572_v31  ;;  %v8355_v6 = vsub.f32 %v16441_v53, %v16572_v31 }
0x179d   : > { %8470 = vst.msk [vmem:[#allocation2 + $0x18] sm:$0xff] %vm1724_vm4, %v8452_v39  ;;  %v8405_v60 = vmul.f32 %v12128_v42, %v8351_v3  ;;  %v8265_v47 = vpop.xlane.xlu0 %8264 }
0x179e   : > { %v12130_v55 = vpop.eup %12129  ;;  %v8301_v34 = vmul.f32 0.015625, %v8265_v47  ;;  %v8320_v56 = vmul.f32 %v16578_v14, %v16578_v14 }
0x179f   : > { %v8429_v7 = vmul.f32 %v16539_v35, %v8405_v60  ;;  %v8406_v29 = vmul.f32 %v12130_v55, %v8352_v15  ;;  %v8268_v36 = vpop.xlane.xlu1 %8267  ;;  %v8356_v60 = vsub.f32 %v16445_v9, %v16578_v14 }
0x17a0   : > { %v8337_v44 = vsub.f32 %v8301_v34, %v8319_v11  ;;  %v8302_v46 = vmul.f32 0.015625, %v8268_v36 }
0x17a1   : > { %v8453_v2 = vadd.f32 %v16549_v24, %v8429_v7  ;;  %v8430_v16 = vmul.f32 %v16539_v35, %v8406_v29  ;;  %v8181_v48 = vpop.xlane.xlu0 %8180 }
0x17a2   : > { %v8373_v32 = vadd.f32 1e-05, %v8337_v44  ;;  %v8338_v4 = vsub.f32 %v8302_v46, %v8320_v56  ;;  %v16590_v61 = vmul.f32 0.015625, %v8181_v48 }
0x17a3   : > { %8471 = vst.msk [vmem:[#allocation2 + $0x20] sm:$0xff] %vm1724_vm4, %v8453_v2  ;;  %v8454_v50 = vadd.f32 %v16549_v24, %v8430_v16  ;;  %v8184_v57 = vpop.xlane.xlu1 %8183 }
0x17a4   : > { %v12132_v63 = vpop.eup %12131  ;;  %12135 = vrsqrt.f32 %v8373_v32  ;;  %v8374_v22 = vadd.f32 1e-05, %v8338_v4  ;;  %v16599_v19 = vmul.f32 0.015625, %v8184_v57  ;;  %v8321_v45 = vmul.f32 %v16590_v61, %v16590_v61 }
0x17a5   : > { %8472 = vst.msk [vmem:[#allocation2 + $0x28] sm:$0xff] %vm1724_vm4, %v8454_v50  ;;  %v8407_v13 = vmul.f32 %v12132_v63, %v8353_v18  ;;  %v8271_v51 = vpop.xlane.xlu0 %8270  ;;  %v8357_v32 = vsub.f32 %v16458_v0, %v16590_v61 }
0x17a6   : > { %v12134_v40 = vpop.eup %12133  ;;  %12137 = vrsqrt.f32 %v8374_v22  ;;  %v8303_v27 = vmul.f32 0.015625, %v8271_v51  ;;  %v8322_v52 = vmul.f32 %v16599_v19, %v16599_v19  ;;  %v8358_v22 = vsub.f32 %v16463_v21, %v16599_v19 }
0x17a7   : > { %v8431_v25 = vmul.f32 %v16539_v35, %v8407_v13  ;;  %v8408_v62 = vmul.f32 %v12134_v40, %v8354_v23  ;;  %v8274_v26 = vpop.xlane.xlu1 %8273 }
0x17a8   : > { %v8339_v33 = vsub.f32 %v8303_v27, %v8321_v45  ;;  %v8304_v17 = vmul.f32 0.015625, %v8274_v26 }
0x17a9   : > { %v8455_v20 = vadd.f32 %v16549_v24, %v8431_v25  ;;  %v8432_v49 = vmul.f32 %v16539_v35, %v8408_v62  ;;  %v8187_v28 = vpop.xlane.xlu0 %8186 }
0x17aa   : > { %v8375_v10 = vadd.f32 1e-05, %v8339_v33  ;;  %v8340_v12 = vsub.f32 %v8304_v17, %v8322_v52  ;;  %v16608_v54 = vmul.f32 0.015625, %v8187_v28 }
0x17ab   : > { %8473 = vst.msk [vmem:[#allocation2 + $0x30] sm:$0xff] %vm1724_vm4, %v8455_v20  ;;  %v8456_v59 = vadd.f32 %v16549_v24, %v8432_v49  ;;  %v8190_v43 = vpop.xlane.xlu1 %8189 }
0x17ac   : > { %12139 = vrsqrt.f32 %v8375_v10  ;;  %v8376_v8 = vadd.f32 1e-05, %v8340_v12  ;;  %v16615_v39 = vmul.f32 0.015625, %v8190_v43  ;;  %v8323_v42 = vmul.f32 %v16608_v54, %v16608_v54 }
0x17ad   : > { %8474 = vst.msk [vmem:[#allocation2 + $0x38] sm:$0xff] %vm1724_vm4, %v8456_v59  ;;  %v8277_v3 = vpop.xlane.xlu0 %8276  ;;  %v8359_v49 = vsub.f32 %v16476_v58, %v16608_v54 }
0x17ae   : > { %v12136_v5 = vpop.eup %12135  ;;  %12141 = vrsqrt.f32 %v8376_v8  ;;  %v8305_v15 = vmul.f32 0.015625, %v8277_v3  ;;  %v8324_v34 = vmul.f32 %v16615_v39, %v16615_v39  ;;  %v8360_v8 = vsub.f32 %v16481_v41, %v16615_v39 }
0x17af   : > { %v8409_v47 = vmul.f32 %v12136_v5, %v8355_v6  ;;  %v8280_v55 = vpop.xlane.xlu1 %8279 }
0x17b0   : > { %v12138_v11 = vpop.eup %12137  ;;  %v8341_v7 = vsub.f32 %v8305_v15, %v8323_v42  ;;  %v8306_v53 = vmul.f32 0.015625, %v8280_v55 }
0x17b1   : > { %v8433_v31 = vmul.f32 %v16539_v35, %v8409_v47  ;;  %v8410_v29 = vmul.f32 %v12138_v11, %v8356_v60  ;;  %v8193_v36 = vpop.xlane.xlu0 %8192 }
0x17b2   : > { %v8377_v56 = vadd.f32 1e-05, %v8341_v7  ;;  %v8342_v44 = vsub.f32 %v8306_v53, %v8324_v34  ;;  %v16624_v46 = vmul.f32 0.015625, %v8193_v36 }
0x17b3   : > { %v16627_v2 = vadd.f32 %v16549_v24, %v8433_v31  ;;  %v8434_v9 = vmul.f32 %v16539_v35, %v8410_v29  ;;  %v8196_v14 = vpop.xlane.xlu1 %8195 }
0x17b4   : > { %12143 = vrsqrt.f32 %v8377_v56  ;;  %v8378_v16 = vadd.f32 1e-05, %v8342_v44  ;;  %v8218_v4 = vmul.f32 0.015625, %v8196_v14  ;;  %v8325_v57 = vmul.f32 %v16624_v46, %v16624_v46 }
0x17b5   : > { %8475 = vst.msk [vmem:[#allocation2 + $0x40] sm:$0xff] %vm1724_vm4, %v16627_v2  ;;  %v8458_v48 = vadd.f32 %v16549_v24, %v8434_v9  ;;  %v8283_v50 = vpop.xlane.xlu0 %8282  ;;  %v8361_v39 = vsub.f32 %v16494_v1, %v16624_v46 }
0x17b6   : > { %v12140_v18 = vpop.eup %12139  ;;  %12145 = vrsqrt.f32 %v8378_v16  ;;  %v8307_v63 = vmul.f32 0.015625, %v8283_v50  ;;  %v8326_v40 = vmul.f32 %v8218_v4, %v8218_v4  ;;  %v8362_v31 = vsub.f32 %v16499_v38, %v8218_v4 }
0x17b7   : > { %8476 = vst.msk [vmem:[#allocation2 + $0x48] sm:$0xff] %vm1724_vm4, %v8458_v48  ;;  %v8411_v23 = vmul.f32 %v12140_v18, %v8357_v32  ;;  %v8286_v13 = vpop.xlane.xlu1 %8285 }
0x17b8   : > { %v12142_v51 = vpop.eup %12141  ;;  %v8343_v45 = vsub.f32 %v8307_v63, %v8325_v57  ;;  %v8308_v27 = vmul.f32 0.015625, %v8286_v13 }
0x17b9   : > { %v8435_v0 = vmul.f32 %v16539_v35, %v8411_v23  ;;  %v8412_v61 = vmul.f32 %v12142_v51, %v8358_v22  ;;  %v8199_v25 = vpop.xlane.xlu0 %8198 }
0x17ba   : > { %v8379_v62 = vadd.f32 1e-05, %v8343_v45  ;;  %v8344_v26 = vsub.f32 %v8308_v27, %v8326_v40  ;;  %v8219_v52 = vmul.f32 0.015625, %v8199_v25 }
0x17bb   : > { %v8459_v33 = vadd.f32 %v16549_v24, %v8435_v0  ;;  %v8436_v17 = vmul.f32 %v16539_v35, %v8412_v61  ;;  %v8202_v20 = vpop.xlane.xlu1 %8201 }
0x17bc   : > { %12147 = vrsqrt.f32 %v8379_v62  ;;  %v8380_v21 = vadd.f32 1e-05, %v8344_v26  ;;  %v8220_v28 = vmul.f32 0.015625, %v8202_v20  ;;  %v8327_v59 = vmul.f32 %v8219_v52, %v8219_v52 }
0x17bd   : > { %8477 = vst.msk [vmem:[#allocation2 + $0x50] sm:$0xff] %vm1724_vm4, %v8459_v33  ;;  %v8460_v19 = vadd.f32 %v16549_v24, %v8436_v17  ;;  %v8289_v10 = vpop.xlane.xlu0 %8288  ;;  %v8363_v1 = vsub.f32 %v16512_v37, %v8219_v52  ;;  %v8489_v37 = vld [vmem:[%s17075_s25] sm:$0xff] (!%p9366_p12) }
0x17be   : > { %v12144_v12 = vpop.eup %12143  ;;  %12149 = vrsqrt.f32 %v8380_v21  ;;  %v8309_v43 = vmul.f32 0.015625, %v8289_v10  ;;  %v8328_v42 = vmul.f32 %v8220_v28, %v8220_v28  ;;  %v8364_v38 = vsub.f32 %v16517_v30, %v8220_v28 }
0x17bf   : > { %8478 = vst.msk [vmem:[#allocation2 + $0x58] sm:$0xff] %vm1724_vm4, %v8460_v19  ;;  %v8413_v6 = vmul.f32 %v12144_v12, %v8359_v49  ;;  %v8292_v3 = vpop.xlane.xlu1 %8291  ;;  %v8491_v30 = vmul.f32 (!%p9366_p12), %v8489_v37, %v16627_v2 }
0x17c0   : > { %v12146_v5 = vpop.eup %12145  ;;  %v8345_v15 = vsub.f32 %v8309_v43, %v8327_v59  ;;  %v8310_v60 = vmul.f32 0.015625, %v8292_v3 }
0x17c1   : > { %v8437_v47 = vmul.f32 %v16539_v35, %v8413_v6  ;;  %v8414_v58 = vmul.f32 %v12146_v5, %v8360_v8  ;;  %v8492_v23 = vsel (!%p9366_p12), %vm1724_vm4, %v8491_v30, 0.0 }
0x17c2   : > { %v8381_v54 = vadd.f32 1e-05, %v8345_v15  ;;  %v8346_v55 = vsub.f32 %v8310_v60, %v8328_v42  ;;  %8493 = vadd.xlane.f32.xlu0 (!%p9366_p12), %v8492_v23 }
0x17c3   : > { %v8461_v11 = vadd.f32 %v16549_v24, %v8437_v47  ;;  %v8438_v34 = vmul.f32 %v16539_v35, %v8414_v58 }
0x17c4   : > { %12151 = vrsqrt.f32 %v8381_v54  ;;  %v8382_v7 = vadd.f32 1e-05, %v8346_v55 }
0x17c5   : > { %8479 = vst.msk [vmem:[#allocation2 + $0x60] sm:$0xff] %vm1724_vm4, %v8461_v11  ;;  %v8462_v41 = vadd.f32 %v16549_v24, %v8438_v34 }
0x17c6   : > { %v12148_v53 = vpop.eup %12147  ;;  %12153 = vrsqrt.f32 %v8382_v7 }
0x17c7   : > { %8480 = vst.msk [vmem:[#allocation2 + $0x68] sm:$0xff] %vm1724_vm4, %v8462_v41  ;;  %v8415_v29 = vmul.f32 %v12148_v53, %v8361_v39 }
0x17c8   : > { %v12150_v36 = vpop.eup %12149 }
0x17c9   : > { %v8439_v56 = vmul.f32 %v16539_v35, %v8415_v29  ;;  %v8416_v44 = vmul.f32 %v12150_v36, %v8362_v31 }
0x17cb   : > { %v8463_v9 = vadd.f32 %v16549_v24, %v8439_v56  ;;  %v8440_v14 = vmul.f32 %v16539_v35, %v8416_v44 }
0x17cd   : > { %8481 = vst.msk [vmem:[#allocation2 + $0x70] sm:$0xff] %vm1724_vm4, %v8463_v9  ;;  %v8464_v16 = vadd.f32 %v16549_v24, %v8440_v14 }
0x17ce   : > { %v12152_v46 = vpop.eup %12151 }
0x17cf   : > { %8482 = vst.msk [vmem:[#allocation2 + $0x78] sm:$0xff] %vm1724_vm4, %v8464_v16  ;;  %v8417_v48 = vmul.f32 %v12152_v46, %v8363_v1 }
0x17d0   : > { %v12154_v32 = vpop.eup %12153 }
0x17d1   : > { %v8441_v4 = vmul.f32 %v16539_v35, %v8417_v48  ;;  %v8418_v50 = vmul.f32 %v12154_v32, %v8364_v38  ;;  %8488 = sbr.rel (%p9366_p12) target bundleno = 6251 (0x186b), region = 124 }
0x17d3   : > { %v8465_v18 = vadd.f32 %v16549_v24, %v8441_v4  ;;  %v8442_v57 = vmul.f32 %v16539_v35, %v8418_v50 }
0x17d5   : > { %8483 = vst.msk [vmem:[#allocation2 + $0x80] sm:$0xff] %vm1724_vm4, %v8465_v18  ;;  %v8466_v63 = vadd.f32 %v16549_v24, %v8442_v57  ;;  %v8490_v24 = vld [vmem:[%s17076_s29] sm:$0xff] (!%p9366_p12) }
0x17d7   : > { %8484 = vst.msk [vmem:[#allocation2 + $0x88] sm:$0xff] %vm1724_vm4, %v8466_v63  ;;  %v8498_v22 = vmul.f32 (!%p9366_p12), %v8489_v37, %v8466_v63 }
0x17d9   : > { %v8499_v35 = vsel %vm1724_vm4, %v8498_v22, 0.0 }
0x17da   : > { %8500 = vadd.xlane.f32.xlu0 %v8499_v35 }
0x184f   : > { %v8494_v13 = vpop.xlane.xlu0 %8493 }
0x1850   : > { %v8495_v51 = vadd.f32 %v8494_v13, %v8490_v24 }
0x1852   : > { %8497 = vst.msk [vmem:[%s17077_s0] sm:$0xff] %vm8496_vm8, %v8495_v51 }
0x1867   : > { %v8501_v40 = vpop.xlane.xlu0 %8500 }
0x1868   : > { %v8502_v2 = vadd.f32 %v8501_v40, %v8490_v24 }
0x186a   : > { %9367 = vst.msk [vmem:[%s17077_s0 + $0x8] sm:$0xff] %vm8496_vm8, %v8502_v2 }
0x186b PF: > { %s12270_s23 = smov [#allocation3]   ;;  %s17078_s21 = sld [smem:[#allocation13_spill]] }
0x186c   : > { %s8519_s9 = sshll.u32 %s12270_s23, 4  ;;  %s8520_s9 = int_to_ptr.vmem [resolvable:$true] %s8519_s9 }
0x186d   : > { %s12173_s16 = scalar_lea.vmem %s8520_s9, 2048  ;;  %p12180_p3 = scmp.lt.s32.totalorder %s8520_s9, %s8520_s9 }
0x186e   : > { %p12174_p13 = scmp.ne.s32.totalorder %s8520_s9, %s12173_s16  ;;  %p12181_p4 = scmp.lt.s32.totalorder %s12173_s16, %s12173_s16 }
0x1870   : > { %p12175_p0 = pnand %p12174_p13, %p685_p2  ;;  %p12182_p7 = por %p12181_p4, %p12180_p3 }
0x1872   : > { %p12176_p1 = pneg %p12175_p0 }
0x1874   : > { %p12183_p8 = pnand %p12182_p7, %p12176_p1 }
0x1876   : > { %12186 = shalt.err (!%p12183_p8)
}
0x1877   : > { %s17079_s4 = sld [smem:[#allocation85_spill]] }
0x187d   : > { %s12187_s7 = scalar_lea.hbm %s17079_s4, 2048 }
0x187e   : > { %p12188_p9 = scmp.ne.s32.totalorder %s17079_s4, %s12187_s7  ;;  %p12193_p12 = scmp.lt.u32.totalorder %s12187_s7, %s17079_s4 }
0x1880   : > { %p12189_p10 = pnand %p12188_p9, %p685_p2 }
0x1882   : > { %p12190_p11 = pneg %p12189_p10 }
0x1884   : > { %p12195_p13 = pnand %p12193_p12, %p12190_p11 }
0x1886   : > { %12198 = shalt.err (!%p12195_p13)
}
0x1887   : > { %s12271_s12 = smov 128   ;;  %s17080_s15 = sld [smem:[#allocation10_spill]] }
0x1888   : > { %s12272_s25 = smov 8   ;;  %s11647_s29 = smul.u32 2304, %s17078_s21 }
0x1889   : > { %11649 = dma.vmem_to_hbm [thread:$0]  (%p685_p2), %s8520_s9, 2048, %s17079_s4, [#allocation4], %s12271_s12, %s12271_s12, %s12272_s25  }
0x188a   : > { %s8535_s26 = sshll.u32 %s12542_s14, 4  ;;  %s17082_s30 = sld [smem:[#allocation86_spill]]  ;;  %s16712_s26 = int_to_ptr.vmem [resolvable:$true] %s8535_s26 }
0x188b   : > { %s12199_s2 = scalar_lea.vmem %s16712_s26, 2304  ;;  %s12273_s9 = smov [#allocation5]  }
0x188c   : > { %p12200_p0 = scmp.ne.s32.totalorder %s16712_s26, %s12199_s2  ;;  %s12203_s14 = sshll.u32 %s12273_s9, 4  ;;  %s12204_s14 = int_to_ptr.vmem [resolvable:$false] %s12203_s14 }
0x188d   : > { %s17083_s16 = sand.u32 1, %s17080_s15   ;;  %s12205_s7 = scalar_lea.vmem %s12204_s14, 4608 }
0x188e   : > { %s16721_s11 = scalar_lea.sflag [#allocation6], %s17083_s16  ;;  %p12201_p1 = pnand %p12200_p0, %p12449_p5 }
0x188f   : > { %p12206_p4 = scmp.lt.s32.totalorder %s16712_s26, %s12204_s14  ;;  %p12207_p7 = scmp.lt.s32.totalorder %s12205_s7, %s12199_s2 }
0x1890   : > { %s16717_s23 = scalar_lea.hbm %s17082_s30, %s11647_s29  ;;  %p12202_p3 = pneg %p12201_p1 }
0x1891   : > { %p12208_p8 = por %p12207_p7, %p12206_p4 }
0x1893   : > { %p12209_p9 = pnand %p12208_p8, %p12202_p3 }
0x1895   : > { %12212 = shalt.err (!%p12209_p9)
}
0x1896   : > { %s12213_s5 = scalar_lea.hbm %s16717_s23, 2304  ;;  %s12217_s28 = scalar_lea.hbm %s17082_s30, 6912 }
0x1897   : > { %p12214_p10 = scmp.ne.s32.totalorder %s16717_s23, %s12213_s5  ;;  %p12218_p13 = scmp.lt.u32.totalorder %s16717_s23, %s17082_s30 }
0x1898   : > { %p12219_p0 = scmp.lt.u32.totalorder %s12217_s28, %s12213_s5  ;;  %p12221_p3 = scmp.lt.u32.totalorder %s12213_s5, %s16717_s23 }
0x1899   : > { %p12215_p11 = pnand %p12214_p10, %p12449_p5 }
0x189a   : > { %p12220_p1 = por %p12219_p0, %p12218_p13 }
0x189b   : > { %p12216_p12 = pneg %p12215_p11 }
0x189c   : > { %p12222_p4 = por %p12221_p3, %p12220_p1 }
0x189e   : > { %p12223_p7 = pnand %p12222_p4, %p12216_p12 }
0x18a0   : > { %12226 = shalt.err (!%p12223_p7)
}
0x18a1   : > { %11650 = dma.vmem_to_hbm [thread:$0]  (%p12449_p5), %s16712_s26, 2304, %s16717_s23, %s16721_s11, %s12271_s12, %s12271_s12, %s12272_s25  }
0x18a2   : > { %12244 = dma.done.wait (%p685_p2), [#allocation4], 2048  }
0x18a3   : > { %12246 = vsyncadd (%p685_p2), [#allocation4], 4294965248 }
0x18a4 PF: > { %s17084_s27 = sld [smem:[#allocation12_spill]]  ;;  %s17085_s29 = sld [smem:[#allocation9_spill]] }
0x18aa   : > { %p11660_p8 = scmp.ge.s32.totalorder %s17084_s27, 2  ;;  %s8557_s3 = sand.u32 1, %s17085_s29  }
0x18ab   : > { %s8558_s1 = scalar_lea.sflag [#allocation6], %s8557_s3 }
0x18ac   : > { %p11655_p9 = pnand %p11660_p8, %p12453_p6 }
0x18ae   : > { %12248 = dma.done.wait (!%p11655_p9), %s8558_s1, 2304  }
0x18af   : > { %12250 = vsyncadd (!%p11655_p9), %s8558_s1, 4294964992  ;;  %s17087_s28 = sld [smem:[#allocation14_spill]]  ;;  %s17088_s27 = sld [smem:[#allocation10_spill]] }
0x18b0   : > { %s17089_s3 = sld [smem:[#allocation11_spill]]  ;;  %s17090_s7 = sld [smem:[#allocation15_spill]] }
0x18b5   : > { %p38_p5 = scmp.ge.s32.totalorder %s17087_s28, 5  }
0x18b7   :  { %40 = sbr.rel (!%p38_p5) target bundleno = 28 (0x1c), region = 246 }
0x18be   :  { %8563 = vsyncpa [#allocation4], 1 }
0x18bf   :  { %8565 = vsyncpa [#allocation4 + $0x1], 1 }
0x18c0   :  { %8566 = vsyncpa [#allocation6], 1 }
0x18c1   :  { %8568 = vsyncpa [#allocation6 + $0x1], 1 }

</bundles_post_ra>
